<compile_context>
chip_gen: v5e
topology: v5e:2x2
jax: 0.10.0
libtpu: 0.0.40
codegen_flags: <defaults>
</compile_context>

<pallas_src>
import functools
from collections import namedtuple

import numpy as np
import jax
import jax.numpy as jnp
from jax import lax
from jax.experimental import pallas as pl
from jax.experimental.pallas import tpu as pltpu


LayerMeta = namedtuple(
    "LayerMeta", ["cin", "cout", "kh", "kw", "stride", "pad", "h", "w", "ho", "wo"])

_NEG_SLOPE = 0.1  # LeakyReLU slope used by the conv2d() helper in the torch code.


def _conv_out(n, k, s, p):
    return (n + 2 * p - k) // s + 1


# ----------------------------------------------------------------------------
# One-time (init-time) weight preprocessing — hoisted out of the forward path.
# ----------------------------------------------------------------------------
def _expand_conv_weight(weight, meta):
    """Expand a torch-layout conv weight (C_out, C_in, kh, kw) into
    per-kernel-row GEMM matrices of shape (kh, W*C_in, Wo*C_out).

    Inside the kernel, output row `ho` of the layer is computed as
        out_row = sum_i  act_rows[ho*stride + i] @ RW[i]        # (N, Wo*C_out)
    where act_rows is the row-zero-padded, channels-last activation buffer of
    shape (H + 2*pad, N, W*C_in).  The stride and the column zero-padding are
    folded into RW's sparsity pattern, so the kernel only ever reads full,
    contiguous activation rows.
    """
    w_np = np.asarray(weight, np.float32)
    cout, cin, kh, kw = w_np.shape
    rw = np.zeros((kh, meta.w * cin, meta.wo * cout), np.float32)
    for i in range(kh):
        for wo in range(meta.wo):
            for j in range(kw):
                wr = meta.stride * wo + j - meta.pad   # real (unpadded) input col
                if 0 <= wr < meta.w:                   # padded cols contribute 0
                    rw[i, wr * cin:(wr + 1) * cin,
                       wo * cout:(wo + 1) * cout] = w_np[:, :, i, j].T
    return jnp.asarray(rw)


def prepare_depth_encoder(raw_params, input_hw):
    """Per-resolution preprocessing of the raw torch-layout parameters."""
    h, w = input_hw
    metas = []
    for (wt, _b, stride, pad) in raw_params["convs"]:
        cout, cin, kh, kw = wt.shape
        ho, wo = _conv_out(h, kh, stride, pad), _conv_out(w, kw, stride, pad)
        metas.append(LayerMeta(cin, cout, kh, kw, stride, pad, h, w, ho, wo))
        h, w = ho, wo
    metas = tuple(metas)
    # The PyTorch flatten(NCHW) before the Linear matches the kernel's
    # channels-last layout exactly when the last feature map is spatially 1x1.
    assert metas[-1].ho == 1 and metas[-1].wo == 1, metas[-1]

    conv_ws = tuple(_expand_conv_weight(wt, m)
                    for (wt, _, _, _), m in zip(raw_params["convs"], metas))
    conv_bs = tuple(jnp.tile(jnp.asarray(b, jnp.float32), m.wo).reshape(1, -1)
                    for (_, b, _, _), m in zip(raw_params["convs"], metas))
    lw, lb = raw_params["linear"]
    arrays = dict(conv_ws=conv_ws, conv_bs=conv_bs,
                  lin_w=jnp.asarray(lw, jnp.float32).T,          # (in, out)
                  lin_b=jnp.asarray(lb, jnp.float32).reshape(1, -1))
    return {"metas": metas, "arrays": arrays}


# ----------------------------------------------------------------------------
# The single fused kernel: 7x (conv + bias + LeakyReLU) + Linear, all in VMEM.
# ----------------------------------------------------------------------------
def _depth_encoder_kernel(metas, negative_slope, *refs):
    nl = len(metas)
    x_ref = refs[0]
    w_refs = refs[1:1 + nl]
    b_refs = refs[1 + nl:1 + 2 * nl]
    lw_ref = refs[1 + 2 * nl]
    lb_ref = refs[2 + 2 * nl]
    out_refs = refs[3 + 2 * nl:3 + 3 * nl]
    dout_ref = refs[3 + 3 * nl]
    pad_bufs = refs[4 + 3 * nl:]                     # padded inputs of layers 2..L

    # Zero the padded-row activation buffers once; their untouched first/last
    # rows provide the convolutions' zero padding.
    for buf in pad_bufs:
        buf[...] = jnp.zeros_like(buf)

    in_bufs = (x_ref,) + tuple(pad_bufs)             # in_bufs[l] = layer l's input

    last = None
    for l, m in enumerate(metas):
        src, w_ref = in_bufs[l], w_refs[l]
        bias = b_refs[l][...]                        # (1, Wo*Cout)
        for ho in range(m.ho):
            acc = None
            for i in range(m.kh):                    # accumulate over kernel rows
                slab = src[ho * m.stride + i]        # (N, W*Cin), contiguous row
                part = jnp.dot(slab, w_ref[i],
                               preferred_element_type=jnp.float32)
                acc = part if acc is None else acc + part
            y = acc + bias
            y = jnp.where(y >= 0, y, negative_slope * y)      # LeakyReLU(0.1)
            out_refs[l][ho, :, :] = y.astype(out_refs[l].dtype)
            if l + 1 < nl:
                # Stage the row into the next layer's padded buffer (VMEM only).
                in_bufs[l + 1][metas[l + 1].pad + ho, :, :] = y
            else:
                last = y                             # (N, Cout); spatial is 1x1

    # Final nn.Linear on the flattened conv7 output (1x1 spatial, so the
    # PyTorch NCHW flatten order is preserved exactly).
    z = jnp.dot(last, lw_ref[...], preferred_element_type=jnp.float32) + lb_ref[...]
    dout_ref[...] = z.astype(dout_ref.dtype)


# ----------------------------------------------------------------------------
# Forward wrappers.
# ----------------------------------------------------------------------------
def depth_encoder_forward(prepared, depth, z_depth=None):  # z_depth unused (as in torch)
    """Pallas forward.  depth: (N, 1, H, W) NCHW, as in the PyTorch module.
    Returns (depth_out (N, D, 1), tuple of 7 NCHW conv feature maps)."""
    metas, arrays = prepared["metas"], prepared["arrays"]
    nl = len(metas)
    n, cin, h, w = depth.shape
    m0 = metas[0]
    assert (cin, h, w) == (m0.cin, m0.h, m0.w), (depth.shape, m0)

    # Network-input staging only (not per-layer plumbing): channels-last,
    # rows padded with zeros; this array is the layer-1 padded buffer.
    x = depth.transpose(2, 0, 3, 1).reshape(h, n, w * cin)
    x = jnp.pad(x, ((m0.pad, m0.pad), (0, 0), (0, 0)))

    inputs = ([x] + list(arrays["conv_ws"]) + list(arrays["conv_bs"])
              + [arrays["lin_w"], arrays["lin_b"]])

    d_out = arrays["lin_w"].shape[1]
    out_shape = tuple(jax.ShapeDtypeStruct((m.ho, n, m.wo * m.cout), jnp.float32)
                      for m in metas)
    out_shape = out_shape + (jax.ShapeDtypeStruct((n, d_out), jnp.float32),)

    # Padded-row VMEM buffers for layers 2..L (layer 1 reads x directly).
    scratch_shapes = [
        pltpu.VMEM((m.h + 2 * m.pad, n, m.w * m.cin), jnp.float32)
        for m in metas[1:]
    ]

    outs = pl.pallas_call(
        functools.partial(_depth_encoder_kernel, metas, _NEG_SLOPE),
        out_shape=out_shape,
        in_specs=[pl.BlockSpec(memory_space=pltpu.MemorySpace.VMEM)
                  for _ in inputs],
        out_specs=tuple(pl.BlockSpec(memory_space=pltpu.MemorySpace.VMEM)
                        for _ in out_shape),
        scratch_shapes=scratch_shapes,
    )(*inputs)

    conv_outs = tuple(
        o.reshape(m.ho, n, m.wo, m.cout).transpose(1, 3, 0, 2)   # -> NCHW
        for o, m in zip(outs[:nl], metas))
    depth_out = outs[nl][:, :, None]                             # unsqueeze(2)
    return depth_out, conv_outs


def depth_encoder_forward_ref(raw_params, depth, z_depth=None):
    """Pure-JAX reference (matches the PyTorch module)."""
    out = depth
    conv_outs = []
    for (wt, b, s, p) in raw_params["convs"]:
        out = lax.conv_general_dilated(
            out, wt, (s, s), [(p, p), (p, p)],
            dimension_numbers=("NCHW", "OIHW", "NCHW"),
            precision=lax.Precision.HIGHEST)
        out = out + b[None, :, None, None]
        out = jnp.where(out >= 0, out, _NEG_SLOPE * out)
        conv_outs.append(out)
    n = out.shape[0]
    flattened = out.reshape(n, -1)
    lw, lb = raw_params["linear"]
    depth_out = jnp.dot(flattened, lw.T, precision=lax.Precision.HIGHEST) + lb
    return depth_out[:, :, None], tuple(conv_outs)


if __name__ == "__main__":
    key = jax.random.PRNGKey(0)
    z_dim, z_depth = 32, 4
    batch, spatial = 2, 16                                      # small NCHW input

    # (in_ch, out_ch, kernel, stride) exactly as in DepthEncoder.__init__
    conv_defs = [(1, 32, 3, 2), (32, 64, 3, 2), (64, 64, 4, 2),
                 (64, 64, 3, 2), (64, 128, 3, 2), (128, z_dim, 3, 2),
                 (z_dim, z_depth * z_dim, 3, 2)]

    keys = jax.random.split(key, len(conv_defs) + 3)
    convs = []
    for i, (cin, cout, k, s) in enumerate(conv_defs):
        fan_in = cin * k * k
        wt = jax.random.normal(keys[i], (cout, cin, k, k), jnp.float32) \
            * (2.0 / fan_in) ** 0.5                             # kaiming_normal_
        b = jnp.zeros((cout,), jnp.float32)                     # init_weights zeros
        convs.append((wt, b, s, (k - 1) // 2))                  # `same` padding
    d = z_depth * z_dim
    lw = jax.random.normal(keys[-3], (d, d), jnp.float32) * (1.0 / d) ** 0.5
    lb = jax.random.normal(keys[-2], (d,), jnp.float32) * 0.01
    raw_params = {"convs": convs, "linear": (lw, lb)}

    depth = jax.random.normal(keys[-1], (batch, 1, spatial, spatial), jnp.float32)

    # One-time static preprocessing (hoisted out of the forward path).
    prepared = prepare_depth_encoder(raw_params, (spatial, spatial))

    depth_out, conv_outs = depth_encoder_forward(prepared, depth)
    depth_out = jax.block_until_ready(depth_out)

    ref_out, ref_conv_outs = depth_encoder_forward_ref(raw_params, depth)

    assert depth_out.shape == (batch, d, 1), depth_out.shape
    for got, want in zip(conv_outs, ref_conv_outs):
        assert got.shape == want.shape, (got.shape, want.shape)
        assert jnp.allclose(got, want, atol=5e-2, rtol=5e-2), \
            float(jnp.max(jnp.abs(got - want)))
    assert jnp.allclose(depth_out, ref_out, atol=5e-2, rtol=5e-2), \
        float(jnp.max(jnp.abs(depth_out - ref_out)))

    print("KERNEL_OK")
</pallas_src>

<mosaic_0001>
module attributes {stable_mosaic.version = 11 : i64} {
  func.func @_depth_encoder_kernel(%arg0: memref<18x2x16xf32, #tpu.memory_space<vmem>>, %arg1: memref<3x16x256xf32, #tpu.memory_space<vmem>>, %arg2: memref<3x256x256xf32, #tpu.memory_space<vmem>>, %arg3: memref<4x256x128xf32, #tpu.memory_space<vmem>>, %arg4: memref<3x128x64xf32, #tpu.memory_space<vmem>>, %arg5: memref<3x64x128xf32, #tpu.memory_space<vmem>>, %arg6: memref<3x128x32xf32, #tpu.memory_space<vmem>>, %arg7: memref<3x32x128xf32, #tpu.memory_space<vmem>>, %arg8: memref<1x256xf32, #tpu.memory_space<vmem>>, %arg9: memref<1x256xf32, #tpu.memory_space<vmem>>, %arg10: memref<1x128xf32, #tpu.memory_space<vmem>>, %arg11: memref<1x64xf32, #tpu.memory_space<vmem>>, %arg12: memref<1x128xf32, #tpu.memory_space<vmem>>, %arg13: memref<1x32xf32, #tpu.memory_space<vmem>>, %arg14: memref<1x128xf32, #tpu.memory_space<vmem>>, %arg15: memref<128x128xf32, #tpu.memory_space<vmem>>, %arg16: memref<1x128xf32, #tpu.memory_space<vmem>>, %arg17: memref<8x2x256xf32, #tpu.memory_space<vmem>>, %arg18: memref<4x2x256xf32, #tpu.memory_space<vmem>>, %arg19: memref<2x2x128xf32, #tpu.memory_space<vmem>>, %arg20: memref<1x2x64xf32, #tpu.memory_space<vmem>>, %arg21: memref<1x2x128xf32, #tpu.memory_space<vmem>>, %arg22: memref<1x2x32xf32, #tpu.memory_space<vmem>>, %arg23: memref<1x2x128xf32, #tpu.memory_space<vmem>>, %arg24: memref<2x128xf32, #tpu.memory_space<vmem>>, %arg25: memref<10x2x256xf32, #tpu.memory_space<vmem>>, %arg26: memref<6x2x256xf32, #tpu.memory_space<vmem>>, %arg27: memref<4x2x128xf32, #tpu.memory_space<vmem>>, %arg28: memref<3x2x64xf32, #tpu.memory_space<vmem>>, %arg29: memref<3x2x128xf32, #tpu.memory_space<vmem>>, %arg30: memref<3x2x32xf32, #tpu.memory_space<vmem>>) attributes {dimension_semantics = [], scalar_prefetch = 0 : i64, scratch_operands = 6 : i64, tpu.core_type = #tpu.core_type<tc>} {
    %cst = arith.constant 0.000000e+00 : f32
    %0 = vector.broadcast %cst : f32 to vector<10x2x256xf32>
    %c0 = arith.constant 0 : index
    %c0_0 = arith.constant 0 : index
    %c0_1 = arith.constant 0 : index
    %1 = vector.load %arg25[%c0, %c0_0, %c0_1] : memref<10x2x256xf32, #tpu.memory_space<vmem>>, vector<10x2x256xf32>
    tpu.vector_store %arg25[%c0, %c0_0, %c0_1], %0 {strides = array<i32>} : memref<10x2x256xf32, #tpu.memory_space<vmem>>, vector<10x2x256xf32>,
    %cst_2 = arith.constant 0.000000e+00 : f32
    %2 = vector.broadcast %cst_2 : f32 to vector<6x2x256xf32>
    %c0_3 = arith.constant 0 : index
    %c0_4 = arith.constant 0 : index
    %c0_5 = arith.constant 0 : index
    %3 = vector.load %arg26[%c0_3, %c0_4, %c0_5] : memref<6x2x256xf32, #tpu.memory_space<vmem>>, vector<6x2x256xf32>
    tpu.vector_store %arg26[%c0_3, %c0_4, %c0_5], %2 {strides = array<i32>} : memref<6x2x256xf32, #tpu.memory_space<vmem>>, vector<6x2x256xf32>,
    %cst_6 = arith.constant 0.000000e+00 : f32
    %4 = vector.broadcast %cst_6 : f32 to vector<4x2x128xf32>
    %c0_7 = arith.constant 0 : index
    %c0_8 = arith.constant 0 : index
    %c0_9 = arith.constant 0 : index
    %5 = vector.load %arg27[%c0_7, %c0_8, %c0_9] : memref<4x2x128xf32, #tpu.memory_space<vmem>>, vector<4x2x128xf32>
    tpu.vector_store %arg27[%c0_7, %c0_8, %c0_9], %4 {strides = array<i32>} : memref<4x2x128xf32, #tpu.memory_space<vmem>>, vector<4x2x128xf32>,
    %cst_10 = arith.constant 0.000000e+00 : f32
    %6 = vector.broadcast %cst_10 : f32 to vector<3x2x64xf32>
    %c0_11 = arith.constant 0 : index
    %c0_12 = arith.constant 0 : index
    %c0_13 = arith.constant 0 : index
    %7 = vector.load %arg28[%c0_11, %c0_12, %c0_13] : memref<3x2x64xf32, #tpu.memory_space<vmem>>, vector<3x2x64xf32>
    tpu.vector_store %arg28[%c0_11, %c0_12, %c0_13], %6 {strides = array<i32>} : memref<3x2x64xf32, #tpu.memory_space<vmem>>, vector<3x2x64xf32>,
    %cst_14 = arith.constant 0.000000e+00 : f32
    %8 = vector.broadcast %cst_14 : f32 to vector<3x2x128xf32>
    %c0_15 = arith.constant 0 : index
    %c0_16 = arith.constant 0 : index
    %c0_17 = arith.constant 0 : index
    %9 = vector.load %arg29[%c0_15, %c0_16, %c0_17] : memref<3x2x128xf32, #tpu.memory_space<vmem>>, vector<3x2x128xf32>
    tpu.vector_store %arg29[%c0_15, %c0_16, %c0_17], %8 {strides = array<i32>} : memref<3x2x128xf32, #tpu.memory_space<vmem>>, vector<3x2x128xf32>,
    %cst_18 = arith.constant 0.000000e+00 : f32
    %10 = vector.broadcast %cst_18 : f32 to vector<3x2x32xf32>
    %c0_19 = arith.constant 0 : index
    %c0_20 = arith.constant 0 : index
    %c0_21 = arith.constant 0 : index
    %11 = vector.load %arg30[%c0_19, %c0_20, %c0_21] : memref<3x2x32xf32, #tpu.memory_space<vmem>>, vector<3x2x32xf32>
    tpu.vector_store %arg30[%c0_19, %c0_20, %c0_21], %10 {strides = array<i32>} : memref<3x2x32xf32, #tpu.memory_space<vmem>>, vector<3x2x32xf32>,
    %c0_22 = arith.constant 0 : index
    %c0_23 = arith.constant 0 : index
    %12 = vector.load %arg8[%c0_22, %c0_23] : memref<1x256xf32, #tpu.memory_space<vmem>>, vector<1x256xf32>
    %c0_24 = arith.constant 0 : index
    %c0_25 = arith.constant 0 : index
    %c0_26 = arith.constant 0 : index
    %13 = vector.load %arg0[%c0_24, %c0_25, %c0_26] : memref<18x2x16xf32, #tpu.memory_space<vmem>>, vector<1x2x16xf32>
    %14 = vector.shape_cast %13 : vector<1x2x16xf32> to vector<2x16xf32>
    %c0_27 = arith.constant 0 : index
    %c0_28 = arith.constant 0 : index
    %c0_29 = arith.constant 0 : index
    %15 = vector.load %arg1[%c0_27, %c0_28, %c0_29] : memref<3x16x256xf32, #tpu.memory_space<vmem>>, vector<1x16x256xf32>
    %16 = vector.shape_cast %15 : vector<1x16x256xf32> to vector<16x256xf32>
    %cst_30 = arith.constant dense<0.000000e+00> : vector<2x256xf32>
    %17 = tpu.matmul %14, %16, %cst_30 {dimension_numbers = #tpu.dot_dimension_numbers<[1], [0], [0], [1], [0, 0, 1, 1], [], []>} : vector<2x16xf32>, vector<16x256xf32>, vector<2x256xf32> -> vector<2x256xf32>
    %c1 = arith.constant 1 : index
    %c0_31 = arith.constant 0 : index
    %c0_32 = arith.constant 0 : index
    %18 = vector.load %arg0[%c1, %c0_31, %c0_32] : memref<18x2x16xf32, #tpu.memory_space<vmem>>, vector<1x2x16xf32>
    %19 = vector.shape_cast %18 : vector<1x2x16xf32> to vector<2x16xf32>
    %c1_33 = arith.constant 1 : index
    %c0_34 = arith.constant 0 : index
    %c0_35 = arith.constant 0 : index
    %20 = vector.load %arg1[%c1_33, %c0_34, %c0_35] : memref<3x16x256xf32, #tpu.memory_space<vmem>>, vector<1x16x256xf32>
    %21 = vector.shape_cast %20 : vector<1x16x256xf32> to vector<16x256xf32>
    %cst_36 = arith.constant dense<0.000000e+00> : vector<2x256xf32>
    %22 = tpu.matmul %19, %21, %cst_36 {dimension_numbers = #tpu.dot_dimension_numbers<[1], [0], [0], [1], [0, 0, 1, 1], [], []>} : vector<2x16xf32>, vector<16x256xf32>, vector<2x256xf32> -> vector<2x256xf32>
    %23 = arith.addf %17, %22 : vector<2x256xf32>
    %c2 = arith.constant 2 : index
    %c0_37 = arith.constant 0 : index
    %c0_38 = arith.constant 0 : index
    %24 = vector.load %arg0[%c2, %c0_37, %c0_38] : memref<18x2x16xf32, #tpu.memory_space<vmem>>, vector<1x2x16xf32>
    %25 = vector.shape_cast %24 : vector<1x2x16xf32> to vector<2x16xf32>
    %c2_39 = arith.constant 2 : index
    %c0_40 = arith.constant 0 : index
    %c0_41 = arith.constant 0 : index
    %26 = vector.load %arg1[%c2_39, %c0_40, %c0_41] : memref<3x16x256xf32, #tpu.memory_space<vmem>>, vector<1x16x256xf32>
    %27 = vector.shape_cast %26 : vector<1x16x256xf32> to vector<16x256xf32>
    %cst_42 = arith.constant dense<0.000000e+00> : vector<2x256xf32>
    %28 = tpu.matmul %25, %27, %cst_42 {dimension_numbers = #tpu.dot_dimension_numbers<[1], [0], [0], [1], [0, 0, 1, 1], [], []>} : vector<2x16xf32>, vector<16x256xf32>, vector<2x256xf32> -> vector<2x256xf32>
    %29 = arith.addf %23, %28 : vector<2x256xf32>
    %30 = vector.broadcast %12 : vector<1x256xf32> to vector<2x256xf32>
    %31 = arith.addf %29, %30 : vector<2x256xf32>
    %cst_43 = arith.constant 0.000000e+00 : f32
    %32 = vector.broadcast %cst_43 : f32 to vector<2x256xf32>
    %33 = arith.cmpf oge, %31, %32 : vector<2x256xf32>
    %cst_44 = arith.constant 1.000000e-01 : f32
    %34 = vector.broadcast %cst_44 : f32 to vector<2x256xf32>
    %35 = arith.mulf %34, %31 : vector<2x256xf32>
    %36 = arith.select %33, %31, %35 : vector<2x256xi1>, vector<2x256xf32>
    %c0_45 = arith.constant 0 : index
    %c0_46 = arith.constant 0 : index
    %c0_47 = arith.constant 0 : index
    %37 = vector.load %arg17[%c0_45, %c0_46, %c0_47] : memref<8x2x256xf32, #tpu.memory_space<vmem>>, vector<1x2x256xf32>
    %38 = vector.shape_cast %37 : vector<1x2x256xf32> to vector<2x256xf32>
    %39 = vector.shape_cast %36 : vector<2x256xf32> to vector<1x2x256xf32>
    tpu.vector_store %arg17[%c0_45, %c0_46, %c0_47], %39 {strides = array<i32>} : memref<8x2x256xf32, #tpu.memory_space<vmem>>, vector<1x2x256xf32>,
    %c1_48 = arith.constant 1 : index
    %c0_49 = arith.constant 0 : index
    %c0_50 = arith.constant 0 : index
    %40 = vector.load %arg25[%c1_48, %c0_49, %c0_50] : memref<10x2x256xf32, #tpu.memory_space<vmem>>, vector<1x2x256xf32>
    %41 = vector.shape_cast %40 : vector<1x2x256xf32> to vector<2x256xf32>
    %42 = vector.shape_cast %36 : vector<2x256xf32> to vector<1x2x256xf32>
    tpu.vector_store %arg25[%c1_48, %c0_49, %c0_50], %42 {strides = array<i32>} : memref<10x2x256xf32, #tpu.memory_space<vmem>>, vector<1x2x256xf32>,
    %c2_51 = arith.constant 2 : index
    %c0_52 = arith.constant 0 : index
    %c0_53 = arith.constant 0 : index
    %43 = vector.load %arg0[%c2_51, %c0_52, %c0_53] : memref<18x2x16xf32, #tpu.memory_space<vmem>>, vector<1x2x16xf32>
    %44 = vector.shape_cast %43 : vector<1x2x16xf32> to vector<2x16xf32>
    %c0_54 = arith.constant 0 : index
    %c0_55 = arith.constant 0 : index
    %c0_56 = arith.constant 0 : index
    %45 = vector.load %arg1[%c0_54, %c0_55, %c0_56] : memref<3x16x256xf32, #tpu.memory_space<vmem>>, vector<1x16x256xf32>
    %46 = vector.shape_cast %45 : vector<1x16x256xf32> to vector<16x256xf32>
    %cst_57 = arith.constant dense<0.000000e+00> : vector<2x256xf32>
    %47 = tpu.matmul %44, %46, %cst_57 {dimension_numbers = #tpu.dot_dimension_numbers<[1], [0], [0], [1], [0, 0, 1, 1], [], []>} : vector<2x16xf32>, vector<16x256xf32>, vector<2x256xf32> -> vector<2x256xf32>
    %c3 = arith.constant 3 : index
    %c0_58 = arith.constant 0 : index
    %c0_59 = arith.constant 0 : index
    %48 = vector.load %arg0[%c3, %c0_58, %c0_59] : memref<18x2x16xf32, #tpu.memory_space<vmem>>, vector<1x2x16xf32>
    %49 = vector.shape_cast %48 : vector<1x2x16xf32> to vector<2x16xf32>
    %c1_60 = arith.constant 1 : index
    %c0_61 = arith.constant 0 : index
    %c0_62 = arith.constant 0 : index
    %50 = vector.load %arg1[%c1_60, %c0_61, %c0_62] : memref<3x16x256xf32, #tpu.memory_space<vmem>>, vector<1x16x256xf32>
    %51 = vector.shape_cast %50 : vector<1x16x256xf32> to vector<16x256xf32>
    %cst_63 = arith.constant dense<0.000000e+00> : vector<2x256xf32>
    %52 = tpu.matmul %49, %51, %cst_63 {dimension_numbers = #tpu.dot_dimension_numbers<[1], [0], [0], [1], [0, 0, 1, 1], [], []>} : vector<2x16xf32>, vector<16x256xf32>, vector<2x256xf32> -> vector<2x256xf32>
    %53 = arith.addf %47, %52 : vector<2x256xf32>
    %c4 = arith.constant 4 : index
    %c0_64 = arith.constant 0 : index
    %c0_65 = arith.constant 0 : index
    %54 = vector.load %arg0[%c4, %c0_64, %c0_65] : memref<18x2x16xf32, #tpu.memory_space<vmem>>, vector<1x2x16xf32>
    %55 = vector.shape_cast %54 : vector<1x2x16xf32> to vector<2x16xf32>
    %c2_66 = arith.constant 2 : index
    %c0_67 = arith.constant 0 : index
    %c0_68 = arith.constant 0 : index
    %56 = vector.load %arg1[%c2_66, %c0_67, %c0_68] : memref<3x16x256xf32, #tpu.memory_space<vmem>>, vector<1x16x256xf32>
    %57 = vector.shape_cast %56 : vector<1x16x256xf32> to vector<16x256xf32>
    %cst_69 = arith.constant dense<0.000000e+00> : vector<2x256xf32>
    %58 = tpu.matmul %55, %57, %cst_69 {dimension_numbers = #tpu.dot_dimension_numbers<[1], [0], [0], [1], [0, 0, 1, 1], [], []>} : vector<2x16xf32>, vector<16x256xf32>, vector<2x256xf32> -> vector<2x256xf32>
    %59 = arith.addf %53, %58 : vector<2x256xf32>
    %60 = vector.broadcast %12 : vector<1x256xf32> to vector<2x256xf32>
    %61 = arith.addf %59, %60 : vector<2x256xf32>
    %cst_70 = arith.constant 0.000000e+00 : f32
    %62 = vector.broadcast %cst_70 : f32 to vector<2x256xf32>
    %63 = arith.cmpf oge, %61, %62 : vector<2x256xf32>
    %cst_71 = arith.constant 1.000000e-01 : f32
    %64 = vector.broadcast %cst_71 : f32 to vector<2x256xf32>
    %65 = arith.mulf %64, %61 : vector<2x256xf32>
    %66 = arith.select %63, %61, %65 : vector<2x256xi1>, vector<2x256xf32>
    %c1_72 = arith.constant 1 : index
    %c0_73 = arith.constant 0 : index
    %c0_74 = arith.constant 0 : index
    %67 = vector.load %arg17[%c1_72, %c0_73, %c0_74] : memref<8x2x256xf32, #tpu.memory_space<vmem>>, vector<1x2x256xf32>
    %68 = vector.shape_cast %67 : vector<1x2x256xf32> to vector<2x256xf32>
    %69 = vector.shape_cast %66 : vector<2x256xf32> to vector<1x2x256xf32>
    tpu.vector_store %arg17[%c1_72, %c0_73, %c0_74], %69 {strides = array<i32>} : memref<8x2x256xf32, #tpu.memory_space<vmem>>, vector<1x2x256xf32>,
    %c2_75 = arith.constant 2 : index
    %c0_76 = arith.constant 0 : index
    %c0_77 = arith.constant 0 : index
    %70 = vector.load %arg25[%c2_75, %c0_76, %c0_77] : memref<10x2x256xf32, #tpu.memory_space<vmem>>, vector<1x2x256xf32>
    %71 = vector.shape_cast %70 : vector<1x2x256xf32> to vector<2x256xf32>
    %72 = vector.shape_cast %66 : vector<2x256xf32> to vector<1x2x256xf32>
    tpu.vector_store %arg25[%c2_75, %c0_76, %c0_77], %72 {strides = array<i32>} : memref<10x2x256xf32, #tpu.memory_space<vmem>>, vector<1x2x256xf32>,
    %c4_78 = arith.constant 4 : index
    %c0_79 = arith.constant 0 : index
    %c0_80 = arith.constant 0 : index
    %73 = vector.load %arg0[%c4_78, %c0_79, %c0_80] : memref<18x2x16xf32, #tpu.memory_space<vmem>>, vector<1x2x16xf32>
    %74 = vector.shape_cast %73 : vector<1x2x16xf32> to vector<2x16xf32>
    %c0_81 = arith.constant 0 : index
    %c0_82 = arith.constant 0 : index
    %c0_83 = arith.constant 0 : index
    %75 = vector.load %arg1[%c0_81, %c0_82, %c0_83] : memref<3x16x256xf32, #tpu.memory_space<vmem>>, vector<1x16x256xf32>
    %76 = vector.shape_cast %75 : vector<1x16x256xf32> to vector<16x256xf32>
    %cst_84 = arith.constant dense<0.000000e+00> : vector<2x256xf32>
    %77 = tpu.matmul %74, %76, %cst_84 {dimension_numbers = #tpu.dot_dimension_numbers<[1], [0], [0], [1], [0, 0, 1, 1], [], []>} : vector<2x16xf32>, vector<16x256xf32>, vector<2x256xf32> -> vector<2x256xf32>
    %c5 = arith.constant 5 : index
    %c0_85 = arith.constant 0 : index
    %c0_86 = arith.constant 0 : index
    %78 = vector.load %arg0[%c5, %c0_85, %c0_86] : memref<18x2x16xf32, #tpu.memory_space<vmem>>, vector<1x2x16xf32>
    %79 = vector.shape_cast %78 : vector<1x2x16xf32> to vector<2x16xf32>
    %c1_87 = arith.constant 1 : index
    %c0_88 = arith.constant 0 : index
    %c0_89 = arith.constant 0 : index
    %80 = vector.load %arg1[%c1_87, %c0_88, %c0_89] : memref<3x16x256xf32, #tpu.memory_space<vmem>>, vector<1x16x256xf32>
    %81 = vector.shape_cast %80 : vector<1x16x256xf32> to vector<16x256xf32>
    %cst_90 = arith.constant dense<0.000000e+00> : vector<2x256xf32>
    %82 = tpu.matmul %79, %81, %cst_90 {dimension_numbers = #tpu.dot_dimension_numbers<[1], [0], [0], [1], [0, 0, 1, 1], [], []>} : vector<2x16xf32>, vector<16x256xf32>, vector<2x256xf32> -> vector<2x256xf32>
    %83 = arith.addf %77, %82 : vector<2x256xf32>
    %c6 = arith.constant 6 : index
    %c0_91 = arith.constant 0 : index
    %c0_92 = arith.constant 0 : index
    %84 = vector.load %arg0[%c6, %c0_91, %c0_92] : memref<18x2x16xf32, #tpu.memory_space<vmem>>, vector<1x2x16xf32>
    %85 = vector.shape_cast %84 : vector<1x2x16xf32> to vector<2x16xf32>
    %c2_93 = arith.constant 2 : index
    %c0_94 = arith.constant 0 : index
    %c0_95 = arith.constant 0 : index
    %86 = vector.load %arg1[%c2_93, %c0_94, %c0_95] : memref<3x16x256xf32, #tpu.memory_space<vmem>>, vector<1x16x256xf32>
    %87 = vector.shape_cast %86 : vector<1x16x256xf32> to vector<16x256xf32>
    %cst_96 = arith.constant dense<0.000000e+00> : vector<2x256xf32>
    %88 = tpu.matmul %85, %87, %cst_96 {dimension_numbers = #tpu.dot_dimension_numbers<[1], [0], [0], [1], [0, 0, 1, 1], [], []>} : vector<2x16xf32>, vector<16x256xf32>, vector<2x256xf32> -> vector<2x256xf32>
    %89 = arith.addf %83, %88 : vector<2x256xf32>
    %90 = vector.broadcast %12 : vector<1x256xf32> to vector<2x256xf32>
    %91 = arith.addf %89, %90 : vector<2x256xf32>
    %cst_97 = arith.constant 0.000000e+00 : f32
    %92 = vector.broadcast %cst_97 : f32 to vector<2x256xf32>
    %93 = arith.cmpf oge, %91, %92 : vector<2x256xf32>
    %cst_98 = arith.constant 1.000000e-01 : f32
    %94 = vector.broadcast %cst_98 : f32 to vector<2x256xf32>
    %95 = arith.mulf %94, %91 : vector<2x256xf32>
    %96 = arith.select %93, %91, %95 : vector<2x256xi1>, vector<2x256xf32>
    %c2_99 = arith.constant 2 : index
    %c0_100 = arith.constant 0 : index
    %c0_101 = arith.constant 0 : index
    %97 = vector.load %arg17[%c2_99, %c0_100, %c0_101] : memref<8x2x256xf32, #tpu.memory_space<vmem>>, vector<1x2x256xf32>
    %98 = vector.shape_cast %97 : vector<1x2x256xf32> to vector<2x256xf32>
    %99 = vector.shape_cast %96 : vector<2x256xf32> to vector<1x2x256xf32>
    tpu.vector_store %arg17[%c2_99, %c0_100, %c0_101], %99 {strides = array<i32>} : memref<8x2x256xf32, #tpu.memory_space<vmem>>, vector<1x2x256xf32>,
    %c3_102 = arith.constant 3 : index
    %c0_103 = arith.constant 0 : index
    %c0_104 = arith.constant 0 : index
    %100 = vector.load %arg25[%c3_102, %c0_103, %c0_104] : memref<10x2x256xf32, #tpu.memory_space<vmem>>, vector<1x2x256xf32>
    %101 = vector.shape_cast %100 : vector<1x2x256xf32> to vector<2x256xf32>
    %102 = vector.shape_cast %96 : vector<2x256xf32> to vector<1x2x256xf32>
    tpu.vector_store %arg25[%c3_102, %c0_103, %c0_104], %102 {strides = array<i32>} : memref<10x2x256xf32, #tpu.memory_space<vmem>>, vector<1x2x256xf32>,
    %c6_105 = arith.constant 6 : index
    %c0_106 = arith.constant 0 : index
    %c0_107 = arith.constant 0 : index
    %103 = vector.load %arg0[%c6_105, %c0_106, %c0_107] : memref<18x2x16xf32, #tpu.memory_space<vmem>>, vector<1x2x16xf32>
    %104 = vector.shape_cast %103 : vector<1x2x16xf32> to vector<2x16xf32>
    %c0_108 = arith.constant 0 : index
    %c0_109 = arith.constant 0 : index
    %c0_110 = arith.constant 0 : index
    %105 = vector.load %arg1[%c0_108, %c0_109, %c0_110] : memref<3x16x256xf32, #tpu.memory_space<vmem>>, vector<1x16x256xf32>
    %106 = vector.shape_cast %105 : vector<1x16x256xf32> to vector<16x256xf32>
    %cst_111 = arith.constant dense<0.000000e+00> : vector<2x256xf32>
    %107 = tpu.matmul %104, %106, %cst_111 {dimension_numbers = #tpu.dot_dimension_numbers<[1], [0], [0], [1], [0, 0, 1, 1], [], []>} : vector<2x16xf32>, vector<16x256xf32>, vector<2x256xf32> -> vector<2x256xf32>
    %c7 = arith.constant 7 : index
    %c0_112 = arith.constant 0 : index
    %c0_113 = arith.constant 0 : index
    %108 = vector.load %arg0[%c7, %c0_112, %c0_113] : memref<18x2x16xf32, #tpu.memory_space<vmem>>, vector<1x2x16xf32>
    %109 = vector.shape_cast %108 : vector<1x2x16xf32> to vector<2x16xf32>
    %c1_114 = arith.constant 1 : index
    %c0_115 = arith.constant 0 : index
    %c0_116 = arith.constant 0 : index
    %110 = vector.load %arg1[%c1_114, %c0_115, %c0_116] : memref<3x16x256xf32, #tpu.memory_space<vmem>>, vector<1x16x256xf32>
    %111 = vector.shape_cast %110 : vector<1x16x256xf32> to vector<16x256xf32>
    %cst_117 = arith.constant dense<0.000000e+00> : vector<2x256xf32>
    %112 = tpu.matmul %109, %111, %cst_117 {dimension_numbers = #tpu.dot_dimension_numbers<[1], [0], [0], [1], [0, 0, 1, 1], [], []>} : vector<2x16xf32>, vector<16x256xf32>, vector<2x256xf32> -> vector<2x256xf32>
    %113 = arith.addf %107, %112 : vector<2x256xf32>
    %c8 = arith.constant 8 : index
    %c0_118 = arith.constant 0 : index
    %c0_119 = arith.constant 0 : index
    %114 = vector.load %arg0[%c8, %c0_118, %c0_119] : memref<18x2x16xf32, #tpu.memory_space<vmem>>, vector<1x2x16xf32>
    %115 = vector.shape_cast %114 : vector<1x2x16xf32> to vector<2x16xf32>
    %c2_120 = arith.constant 2 : index
    %c0_121 = arith.constant 0 : index
    %c0_122 = arith.constant 0 : index
    %116 = vector.load %arg1[%c2_120, %c0_121, %c0_122] : memref<3x16x256xf32, #tpu.memory_space<vmem>>, vector<1x16x256xf32>
    %117 = vector.shape_cast %116 : vector<1x16x256xf32> to vector<16x256xf32>
    %cst_123 = arith.constant dense<0.000000e+00> : vector<2x256xf32>
    %118 = tpu.matmul %115, %117, %cst_123 {dimension_numbers = #tpu.dot_dimension_numbers<[1], [0], [0], [1], [0, 0, 1, 1], [], []>} : vector<2x16xf32>, vector<16x256xf32>, vector<2x256xf32> -> vector<2x256xf32>
    %119 = arith.addf %113, %118 : vector<2x256xf32>
    %120 = vector.broadcast %12 : vector<1x256xf32> to vector<2x256xf32>
    %121 = arith.addf %119, %120 : vector<2x256xf32>
    %cst_124 = arith.constant 0.000000e+00 : f32
    %122 = vector.broadcast %cst_124 : f32 to vector<2x256xf32>
    %123 = arith.cmpf oge, %121, %122 : vector<2x256xf32>
    %cst_125 = arith.constant 1.000000e-01 : f32
    %124 = vector.broadcast %cst_125 : f32 to vector<2x256xf32>
    %125 = arith.mulf %124, %121 : vector<2x256xf32>
    %126 = arith.select %123, %121, %125 : vector<2x256xi1>, vector<2x256xf32>
    %c3_126 = arith.constant 3 : index
    %c0_127 = arith.constant 0 : index
    %c0_128 = arith.constant 0 : index
    %127 = vector.load %arg17[%c3_126, %c0_127, %c0_128] : memref<8x2x256xf32, #tpu.memory_space<vmem>>, vector<1x2x256xf32>
    %128 = vector.shape_cast %127 : vector<1x2x256xf32> to vector<2x256xf32>
    %129 = vector.shape_cast %126 : vector<2x256xf32> to vector<1x2x256xf32>
    tpu.vector_store %arg17[%c3_126, %c0_127, %c0_128], %129 {strides = array<i32>} : memref<8x2x256xf32, #tpu.memory_space<vmem>>, vector<1x2x256xf32>,
    %c4_129 = arith.constant 4 : index
    %c0_130 = arith.constant 0 : index
    %c0_131 = arith.constant 0 : index
    %130 = vector.load %arg25[%c4_129, %c0_130, %c0_131] : memref<10x2x256xf32, #tpu.memory_space<vmem>>, vector<1x2x256xf32>
    %131 = vector.shape_cast %130 : vector<1x2x256xf32> to vector<2x256xf32>
    %132 = vector.shape_cast %126 : vector<2x256xf32> to vector<1x2x256xf32>
    tpu.vector_store %arg25[%c4_129, %c0_130, %c0_131], %132 {strides = array<i32>} : memref<10x2x256xf32, #tpu.memory_space<vmem>>, vector<1x2x256xf32>,
    %c8_132 = arith.constant 8 : index
    %c0_133 = arith.constant 0 : index
    %c0_134 = arith.constant 0 : index
    %133 = vector.load %arg0[%c8_132, %c0_133, %c0_134] : memref<18x2x16xf32, #tpu.memory_space<vmem>>, vector<1x2x16xf32>
    %134 = vector.shape_cast %133 : vector<1x2x16xf32> to vector<2x16xf32>
    %c0_135 = arith.constant 0 : index
    %c0_136 = arith.constant 0 : index
    %c0_137 = arith.constant 0 : index
    %135 = vector.load %arg1[%c0_135, %c0_136, %c0_137] : memref<3x16x256xf32, #tpu.memory_space<vmem>>, vector<1x16x256xf32>
    %136 = vector.shape_cast %135 : vector<1x16x256xf32> to vector<16x256xf32>
    %cst_138 = arith.constant dense<0.000000e+00> : vector<2x256xf32>
    %137 = tpu.matmul %134, %136, %cst_138 {dimension_numbers = #tpu.dot_dimension_numbers<[1], [0], [0], [1], [0, 0, 1, 1], [], []>} : vector<2x16xf32>, vector<16x256xf32>, vector<2x256xf32> -> vector<2x256xf32>
    %c9 = arith.constant 9 : index
    %c0_139 = arith.constant 0 : index
    %c0_140 = arith.constant 0 : index
    %138 = vector.load %arg0[%c9, %c0_139, %c0_140] : memref<18x2x16xf32, #tpu.memory_space<vmem>>, vector<1x2x16xf32>
    %139 = vector.shape_cast %138 : vector<1x2x16xf32> to vector<2x16xf32>
    %c1_141 = arith.constant 1 : index
    %c0_142 = arith.constant 0 : index
    %c0_143 = arith.constant 0 : index
    %140 = vector.load %arg1[%c1_141, %c0_142, %c0_143] : memref<3x16x256xf32, #tpu.memory_space<vmem>>, vector<1x16x256xf32>
    %141 = vector.shape_cast %140 : vector<1x16x256xf32> to vector<16x256xf32>
    %cst_144 = arith.constant dense<0.000000e+00> : vector<2x256xf32>
    %142 = tpu.matmul %139, %141, %cst_144 {dimension_numbers = #tpu.dot_dimension_numbers<[1], [0], [0], [1], [0, 0, 1, 1], [], []>} : vector<2x16xf32>, vector<16x256xf32>, vector<2x256xf32> -> vector<2x256xf32>
    %143 = arith.addf %137, %142 : vector<2x256xf32>
    %c10 = arith.constant 10 : index
    %c0_145 = arith.constant 0 : index
    %c0_146 = arith.constant 0 : index
    %144 = vector.load %arg0[%c10, %c0_145, %c0_146] : memref<18x2x16xf32, #tpu.memory_space<vmem>>, vector<1x2x16xf32>
    %145 = vector.shape_cast %144 : vector<1x2x16xf32> to vector<2x16xf32>
    %c2_147 = arith.constant 2 : index
    %c0_148 = arith.constant 0 : index
    %c0_149 = arith.constant 0 : index
    %146 = vector.load %arg1[%c2_147, %c0_148, %c0_149] : memref<3x16x256xf32, #tpu.memory_space<vmem>>, vector<1x16x256xf32>
    %147 = vector.shape_cast %146 : vector<1x16x256xf32> to vector<16x256xf32>
    %cst_150 = arith.constant dense<0.000000e+00> : vector<2x256xf32>
    %148 = tpu.matmul %145, %147, %cst_150 {dimension_numbers = #tpu.dot_dimension_numbers<[1], [0], [0], [1], [0, 0, 1, 1], [], []>} : vector<2x16xf32>, vector<16x256xf32>, vector<2x256xf32> -> vector<2x256xf32>
    %149 = arith.addf %143, %148 : vector<2x256xf32>
    %150 = vector.broadcast %12 : vector<1x256xf32> to vector<2x256xf32>
    %151 = arith.addf %149, %150 : vector<2x256xf32>
    %cst_151 = arith.constant 0.000000e+00 : f32
    %152 = vector.broadcast %cst_151 : f32 to vector<2x256xf32>
    %153 = arith.cmpf oge, %151, %152 : vector<2x256xf32>
    %cst_152 = arith.constant 1.000000e-01 : f32
    %154 = vector.broadcast %cst_152 : f32 to vector<2x256xf32>
    %155 = arith.mulf %154, %151 : vector<2x256xf32>
    %156 = arith.select %153, %151, %155 : vector<2x256xi1>, vector<2x256xf32>
    %c4_153 = arith.constant 4 : index
    %c0_154 = arith.constant 0 : index
    %c0_155 = arith.constant 0 : index
    %157 = vector.load %arg17[%c4_153, %c0_154, %c0_155] : memref<8x2x256xf32, #tpu.memory_space<vmem>>, vector<1x2x256xf32>
    %158 = vector.shape_cast %157 : vector<1x2x256xf32> to vector<2x256xf32>
    %159 = vector.shape_cast %156 : vector<2x256xf32> to vector<1x2x256xf32>
    tpu.vector_store %arg17[%c4_153, %c0_154, %c0_155], %159 {strides = array<i32>} : memref<8x2x256xf32, #tpu.memory_space<vmem>>, vector<1x2x256xf32>,
    %c5_156 = arith.constant 5 : index
    %c0_157 = arith.constant 0 : index
    %c0_158 = arith.constant 0 : index
    %160 = vector.load %arg25[%c5_156, %c0_157, %c0_158] : memref<10x2x256xf32, #tpu.memory_space<vmem>>, vector<1x2x256xf32>
    %161 = vector.shape_cast %160 : vector<1x2x256xf32> to vector<2x256xf32>
    %162 = vector.shape_cast %156 : vector<2x256xf32> to vector<1x2x256xf32>
    tpu.vector_store %arg25[%c5_156, %c0_157, %c0_158], %162 {strides = array<i32>} : memref<10x2x256xf32, #tpu.memory_space<vmem>>, vector<1x2x256xf32>,
    %c10_159 = arith.constant 10 : index
    %c0_160 = arith.constant 0 : index
    %c0_161 = arith.constant 0 : index
    %163 = vector.load %arg0[%c10_159, %c0_160, %c0_161] : memref<18x2x16xf32, #tpu.memory_space<vmem>>, vector<1x2x16xf32>
    %164 = vector.shape_cast %163 : vector<1x2x16xf32> to vector<2x16xf32>
    %c0_162 = arith.constant 0 : index
    %c0_163 = arith.constant 0 : index
    %c0_164 = arith.constant 0 : index
    %165 = vector.load %arg1[%c0_162, %c0_163, %c0_164] : memref<3x16x256xf32, #tpu.memory_space<vmem>>, vector<1x16x256xf32>
    %166 = vector.shape_cast %165 : vector<1x16x256xf32> to vector<16x256xf32>
    %cst_165 = arith.constant dense<0.000000e+00> : vector<2x256xf32>
    %167 = tpu.matmul %164, %166, %cst_165 {dimension_numbers = #tpu.dot_dimension_numbers<[1], [0], [0], [1], [0, 0, 1, 1], [], []>} : vector<2x16xf32>, vector<16x256xf32>, vector<2x256xf32> -> vector<2x256xf32>
    %c11 = arith.constant 11 : index
    %c0_166 = arith.constant 0 : index
    %c0_167 = arith.constant 0 : index
    %168 = vector.load %arg0[%c11, %c0_166, %c0_167] : memref<18x2x16xf32, #tpu.memory_space<vmem>>, vector<1x2x16xf32>
    %169 = vector.shape_cast %168 : vector<1x2x16xf32> to vector<2x16xf32>
    %c1_168 = arith.constant 1 : index
    %c0_169 = arith.constant 0 : index
    %c0_170 = arith.constant 0 : index
    %170 = vector.load %arg1[%c1_168, %c0_169, %c0_170] : memref<3x16x256xf32, #tpu.memory_space<vmem>>, vector<1x16x256xf32>
    %171 = vector.shape_cast %170 : vector<1x16x256xf32> to vector<16x256xf32>
    %cst_171 = arith.constant dense<0.000000e+00> : vector<2x256xf32>
    %172 = tpu.matmul %169, %171, %cst_171 {dimension_numbers = #tpu.dot_dimension_numbers<[1], [0], [0], [1], [0, 0, 1, 1], [], []>} : vector<2x16xf32>, vector<16x256xf32>, vector<2x256xf32> -> vector<2x256xf32>
    %173 = arith.addf %167, %172 : vector<2x256xf32>
    %c12 = arith.constant 12 : index
    %c0_172 = arith.constant 0 : index
    %c0_173 = arith.constant 0 : index
    %174 = vector.load %arg0[%c12, %c0_172, %c0_173] : memref<18x2x16xf32, #tpu.memory_space<vmem>>, vector<1x2x16xf32>
    %175 = vector.shape_cast %174 : vector<1x2x16xf32> to vector<2x16xf32>
    %c2_174 = arith.constant 2 : index
    %c0_175 = arith.constant 0 : index
    %c0_176 = arith.constant 0 : index
    %176 = vector.load %arg1[%c2_174, %c0_175, %c0_176] : memref<3x16x256xf32, #tpu.memory_space<vmem>>, vector<1x16x256xf32>
    %177 = vector.shape_cast %176 : vector<1x16x256xf32> to vector<16x256xf32>
    %cst_177 = arith.constant dense<0.000000e+00> : vector<2x256xf32>
    %178 = tpu.matmul %175, %177, %cst_177 {dimension_numbers = #tpu.dot_dimension_numbers<[1], [0], [0], [1], [0, 0, 1, 1], [], []>} : vector<2x16xf32>, vector<16x256xf32>, vector<2x256xf32> -> vector<2x256xf32>
    %179 = arith.addf %173, %178 : vector<2x256xf32>
    %180 = vector.broadcast %12 : vector<1x256xf32> to vector<2x256xf32>
    %181 = arith.addf %179, %180 : vector<2x256xf32>
    %cst_178 = arith.constant 0.000000e+00 : f32
    %182 = vector.broadcast %cst_178 : f32 to vector<2x256xf32>
    %183 = arith.cmpf oge, %181, %182 : vector<2x256xf32>
    %cst_179 = arith.constant 1.000000e-01 : f32
    %184 = vector.broadcast %cst_179 : f32 to vector<2x256xf32>
    %185 = arith.mulf %184, %181 : vector<2x256xf32>
    %186 = arith.select %183, %181, %185 : vector<2x256xi1>, vector<2x256xf32>
    %c5_180 = arith.constant 5 : index
    %c0_181 = arith.constant 0 : index
    %c0_182 = arith.constant 0 : index
    %187 = vector.load %arg17[%c5_180, %c0_181, %c0_182] : memref<8x2x256xf32, #tpu.memory_space<vmem>>, vector<1x2x256xf32>
    %188 = vector.shape_cast %187 : vector<1x2x256xf32> to vector<2x256xf32>
    %189 = vector.shape_cast %186 : vector<2x256xf32> to vector<1x2x256xf32>
    tpu.vector_store %arg17[%c5_180, %c0_181, %c0_182], %189 {strides = array<i32>} : memref<8x2x256xf32, #tpu.memory_space<vmem>>, vector<1x2x256xf32>,
    %c6_183 = arith.constant 6 : index
    %c0_184 = arith.constant 0 : index
    %c0_185 = arith.constant 0 : index
    %190 = vector.load %arg25[%c6_183, %c0_184, %c0_185] : memref<10x2x256xf32, #tpu.memory_space<vmem>>, vector<1x2x256xf32>
    %191 = vector.shape_cast %190 : vector<1x2x256xf32> to vector<2x256xf32>
    %192 = vector.shape_cast %186 : vector<2x256xf32> to vector<1x2x256xf32>
    tpu.vector_store %arg25[%c6_183, %c0_184, %c0_185], %192 {strides = array<i32>} : memref<10x2x256xf32, #tpu.memory_space<vmem>>, vector<1x2x256xf32>,
    %c12_186 = arith.constant 12 : index
    %c0_187 = arith.constant 0 : index
    %c0_188 = arith.constant 0 : index
    %193 = vector.load %arg0[%c12_186, %c0_187, %c0_188] : memref<18x2x16xf32, #tpu.memory_space<vmem>>, vector<1x2x16xf32>
    %194 = vector.shape_cast %193 : vector<1x2x16xf32> to vector<2x16xf32>
    %c0_189 = arith.constant 0 : index
    %c0_190 = arith.constant 0 : index
    %c0_191 = arith.constant 0 : index
    %195 = vector.load %arg1[%c0_189, %c0_190, %c0_191] : memref<3x16x256xf32, #tpu.memory_space<vmem>>, vector<1x16x256xf32>
    %196 = vector.shape_cast %195 : vector<1x16x256xf32> to vector<16x256xf32>
    %cst_192 = arith.constant dense<0.000000e+00> : vector<2x256xf32>
    %197 = tpu.matmul %194, %196, %cst_192 {dimension_numbers = #tpu.dot_dimension_numbers<[1], [0], [0], [1], [0, 0, 1, 1], [], []>} : vector<2x16xf32>, vector<16x256xf32>, vector<2x256xf32> -> vector<2x256xf32>
    %c13 = arith.constant 13 : index
    %c0_193 = arith.constant 0 : index
    %c0_194 = arith.constant 0 : index
    %198 = vector.load %arg0[%c13, %c0_193, %c0_194] : memref<18x2x16xf32, #tpu.memory_space<vmem>>, vector<1x2x16xf32>
    %199 = vector.shape_cast %198 : vector<1x2x16xf32> to vector<2x16xf32>
    %c1_195 = arith.constant 1 : index
    %c0_196 = arith.constant 0 : index
    %c0_197 = arith.constant 0 : index
    %200 = vector.load %arg1[%c1_195, %c0_196, %c0_197] : memref<3x16x256xf32, #tpu.memory_space<vmem>>, vector<1x16x256xf32>
    %201 = vector.shape_cast %200 : vector<1x16x256xf32> to vector<16x256xf32>
    %cst_198 = arith.constant dense<0.000000e+00> : vector<2x256xf32>
    %202 = tpu.matmul %199, %201, %cst_198 {dimension_numbers = #tpu.dot_dimension_numbers<[1], [0], [0], [1], [0, 0, 1, 1], [], []>} : vector<2x16xf32>, vector<16x256xf32>, vector<2x256xf32> -> vector<2x256xf32>
    %203 = arith.addf %197, %202 : vector<2x256xf32>
    %c14 = arith.constant 14 : index
    %c0_199 = arith.constant 0 : index
    %c0_200 = arith.constant 0 : index
    %204 = vector.load %arg0[%c14, %c0_199, %c0_200] : memref<18x2x16xf32, #tpu.memory_space<vmem>>, vector<1x2x16xf32>
    %205 = vector.shape_cast %204 : vector<1x2x16xf32> to vector<2x16xf32>
    %c2_201 = arith.constant 2 : index
    %c0_202 = arith.constant 0 : index
    %c0_203 = arith.constant 0 : index
    %206 = vector.load %arg1[%c2_201, %c0_202, %c0_203] : memref<3x16x256xf32, #tpu.memory_space<vmem>>, vector<1x16x256xf32>
    %207 = vector.shape_cast %206 : vector<1x16x256xf32> to vector<16x256xf32>
    %cst_204 = arith.constant dense<0.000000e+00> : vector<2x256xf32>
    %208 = tpu.matmul %205, %207, %cst_204 {dimension_numbers = #tpu.dot_dimension_numbers<[1], [0], [0], [1], [0, 0, 1, 1], [], []>} : vector<2x16xf32>, vector<16x256xf32>, vector<2x256xf32> -> vector<2x256xf32>
    %209 = arith.addf %203, %208 : vector<2x256xf32>
    %210 = vector.broadcast %12 : vector<1x256xf32> to vector<2x256xf32>
    %211 = arith.addf %209, %210 : vector<2x256xf32>
    %cst_205 = arith.constant 0.000000e+00 : f32
    %212 = vector.broadcast %cst_205 : f32 to vector<2x256xf32>
    %213 = arith.cmpf oge, %211, %212 : vector<2x256xf32>
    %cst_206 = arith.constant 1.000000e-01 : f32
    %214 = vector.broadcast %cst_206 : f32 to vector<2x256xf32>
    %215 = arith.mulf %214, %211 : vector<2x256xf32>
    %216 = arith.select %213, %211, %215 : vector<2x256xi1>, vector<2x256xf32>
    %c6_207 = arith.constant 6 : index
    %c0_208 = arith.constant 0 : index
    %c0_209 = arith.constant 0 : index
    %217 = vector.load %arg17[%c6_207, %c0_208, %c0_209] : memref<8x2x256xf32, #tpu.memory_space<vmem>>, vector<1x2x256xf32>
    %218 = vector.shape_cast %217 : vector<1x2x256xf32> to vector<2x256xf32>
    %219 = vector.shape_cast %216 : vector<2x256xf32> to vector<1x2x256xf32>
    tpu.vector_store %arg17[%c6_207, %c0_208, %c0_209], %219 {strides = array<i32>} : memref<8x2x256xf32, #tpu.memory_space<vmem>>, vector<1x2x256xf32>,
    %c7_210 = arith.constant 7 : index
    %c0_211 = arith.constant 0 : index
    %c0_212 = arith.constant 0 : index
    %220 = vector.load %arg25[%c7_210, %c0_211, %c0_212] : memref<10x2x256xf32, #tpu.memory_space<vmem>>, vector<1x2x256xf32>
    %221 = vector.shape_cast %220 : vector<1x2x256xf32> to vector<2x256xf32>
    %222 = vector.shape_cast %216 : vector<2x256xf32> to vector<1x2x256xf32>
    tpu.vector_store %arg25[%c7_210, %c0_211, %c0_212], %222 {strides = array<i32>} : memref<10x2x256xf32, #tpu.memory_space<vmem>>, vector<1x2x256xf32>,
    %c14_213 = arith.constant 14 : index
    %c0_214 = arith.constant 0 : index
    %c0_215 = arith.constant 0 : index
    %223 = vector.load %arg0[%c14_213, %c0_214, %c0_215] : memref<18x2x16xf32, #tpu.memory_space<vmem>>, vector<1x2x16xf32>
    %224 = vector.shape_cast %223 : vector<1x2x16xf32> to vector<2x16xf32>
    %c0_216 = arith.constant 0 : index
    %c0_217 = arith.constant 0 : index
    %c0_218 = arith.constant 0 : index
    %225 = vector.load %arg1[%c0_216, %c0_217, %c0_218] : memref<3x16x256xf32, #tpu.memory_space<vmem>>, vector<1x16x256xf32>
    %226 = vector.shape_cast %225 : vector<1x16x256xf32> to vector<16x256xf32>
    %cst_219 = arith.constant dense<0.000000e+00> : vector<2x256xf32>
    %227 = tpu.matmul %224, %226, %cst_219 {dimension_numbers = #tpu.dot_dimension_numbers<[1], [0], [0], [1], [0, 0, 1, 1], [], []>} : vector<2x16xf32>, vector<16x256xf32>, vector<2x256xf32> -> vector<2x256xf32>
    %c15 = arith.constant 15 : index
    %c0_220 = arith.constant 0 : index
    %c0_221 = arith.constant 0 : index
    %228 = vector.load %arg0[%c15, %c0_220, %c0_221] : memref<18x2x16xf32, #tpu.memory_space<vmem>>, vector<1x2x16xf32>
    %229 = vector.shape_cast %228 : vector<1x2x16xf32> to vector<2x16xf32>
    %c1_222 = arith.constant 1 : index
    %c0_223 = arith.constant 0 : index
    %c0_224 = arith.constant 0 : index
    %230 = vector.load %arg1[%c1_222, %c0_223, %c0_224] : memref<3x16x256xf32, #tpu.memory_space<vmem>>, vector<1x16x256xf32>
    %231 = vector.shape_cast %230 : vector<1x16x256xf32> to vector<16x256xf32>
    %cst_225 = arith.constant dense<0.000000e+00> : vector<2x256xf32>
    %232 = tpu.matmul %229, %231, %cst_225 {dimension_numbers = #tpu.dot_dimension_numbers<[1], [0], [0], [1], [0, 0, 1, 1], [], []>} : vector<2x16xf32>, vector<16x256xf32>, vector<2x256xf32> -> vector<2x256xf32>
    %233 = arith.addf %227, %232 : vector<2x256xf32>
    %c16 = arith.constant 16 : index
    %c0_226 = arith.constant 0 : index
    %c0_227 = arith.constant 0 : index
    %234 = vector.load %arg0[%c16, %c0_226, %c0_227] : memref<18x2x16xf32, #tpu.memory_space<vmem>>, vector<1x2x16xf32>
    %235 = vector.shape_cast %234 : vector<1x2x16xf32> to vector<2x16xf32>
    %c2_228 = arith.constant 2 : index
    %c0_229 = arith.constant 0 : index
    %c0_230 = arith.constant 0 : index
    %236 = vector.load %arg1[%c2_228, %c0_229, %c0_230] : memref<3x16x256xf32, #tpu.memory_space<vmem>>, vector<1x16x256xf32>
    %237 = vector.shape_cast %236 : vector<1x16x256xf32> to vector<16x256xf32>
    %cst_231 = arith.constant dense<0.000000e+00> : vector<2x256xf32>
    %238 = tpu.matmul %235, %237, %cst_231 {dimension_numbers = #tpu.dot_dimension_numbers<[1], [0], [0], [1], [0, 0, 1, 1], [], []>} : vector<2x16xf32>, vector<16x256xf32>, vector<2x256xf32> -> vector<2x256xf32>
    %239 = arith.addf %233, %238 : vector<2x256xf32>
    %240 = vector.broadcast %12 : vector<1x256xf32> to vector<2x256xf32>
    %241 = arith.addf %239, %240 : vector<2x256xf32>
    %cst_232 = arith.constant 0.000000e+00 : f32
    %242 = vector.broadcast %cst_232 : f32 to vector<2x256xf32>
    %243 = arith.cmpf oge, %241, %242 : vector<2x256xf32>
    %cst_233 = arith.constant 1.000000e-01 : f32
    %244 = vector.broadcast %cst_233 : f32 to vector<2x256xf32>
    %245 = arith.mulf %244, %241 : vector<2x256xf32>
    %246 = arith.select %243, %241, %245 : vector<2x256xi1>, vector<2x256xf32>
    %c7_234 = arith.constant 7 : index
    %c0_235 = arith.constant 0 : index
    %c0_236 = arith.constant 0 : index
    %247 = vector.load %arg17[%c7_234, %c0_235, %c0_236] : memref<8x2x256xf32, #tpu.memory_space<vmem>>, vector<1x2x256xf32>
    %248 = vector.shape_cast %247 : vector<1x2x256xf32> to vector<2x256xf32>
    %249 = vector.shape_cast %246 : vector<2x256xf32> to vector<1x2x256xf32>
    tpu.vector_store %arg17[%c7_234, %c0_235, %c0_236], %249 {strides = array<i32>} : memref<8x2x256xf32, #tpu.memory_space<vmem>>, vector<1x2x256xf32>,
    %c8_237 = arith.constant 8 : index
    %c0_238 = arith.constant 0 : index
    %c0_239 = arith.constant 0 : index
    %250 = vector.load %arg25[%c8_237, %c0_238, %c0_239] : memref<10x2x256xf32, #tpu.memory_space<vmem>>, vector<1x2x256xf32>
    %251 = vector.shape_cast %250 : vector<1x2x256xf32> to vector<2x256xf32>
    %252 = vector.shape_cast %246 : vector<2x256xf32> to vector<1x2x256xf32>
    tpu.vector_store %arg25[%c8_237, %c0_238, %c0_239], %252 {strides = array<i32>} : memref<10x2x256xf32, #tpu.memory_space<vmem>>, vector<1x2x256xf32>,
    %c0_240 = arith.constant 0 : index
    %c0_241 = arith.constant 0 : index
    %253 = vector.load %arg9[%c0_240, %c0_241] : memref<1x256xf32, #tpu.memory_space<vmem>>, vector<1x256xf32>
    %c0_242 = arith.constant 0 : index
    %c0_243 = arith.constant 0 : index
    %c0_244 = arith.constant 0 : index
    %254 = vector.load %arg25[%c0_242, %c0_243, %c0_244] : memref<10x2x256xf32, #tpu.memory_space<vmem>>, vector<1x2x256xf32>
    %255 = vector.shape_cast %254 : vector<1x2x256xf32> to vector<2x256xf32>
    %c0_245 = arith.constant 0 : index
    %c0_246 = arith.constant 0 : index
    %c0_247 = arith.constant 0 : index
    %256 = vector.load %arg2[%c0_245, %c0_246, %c0_247] : memref<3x256x256xf32, #tpu.memory_space<vmem>>, vector<1x256x256xf32>
    %257 = vector.shape_cast %256 : vector<1x256x256xf32> to vector<256x256xf32>
    %cst_248 = arith.constant dense<0.000000e+00> : vector<2x256xf32>
    %258 = tpu.matmul %255, %257, %cst_248 {dimension_numbers = #tpu.dot_dimension_numbers<[1], [0], [0], [1], [0, 0, 1, 1], [], []>} : vector<2x256xf32>, vector<256x256xf32>, vector<2x256xf32> -> vector<2x256xf32>
    %c1_249 = arith.constant 1 : index
    %c0_250 = arith.constant 0 : index
    %c0_251 = arith.constant 0 : index
    %259 = vector.load %arg25[%c1_249, %c0_250, %c0_251] : memref<10x2x256xf32, #tpu.memory_space<vmem>>, vector<1x2x256xf32>
    %260 = vector.shape_cast %259 : vector<1x2x256xf32> to vector<2x256xf32>
    %c1_252 = arith.constant 1 : index
    %c0_253 = arith.constant 0 : index
    %c0_254 = arith.constant 0 : index
    %261 = vector.load %arg2[%c1_252, %c0_253, %c0_254] : memref<3x256x256xf32, #tpu.memory_space<vmem>>, vector<1x256x256xf32>
    %262 = vector.shape_cast %261 : vector<1x256x256xf32> to vector<256x256xf32>
    %cst_255 = arith.constant dense<0.000000e+00> : vector<2x256xf32>
    %263 = tpu.matmul %260, %262, %cst_255 {dimension_numbers = #tpu.dot_dimension_numbers<[1], [0], [0], [1], [0, 0, 1, 1], [], []>} : vector<2x256xf32>, vector<256x256xf32>, vector<2x256xf32> -> vector<2x256xf32>
    %264 = arith.addf %258, %263 : vector<2x256xf32>
    %c2_256 = arith.constant 2 : index
    %c0_257 = arith.constant 0 : index
    %c0_258 = arith.constant 0 : index
    %265 = vector.load %arg25[%c2_256, %c0_257, %c0_258] : memref<10x2x256xf32, #tpu.memory_space<vmem>>, vector<1x2x256xf32>
    %266 = vector.shape_cast %265 : vector<1x2x256xf32> to vector<2x256xf32>
    %c2_259 = arith.constant 2 : index
    %c0_260 = arith.constant 0 : index
    %c0_261 = arith.constant 0 : index
    %267 = vector.load %arg2[%c2_259, %c0_260, %c0_261] : memref<3x256x256xf32, #tpu.memory_space<vmem>>, vector<1x256x256xf32>
    %268 = vector.shape_cast %267 : vector<1x256x256xf32> to vector<256x256xf32>
    %cst_262 = arith.constant dense<0.000000e+00> : vector<2x256xf32>
    %269 = tpu.matmul %266, %268, %cst_262 {dimension_numbers = #tpu.dot_dimension_numbers<[1], [0], [0], [1], [0, 0, 1, 1], [], []>} : vector<2x256xf32>, vector<256x256xf32>, vector<2x256xf32> -> vector<2x256xf32>
    %270 = arith.addf %264, %269 : vector<2x256xf32>
    %271 = vector.broadcast %253 : vector<1x256xf32> to vector<2x256xf32>
    %272 = arith.addf %270, %271 : vector<2x256xf32>
    %cst_263 = arith.constant 0.000000e+00 : f32
    %273 = vector.broadcast %cst_263 : f32 to vector<2x256xf32>
    %274 = arith.cmpf oge, %272, %273 : vector<2x256xf32>
    %cst_264 = arith.constant 1.000000e-01 : f32
    %275 = vector.broadcast %cst_264 : f32 to vector<2x256xf32>
    %276 = arith.mulf %275, %272 : vector<2x256xf32>
    %277 = arith.select %274, %272, %276 : vector<2x256xi1>, vector<2x256xf32>
    %c0_265 = arith.constant 0 : index
    %c0_266 = arith.constant 0 : index
    %c0_267 = arith.constant 0 : index
    %278 = vector.load %arg18[%c0_265, %c0_266, %c0_267] : memref<4x2x256xf32, #tpu.memory_space<vmem>>, vector<1x2x256xf32>
    %279 = vector.shape_cast %278 : vector<1x2x256xf32> to vector<2x256xf32>
    %280 = vector.shape_cast %277 : vector<2x256xf32> to vector<1x2x256xf32>
    tpu.vector_store %arg18[%c0_265, %c0_266, %c0_267], %280 {strides = array<i32>} : memref<4x2x256xf32, #tpu.memory_space<vmem>>, vector<1x2x256xf32>,
    %c1_268 = arith.constant 1 : index
    %c0_269 = arith.constant 0 : index
    %c0_270 = arith.constant 0 : index
    %281 = vector.load %arg26[%c1_268, %c0_269, %c0_270] : memref<6x2x256xf32, #tpu.memory_space<vmem>>, vector<1x2x256xf32>
    %282 = vector.shape_cast %281 : vector<1x2x256xf32> to vector<2x256xf32>
    %283 = vector.shape_cast %277 : vector<2x256xf32> to vector<1x2x256xf32>
    tpu.vector_store %arg26[%c1_268, %c0_269, %c0_270], %283 {strides = array<i32>} : memref<6x2x256xf32, #tpu.memory_space<vmem>>, vector<1x2x256xf32>,
    %c2_271 = arith.constant 2 : index
    %c0_272 = arith.constant 0 : index
    %c0_273 = arith.constant 0 : index
    %284 = vector.load %arg25[%c2_271, %c0_272, %c0_273] : memref<10x2x256xf32, #tpu.memory_space<vmem>>, vector<1x2x256xf32>
    %285 = vector.shape_cast %284 : vector<1x2x256xf32> to vector<2x256xf32>
    %c0_274 = arith.constant 0 : index
    %c0_275 = arith.constant 0 : index
    %c0_276 = arith.constant 0 : index
    %286 = vector.load %arg2[%c0_274, %c0_275, %c0_276] : memref<3x256x256xf32, #tpu.memory_space<vmem>>, vector<1x256x256xf32>
    %287 = vector.shape_cast %286 : vector<1x256x256xf32> to vector<256x256xf32>
    %cst_277 = arith.constant dense<0.000000e+00> : vector<2x256xf32>
    %288 = tpu.matmul %285, %287, %cst_277 {dimension_numbers = #tpu.dot_dimension_numbers<[1], [0], [0], [1], [0, 0, 1, 1], [], []>} : vector<2x256xf32>, vector<256x256xf32>, vector<2x256xf32> -> vector<2x256xf32>
    %c3_278 = arith.constant 3 : index
    %c0_279 = arith.constant 0 : index
    %c0_280 = arith.constant 0 : index
    %289 = vector.load %arg25[%c3_278, %c0_279, %c0_280] : memref<10x2x256xf32, #tpu.memory_space<vmem>>, vector<1x2x256xf32>
    %290 = vector.shape_cast %289 : vector<1x2x256xf32> to vector<2x256xf32>
    %c1_281 = arith.constant 1 : index
    %c0_282 = arith.constant 0 : index
    %c0_283 = arith.constant 0 : index
    %291 = vector.load %arg2[%c1_281, %c0_282, %c0_283] : memref<3x256x256xf32, #tpu.memory_space<vmem>>, vector<1x256x256xf32>
    %292 = vector.shape_cast %291 : vector<1x256x256xf32> to vector<256x256xf32>
    %cst_284 = arith.constant dense<0.000000e+00> : vector<2x256xf32>
    %293 = tpu.matmul %290, %292, %cst_284 {dimension_numbers = #tpu.dot_dimension_numbers<[1], [0], [0], [1], [0, 0, 1, 1], [], []>} : vector<2x256xf32>, vector<256x256xf32>, vector<2x256xf32> -> vector<2x256xf32>
    %294 = arith.addf %288, %293 : vector<2x256xf32>
    %c4_285 = arith.constant 4 : index
    %c0_286 = arith.constant 0 : index
    %c0_287 = arith.constant 0 : index
    %295 = vector.load %arg25[%c4_285, %c0_286, %c0_287] : memref<10x2x256xf32, #tpu.memory_space<vmem>>, vector<1x2x256xf32>
    %296 = vector.shape_cast %295 : vector<1x2x256xf32> to vector<2x256xf32>
    %c2_288 = arith.constant 2 : index
    %c0_289 = arith.constant 0 : index
    %c0_290 = arith.constant 0 : index
    %297 = vector.load %arg2[%c2_288, %c0_289, %c0_290] : memref<3x256x256xf32, #tpu.memory_space<vmem>>, vector<1x256x256xf32>
    %298 = vector.shape_cast %297 : vector<1x256x256xf32> to vector<256x256xf32>
    %cst_291 = arith.constant dense<0.000000e+00> : vector<2x256xf32>
    %299 = tpu.matmul %296, %298, %cst_291 {dimension_numbers = #tpu.dot_dimension_numbers<[1], [0], [0], [1], [0, 0, 1, 1], [], []>} : vector<2x256xf32>, vector<256x256xf32>, vector<2x256xf32> -> vector<2x256xf32>
    %300 = arith.addf %294, %299 : vector<2x256xf32>
    %301 = vector.broadcast %253 : vector<1x256xf32> to vector<2x256xf32>
    %302 = arith.addf %300, %301 : vector<2x256xf32>
    %cst_292 = arith.constant 0.000000e+00 : f32
    %303 = vector.broadcast %cst_292 : f32 to vector<2x256xf32>
    %304 = arith.cmpf oge, %302, %303 : vector<2x256xf32>
    %cst_293 = arith.constant 1.000000e-01 : f32
    %305 = vector.broadcast %cst_293 : f32 to vector<2x256xf32>
    %306 = arith.mulf %305, %302 : vector<2x256xf32>
    %307 = arith.select %304, %302, %306 : vector<2x256xi1>, vector<2x256xf32>
    %c1_294 = arith.constant 1 : index
    %c0_295 = arith.constant 0 : index
    %c0_296 = arith.constant 0 : index
    %308 = vector.load %arg18[%c1_294, %c0_295, %c0_296] : memref<4x2x256xf32, #tpu.memory_space<vmem>>, vector<1x2x256xf32>
    %309 = vector.shape_cast %308 : vector<1x2x256xf32> to vector<2x256xf32>
    %310 = vector.shape_cast %307 : vector<2x256xf32> to vector<1x2x256xf32>
    tpu.vector_store %arg18[%c1_294, %c0_295, %c0_296], %310 {strides = array<i32>} : memref<4x2x256xf32, #tpu.memory_space<vmem>>, vector<1x2x256xf32>,
    %c2_297 = arith.constant 2 : index
    %c0_298 = arith.constant 0 : index
    %c0_299 = arith.constant 0 : index
    %311 = vector.load %arg26[%c2_297, %c0_298, %c0_299] : memref<6x2x256xf32, #tpu.memory_space<vmem>>, vector<1x2x256xf32>
    %312 = vector.shape_cast %311 : vector<1x2x256xf32> to vector<2x256xf32>
    %313 = vector.shape_cast %307 : vector<2x256xf32> to vector<1x2x256xf32>
    tpu.vector_store %arg26[%c2_297, %c0_298, %c0_299], %313 {strides = array<i32>} : memref<6x2x256xf32, #tpu.memory_space<vmem>>, vector<1x2x256xf32>,
    %c4_300 = arith.constant 4 : index
    %c0_301 = arith.constant 0 : index
    %c0_302 = arith.constant 0 : index
    %314 = vector.load %arg25[%c4_300, %c0_301, %c0_302] : memref<10x2x256xf32, #tpu.memory_space<vmem>>, vector<1x2x256xf32>
    %315 = vector.shape_cast %314 : vector<1x2x256xf32> to vector<2x256xf32>
    %c0_303 = arith.constant 0 : index
    %c0_304 = arith.constant 0 : index
    %c0_305 = arith.constant 0 : index
    %316 = vector.load %arg2[%c0_303, %c0_304, %c0_305] : memref<3x256x256xf32, #tpu.memory_space<vmem>>, vector<1x256x256xf32>
    %317 = vector.shape_cast %316 : vector<1x256x256xf32> to vector<256x256xf32>
    %cst_306 = arith.constant dense<0.000000e+00> : vector<2x256xf32>
    %318 = tpu.matmul %315, %317, %cst_306 {dimension_numbers = #tpu.dot_dimension_numbers<[1], [0], [0], [1], [0, 0, 1, 1], [], []>} : vector<2x256xf32>, vector<256x256xf32>, vector<2x256xf32> -> vector<2x256xf32>
    %c5_307 = arith.constant 5 : index
    %c0_308 = arith.constant 0 : index
    %c0_309 = arith.constant 0 : index
    %319 = vector.load %arg25[%c5_307, %c0_308, %c0_309] : memref<10x2x256xf32, #tpu.memory_space<vmem>>, vector<1x2x256xf32>
    %320 = vector.shape_cast %319 : vector<1x2x256xf32> to vector<2x256xf32>
    %c1_310 = arith.constant 1 : index
    %c0_311 = arith.constant 0 : index
    %c0_312 = arith.constant 0 : index
    %321 = vector.load %arg2[%c1_310, %c0_311, %c0_312] : memref<3x256x256xf32, #tpu.memory_space<vmem>>, vector<1x256x256xf32>
    %322 = vector.shape_cast %321 : vector<1x256x256xf32> to vector<256x256xf32>
    %cst_313 = arith.constant dense<0.000000e+00> : vector<2x256xf32>
    %323 = tpu.matmul %320, %322, %cst_313 {dimension_numbers = #tpu.dot_dimension_numbers<[1], [0], [0], [1], [0, 0, 1, 1], [], []>} : vector<2x256xf32>, vector<256x256xf32>, vector<2x256xf32> -> vector<2x256xf32>
    %324 = arith.addf %318, %323 : vector<2x256xf32>
    %c6_314 = arith.constant 6 : index
    %c0_315 = arith.constant 0 : index
    %c0_316 = arith.constant 0 : index
    %325 = vector.load %arg25[%c6_314, %c0_315, %c0_316] : memref<10x2x256xf32, #tpu.memory_space<vmem>>, vector<1x2x256xf32>
    %326 = vector.shape_cast %325 : vector<1x2x256xf32> to vector<2x256xf32>
    %c2_317 = arith.constant 2 : index
    %c0_318 = arith.constant 0 : index
    %c0_319 = arith.constant 0 : index
    %327 = vector.load %arg2[%c2_317, %c0_318, %c0_319] : memref<3x256x256xf32, #tpu.memory_space<vmem>>, vector<1x256x256xf32>
    %328 = vector.shape_cast %327 : vector<1x256x256xf32> to vector<256x256xf32>
    %cst_320 = arith.constant dense<0.000000e+00> : vector<2x256xf32>
    %329 = tpu.matmul %326, %328, %cst_320 {dimension_numbers = #tpu.dot_dimension_numbers<[1], [0], [0], [1], [0, 0, 1, 1], [], []>} : vector<2x256xf32>, vector<256x256xf32>, vector<2x256xf32> -> vector<2x256xf32>
    %330 = arith.addf %324, %329 : vector<2x256xf32>
    %331 = vector.broadcast %253 : vector<1x256xf32> to vector<2x256xf32>
    %332 = arith.addf %330, %331 : vector<2x256xf32>
    %cst_321 = arith.constant 0.000000e+00 : f32
    %333 = vector.broadcast %cst_321 : f32 to vector<2x256xf32>
    %334 = arith.cmpf oge, %332, %333 : vector<2x256xf32>
    %cst_322 = arith.constant 1.000000e-01 : f32
    %335 = vector.broadcast %cst_322 : f32 to vector<2x256xf32>
    %336 = arith.mulf %335, %332 : vector<2x256xf32>
    %337 = arith.select %334, %332, %336 : vector<2x256xi1>, vector<2x256xf32>
    %c2_323 = arith.constant 2 : index
    %c0_324 = arith.constant 0 : index
    %c0_325 = arith.constant 0 : index
    %338 = vector.load %arg18[%c2_323, %c0_324, %c0_325] : memref<4x2x256xf32, #tpu.memory_space<vmem>>, vector<1x2x256xf32>
    %339 = vector.shape_cast %338 : vector<1x2x256xf32> to vector<2x256xf32>
    %340 = vector.shape_cast %337 : vector<2x256xf32> to vector<1x2x256xf32>
    tpu.vector_store %arg18[%c2_323, %c0_324, %c0_325], %340 {strides = array<i32>} : memref<4x2x256xf32, #tpu.memory_space<vmem>>, vector<1x2x256xf32>,
    %c3_326 = arith.constant 3 : index
    %c0_327 = arith.constant 0 : index
    %c0_328 = arith.constant 0 : index
    %341 = vector.load %arg26[%c3_326, %c0_327, %c0_328] : memref<6x2x256xf32, #tpu.memory_space<vmem>>, vector<1x2x256xf32>
    %342 = vector.shape_cast %341 : vector<1x2x256xf32> to vector<2x256xf32>
    %343 = vector.shape_cast %337 : vector<2x256xf32> to vector<1x2x256xf32>
    tpu.vector_store %arg26[%c3_326, %c0_327, %c0_328], %343 {strides = array<i32>} : memref<6x2x256xf32, #tpu.memory_space<vmem>>, vector<1x2x256xf32>,
    %c6_329 = arith.constant 6 : index
    %c0_330 = arith.constant 0 : index
    %c0_331 = arith.constant 0 : index
    %344 = vector.load %arg25[%c6_329, %c0_330, %c0_331] : memref<10x2x256xf32, #tpu.memory_space<vmem>>, vector<1x2x256xf32>
    %345 = vector.shape_cast %344 : vector<1x2x256xf32> to vector<2x256xf32>
    %c0_332 = arith.constant 0 : index
    %c0_333 = arith.constant 0 : index
    %c0_334 = arith.constant 0 : index
    %346 = vector.load %arg2[%c0_332, %c0_333, %c0_334] : memref<3x256x256xf32, #tpu.memory_space<vmem>>, vector<1x256x256xf32>
    %347 = vector.shape_cast %346 : vector<1x256x256xf32> to vector<256x256xf32>
    %cst_335 = arith.constant dense<0.000000e+00> : vector<2x256xf32>
    %348 = tpu.matmul %345, %347, %cst_335 {dimension_numbers = #tpu.dot_dimension_numbers<[1], [0], [0], [1], [0, 0, 1, 1], [], []>} : vector<2x256xf32>, vector<256x256xf32>, vector<2x256xf32> -> vector<2x256xf32>
    %c7_336 = arith.constant 7 : index
    %c0_337 = arith.constant 0 : index
    %c0_338 = arith.constant 0 : index
    %349 = vector.load %arg25[%c7_336, %c0_337, %c0_338] : memref<10x2x256xf32, #tpu.memory_space<vmem>>, vector<1x2x256xf32>
    %350 = vector.shape_cast %349 : vector<1x2x256xf32> to vector<2x256xf32>
    %c1_339 = arith.constant 1 : index
    %c0_340 = arith.constant 0 : index
    %c0_341 = arith.constant 0 : index
    %351 = vector.load %arg2[%c1_339, %c0_340, %c0_341] : memref<3x256x256xf32, #tpu.memory_space<vmem>>, vector<1x256x256xf32>
    %352 = vector.shape_cast %351 : vector<1x256x256xf32> to vector<256x256xf32>
    %cst_342 = arith.constant dense<0.000000e+00> : vector<2x256xf32>
    %353 = tpu.matmul %350, %352, %cst_342 {dimension_numbers = #tpu.dot_dimension_numbers<[1], [0], [0], [1], [0, 0, 1, 1], [], []>} : vector<2x256xf32>, vector<256x256xf32>, vector<2x256xf32> -> vector<2x256xf32>
    %354 = arith.addf %348, %353 : vector<2x256xf32>
    %c8_343 = arith.constant 8 : index
    %c0_344 = arith.constant 0 : index
    %c0_345 = arith.constant 0 : index
    %355 = vector.load %arg25[%c8_343, %c0_344, %c0_345] : memref<10x2x256xf32, #tpu.memory_space<vmem>>, vector<1x2x256xf32>
    %356 = vector.shape_cast %355 : vector<1x2x256xf32> to vector<2x256xf32>
    %c2_346 = arith.constant 2 : index
    %c0_347 = arith.constant 0 : index
    %c0_348 = arith.constant 0 : index
    %357 = vector.load %arg2[%c2_346, %c0_347, %c0_348] : memref<3x256x256xf32, #tpu.memory_space<vmem>>, vector<1x256x256xf32>
    %358 = vector.shape_cast %357 : vector<1x256x256xf32> to vector<256x256xf32>
    %cst_349 = arith.constant dense<0.000000e+00> : vector<2x256xf32>
    %359 = tpu.matmul %356, %358, %cst_349 {dimension_numbers = #tpu.dot_dimension_numbers<[1], [0], [0], [1], [0, 0, 1, 1], [], []>} : vector<2x256xf32>, vector<256x256xf32>, vector<2x256xf32> -> vector<2x256xf32>
    %360 = arith.addf %354, %359 : vector<2x256xf32>
    %361 = vector.broadcast %253 : vector<1x256xf32> to vector<2x256xf32>
    %362 = arith.addf %360, %361 : vector<2x256xf32>
    %cst_350 = arith.constant 0.000000e+00 : f32
    %363 = vector.broadcast %cst_350 : f32 to vector<2x256xf32>
    %364 = arith.cmpf oge, %362, %363 : vector<2x256xf32>
    %cst_351 = arith.constant 1.000000e-01 : f32
    %365 = vector.broadcast %cst_351 : f32 to vector<2x256xf32>
    %366 = arith.mulf %365, %362 : vector<2x256xf32>
    %367 = arith.select %364, %362, %366 : vector<2x256xi1>, vector<2x256xf32>
    %c3_352 = arith.constant 3 : index
    %c0_353 = arith.constant 0 : index
    %c0_354 = arith.constant 0 : index
    %368 = vector.load %arg18[%c3_352, %c0_353, %c0_354] : memref<4x2x256xf32, #tpu.memory_space<vmem>>, vector<1x2x256xf32>
    %369 = vector.shape_cast %368 : vector<1x2x256xf32> to vector<2x256xf32>
    %370 = vector.shape_cast %367 : vector<2x256xf32> to vector<1x2x256xf32>
    tpu.vector_store %arg18[%c3_352, %c0_353, %c0_354], %370 {strides = array<i32>} : memref<4x2x256xf32, #tpu.memory_space<vmem>>, vector<1x2x256xf32>,
    %c4_355 = arith.constant 4 : index
    %c0_356 = arith.constant 0 : index
    %c0_357 = arith.constant 0 : index
    %371 = vector.load %arg26[%c4_355, %c0_356, %c0_357] : memref<6x2x256xf32, #tpu.memory_space<vmem>>, vector<1x2x256xf32>
    %372 = vector.shape_cast %371 : vector<1x2x256xf32> to vector<2x256xf32>
    %373 = vector.shape_cast %367 : vector<2x256xf32> to vector<1x2x256xf32>
    tpu.vector_store %arg26[%c4_355, %c0_356, %c0_357], %373 {strides = array<i32>} : memref<6x2x256xf32, #tpu.memory_space<vmem>>, vector<1x2x256xf32>,
    %c0_358 = arith.constant 0 : index
    %c0_359 = arith.constant 0 : index
    %374 = vector.load %arg10[%c0_358, %c0_359] : memref<1x128xf32, #tpu.memory_space<vmem>>, vector<1x128xf32>
    %c0_360 = arith.constant 0 : index
    %c0_361 = arith.constant 0 : index
    %c0_362 = arith.constant 0 : index
    %375 = vector.load %arg26[%c0_360, %c0_361, %c0_362] : memref<6x2x256xf32, #tpu.memory_space<vmem>>, vector<1x2x256xf32>
    %376 = vector.shape_cast %375 : vector<1x2x256xf32> to vector<2x256xf32>
    %c0_363 = arith.constant 0 : index
    %c0_364 = arith.constant 0 : index
    %c0_365 = arith.constant 0 : index
    %377 = vector.load %arg3[%c0_363, %c0_364, %c0_365] : memref<4x256x128xf32, #tpu.memory_space<vmem>>, vector<1x256x128xf32>
    %378 = vector.shape_cast %377 : vector<1x256x128xf32> to vector<256x128xf32>
    %cst_366 = arith.constant dense<0.000000e+00> : vector<2x128xf32>
    %379 = tpu.matmul %376, %378, %cst_366 {dimension_numbers = #tpu.dot_dimension_numbers<[1], [0], [0], [1], [0, 0, 1, 1], [], []>} : vector<2x256xf32>, vector<256x128xf32>, vector<2x128xf32> -> vector<2x128xf32>
    %c1_367 = arith.constant 1 : index
    %c0_368 = arith.constant 0 : index
    %c0_369 = arith.constant 0 : index
    %380 = vector.load %arg26[%c1_367, %c0_368, %c0_369] : memref<6x2x256xf32, #tpu.memory_space<vmem>>, vector<1x2x256xf32>
    %381 = vector.shape_cast %380 : vector<1x2x256xf32> to vector<2x256xf32>
    %c1_370 = arith.constant 1 : index
    %c0_371 = arith.constant 0 : index
    %c0_372 = arith.constant 0 : index
    %382 = vector.load %arg3[%c1_370, %c0_371, %c0_372] : memref<4x256x128xf32, #tpu.memory_space<vmem>>, vector<1x256x128xf32>
    %383 = vector.shape_cast %382 : vector<1x256x128xf32> to vector<256x128xf32>
    %cst_373 = arith.constant dense<0.000000e+00> : vector<2x128xf32>
    %384 = tpu.matmul %381, %383, %cst_373 {dimension_numbers = #tpu.dot_dimension_numbers<[1], [0], [0], [1], [0, 0, 1, 1], [], []>} : vector<2x256xf32>, vector<256x128xf32>, vector<2x128xf32> -> vector<2x128xf32>
    %385 = arith.addf %379, %384 : vector<2x128xf32>
    %c2_374 = arith.constant 2 : index
    %c0_375 = arith.constant 0 : index
    %c0_376 = arith.constant 0 : index
    %386 = vector.load %arg26[%c2_374, %c0_375, %c0_376] : memref<6x2x256xf32, #tpu.memory_space<vmem>>, vector<1x2x256xf32>
    %387 = vector.shape_cast %386 : vector<1x2x256xf32> to vector<2x256xf32>
    %c2_377 = arith.constant 2 : index
    %c0_378 = arith.constant 0 : index
    %c0_379 = arith.constant 0 : index
    %388 = vector.load %arg3[%c2_377, %c0_378, %c0_379] : memref<4x256x128xf32, #tpu.memory_space<vmem>>, vector<1x256x128xf32>
    %389 = vector.shape_cast %388 : vector<1x256x128xf32> to vector<256x128xf32>
    %cst_380 = arith.constant dense<0.000000e+00> : vector<2x128xf32>
    %390 = tpu.matmul %387, %389, %cst_380 {dimension_numbers = #tpu.dot_dimension_numbers<[1], [0], [0], [1], [0, 0, 1, 1], [], []>} : vector<2x256xf32>, vector<256x128xf32>, vector<2x128xf32> -> vector<2x128xf32>
    %391 = arith.addf %385, %390 : vector<2x128xf32>
    %c3_381 = arith.constant 3 : index
    %c0_382 = arith.constant 0 : index
    %c0_383 = arith.constant 0 : index
    %392 = vector.load %arg26[%c3_381, %c0_382, %c0_383] : memref<6x2x256xf32, #tpu.memory_space<vmem>>, vector<1x2x256xf32>
    %393 = vector.shape_cast %392 : vector<1x2x256xf32> to vector<2x256xf32>
    %c3_384 = arith.constant 3 : index
    %c0_385 = arith.constant 0 : index
    %c0_386 = arith.constant 0 : index
    %394 = vector.load %arg3[%c3_384, %c0_385, %c0_386] : memref<4x256x128xf32, #tpu.memory_space<vmem>>, vector<1x256x128xf32>
    %395 = vector.shape_cast %394 : vector<1x256x128xf32> to vector<256x128xf32>
    %cst_387 = arith.constant dense<0.000000e+00> : vector<2x128xf32>
    %396 = tpu.matmul %393, %395, %cst_387 {dimension_numbers = #tpu.dot_dimension_numbers<[1], [0], [0], [1], [0, 0, 1, 1], [], []>} : vector<2x256xf32>, vector<256x128xf32>, vector<2x128xf32> -> vector<2x128xf32>
    %397 = arith.addf %391, %396 : vector<2x128xf32>
    %398 = vector.broadcast %374 : vector<1x128xf32> to vector<2x128xf32>
    %399 = arith.addf %397, %398 : vector<2x128xf32>
    %cst_388 = arith.constant 0.000000e+00 : f32
    %400 = vector.broadcast %cst_388 : f32 to vector<2x128xf32>
    %401 = arith.cmpf oge, %399, %400 : vector<2x128xf32>
    %cst_389 = arith.constant 1.000000e-01 : f32
    %402 = vector.broadcast %cst_389 : f32 to vector<2x128xf32>
    %403 = arith.mulf %402, %399 : vector<2x128xf32>
    %404 = arith.select %401, %399, %403 : vector<2x128xi1>, vector<2x128xf32>
    %c0_390 = arith.constant 0 : index
    %c0_391 = arith.constant 0 : index
    %c0_392 = arith.constant 0 : index
    %405 = vector.load %arg19[%c0_390, %c0_391, %c0_392] : memref<2x2x128xf32, #tpu.memory_space<vmem>>, vector<1x2x128xf32>
    %406 = vector.shape_cast %405 : vector<1x2x128xf32> to vector<2x128xf32>
    %407 = vector.shape_cast %404 : vector<2x128xf32> to vector<1x2x128xf32>
    tpu.vector_store %arg19[%c0_390, %c0_391, %c0_392], %407 {strides = array<i32>} : memref<2x2x128xf32, #tpu.memory_space<vmem>>, vector<1x2x128xf32>,
    %c1_393 = arith.constant 1 : index
    %c0_394 = arith.constant 0 : index
    %c0_395 = arith.constant 0 : index
    %408 = vector.load %arg27[%c1_393, %c0_394, %c0_395] : memref<4x2x128xf32, #tpu.memory_space<vmem>>, vector<1x2x128xf32>
    %409 = vector.shape_cast %408 : vector<1x2x128xf32> to vector<2x128xf32>
    %410 = vector.shape_cast %404 : vector<2x128xf32> to vector<1x2x128xf32>
    tpu.vector_store %arg27[%c1_393, %c0_394, %c0_395], %410 {strides = array<i32>} : memref<4x2x128xf32, #tpu.memory_space<vmem>>, vector<1x2x128xf32>,
    %c2_396 = arith.constant 2 : index
    %c0_397 = arith.constant 0 : index
    %c0_398 = arith.constant 0 : index
    %411 = vector.load %arg26[%c2_396, %c0_397, %c0_398] : memref<6x2x256xf32, #tpu.memory_space<vmem>>, vector<1x2x256xf32>
    %412 = vector.shape_cast %411 : vector<1x2x256xf32> to vector<2x256xf32>
    %c0_399 = arith.constant 0 : index
    %c0_400 = arith.constant 0 : index
    %c0_401 = arith.constant 0 : index
    %413 = vector.load %arg3[%c0_399, %c0_400, %c0_401] : memref<4x256x128xf32, #tpu.memory_space<vmem>>, vector<1x256x128xf32>
    %414 = vector.shape_cast %413 : vector<1x256x128xf32> to vector<256x128xf32>
    %cst_402 = arith.constant dense<0.000000e+00> : vector<2x128xf32>
    %415 = tpu.matmul %412, %414, %cst_402 {dimension_numbers = #tpu.dot_dimension_numbers<[1], [0], [0], [1], [0, 0, 1, 1], [], []>} : vector<2x256xf32>, vector<256x128xf32>, vector<2x128xf32> -> vector<2x128xf32>
    %c3_403 = arith.constant 3 : index
    %c0_404 = arith.constant 0 : index
    %c0_405 = arith.constant 0 : index
    %416 = vector.load %arg26[%c3_403, %c0_404, %c0_405] : memref<6x2x256xf32, #tpu.memory_space<vmem>>, vector<1x2x256xf32>
    %417 = vector.shape_cast %416 : vector<1x2x256xf32> to vector<2x256xf32>
    %c1_406 = arith.constant 1 : index
    %c0_407 = arith.constant 0 : index
    %c0_408 = arith.constant 0 : index
    %418 = vector.load %arg3[%c1_406, %c0_407, %c0_408] : memref<4x256x128xf32, #tpu.memory_space<vmem>>, vector<1x256x128xf32>
    %419 = vector.shape_cast %418 : vector<1x256x128xf32> to vector<256x128xf32>
    %cst_409 = arith.constant dense<0.000000e+00> : vector<2x128xf32>
    %420 = tpu.matmul %417, %419, %cst_409 {dimension_numbers = #tpu.dot_dimension_numbers<[1], [0], [0], [1], [0, 0, 1, 1], [], []>} : vector<2x256xf32>, vector<256x128xf32>, vector<2x128xf32> -> vector<2x128xf32>
    %421 = arith.addf %415, %420 : vector<2x128xf32>
    %c4_410 = arith.constant 4 : index
    %c0_411 = arith.constant 0 : index
    %c0_412 = arith.constant 0 : index
    %422 = vector.load %arg26[%c4_410, %c0_411, %c0_412] : memref<6x2x256xf32, #tpu.memory_space<vmem>>, vector<1x2x256xf32>
    %423 = vector.shape_cast %422 : vector<1x2x256xf32> to vector<2x256xf32>
    %c2_413 = arith.constant 2 : index
    %c0_414 = arith.constant 0 : index
    %c0_415 = arith.constant 0 : index
    %424 = vector.load %arg3[%c2_413, %c0_414, %c0_415] : memref<4x256x128xf32, #tpu.memory_space<vmem>>, vector<1x256x128xf32>
    %425 = vector.shape_cast %424 : vector<1x256x128xf32> to vector<256x128xf32>
    %cst_416 = arith.constant dense<0.000000e+00> : vector<2x128xf32>
    %426 = tpu.matmul %423, %425, %cst_416 {dimension_numbers = #tpu.dot_dimension_numbers<[1], [0], [0], [1], [0, 0, 1, 1], [], []>} : vector<2x256xf32>, vector<256x128xf32>, vector<2x128xf32> -> vector<2x128xf32>
    %427 = arith.addf %421, %426 : vector<2x128xf32>
    %c5_417 = arith.constant 5 : index
    %c0_418 = arith.constant 0 : index
    %c0_419 = arith.constant 0 : index
    %428 = vector.load %arg26[%c5_417, %c0_418, %c0_419] : memref<6x2x256xf32, #tpu.memory_space<vmem>>, vector<1x2x256xf32>
    %429 = vector.shape_cast %428 : vector<1x2x256xf32> to vector<2x256xf32>
    %c3_420 = arith.constant 3 : index
    %c0_421 = arith.constant 0 : index
    %c0_422 = arith.constant 0 : index
    %430 = vector.load %arg3[%c3_420, %c0_421, %c0_422] : memref<4x256x128xf32, #tpu.memory_space<vmem>>, vector<1x256x128xf32>
    %431 = vector.shape_cast %430 : vector<1x256x128xf32> to vector<256x128xf32>
    %cst_423 = arith.constant dense<0.000000e+00> : vector<2x128xf32>
    %432 = tpu.matmul %429, %431, %cst_423 {dimension_numbers = #tpu.dot_dimension_numbers<[1], [0], [0], [1], [0, 0, 1, 1], [], []>} : vector<2x256xf32>, vector<256x128xf32>, vector<2x128xf32> -> vector<2x128xf32>
    %433 = arith.addf %427, %432 : vector<2x128xf32>
    %434 = vector.broadcast %374 : vector<1x128xf32> to vector<2x128xf32>
    %435 = arith.addf %433, %434 : vector<2x128xf32>
    %cst_424 = arith.constant 0.000000e+00 : f32
    %436 = vector.broadcast %cst_424 : f32 to vector<2x128xf32>
    %437 = arith.cmpf oge, %435, %436 : vector<2x128xf32>
    %cst_425 = arith.constant 1.000000e-01 : f32
    %438 = vector.broadcast %cst_425 : f32 to vector<2x128xf32>
    %439 = arith.mulf %438, %435 : vector<2x128xf32>
    %440 = arith.select %437, %435, %439 : vector<2x128xi1>, vector<2x128xf32>
    %c1_426 = arith.constant 1 : index
    %c0_427 = arith.constant 0 : index
    %c0_428 = arith.constant 0 : index
    %441 = vector.load %arg19[%c1_426, %c0_427, %c0_428] : memref<2x2x128xf32, #tpu.memory_space<vmem>>, vector<1x2x128xf32>
    %442 = vector.shape_cast %441 : vector<1x2x128xf32> to vector<2x128xf32>
    %443 = vector.shape_cast %440 : vector<2x128xf32> to vector<1x2x128xf32>
    tpu.vector_store %arg19[%c1_426, %c0_427, %c0_428], %443 {strides = array<i32>} : memref<2x2x128xf32, #tpu.memory_space<vmem>>, vector<1x2x128xf32>,
    %c2_429 = arith.constant 2 : index
    %c0_430 = arith.constant 0 : index
    %c0_431 = arith.constant 0 : index
    %444 = vector.load %arg27[%c2_429, %c0_430, %c0_431] : memref<4x2x128xf32, #tpu.memory_space<vmem>>, vector<1x2x128xf32>
    %445 = vector.shape_cast %444 : vector<1x2x128xf32> to vector<2x128xf32>
    %446 = vector.shape_cast %440 : vector<2x128xf32> to vector<1x2x128xf32>
    tpu.vector_store %arg27[%c2_429, %c0_430, %c0_431], %446 {strides = array<i32>} : memref<4x2x128xf32, #tpu.memory_space<vmem>>, vector<1x2x128xf32>,
    %c0_432 = arith.constant 0 : index
    %c0_433 = arith.constant 0 : index
    %447 = vector.load %arg11[%c0_432, %c0_433] : memref<1x64xf32, #tpu.memory_space<vmem>>, vector<1x64xf32>
    %c0_434 = arith.constant 0 : index
    %c0_435 = arith.constant 0 : index
    %c0_436 = arith.constant 0 : index
    %448 = vector.load %arg27[%c0_434, %c0_435, %c0_436] : memref<4x2x128xf32, #tpu.memory_space<vmem>>, vector<1x2x128xf32>
    %449 = vector.shape_cast %448 : vector<1x2x128xf32> to vector<2x128xf32>
    %c0_437 = arith.constant 0 : index
    %c0_438 = arith.constant 0 : index
    %c0_439 = arith.constant 0 : index
    %450 = vector.load %arg4[%c0_437, %c0_438, %c0_439] : memref<3x128x64xf32, #tpu.memory_space<vmem>>, vector<1x128x64xf32>
    %451 = vector.shape_cast %450 : vector<1x128x64xf32> to vector<128x64xf32>
    %cst_440 = arith.constant dense<0.000000e+00> : vector<2x64xf32>
    %452 = tpu.matmul %449, %451, %cst_440 {dimension_numbers = #tpu.dot_dimension_numbers<[1], [0], [0], [1], [0, 0, 1, 1], [], []>} : vector<2x128xf32>, vector<128x64xf32>, vector<2x64xf32> -> vector<2x64xf32>
    %c1_441 = arith.constant 1 : index
    %c0_442 = arith.constant 0 : index
    %c0_443 = arith.constant 0 : index
    %453 = vector.load %arg27[%c1_441, %c0_442, %c0_443] : memref<4x2x128xf32, #tpu.memory_space<vmem>>, vector<1x2x128xf32>
    %454 = vector.shape_cast %453 : vector<1x2x128xf32> to vector<2x128xf32>
    %c1_444 = arith.constant 1 : index
    %c0_445 = arith.constant 0 : index
    %c0_446 = arith.constant 0 : index
    %455 = vector.load %arg4[%c1_444, %c0_445, %c0_446] : memref<3x128x64xf32, #tpu.memory_space<vmem>>, vector<1x128x64xf32>
    %456 = vector.shape_cast %455 : vector<1x128x64xf32> to vector<128x64xf32>
    %cst_447 = arith.constant dense<0.000000e+00> : vector<2x64xf32>
    %457 = tpu.matmul %454, %456, %cst_447 {dimension_numbers = #tpu.dot_dimension_numbers<[1], [0], [0], [1], [0, 0, 1, 1], [], []>} : vector<2x128xf32>, vector<128x64xf32>, vector<2x64xf32> -> vector<2x64xf32>
    %458 = arith.addf %452, %457 : vector<2x64xf32>
    %c2_448 = arith.constant 2 : index
    %c0_449 = arith.constant 0 : index
    %c0_450 = arith.constant 0 : index
    %459 = vector.load %arg27[%c2_448, %c0_449, %c0_450] : memref<4x2x128xf32, #tpu.memory_space<vmem>>, vector<1x2x128xf32>
    %460 = vector.shape_cast %459 : vector<1x2x128xf32> to vector<2x128xf32>
    %c2_451 = arith.constant 2 : index
    %c0_452 = arith.constant 0 : index
    %c0_453 = arith.constant 0 : index
    %461 = vector.load %arg4[%c2_451, %c0_452, %c0_453] : memref<3x128x64xf32, #tpu.memory_space<vmem>>, vector<1x128x64xf32>
    %462 = vector.shape_cast %461 : vector<1x128x64xf32> to vector<128x64xf32>
    %cst_454 = arith.constant dense<0.000000e+00> : vector<2x64xf32>
    %463 = tpu.matmul %460, %462, %cst_454 {dimension_numbers = #tpu.dot_dimension_numbers<[1], [0], [0], [1], [0, 0, 1, 1], [], []>} : vector<2x128xf32>, vector<128x64xf32>, vector<2x64xf32> -> vector<2x64xf32>
    %464 = arith.addf %458, %463 : vector<2x64xf32>
    %465 = vector.broadcast %447 : vector<1x64xf32> to vector<2x64xf32>
    %466 = arith.addf %464, %465 : vector<2x64xf32>
    %cst_455 = arith.constant 0.000000e+00 : f32
    %467 = vector.broadcast %cst_455 : f32 to vector<2x64xf32>
    %468 = arith.cmpf oge, %466, %467 : vector<2x64xf32>
    %cst_456 = arith.constant 1.000000e-01 : f32
    %469 = vector.broadcast %cst_456 : f32 to vector<2x64xf32>
    %470 = arith.mulf %469, %466 : vector<2x64xf32>
    %471 = arith.select %468, %466, %470 : vector<2x64xi1>, vector<2x64xf32>
    %c0_457 = arith.constant 0 : index
    %c0_458 = arith.constant 0 : index
    %c0_459 = arith.constant 0 : index
    %472 = vector.load %arg20[%c0_457, %c0_458, %c0_459] : memref<1x2x64xf32, #tpu.memory_space<vmem>>, vector<1x2x64xf32>
    %473 = vector.shape_cast %472 : vector<1x2x64xf32> to vector<2x64xf32>
    %474 = vector.shape_cast %471 : vector<2x64xf32> to vector<1x2x64xf32>
    tpu.vector_store %arg20[%c0_457, %c0_458, %c0_459], %474 {strides = array<i32>} : memref<1x2x64xf32, #tpu.memory_space<vmem>>, vector<1x2x64xf32>,
    %c1_460 = arith.constant 1 : index
    %c0_461 = arith.constant 0 : index
    %c0_462 = arith.constant 0 : index
    %475 = vector.load %arg28[%c1_460, %c0_461, %c0_462] : memref<3x2x64xf32, #tpu.memory_space<vmem>>, vector<1x2x64xf32>
    %476 = vector.shape_cast %475 : vector<1x2x64xf32> to vector<2x64xf32>
    %477 = vector.shape_cast %471 : vector<2x64xf32> to vector<1x2x64xf32>
    tpu.vector_store %arg28[%c1_460, %c0_461, %c0_462], %477 {strides = array<i32>} : memref<3x2x64xf32, #tpu.memory_space<vmem>>, vector<1x2x64xf32>,
    %c0_463 = arith.constant 0 : index
    %c0_464 = arith.constant 0 : index
    %478 = vector.load %arg12[%c0_463, %c0_464] : memref<1x128xf32, #tpu.memory_space<vmem>>, vector<1x128xf32>
    %c0_465 = arith.constant 0 : index
    %c0_466 = arith.constant 0 : index
    %c0_467 = arith.constant 0 : index
    %479 = vector.load %arg28[%c0_465, %c0_466, %c0_467] : memref<3x2x64xf32, #tpu.memory_space<vmem>>, vector<1x2x64xf32>
    %480 = vector.shape_cast %479 : vector<1x2x64xf32> to vector<2x64xf32>
    %c0_468 = arith.constant 0 : index
    %c0_469 = arith.constant 0 : index
    %c0_470 = arith.constant 0 : index
    %481 = vector.load %arg5[%c0_468, %c0_469, %c0_470] : memref<3x64x128xf32, #tpu.memory_space<vmem>>, vector<1x64x128xf32>
    %482 = vector.shape_cast %481 : vector<1x64x128xf32> to vector<64x128xf32>
    %cst_471 = arith.constant dense<0.000000e+00> : vector<2x128xf32>
    %483 = tpu.matmul %480, %482, %cst_471 {dimension_numbers = #tpu.dot_dimension_numbers<[1], [0], [0], [1], [0, 0, 1, 1], [], []>} : vector<2x64xf32>, vector<64x128xf32>, vector<2x128xf32> -> vector<2x128xf32>
    %c1_472 = arith.constant 1 : index
    %c0_473 = arith.constant 0 : index
    %c0_474 = arith.constant 0 : index
    %484 = vector.load %arg28[%c1_472, %c0_473, %c0_474] : memref<3x2x64xf32, #tpu.memory_space<vmem>>, vector<1x2x64xf32>
    %485 = vector.shape_cast %484 : vector<1x2x64xf32> to vector<2x64xf32>
    %c1_475 = arith.constant 1 : index
    %c0_476 = arith.constant 0 : index
    %c0_477 = arith.constant 0 : index
    %486 = vector.load %arg5[%c1_475, %c0_476, %c0_477] : memref<3x64x128xf32, #tpu.memory_space<vmem>>, vector<1x64x128xf32>
    %487 = vector.shape_cast %486 : vector<1x64x128xf32> to vector<64x128xf32>
    %cst_478 = arith.constant dense<0.000000e+00> : vector<2x128xf32>
    %488 = tpu.matmul %485, %487, %cst_478 {dimension_numbers = #tpu.dot_dimension_numbers<[1], [0], [0], [1], [0, 0, 1, 1], [], []>} : vector<2x64xf32>, vector<64x128xf32>, vector<2x128xf32> -> vector<2x128xf32>
    %489 = arith.addf %483, %488 : vector<2x128xf32>
    %c2_479 = arith.constant 2 : index
    %c0_480 = arith.constant 0 : index
    %c0_481 = arith.constant 0 : index
    %490 = vector.load %arg28[%c2_479, %c0_480, %c0_481] : memref<3x2x64xf32, #tpu.memory_space<vmem>>, vector<1x2x64xf32>
    %491 = vector.shape_cast %490 : vector<1x2x64xf32> to vector<2x64xf32>
    %c2_482 = arith.constant 2 : index
    %c0_483 = arith.constant 0 : index
    %c0_484 = arith.constant 0 : index
    %492 = vector.load %arg5[%c2_482, %c0_483, %c0_484] : memref<3x64x128xf32, #tpu.memory_space<vmem>>, vector<1x64x128xf32>
    %493 = vector.shape_cast %492 : vector<1x64x128xf32> to vector<64x128xf32>
    %cst_485 = arith.constant dense<0.000000e+00> : vector<2x128xf32>
    %494 = tpu.matmul %491, %493, %cst_485 {dimension_numbers = #tpu.dot_dimension_numbers<[1], [0], [0], [1], [0, 0, 1, 1], [], []>} : vector<2x64xf32>, vector<64x128xf32>, vector<2x128xf32> -> vector<2x128xf32>
    %495 = arith.addf %489, %494 : vector<2x128xf32>
    %496 = vector.broadcast %478 : vector<1x128xf32> to vector<2x128xf32>
    %497 = arith.addf %495, %496 : vector<2x128xf32>
    %cst_486 = arith.constant 0.000000e+00 : f32
    %498 = vector.broadcast %cst_486 : f32 to vector<2x128xf32>
    %499 = arith.cmpf oge, %497, %498 : vector<2x128xf32>
    %cst_487 = arith.constant 1.000000e-01 : f32
    %500 = vector.broadcast %cst_487 : f32 to vector<2x128xf32>
    %501 = arith.mulf %500, %497 : vector<2x128xf32>
    %502 = arith.select %499, %497, %501 : vector<2x128xi1>, vector<2x128xf32>
    %c0_488 = arith.constant 0 : index
    %c0_489 = arith.constant 0 : index
    %c0_490 = arith.constant 0 : index
    %503 = vector.load %arg21[%c0_488, %c0_489, %c0_490] : memref<1x2x128xf32, #tpu.memory_space<vmem>>, vector<1x2x128xf32>
    %504 = vector.shape_cast %503 : vector<1x2x128xf32> to vector<2x128xf32>
    %505 = vector.shape_cast %502 : vector<2x128xf32> to vector<1x2x128xf32>
    tpu.vector_store %arg21[%c0_488, %c0_489, %c0_490], %505 {strides = array<i32>} : memref<1x2x128xf32, #tpu.memory_space<vmem>>, vector<1x2x128xf32>,
    %c1_491 = arith.constant 1 : index
    %c0_492 = arith.constant 0 : index
    %c0_493 = arith.constant 0 : index
    %506 = vector.load %arg29[%c1_491, %c0_492, %c0_493] : memref<3x2x128xf32, #tpu.memory_space<vmem>>, vector<1x2x128xf32>
    %507 = vector.shape_cast %506 : vector<1x2x128xf32> to vector<2x128xf32>
    %508 = vector.shape_cast %502 : vector<2x128xf32> to vector<1x2x128xf32>
    tpu.vector_store %arg29[%c1_491, %c0_492, %c0_493], %508 {strides = array<i32>} : memref<3x2x128xf32, #tpu.memory_space<vmem>>, vector<1x2x128xf32>,
    %c0_494 = arith.constant 0 : index
    %c0_495 = arith.constant 0 : index
    %509 = vector.load %arg13[%c0_494, %c0_495] : memref<1x32xf32, #tpu.memory_space<vmem>>, vector<1x32xf32>
    %c0_496 = arith.constant 0 : index
    %c0_497 = arith.constant 0 : index
    %c0_498 = arith.constant 0 : index
    %510 = vector.load %arg29[%c0_496, %c0_497, %c0_498] : memref<3x2x128xf32, #tpu.memory_space<vmem>>, vector<1x2x128xf32>
    %511 = vector.shape_cast %510 : vector<1x2x128xf32> to vector<2x128xf32>
    %c0_499 = arith.constant 0 : index
    %c0_500 = arith.constant 0 : index
    %c0_501 = arith.constant 0 : index
    %512 = vector.load %arg6[%c0_499, %c0_500, %c0_501] : memref<3x128x32xf32, #tpu.memory_space<vmem>>, vector<1x128x32xf32>
    %513 = vector.shape_cast %512 : vector<1x128x32xf32> to vector<128x32xf32>
    %cst_502 = arith.constant dense<0.000000e+00> : vector<2x32xf32>
    %514 = tpu.matmul %511, %513, %cst_502 {dimension_numbers = #tpu.dot_dimension_numbers<[1], [0], [0], [1], [0, 0, 1, 1], [], []>} : vector<2x128xf32>, vector<128x32xf32>, vector<2x32xf32> -> vector<2x32xf32>
    %c1_503 = arith.constant 1 : index
    %c0_504 = arith.constant 0 : index
    %c0_505 = arith.constant 0 : index
    %515 = vector.load %arg29[%c1_503, %c0_504, %c0_505] : memref<3x2x128xf32, #tpu.memory_space<vmem>>, vector<1x2x128xf32>
    %516 = vector.shape_cast %515 : vector<1x2x128xf32> to vector<2x128xf32>
    %c1_506 = arith.constant 1 : index
    %c0_507 = arith.constant 0 : index
    %c0_508 = arith.constant 0 : index
    %517 = vector.load %arg6[%c1_506, %c0_507, %c0_508] : memref<3x128x32xf32, #tpu.memory_space<vmem>>, vector<1x128x32xf32>
    %518 = vector.shape_cast %517 : vector<1x128x32xf32> to vector<128x32xf32>
    %cst_509 = arith.constant dense<0.000000e+00> : vector<2x32xf32>
    %519 = tpu.matmul %516, %518, %cst_509 {dimension_numbers = #tpu.dot_dimension_numbers<[1], [0], [0], [1], [0, 0, 1, 1], [], []>} : vector<2x128xf32>, vector<128x32xf32>, vector<2x32xf32> -> vector<2x32xf32>
    %520 = arith.addf %514, %519 : vector<2x32xf32>
    %c2_510 = arith.constant 2 : index
    %c0_511 = arith.constant 0 : index
    %c0_512 = arith.constant 0 : index
    %521 = vector.load %arg29[%c2_510, %c0_511, %c0_512] : memref<3x2x128xf32, #tpu.memory_space<vmem>>, vector<1x2x128xf32>
    %522 = vector.shape_cast %521 : vector<1x2x128xf32> to vector<2x128xf32>
    %c2_513 = arith.constant 2 : index
    %c0_514 = arith.constant 0 : index
    %c0_515 = arith.constant 0 : index
    %523 = vector.load %arg6[%c2_513, %c0_514, %c0_515] : memref<3x128x32xf32, #tpu.memory_space<vmem>>, vector<1x128x32xf32>
    %524 = vector.shape_cast %523 : vector<1x128x32xf32> to vector<128x32xf32>
    %cst_516 = arith.constant dense<0.000000e+00> : vector<2x32xf32>
    %525 = tpu.matmul %522, %524, %cst_516 {dimension_numbers = #tpu.dot_dimension_numbers<[1], [0], [0], [1], [0, 0, 1, 1], [], []>} : vector<2x128xf32>, vector<128x32xf32>, vector<2x32xf32> -> vector<2x32xf32>
    %526 = arith.addf %520, %525 : vector<2x32xf32>
    %527 = vector.broadcast %509 : vector<1x32xf32> to vector<2x32xf32>
    %528 = arith.addf %526, %527 : vector<2x32xf32>
    %cst_517 = arith.constant 0.000000e+00 : f32
    %529 = vector.broadcast %cst_517 : f32 to vector<2x32xf32>
    %530 = arith.cmpf oge, %528, %529 : vector<2x32xf32>
    %cst_518 = arith.constant 1.000000e-01 : f32
    %531 = vector.broadcast %cst_518 : f32 to vector<2x32xf32>
    %532 = arith.mulf %531, %528 : vector<2x32xf32>
    %533 = arith.select %530, %528, %532 : vector<2x32xi1>, vector<2x32xf32>
    %c0_519 = arith.constant 0 : index
    %c0_520 = arith.constant 0 : index
    %c0_521 = arith.constant 0 : index
    %534 = vector.load %arg22[%c0_519, %c0_520, %c0_521] : memref<1x2x32xf32, #tpu.memory_space<vmem>>, vector<1x2x32xf32>
    %535 = vector.shape_cast %534 : vector<1x2x32xf32> to vector<2x32xf32>
    %536 = vector.shape_cast %533 : vector<2x32xf32> to vector<1x2x32xf32>
    tpu.vector_store %arg22[%c0_519, %c0_520, %c0_521], %536 {strides = array<i32>} : memref<1x2x32xf32, #tpu.memory_space<vmem>>, vector<1x2x32xf32>,
    %c1_522 = arith.constant 1 : index
    %c0_523 = arith.constant 0 : index
    %c0_524 = arith.constant 0 : index
    %537 = vector.load %arg30[%c1_522, %c0_523, %c0_524] : memref<3x2x32xf32, #tpu.memory_space<vmem>>, vector<1x2x32xf32>
    %538 = vector.shape_cast %537 : vector<1x2x32xf32> to vector<2x32xf32>
    %539 = vector.shape_cast %533 : vector<2x32xf32> to vector<1x2x32xf32>
    tpu.vector_store %arg30[%c1_522, %c0_523, %c0_524], %539 {strides = array<i32>} : memref<3x2x32xf32, #tpu.memory_space<vmem>>, vector<1x2x32xf32>,
    %c0_525 = arith.constant 0 : index
    %c0_526 = arith.constant 0 : index
    %540 = vector.load %arg14[%c0_525, %c0_526] : memref<1x128xf32, #tpu.memory_space<vmem>>, vector<1x128xf32>
    %c0_527 = arith.constant 0 : index
    %c0_528 = arith.constant 0 : index
    %c0_529 = arith.constant 0 : index
    %541 = vector.load %arg30[%c0_527, %c0_528, %c0_529] : memref<3x2x32xf32, #tpu.memory_space<vmem>>, vector<1x2x32xf32>
    %542 = vector.shape_cast %541 : vector<1x2x32xf32> to vector<2x32xf32>
    %c0_530 = arith.constant 0 : index
    %c0_531 = arith.constant 0 : index
    %c0_532 = arith.constant 0 : index
    %543 = vector.load %arg7[%c0_530, %c0_531, %c0_532] : memref<3x32x128xf32, #tpu.memory_space<vmem>>, vector<1x32x128xf32>
    %544 = vector.shape_cast %543 : vector<1x32x128xf32> to vector<32x128xf32>
    %cst_533 = arith.constant dense<0.000000e+00> : vector<2x128xf32>
    %545 = tpu.matmul %542, %544, %cst_533 {dimension_numbers = #tpu.dot_dimension_numbers<[1], [0], [0], [1], [0, 0, 1, 1], [], []>} : vector<2x32xf32>, vector<32x128xf32>, vector<2x128xf32> -> vector<2x128xf32>
    %c1_534 = arith.constant 1 : index
    %c0_535 = arith.constant 0 : index
    %c0_536 = arith.constant 0 : index
    %546 = vector.load %arg30[%c1_534, %c0_535, %c0_536] : memref<3x2x32xf32, #tpu.memory_space<vmem>>, vector<1x2x32xf32>
    %547 = vector.shape_cast %546 : vector<1x2x32xf32> to vector<2x32xf32>
    %c1_537 = arith.constant 1 : index
    %c0_538 = arith.constant 0 : index
    %c0_539 = arith.constant 0 : index
    %548 = vector.load %arg7[%c1_537, %c0_538, %c0_539] : memref<3x32x128xf32, #tpu.memory_space<vmem>>, vector<1x32x128xf32>
    %549 = vector.shape_cast %548 : vector<1x32x128xf32> to vector<32x128xf32>
    %cst_540 = arith.constant dense<0.000000e+00> : vector<2x128xf32>
    %550 = tpu.matmul %547, %549, %cst_540 {dimension_numbers = #tpu.dot_dimension_numbers<[1], [0], [0], [1], [0, 0, 1, 1], [], []>} : vector<2x32xf32>, vector<32x128xf32>, vector<2x128xf32> -> vector<2x128xf32>
    %551 = arith.addf %545, %550 : vector<2x128xf32>
    %c2_541 = arith.constant 2 : index
    %c0_542 = arith.constant 0 : index
    %c0_543 = arith.constant 0 : index
    %552 = vector.load %arg30[%c2_541, %c0_542, %c0_543] : memref<3x2x32xf32, #tpu.memory_space<vmem>>, vector<1x2x32xf32>
    %553 = vector.shape_cast %552 : vector<1x2x32xf32> to vector<2x32xf32>
    %c2_544 = arith.constant 2 : index
    %c0_545 = arith.constant 0 : index
    %c0_546 = arith.constant 0 : index
    %554 = vector.load %arg7[%c2_544, %c0_545, %c0_546] : memref<3x32x128xf32, #tpu.memory_space<vmem>>, vector<1x32x128xf32>
    %555 = vector.shape_cast %554 : vector<1x32x128xf32> to vector<32x128xf32>
    %cst_547 = arith.constant dense<0.000000e+00> : vector<2x128xf32>
    %556 = tpu.matmul %553, %555, %cst_547 {dimension_numbers = #tpu.dot_dimension_numbers<[1], [0], [0], [1], [0, 0, 1, 1], [], []>} : vector<2x32xf32>, vector<32x128xf32>, vector<2x128xf32> -> vector<2x128xf32>
    %557 = arith.addf %551, %556 : vector<2x128xf32>
    %558 = vector.broadcast %540 : vector<1x128xf32> to vector<2x128xf32>
    %559 = arith.addf %557, %558 : vector<2x128xf32>
    %cst_548 = arith.constant 0.000000e+00 : f32
    %560 = vector.broadcast %cst_548 : f32 to vector<2x128xf32>
    %561 = arith.cmpf oge, %559, %560 : vector<2x128xf32>
    %cst_549 = arith.constant 1.000000e-01 : f32
    %562 = vector.broadcast %cst_549 : f32 to vector<2x128xf32>
    %563 = arith.mulf %562, %559 : vector<2x128xf32>
    %564 = arith.select %561, %559, %563 : vector<2x128xi1>, vector<2x128xf32>
    %c0_550 = arith.constant 0 : index
    %c0_551 = arith.constant 0 : index
    %c0_552 = arith.constant 0 : index
    %565 = vector.load %arg23[%c0_550, %c0_551, %c0_552] : memref<1x2x128xf32, #tpu.memory_space<vmem>>, vector<1x2x128xf32>
    %566 = vector.shape_cast %565 : vector<1x2x128xf32> to vector<2x128xf32>
    %567 = vector.shape_cast %564 : vector<2x128xf32> to vector<1x2x128xf32>
    tpu.vector_store %arg23[%c0_550, %c0_551, %c0_552], %567 {strides = array<i32>} : memref<1x2x128xf32, #tpu.memory_space<vmem>>, vector<1x2x128xf32>,
    %c0_553 = arith.constant 0 : index
    %c0_554 = arith.constant 0 : index
    %568 = vector.load %arg15[%c0_553, %c0_554] : memref<128x128xf32, #tpu.memory_space<vmem>>, vector<128x128xf32>
    %cst_555 = arith.constant dense<0.000000e+00> : vector<2x128xf32>
    %569 = tpu.matmul %564, %568, %cst_555 {dimension_numbers = #tpu.dot_dimension_numbers<[1], [0], [0], [1], [0, 0, 1, 1], [], []>} : vector<2x128xf32>, vector<128x128xf32>, vector<2x128xf32> -> vector<2x128xf32>
    %c0_556 = arith.constant 0 : index
    %c0_557 = arith.constant 0 : index
    %570 = vector.load %arg16[%c0_556, %c0_557] : memref<1x128xf32, #tpu.memory_space<vmem>>, vector<1x128xf32>
    %571 = vector.broadcast %570 : vector<1x128xf32> to vector<2x128xf32>
    %572 = arith.addf %569, %571 : vector<2x128xf32>
    %c0_558 = arith.constant 0 : index
    %c0_559 = arith.constant 0 : index
    %573 = vector.load %arg24[%c0_558, %c0_559] : memref<2x128xf32, #tpu.memory_space<vmem>>, vector<2x128xf32>
    tpu.vector_store %arg24[%c0_558, %c0_559], %572 {strides = array<i32>} : memref<2x128xf32, #tpu.memory_space<vmem>>, vector<2x128xf32>,
    return
  }
}

</mosaic_0001>

<bundles_post_ra>
// kernel: tpu_custom_call.1
= control target key start
LH: loop header
LB: loop body
LE: loop exit
PB: predicated region body
PF: predicated region fallthrough
CT: control target
= control target key end

     0   :  { %s7681_s0 = inlined_call_operand.vmem [shape: f32[18,2,16], index: 0, kind: input, shape index: {}]   ;;  %s7682_s1 = inlined_call_operand.vmem [shape: f32[3,16,256], index: 1, kind: input, shape index: {}]   ;;  %s7683_s2 = inlined_call_operand.hbm [shape: f32[3,256,256], index: 2, kind: input, shape index: {}]   ;;  %s7684_s3 = inlined_call_operand.hbm [shape: f32[4,256,128], index: 3, kind: input, shape index: {}]   ;;  %s7685_s4 = inlined_call_operand.vmem [shape: f32[3,128,64], index: 4, kind: input, shape index: {}]   ;;  %s7686_s5 = inlined_call_operand.vmem [shape: f32[3,64,128], index: 5, kind: input, shape index: {}]   ;;  %s7687_s6 = inlined_call_operand.vmem [shape: f32[3,128,32], index: 6, kind: input, shape index: {}]   ;;  %s7688_s7 = inlined_call_operand.vmem [shape: f32[3,32,128], index: 7, kind: input, shape index: {}]   ;;  %s7689_s8 = inlined_call_operand.vmem [shape: f32[1,256], index: 8, kind: input, shape index: {}]   ;;  %s7690_s9 = inlined_call_operand.vmem [shape: f32[1,256], index: 9, kind: input, shape index: {}]   ;;  %s7691_s10 = inlined_call_operand.vmem [shape: f32[1,128], index: 10, kind: input, shape index: {}]   ;;  %s7692_s11 = inlined_call_operand.vmem [shape: f32[1,64], index: 11, kind: input, shape index: {}]   ;;  %s7693_s12 = inlined_call_operand.vmem [shape: f32[1,128], index: 12, kind: input, shape index: {}]   ;;  %s7694_s13 = inlined_call_operand.vmem [shape: f32[1,32], index: 13, kind: input, shape index: {}]   ;;  %s7695_s14 = inlined_call_operand.vmem [shape: f32[1,128], index: 14, kind: input, shape index: {}]   ;;  %s7696_s15 = inlined_call_operand.vmem [shape: f32[128,128], index: 15, kind: input, shape index: {}]   ;;  %s7697_s16 = inlined_call_operand.vmem [shape: f32[1,128], index: 16, kind: input, shape index: {}]   ;;  %s7698_s17 = inlined_call_operand.hbm [shape: f32[8,2,256], index: 17, kind: output, shape index: {0}]   ;;  %s7699_s18 = inlined_call_operand.hbm [shape: f32[4,2,256], index: 18, kind: output, shape index: {1}]   ;;  %s7700_s19 = inlined_call_operand.hbm [shape: f32[2,2,128], index: 19, kind: output, shape index: {2}]   ;;  %s7701_s20 = inlined_call_operand.hbm [shape: f32[1,2,64], index: 20, kind: output, shape index: {3}]   ;;  %s7702_s21 = inlined_call_operand.hbm [shape: f32[1,2,128], index: 21, kind: output, shape index: {4}]   ;;  %s7703_s22 = inlined_call_operand.hbm [shape: f32[1,2,32], index: 22, kind: output, shape index: {5}]   ;;  %s7704_s23 = inlined_call_operand.hbm [shape: f32[1,2,128], index: 23, kind: output, shape index: {6}]   ;;  %s7705_s24 = inlined_call_operand.hbm [shape: f32[2,128], index: 24, kind: output, shape index: {7}]  }
   0x1   :  { %7929 = sst [smem:[#allocation172_spill]] %s7681_s0 }
   0x2   :  { %7930 = sst [smem:[#allocation173_spill]] %s7682_s1 }
   0x3   :  { %7931 = sst [smem:[#allocation174_spill]] %s7683_s2 }
   0x4   :  { %7932 = sst [smem:[#allocation175_spill]] %s7684_s3 }
   0x5   :  { %7933 = sst [smem:[#allocation176_spill]] %s7685_s4 }
   0x6   :  { %7934 = sst [smem:[#allocation177_spill]] %s7686_s5 }
   0x7   :  { %7935 = sst [smem:[#allocation178_spill]] %s7687_s6 }
   0x8   :  { %7936 = sst [smem:[#allocation179_spill]] %s7688_s7 }
   0x9   :  { %7937 = sst [smem:[#allocation180_spill]] %s7689_s8 }
   0xa   :  { %7938 = sst [smem:[#allocation181_spill]] %s7705_s24 }
   0xb   :  { %30 = vsyncpa [#allocation9], 0 }
   0xc   :  { %31 = vsyncpa [#allocation12], 0 }
   0xd   :  { %32 = vsyncpa [#allocation10], 0 }
   0xe   :  { %33 = vsyncpa [#allocation15], 0 }
   0xf   :  { %34 = vsyncpa [#allocation18], 0 }
  0x10   :  { %35 = vsyncpa [#allocation21], 0 }
  0x11   :  { %36 = vsyncpa [#allocation24], 0  ;;  %s7939_s27 = sld [smem:[#allocation174_spill]]  ;;  %s5168_s6 = smov [#allocation8]  }
  0x12   :  { %s47_s2 = sshll.u32 %s5168_s6, 4  ;;  %s7940_s7 = sld [smem:[#allocation175_spill]]  ;;  %s48_s2 = int_to_ptr.vmem [resolvable:$true] %s47_s2 }
  0x13   :  { %s5169_s3 = smov 256   ;;  %s5170_s25 = smov 16  }
  0x14   :  { %s5171_s8 = smov [#allocation11]   ;;  %s5172_s1 = smov 128  }
  0x15   :  { %s60_s4 = sshll.u32 %s5171_s8, 4  ;;  %s5173_s24 = smov 8   ;;  %s61_s4 = int_to_ptr.vmem [resolvable:$true] %s60_s4 }
  0x17   :  { %s45_s28 = sshll.u32 %s7939_s27, 4  ;;  %s46_s28 = int_to_ptr.hbm [resolvable:$true] %s45_s28 }
  0x18   :  { %s58_s30 = sshll.u32 %s7940_s7, 4  ;;  %s59_s30 = int_to_ptr.hbm [resolvable:$true] %s58_s30 }
  0x19   :  { %53 = dma.hbm_to_vmem [thread:$0]  %s46_s28, 24576, %s48_s2, [#allocation9], %s5169_s3, %s5169_s3, %s5170_s25  }
  0x1a   :  { %66 = dma.hbm_to_vmem [thread:$0]  %s59_s30, 16384, %s61_s4, [#allocation12], %s5172_s1, %s5172_s1, %s5173_s24  }
  0x1b   :  { %5154 = dma.done.wait [#allocation9], 24576  }
  0x1c   :  { %5155 = vsyncadd [#allocation9], 4294942720 }
  0x1d   :  { %5156 = dma.done.wait [#allocation12], 16384  }
  0x1e   :  { %5157 = vsyncadd [#allocation12], 4294950912  ;;  %v7712_v0 = vmov 0.0   ;;  %s7941_s27 = sld [smem:[#allocation173_spill]]  ;;  %vm145_vm0 = vcmask 130048   ;;  %v1591_v32 = vld [vmem:[#allocation8 + $0x3f0] sm:$0xff] }
  0x1f   :  { %101 = vst [vmem:[#allocation2] sm:$0xf] %v7712_v0  ;;  %s7942_s3 = sld [smem:[#allocation172_spill]]  ;;  %v1589_v34 = vld [vmem:[#allocation8 + $0x3e0] sm:$0xff]  ;;  %v1587_v35 = vld [vmem:[#allocation8 + $0x3d0] sm:$0xff]  ;;  %v1560_v45 = vld [vmem:[#allocation8 + $0x2f8] sm:$0xff] }
  0x20   :  { %102 = vst [vmem:[#allocation2 + $0x4] sm:$0xf] %v7712_v0  ;;  %v1585_v37 = vld [vmem:[#allocation8 + $0x3c0] sm:$0xff]  ;;  %v1583_v39 = vld [vmem:[#allocation8 + $0x3b0] sm:$0xff]  ;;  %v1592_v46 = vld [vmem:[#allocation8 + $0x3f8] sm:$0xff]  ;;  %s7943_s5 = sld [smem:[#allocation180_spill]] }
  0x21   :  { %103 = vst [vmem:[#allocation2 + $0x8] sm:$0xf] %v7712_v0  ;;  %v1581_v40 = vld [vmem:[#allocation8 + $0x3a0] sm:$0xff]  ;;  %v1559_v41 = vld [vmem:[#allocation8 + $0x2f0] sm:$0xff]  ;;  %v1558_v49 = vld [vmem:[#allocation8 + $0x2e8] sm:$0xff]  ;;  %vm300_vm3 = vcmask 1041408  }
  0x22   :  { %104 = vst [vmem:[#allocation2 + $0xc] sm:$0xf] %v7712_v0  ;;  %v1579_v42 = vld [vmem:[#allocation8 + $0x390] sm:$0xff]  ;;  %v1557_v43 = vld [vmem:[#allocation8 + $0x2e0] sm:$0xff]  ;;  %v1590_v50 = vld [vmem:[#allocation8 + $0x3e8] sm:$0xff]  ;;  %s8375_s28 = sld [smem:[#allocation177_spill]] }
  0x23   :  { %105 = vst [vmem:[#allocation2 + $0x10] sm:$0xf] %v7712_v0  ;;  %v1555_v47 = vld [vmem:[#allocation8 + $0x2d0] sm:$0xff]  ;;  %v1577_v48 = vld [vmem:[#allocation8 + $0x380] sm:$0xff]  ;;  %v1556_v52 = vld [vmem:[#allocation8 + $0x2d8] sm:$0xff]  ;;  %s8377_s8 = sld [smem:[#allocation178_spill]] }
  0x24   :  { %v5326_v1 = vld [vmem:[%s7941_s27 + $0x38] sm:$0xff]  ;;  %v5336_v3 = vld [vmem:[%s7941_s27 + $0x28] sm:$0xff]  ;;  %106 = vst [vmem:[#allocation2 + $0x14] sm:$0xf] %v7712_v0  ;;  %v5352_v6 = vld [vmem:[%s7941_s27 + $0x30] sm:$0xff]  ;;  %s8378_s30 = sld [smem:[#allocation179_spill]] }
  0x25   :  { %v5331_v2 = vld [vmem:[%s7941_s27 + $0x18] sm:$0xff]  ;;  %183 = vmatpush.msra.mxu2 %v5326_v1  ;;  %v5344_v4 = vld [vmem:[%s7941_s27 + $0x8] sm:$0xff]  ;;  %v4650_v5 = vld [vmem:[%s7942_s3 + $0x2] sm:$0x3]  ;;  %107 = vst [vmem:[#allocation2 + $0x18] sm:$0xf] %v7712_v0  ;;  %163 = vmatpush.msra.mxu0 %v5352_v6 }
  0x26   :  { %226 = vmatpush.msra.mxu3 %v5331_v2  ;;  %v133_v7 = vld [vmem:[%s7942_s3] sm:$0x3]  ;;  %v5362_v8 = vld [vmem:[%s7941_s27 + $0x10] sm:$0xff]  ;;  %v5367_v9 = vld [vmem:[%s7941_s27 + $0x58] sm:$0xff]  ;;  %397 = vmatpush.msra.mxu1 %v5331_v2  ;;  %108 = vst [vmem:[#allocation2 + $0x1c] sm:$0xf] %v7712_v0 }
  0x27   :  { %184 = vmatpush.msra.mxu2 %v5336_v3  ;;  %v5376_v10 = vld [vmem:[%s7941_s27 + $0x20] sm:$0xff]  ;;  %109 = vst [vmem:[#allocation2 + $0x20] sm:$0xf] %v7712_v0  ;;  %v5389_v12 = vld [vmem:[%s7941_s27 + $0x48] sm:$0xff]  ;;  %v5399_v13 = vld [vmem:[%s7941_s27 + $0x50] sm:$0xff]  ;;  %s5176_s4 = smov 64  }
  0x28   :  { %227 = vmatpush.msra.mxu3 %v5344_v4  ;;  %4656 = vmatmul.msk.f32.vlgmr.msra.gmra.mxu2 %vm145_vm0, %v4650_v5  ;;  %v5384_v11 = vld [vmem:[%s7941_s27] sm:$0xff]  ;;  %111 = vst [vmem:[#allocation3] sm:$0xf] %v7712_v0  ;;  %v4684_v17 = vld [vmem:[%s7942_s3 + $0xa] sm:$0x3]  ;;  %v1575_v51 = vld [vmem:[#allocation8 + $0x370] sm:$0xff] }
  0x29   :  { %4658 = vmatmul.msk.f32.vlgmr.msra.gmra.mxu3 %vm145_vm0, %v133_v7  ;;  %206 = vmatpush.msrb.mxu2 %v5362_v8  ;;  %112 = vst [vmem:[#allocation3 + $0x4] sm:$0xf] %v7712_v0  ;;  %v4659_v14 = vld [vmem:[%s7942_s3 + $0x4] sm:$0x3]  ;;  %v4667_v18 = vld [vmem:[%s7942_s3 + $0x6] sm:$0x3] }
  0x2a   :  { %276 = vmatpush.msrb.mxu3 %v5367_v9  ;;  %164 = vmatpush.msra.mxu0 %v5376_v10  ;;  %113 = vst [vmem:[#allocation3 + $0x8] sm:$0xf] %v7712_v0  ;;  %v4666_v15 = vld [vmem:[%s7942_s3 + $0x4] sm:$0x3]  ;;  %v4693_v19 = vld [vmem:[%s7942_s3 + $0xc] sm:$0x3] }
  0x2b   :  { %398 = vmatpush.msra.mxu1 %v5344_v4  ;;  %207 = vmatpush.msrb.mxu2 %v5384_v11  ;;  %114 = vst [vmem:[#allocation3 + $0xc] sm:$0xf] %v7712_v0  ;;  %v5417_v16 = vld [vmem:[%s7941_s27 + $0x40] sm:$0xff]  ;;  %v4676_v20 = vld [vmem:[%s7942_s3 + $0x8] sm:$0x3]  ;;  %v1554_v56 = vld [vmem:[#allocation8 + $0x2c8] sm:$0xff] }
  0x2c   :  { %277 = vmatpush.msrb.mxu3 %v5389_v12  ;;  %4655 = vmatmul.msk.f32.vlgmr.msra.gmra.mxu0 %vm145_vm0, %v4650_v5  ;;  %115 = vst [vmem:[#allocation3 + $0x10] sm:$0xf] %v7712_v0  ;;  %v4700_v21 = vld [vmem:[%s7942_s3 + $0xc] sm:$0x3]  ;;  %v4683_v22 = vld [vmem:[%s7942_s3 + $0x8] sm:$0x3] }
  0x2d   :  { %256 = vmatpush.msrb.mxu0 %v5399_v13  ;;  %334 = vmatpush.msra.mxu2 %v5352_v6  ;;  %116 = vst [vmem:[#allocation3 + $0x14] sm:$0xf] %v7712_v0  ;;  %v4718_v23 = vld [vmem:[%s7942_s3 + $0x12] sm:$0x3]  ;;  %v4701_v24 = vld [vmem:[%s7942_s3 + $0xe] sm:$0x3] }
  0x2e   :  { %354 = vmatpush.msra.mxu3 %v5326_v1  ;;  %4675 = vmatmul.msk.f32.vlgmr.msra.gmra.mxu1 %vm145_vm0, %v4666_v15  ;;  %117 = vst [vmem:[#allocation4] sm:$0x3] %v7712_v0  ;;  %v4727_v25 = vld [vmem:[%s7942_s3 + $0x14] sm:$0x3]  ;;  %v4710_v26 = vld [vmem:[%s7942_s3 + $0x10] sm:$0x3] }
  0x2f   :  { %257 = vmatpush.msrb.mxu0 %v5417_v16  ;;  %335 = vmatpush.msra.mxu2 %v5376_v10  ;;  %118 = vst [vmem:[#allocation4 + $0x2] sm:$0x3] %v7712_v0  ;;  %v4734_v27 = vld [vmem:[%s7942_s3 + $0x14] sm:$0x3]  ;;  %v4717_v28 = vld [vmem:[%s7942_s3 + $0x10] sm:$0x3] }
  0x30   :  { %355 = vmatpush.msra.mxu3 %v5336_v3  ;;  %4657 = vmatmul.msk.f32.vlgmr.msrb.gmra.mxu2 %vm145_vm0, %v133_v7  ;;  %119 = vst [vmem:[#allocation4 + $0x4] sm:$0x3] %v7712_v0  ;;  %v4752_v29 = vld [vmem:[%s7942_s3 + $0x1a] sm:$0x3]  ;;  %v4735_v30 = vld [vmem:[%s7942_s3 + $0x16] sm:$0x3] }
  0x31   :  { %4665 = vmatmul.msk.f32.vlgmr.msrb.gmra.mxu3 %vm145_vm0, %v4659_v14  ;;  %377 = vmatpush.msra.mxu0 %v5362_v8  ;;  %125 = vst [vmem:[#allocation6] sm:$0x3] %v7712_v0  ;;  %v4761_v31 = vld [vmem:[%s7942_s3 + $0x1c] sm:$0x3]  ;;  %v4744_v33 = vld [vmem:[%s7942_s3 + $0x18] sm:$0x3] }
  0x32   :  { %446 = vmatpush.msrb.mxu3 %v5367_v9  ;;  %426 = vmatpush.msrb.mxu2 %v5399_v13  ;;  %126 = vst [vmem:[#allocation6 + $0x2] sm:$0x3] %v7712_v0  ;;  %v4768_v36 = vld [vmem:[%s7942_s3 + $0x1c] sm:$0x3]  ;;  %v4751_v38 = vld [vmem:[%s7942_s3 + $0x18] sm:$0x3] }
  0x33   :  { %519 = vmatpush.msrb.mxu1 %v5326_v1  ;;  %378 = vmatpush.msra.mxu0 %v5384_v11  ;;  %127 = vst [vmem:[#allocation6 + $0x4] sm:$0x3] %v7712_v0  ;;  %v4769_v44 = vld [vmem:[%s7942_s3 + $0x1e] sm:$0x3]  ;;  %v1553_v54 = vld [vmem:[#allocation8 + $0x2c0] sm:$0xff]  ;;  %v1586_v57 = vld [vmem:[#allocation8 + $0x3c8] sm:$0xff] }
  0x34   :  { %447 = vmatpush.msrb.mxu3 %v5389_v12  ;;  %4664 = vmatmul.msk.f32.vlgmr.msrb.gmra.mxu0 %vm145_vm0, %v4659_v14  ;;  %v1588_v53 = vld [vmem:[#allocation8 + $0x3d8] sm:$0xff]  ;;  %v1573_v55 = vld [vmem:[#allocation8 + $0x360] sm:$0xff]  ;;  %v1551_v59 = vld [vmem:[#allocation8 + $0x2b0] sm:$0xff]  ;;  %s8374_s27 = sld [smem:[#allocation176_spill]]  ;;  %s4523_s0 = sshll.u32 %s7698_s17, 4  ;;  %s4524_s0 = int_to_ptr.hbm [resolvable:$true] %s4523_s0 }
  0x35   :  { %427 = vmatpush.msrb.mxu2 %v5417_v16  ;;  %499 = vmatpush.msrb.mxu0 %v5352_v6  ;;  %v4778_v58 = vld [vmem:[%s7942_s3 + $0x20] sm:$0x3]  ;;  %v1571_v62 = vld [vmem:[#allocation8 + $0x350] sm:$0xff]  ;;  %v1549_v63 = vld [vmem:[#allocation8 + $0x2a0] sm:$0xff]  ;;  %s5177_s3 = smov 4   ;;  %s4574_s17 = sshll.u32 %s7702_s21, 4  ;;  %s4575_s17 = int_to_ptr.hbm [resolvable:$true] %s4574_s17 }
  0x36   :  { %520 = vmatpush.msrb.mxu1 %v5336_v3  ;;  %v1552_v60 = vld [vmem:[#allocation8 + $0x2b8] sm:$0xff]  ;;  %v1567_v7 = vld [vmem:[#allocation8 + $0x330] sm:$0xff]  ;;  %s5185_s1 = smov [#allocation22]   ;;  %s5186_s24 = smov [#allocation23]  }
  0x37   :  { %4690 = vmatmul.msk.f32.vlgmr.msrb.gmra.mxu1 %vm145_vm0, %v4684_v17  ;;  %500 = vmatpush.msrb.mxu0 %v5376_v10  ;;  %v1584_v61 = vld [vmem:[#allocation8 + $0x3b8] sm:$0xff] }
  0x38   :  { %611 = vmatpush.msra.mxu1 %v5367_v9  ;;  %4672 = vmatmul.msk.f32.vlgmr.msra.gmra.mxu2 %vm145_vm0, %v4667_v18  ;;  %v1548_v5 = vld [vmem:[#allocation8 + $0x298] sm:$0xff] }
  0x39   :  { %4673 = vmatmul.msk.f32.vlgmr.msra.gmra.mxu3 %vm145_vm0, %v4667_v18  ;;  %542 = vmatpush.msra.mxu2 %v5362_v8  ;;  %v1576_v14 = vld [vmem:[#allocation8 + $0x378] sm:$0xff]  ;;  %v1574_v18 = vld [vmem:[#allocation8 + $0x368] sm:$0xff] }
  0x3a   :  { %562 = vmatpush.msra.mxu3 %v5331_v2  ;;  %612 = vmatpush.msra.mxu1 %v5389_v12 }
  0x3b   :  { %543 = vmatpush.msra.mxu2 %v5384_v11 }
  0x3c   :  { %563 = vmatpush.msra.mxu3 %v5344_v4  ;;  %4674 = vmatmul.msk.f32.vlgmr.msra.gmra.mxu0 %vm145_vm0, %v4666_v15  ;;  %v1563_v15 = vld [vmem:[#allocation8 + $0x310] sm:$0xff] }
  0x3d   :  { %727 = vmatpush.msrb.mxu1 %v5331_v2  ;;  %591 = vmatpush.msra.mxu0 %v5399_v13 }
  0x3f   :  { %4699 = vmatmul.msk.f32.vlgmr.msra.gmra.mxu1 %vm145_vm0, %v4693_v19  ;;  %592 = vmatpush.msra.mxu0 %v5417_v16 }
  0x40   :  { %728 = vmatpush.msrb.mxu1 %v5344_v4  ;;  %4681 = vmatmul.msk.f32.vlgmr.msrb.gmra.mxu2 %vm145_vm0, %v4676_v20 }
  0x41   :  { %4682 = vmatmul.msk.f32.vlgmr.msrb.gmra.mxu3 %vm145_vm0, %v4676_v20  ;;  %664 = vmatpush.msrb.mxu2 %v5352_v6  ;;  %v1539_v20 = vld [vmem:[#allocation8 + $0x250] sm:$0xff] }
  0x42   :  { %684 = vmatpush.msrb.mxu3 %v5326_v1  ;;  %849 = vmatpush.msra.mxu1 %v5326_v1 }
  0x43   :  { %665 = vmatpush.msrb.mxu2 %v5376_v10 }
  0x44   :  { %685 = vmatpush.msrb.mxu3 %v5336_v3  ;;  %4689 = vmatmul.msk.f32.vlgmr.msrb.gmra.mxu0 %vm145_vm0, %v4684_v17  ;;  %v1542_v17 = vld [vmem:[#allocation8 + $0x268] sm:$0xff] }
  0x45   :  { %850 = vmatpush.msra.mxu1 %v5336_v3  ;;  %707 = vmatpush.msrb.mxu0 %v5362_v8 }
  0x47   :  { %4709 = vmatmul.msk.f32.vlgmr.msrb.gmra.mxu1 %vm145_vm0, %v4700_v21  ;;  %708 = vmatpush.msrb.mxu0 %v5384_v11 }
  0x48   :  { %941 = vmatpush.msrb.mxu1 %v5367_v9  ;;  %4691 = vmatmul.msk.f32.vlgmr.msra.gmra.mxu2 %vm145_vm0, %v4683_v22 }
  0x49   :  { %4692 = vmatmul.msk.f32.vlgmr.msra.gmra.mxu3 %vm145_vm0, %v4683_v22  ;;  %756 = vmatpush.msra.mxu2 %v5399_v13  ;;  %v1572_v22 = vld [vmem:[#allocation8 + $0x358] sm:$0xff] }
  0x4a   :  { %776 = vmatpush.msra.mxu3 %v5367_v9  ;;  %942 = vmatpush.msrb.mxu1 %v5389_v12 }
  0x4b   :  { %757 = vmatpush.msra.mxu2 %v5417_v16 }
  0x4c   :  { %777 = vmatpush.msra.mxu3 %v5389_v12  ;;  %4698 = vmatmul.msk.f32.vlgmr.msra.gmra.mxu0 %vm145_vm0, %v4693_v19  ;;  %v1561_v19 = vld [vmem:[#allocation8 + $0x300] sm:$0xff] }
  0x4d   :  { %829 = vmatpush.msra.mxu0 %v5352_v6 }
  0x4f   :  { %4724 = vmatmul.msk.f32.vlgmr.msra.gmra.mxu1 %vm145_vm0, %v4718_v23  ;;  %830 = vmatpush.msra.mxu0 %v5376_v10 }
  0x50   :  { %1057 = vmatpush.msra.mxu1 %v5331_v2  ;;  %4706 = vmatmul.msk.f32.vlgmr.msrb.gmra.mxu2 %vm145_vm0, %v4701_v24 }
  0x51   :  { %4707 = vmatmul.msk.f32.vlgmr.msrb.gmra.mxu3 %vm145_vm0, %v4701_v24  ;;  %872 = vmatpush.msrb.mxu2 %v5362_v8  ;;  %v1537_v24 = vld [vmem:[#allocation8 + $0x240] sm:$0xff] }
  0x52   :  { %892 = vmatpush.msrb.mxu3 %v5331_v2  ;;  %1058 = vmatpush.msra.mxu1 %v5344_v4 }
  0x53   :  { %873 = vmatpush.msrb.mxu2 %v5384_v11 }
  0x54   :  { %893 = vmatpush.msrb.mxu3 %v5344_v4  ;;  %4708 = vmatmul.msk.f32.vlgmr.msrb.gmra.mxu0 %vm145_vm0, %v4700_v21  ;;  %v1540_v21 = vld [vmem:[#allocation8 + $0x258] sm:$0xff] }
  0x55   :  { %921 = vmatpush.msrb.mxu0 %v5399_v13 }
  0x57   :  { %4733 = vmatmul.msk.f32.vlgmr.msrb.gmra.mxu1 %vm145_vm0, %v4727_v25  ;;  %922 = vmatpush.msrb.mxu0 %v5417_v16 }
  0x58   :  { %1179 = vmatpush.msrb.mxu1 %v5326_v1  ;;  %4715 = vmatmul.msk.f32.vlgmr.msra.gmra.mxu2 %vm145_vm0, %v4710_v26 }
  0x59   :  { %4716 = vmatmul.msk.f32.vlgmr.msra.gmra.mxu3 %vm145_vm0, %v4710_v26  ;;  %994 = vmatpush.msra.mxu2 %v5352_v6  ;;  %v1570_v26 = vld [vmem:[#allocation8 + $0x348] sm:$0xff] }
  0x5a   :  { %1014 = vmatpush.msra.mxu3 %v5326_v1  ;;  %1180 = vmatpush.msrb.mxu1 %v5336_v3 }
  0x5b   :  { %995 = vmatpush.msra.mxu2 %v5376_v10 }
  0x5c   :  { %1015 = vmatpush.msra.mxu3 %v5336_v3  ;;  %4723 = vmatmul.msk.f32.vlgmr.msra.gmra.mxu0 %vm145_vm0, %v4718_v23  ;;  %v1525_v23 = vld [vmem:[#allocation8 + $0x1f0] sm:$0xff] }
  0x5d   :  { %1037 = vmatpush.msra.mxu0 %v5362_v8 }
  0x5f   :  { %4743 = vmatmul.msk.f32.vlgmr.msra.gmra.mxu1 %vm145_vm0, %v4734_v27  ;;  %1038 = vmatpush.msra.mxu0 %v5384_v11 }
  0x60   :  { %1271 = vmatpush.msra.mxu1 %v5367_v9  ;;  %4725 = vmatmul.msk.f32.vlgmr.msrb.gmra.mxu2 %vm145_vm0, %v4717_v28 }
  0x61   :  { %4726 = vmatmul.msk.f32.vlgmr.msrb.gmra.mxu3 %vm145_vm0, %v4717_v28  ;;  %1086 = vmatpush.msrb.mxu2 %v5399_v13  ;;  %v1535_v28 = vld [vmem:[#allocation8 + $0x230] sm:$0xff] }
  0x62   :  { %1106 = vmatpush.msrb.mxu3 %v5367_v9  ;;  %1272 = vmatpush.msra.mxu1 %v5389_v12 }
  0x63   :  { %1087 = vmatpush.msrb.mxu2 %v5417_v16 }
  0x64   :  { %1107 = vmatpush.msrb.mxu3 %v5389_v12  ;;  %4732 = vmatmul.msk.f32.vlgmr.msrb.gmra.mxu0 %vm145_vm0, %v4727_v25  ;;  %v1538_v25 = vld [vmem:[#allocation8 + $0x248] sm:$0xff] }
  0x65   :  { %1159 = vmatpush.msrb.mxu0 %v5352_v6 }
  0x67   :  { %4758 = vmatmul.msk.f32.vlgmr.msrb.gmra.mxu1 %vm145_vm0, %v4752_v29  ;;  %1160 = vmatpush.msrb.mxu0 %v5376_v10 }
  0x68   :  { %1387 = vmatpush.msrb.mxu1 %v5331_v2  ;;  %4740 = vmatmul.msk.f32.vlgmr.msra.gmra.mxu2 %vm145_vm0, %v4735_v30 }
  0x69   :  { %4741 = vmatmul.msk.f32.vlgmr.msra.gmra.mxu3 %vm145_vm0, %v4735_v30  ;;  %1202 = vmatpush.msra.mxu2 %v5362_v8  ;;  %v1568_v30 = vld [vmem:[#allocation8 + $0x338] sm:$0xff] }
  0x6a   :  { %1222 = vmatpush.msra.mxu3 %v5331_v2  ;;  %1388 = vmatpush.msrb.mxu1 %v5344_v4  ;;  %v1582_v2 = vld [vmem:[#allocation8 + $0x3a8] sm:$0xff] }
  0x6b   :  { %1203 = vmatpush.msra.mxu2 %v5384_v11 }
  0x6c   :  { %1223 = vmatpush.msra.mxu3 %v5344_v4  ;;  %4742 = vmatmul.msk.f32.vlgmr.msra.gmra.mxu0 %vm145_vm0, %v4734_v27  ;;  %v1547_v4 = vld [vmem:[#allocation8 + $0x290] sm:$0xff]  ;;  %v1523_v27 = vld [vmem:[#allocation8 + $0x1e0] sm:$0xff] }
  0x6d   :  { %1251 = vmatpush.msra.mxu0 %v5399_v13 }
  0x6f   :  { %4767 = vmatmul.msk.f32.vlgmr.msra.gmra.mxu1 %vm145_vm0, %v4761_v31  ;;  %1252 = vmatpush.msra.mxu0 %v5417_v16 }
  0x70   :  { %1619 = vmatpush.msra.mxu1 %v1591_v32  ;;  %4749 = vmatmul.msk.f32.vlgmr.msrb.gmra.mxu2 %vm145_vm0, %v4744_v33  ;;  %v1533_v32 = vld [vmem:[#allocation8 + $0x220] sm:$0xff] }
  0x71   :  { %4750 = vmatmul.msk.f32.vlgmr.msrb.gmra.mxu3 %vm145_vm0, %v4744_v33  ;;  %1324 = vmatpush.msrb.mxu2 %v5352_v6  ;;  %v1580_v6 = vld [vmem:[#allocation8 + $0x398] sm:$0xff]  ;;  %v1534_v33 = vld [vmem:[#allocation8 + $0x228] sm:$0xff] }
  0x72   :  { %1344 = vmatpush.msrb.mxu3 %v5326_v1  ;;  %1620 = vmatpush.msra.mxu1 %v1589_v34  ;;  %v1550_v1 = vld [vmem:[#allocation8 + $0x2a8] sm:$0xff] }
  0x73   :  { %1325 = vmatpush.msrb.mxu2 %v5376_v10  ;;  %v1578_v10 = vld [vmem:[#allocation8 + $0x388] sm:$0xff] }
  0x74   :  { %1345 = vmatpush.msrb.mxu3 %v5336_v3  ;;  %4757 = vmatmul.msk.f32.vlgmr.msrb.gmra.mxu0 %vm145_vm0, %v4752_v29  ;;  %v1569_v3 = vld [vmem:[#allocation8 + $0x340] sm:$0xff]  ;;  %v1536_v29 = vld [vmem:[#allocation8 + $0x238] sm:$0xff]  ;;  %v1566_v34 = vld [vmem:[#allocation8 + $0x328] sm:$0xff] }
  0x75   :  { %1621 = vmatpush.msra.mxu1 %v1587_v35  ;;  %1367 = vmatpush.msrb.mxu0 %v5362_v8  ;;  %v1545_v8 = vld [vmem:[#allocation8 + $0x280] sm:$0xff] }
  0x76   :  { %v1519_v35 = vld [vmem:[#allocation8 + $0x1c0] sm:$0xff] }
  0x77   :  { %4777 = vmatmul.msk.f32.vlgmr.msrb.gmra.mxu1 %vm145_vm0, %v4768_v36  ;;  %1368 = vmatpush.msrb.mxu0 %v5384_v11  ;;  %v1565_v11 = vld [vmem:[#allocation8 + $0x320] sm:$0xff] }
  0x78   :  { %1622 = vmatpush.msra.mxu1 %v1585_v37  ;;  %4759 = vmatmul.msk.f32.vlgmr.msra.gmra.mxu2 %vm145_vm0, %v4751_v38  ;;  %v1532_v37 = vld [vmem:[#allocation8 + $0x218] sm:$0xff] }
  0x79   :  { %4760 = vmatmul.msk.f32.vlgmr.msra.gmra.mxu3 %vm145_vm0, %v4751_v38  ;;  %1416 = vmatpush.msra.mxu2 %v5399_v13  ;;  %v1544_v13 = vld [vmem:[#allocation8 + $0x278] sm:$0xff] }
  0x7a   :  { %1436 = vmatpush.msra.mxu3 %v5367_v9  ;;  %1623 = vmatpush.msra.mxu1 %v1583_v39  ;;  %v1546_v9 = vld [vmem:[#allocation8 + $0x288] sm:$0xff]  ;;  %v1564_v38 = vld [vmem:[#allocation8 + $0x318] sm:$0xff]  ;;  %v1517_v39 = vld [vmem:[#allocation8 + $0x1b0] sm:$0xff] }
  0x7b   :  { %1417 = vmatpush.msra.mxu2 %v5417_v16  ;;  %v1541_v16 = vld [vmem:[#allocation8 + $0x260] sm:$0xff] }
  0x7c   :  { %1437 = vmatpush.msra.mxu3 %v5389_v12  ;;  %4766 = vmatmul.msk.f32.vlgmr.msra.gmra.mxu0 %vm145_vm0, %v4761_v31  ;;  %v1543_v12 = vld [vmem:[#allocation8 + $0x270] sm:$0xff] }
  0x7d   :  { %1624 = vmatpush.msra.mxu1 %v1581_v40  ;;  %1599 = vmatpush.msra.mxu0 %v1559_v41  ;;  %v1521_v31 = vld [vmem:[#allocation8 + $0x1d0] sm:$0xff]  ;;  %v1529_v40 = vld [vmem:[#allocation8 + $0x200] sm:$0xff]  ;;  %v1530_v41 = vld [vmem:[#allocation8 + $0x208] sm:$0xff] }
  0x7f   :  { %1625 = vmatpush.msra.mxu1 %v1579_v42  ;;  %1600 = vmatpush.msra.mxu0 %v1557_v43  ;;  %v1562_v42 = vld [vmem:[#allocation8 + $0x308] sm:$0xff]  ;;  %v1493_v43 = vld [vmem:[#allocation8 + $0xf0] sm:$0xff] }
  0x80   :  { %4774 = vmatmul.msk.f32.vlgmr.msrb.gmra.mxu2 %vm145_vm0, %v4769_v44 }
  0x81   :  { %4775 = vmatmul.msk.f32.vlgmr.msrb.gmra.mxu3 %vm145_vm0, %v4769_v44  ;;  %1639 = vmatpush.msrb.mxu2 %v1560_v45  ;;  %v1494_v44 = vld [vmem:[#allocation8 + $0xf8] sm:$0xff] }
  0x82   :  { %1659 = vmatpush.msrb.mxu3 %v1592_v46  ;;  %1601 = vmatpush.msra.mxu0 %v1555_v47  ;;  %v1526_v45 = vld [vmem:[#allocation8 + $0x1f8] sm:$0xff]  ;;  %v1491_v46 = vld [vmem:[#allocation8 + $0xe0] sm:$0xff] }
  0x83   :  { %1626 = vmatpush.msra.mxu1 %v1577_v48  ;;  %1640 = vmatpush.msrb.mxu2 %v1558_v49  ;;  %v1515_v47 = vld [vmem:[#allocation8 + $0x1a0] sm:$0xff]  ;;  %v1492_v48 = vld [vmem:[#allocation8 + $0xe8] sm:$0xff] }
  0x84   :  { %1660 = vmatpush.msrb.mxu3 %v1590_v50  ;;  %4776 = vmatmul.msk.f32.vlgmr.msrb.gmra.mxu0 %vm145_vm0, %v4768_v36  ;;  %v1531_v36 = vld [vmem:[#allocation8 + $0x210] sm:$0xff]  ;;  %v1524_v49 = vld [vmem:[#allocation8 + $0x1e8] sm:$0xff] }
  0x85   :  { %1627 = vmatpush.msra.mxu1 %v1575_v51  ;;  %1641 = vmatpush.msrb.mxu2 %v1556_v52  ;;  %v1489_v50 = vld [vmem:[#allocation8 + $0xd0] sm:$0xff]  ;;  %v1490_v52 = vld [vmem:[#allocation8 + $0xd8] sm:$0xff] }
  0x86   :  { %1661 = vmatpush.msrb.mxu3 %v1588_v53  ;;  %1602 = vmatpush.msra.mxu0 %v1553_v54  ;;  %v1513_v51 = vld [vmem:[#allocation8 + $0x190] sm:$0xff]  ;;  %v1522_v53 = vld [vmem:[#allocation8 + $0x1d8] sm:$0xff]  ;;  %v1487_v54 = vld [vmem:[#allocation8 + $0xc0] sm:$0xff] }
  0x87   :  { %1628 = vmatpush.msra.mxu1 %v1573_v55  ;;  %1642 = vmatpush.msrb.mxu2 %v1554_v56  ;;  %v1511_v55 = vld [vmem:[#allocation8 + $0x180] sm:$0xff]  ;;  %v1488_v56 = vld [vmem:[#allocation8 + $0xc8] sm:$0xff] }
  0x88   :  { %1662 = vmatpush.msrb.mxu3 %v1586_v57  ;;  %4783 = vmatmul.msk.f32.vlgmr.msra.gmra.mxu2 %vm145_vm0, %v4778_v58  ;;  %v1520_v57 = vld [vmem:[#allocation8 + $0x1c8] sm:$0xff] }
  0x89   :  { %4784 = vmatmul.msk.f32.vlgmr.msra.gmra.mxu3 %vm145_vm0, %v4778_v58  ;;  %1603 = vmatpush.msra.mxu0 %v1551_v59  ;;  %v1485_v58 = vld [vmem:[#allocation8 + $0xb0] sm:$0xff] }
  0x8a   :  { %1643 = vmatpush.msrb.mxu2 %v1552_v60  ;;  %1663 = vmatpush.msrb.mxu3 %v1584_v61  ;;  %v1509_v59 = vld [vmem:[#allocation8 + $0x170] sm:$0xff]  ;;  %v1486_v60 = vld [vmem:[#allocation8 + $0xb8] sm:$0xff] }
  0x8b   :  { %1629 = vmatpush.msra.mxu1 %v1571_v62  ;;  %1604 = vmatpush.msra.mxu0 %v1549_v63  ;;  %v1518_v61 = vld [vmem:[#allocation8 + $0x1b8] sm:$0xff]  ;;  %v1483_v62 = vld [vmem:[#allocation8 + $0xa0] sm:$0xff] }
  0x8c   :  { %1644 = vmatpush.msrb.mxu2 %v1550_v1  ;;  %1664 = vmatpush.msrb.mxu3 %v1582_v2  ;;  %v1507_v63 = vld [vmem:[#allocation8 + $0x160] sm:$0xff]  ;;  %v1484_v1 = vld [vmem:[#allocation8 + $0xa8] sm:$0xff] }
  0x8d   :  { %1630 = vmatpush.msra.mxu1 %v1569_v3  ;;  %1605 = vmatpush.msra.mxu0 %v1547_v4  ;;  %v1516_v2 = vld [vmem:[#allocation8 + $0x1a8] sm:$0xff]  ;;  %v1481_v4 = vld [vmem:[#allocation8 + $0x90] sm:$0xff] }
  0x8e   :  { %1645 = vmatpush.msrb.mxu2 %v1548_v5  ;;  %1665 = vmatpush.msrb.mxu3 %v1580_v6  ;;  %v1505_v5 = vld [vmem:[#allocation8 + $0x150] sm:$0xff]  ;;  %v1482_v6 = vld [vmem:[#allocation8 + $0x98] sm:$0xff] }
  0x8f   :  { %1631 = vmatpush.msra.mxu1 %v1567_v7  ;;  %1606 = vmatpush.msra.mxu0 %v1545_v8  ;;  %v1514_v7 = vld [vmem:[#allocation8 + $0x198] sm:$0xff] }
  0x90   :  { %1646 = vmatpush.msrb.mxu2 %v1546_v9  ;;  %1666 = vmatpush.msrb.mxu3 %v1578_v10  ;;  %v1479_v10 = vld [vmem:[#allocation8 + $0x80] sm:$0xff] }
  0x91   :  { %1632 = vmatpush.msra.mxu1 %v1565_v11  ;;  %1607 = vmatpush.msra.mxu0 %v1543_v12  ;;  %v1503_v11 = vld [vmem:[#allocation8 + $0x140] sm:$0xff] }
  0x92   :  { %1647 = vmatpush.msrb.mxu2 %v1544_v13  ;;  %1667 = vmatpush.msrb.mxu3 %v1576_v14  ;;  %v1480_v13 = vld [vmem:[#allocation8 + $0x88] sm:$0xff] }
  0x93   :  { %1633 = vmatpush.msra.mxu1 %v1563_v15  ;;  %1608 = vmatpush.msra.mxu0 %v1541_v16  ;;  %v1512_v14 = vld [vmem:[#allocation8 + $0x188] sm:$0xff]  ;;  %v1477_v15 = vld [vmem:[#allocation8 + $0x70] sm:$0xff] }
  0x94   :  { %1648 = vmatpush.msrb.mxu2 %v1542_v17  ;;  %1668 = vmatpush.msrb.mxu3 %v1574_v18  ;;  %v1501_v16 = vld [vmem:[#allocation8 + $0x130] sm:$0xff]  ;;  %v1478_v17 = vld [vmem:[#allocation8 + $0x78] sm:$0xff] }
  0x95   :  { %1634 = vmatpush.msra.mxu1 %v1561_v19  ;;  %1609 = vmatpush.msra.mxu0 %v1539_v20  ;;  %v1510_v18 = vld [vmem:[#allocation8 + $0x178] sm:$0xff]  ;;  %v1475_v20 = vld [vmem:[#allocation8 + $0x60] sm:$0xff] }
  0x96   :  { %1649 = vmatpush.msrb.mxu2 %v1540_v21  ;;  %1669 = vmatpush.msrb.mxu3 %v1572_v22  ;;  %v132_v19 = vld [vmem:[%s7943_s5] sm:$0x3]  ;;  %v1499_v21 = vld [vmem:[#allocation8 + $0x120] sm:$0xff]  ;;  %v1476_v22 = vld [vmem:[#allocation8 + $0x68] sm:$0xff]  ;;  %s4563_s5 = sshll.u32 %s7701_s20, 4  ;;  %s4564_s5 = int_to_ptr.hbm [resolvable:$true] %s4563_s5 }
  0x97   :  { %1705 = vmatpush.msrb.mxu1 %v1525_v23  ;;  %1610 = vmatpush.msra.mxu0 %v1537_v24  ;;  %v1508_v23 = vld [vmem:[#allocation8 + $0x168] sm:$0xff] }
  0x98   :  { %1650 = vmatpush.msrb.mxu2 %v1538_v25  ;;  %1670 = vmatpush.msrb.mxu3 %v1570_v26  ;;  %v1473_v25 = vld [vmem:[#allocation8 + $0x50] sm:$0xff] }
  0x99   :  { %1706 = vmatpush.msrb.mxu1 %v1523_v27  ;;  %1611 = vmatpush.msra.mxu0 %v1535_v28  ;;  %v1497_v26 = vld [vmem:[#allocation8 + $0x110] sm:$0xff]  ;;  %v5620_v28 = vperm.slane %v132_v19, 1 }
  0x9a   :  { %1651 = vmatpush.msrb.mxu2 %v1536_v29  ;;  %1671 = vmatpush.msrb.mxu3 %v1568_v30  ;;  %v1474_v29 = vld [vmem:[#allocation8 + $0x58] sm:$0xff] }
  0x9b   :  { %1707 = vmatpush.msrb.mxu1 %v1521_v31  ;;  %1612 = vmatpush.msra.mxu0 %v1533_v32  ;;  %v1506_v30 = vld [vmem:[#allocation8 + $0x158] sm:$0xff] }
  0x9c   :  { %1652 = vmatpush.msrb.mxu2 %v1534_v33  ;;  %1672 = vmatpush.msrb.mxu3 %v1566_v34  ;;  %v1471_v33 = vld [vmem:[#allocation8 + $0x40] sm:$0xff] }
  0x9d   :  { %1708 = vmatpush.msrb.mxu1 %v1519_v35  ;;  %1613 = vmatpush.msra.mxu0 %v1531_v36  ;;  %v1495_v34 = vld [vmem:[#allocation8 + $0x100] sm:$0xff] }
  0x9e   :  { %1653 = vmatpush.msrb.mxu2 %v1532_v37  ;;  %1673 = vmatpush.msrb.mxu3 %v1564_v38  ;;  %v5622_v37 = vperm.slane %v132_v19, 0 }
  0x9f   :  { %1709 = vmatpush.msrb.mxu1 %v1517_v39  ;;  %1614 = vmatpush.msra.mxu0 %v1529_v40  ;;  %v1472_v39 = vld [vmem:[#allocation8 + $0x48] sm:$0xff] }
  0xa0   :  { %1654 = vmatpush.msrb.mxu2 %v1530_v41  ;;  %1674 = vmatpush.msrb.mxu3 %v1562_v42  ;;  %v1504_v40 = vld [vmem:[#allocation8 + $0x148] sm:$0xff]  ;;  %v1469_v41 = vld [vmem:[#allocation8 + $0x30] sm:$0xff] }
  0xa1   :  { %1685 = vmatpush.msrb.mxu0 %v1493_v43  ;;  %1710 = vmatpush.msrb.mxu1 %v1515_v47 }
  0xa2   :  { %1725 = vmatpush.msra.mxu2 %v1494_v44  ;;  %1745 = vmatpush.msra.mxu3 %v1526_v45  ;;  %v1470_v44 = vld [vmem:[#allocation8 + $0x38] sm:$0xff] }
  0xa3   :  { %1686 = vmatpush.msrb.mxu0 %v1491_v46  ;;  %1711 = vmatpush.msrb.mxu1 %v1513_v51  ;;  %v1502_v45 = vld [vmem:[#allocation8 + $0x138] sm:$0xff]  ;;  %v1467_v46 = vld [vmem:[#allocation8 + $0x20] sm:$0xff] }
  0xa4   :  { %1726 = vmatpush.msra.mxu2 %v1492_v48  ;;  %1746 = vmatpush.msra.mxu3 %v1524_v49  ;;  %v1468_v49 = vld [vmem:[#allocation8 + $0x28] sm:$0xff] }
  0xa5   :  { %1687 = vmatpush.msrb.mxu0 %v1489_v50  ;;  %1712 = vmatpush.msrb.mxu1 %v1511_v55  ;;  %v1500_v50 = vld [vmem:[#allocation8 + $0x128] sm:$0xff]  ;;  %v1466_v55 = vld [vmem:[#allocation8 + $0x18] sm:$0xff] }
  0xa6   :  { %1727 = vmatpush.msra.mxu2 %v1490_v52  ;;  %1747 = vmatpush.msra.mxu3 %v1522_v53  ;;  %v1465_v52 = vld [vmem:[#allocation8 + $0x10] sm:$0xff] }
  0xa7   :  { %1688 = vmatpush.msrb.mxu0 %v1487_v54  ;;  %1713 = vmatpush.msrb.mxu1 %v1509_v59 }
  0xa8   :  { %1728 = vmatpush.msra.mxu2 %v1488_v56  ;;  %1748 = vmatpush.msra.mxu3 %v1520_v57  ;;  %v1498_v56 = vld [vmem:[#allocation8 + $0x118] sm:$0xff] }
  0xa9   :  { %1689 = vmatpush.msrb.mxu0 %v1485_v58  ;;  %v166_v3 = vpop.f32.mrf.mxu0  ;;  %1714 = vmatpush.msrb.mxu1 %v1507_v63  ;;  %v1496_v63 = vld [vmem:[#allocation8 + $0x108] sm:$0xff] }
  0xaa   :  { %1729 = vmatpush.msra.mxu2 %v1486_v60  ;;  %1749 = vmatpush.msra.mxu3 %v1518_v61  ;;  %v1463_v60 = vld [vmem:[#allocation8] sm:$0xff] }
  0xab   :  { %1690 = vmatpush.msrb.mxu0 %v1483_v62  ;;  %v186_v8 = vpop.f32.mrf.mxu2  ;;  %v5615_v12 = vpop.f32.mrf.mxu1  ;;  %1715 = vmatpush.msrb.mxu1 %v1505_v5  ;;  %v1464_v62 = vld [vmem:[#allocation8 + $0x8] sm:$0xff] }
  0xac   :  { %v229_v9 = vpop.f32.mrf.mxu3  ;;  %1730 = vmatpush.msra.mxu2 %v1484_v1  ;;  %1750 = vmatpush.msra.mxu3 %v1516_v2 }
  0xad   :  { %1691 = vmatpush.msrb.mxu0 %v1481_v4  ;;  %1716 = vmatpush.msrb.mxu1 %v1503_v11  ;;  %v230_v27 = vadd.f32 %v229_v9, %v186_v8 }
  0xae   :  { %1731 = vmatpush.msra.mxu2 %v1482_v6  ;;  %1751 = vmatpush.msra.mxu3 %v1514_v7 }
  0xaf   :  { %1692 = vmatpush.msrb.mxu0 %v1479_v10  ;;  %1717 = vmatpush.msrb.mxu1 %v1501_v16 }
  0xb0   :  { %1732 = vmatpush.msra.mxu2 %v1480_v13  ;;  %1752 = vmatpush.msra.mxu3 %v1512_v14 }
  0xb1   :  { %1693 = vmatpush.msrb.mxu0 %v1477_v15  ;;  %v259_v24 = vpop.f32.mrf.mxu0  ;;  %1718 = vmatpush.msrb.mxu1 %v1499_v21 }
  0xb2   :  { %1733 = vmatpush.msra.mxu2 %v1478_v17  ;;  %1753 = vmatpush.msra.mxu3 %v1510_v18 }
  0xb3   :  { %1694 = vmatpush.msrb.mxu0 %v1475_v20  ;;  %v209_v31 = vpop.f32.mrf.mxu2  ;;  %1719 = vmatpush.msrb.mxu1 %v1497_v26  ;;  %v1829_v26 = vld [vmem:[#allocation8 + $0x5f0] sm:$0xff] }
  0xb4   :  { %v279_v32 = vpop.f32.mrf.mxu3  ;;  %1734 = vmatpush.msra.mxu2 %v1476_v22  ;;  %1754 = vmatpush.msra.mxu3 %v1508_v23  ;;  %v210_v35 = vadd.f32 %v209_v31, %v166_v3  ;;  %v5624_v38 = vpop.f32.mrf.mxu1  ;;  %v1462_v22 = vld [vmem:[#allocation2] sm:$0xf] }
  0xb5   :  { %v283_v36 = vadd.f32 %v279_v32, %v230_v27  ;;  %1695 = vmatpush.msrb.mxu0 %v1473_v25  ;;  %1720 = vmatpush.msrb.mxu1 %v1495_v34  ;;  %v1797_v25 = vld [vmem:[#allocation8 + $0x4f0] sm:$0xff]  ;;  %v1830_v34 = vld [vmem:[#allocation8 + $0x5f8] sm:$0xff] }
  0xb6   :  { %1735 = vmatpush.msra.mxu2 %v1474_v29  ;;  %1755 = vmatpush.msra.mxu3 %v1506_v30  ;;  %v282_v43 = vadd.f32 %v259_v24, %v210_v35 }
  0xb7   :  { %v290_v42 = vadd.f32 %v5620_v28, %v283_v36  ;;  %1696 = vmatpush.msrb.mxu0 %v1471_v33  ;;  %v1798_v33 = vld [vmem:[#allocation8 + $0x4f8] sm:$0xff] }
  0xb8   :  { %1736 = vmatpush.msra.mxu2 %v1472_v39  ;;  %1756 = vmatpush.msra.mxu3 %v1504_v40  ;;  %v289_v48 = vadd.f32 %v5622_v37, %v282_v43  ;;  %v1827_v39 = vld [vmem:[#allocation8 + $0x5e0] sm:$0xff]  ;;  %v1796_v40 = vld [vmem:[#allocation8 + $0x4e8] sm:$0xff]  ;;  %v1825_v43 = vld [vmem:[#allocation8 + $0x5d0] sm:$0xff] }
  0xb9   :  { %vm292_vm1 = vcmp.ge.f32.partialorder %v290_v42, 0.0  ;;  %v294_v47 = vmul.f32 0.1, %v290_v42  ;;  %1697 = vmatpush.msrb.mxu0 %v1469_v41  ;;  %v380_v51 = vpop.f32.mrf.mxu0  ;;  %v1828_v41 = vld [vmem:[#allocation8 + $0x5e8] sm:$0xff] }
  0xba   :  { %1737 = vmatpush.msra.mxu2 %v1470_v44  ;;  %1757 = vmatpush.msra.mxu3 %v1502_v45  ;;  %vm291_vm2 = vcmp.ge.f32.partialorder %v289_v48, 0.0  ;;  %v293_v54 = vmul.f32 0.1, %v289_v48 }
  0xbb   :  { %v296_v53 = vsel %vm292_vm1, %v290_v42, %v294_v47  ;;  %1698 = vmatpush.msrb.mxu0 %v1467_v46  ;;  %v337_v59 = vpop.f32.mrf.mxu2  ;;  %v1793_v42 = vld [vmem:[#allocation8 + $0x4d0] sm:$0xff] }
  0xbc   :  { %v299_v57 = vrot.slane %v296_v53, 6  ;;  %v357_v58 = vpop.f32.mrf.mxu3  ;;  %1738 = vmatpush.msra.mxu2 %v1468_v49  ;;  %1758 = vmatpush.msra.mxu3 %v1500_v50  ;;  %v295_v61 = vsel %vm291_vm2, %v289_v48, %v293_v54  ;;  %v614_v2 = vpop.f32.mrf.mxu1  ;;  %v381_v4 = vadd.f32 %v380_v51, %v337_v59  ;;  %v1794_v48 = vld [vmem:[#allocation8 + $0x4d8] sm:$0xff]  ;;  %v1791_v54 = vld [vmem:[#allocation8 + $0x4c0] sm:$0xff] }
  0xbd   :  { %1699 = vmatpush.msrb.mxu0 %v1465_v52  ;;  %v401_v3 = vadd.f32 %v5615_v12, %v357_v58  ;;  %v1826_v49 = vld [vmem:[#allocation8 + $0x5d8] sm:$0xff]  ;;  %v1824_v58 = vld [vmem:[#allocation8 + $0x5c8] sm:$0xff] }
  0xbe   :  { %v301_v1 = vsel %vm300_vm3, %v295_v61, %v299_v57  ;;  %1739 = vmatpush.msra.mxu2 %v1466_v55  ;;  %1759 = vmatpush.msra.mxu3 %v1498_v56  ;;  %v1823_v55 = vld [vmem:[#allocation8 + $0x5c0] sm:$0xff]  ;;  %v1792_v57 = vld [vmem:[#allocation8 + $0x4c8] sm:$0xff] }
  0xbf   :  { %303 = vst [vmem:[#allocation13] sm:$0xf] %v301_v1  ;;  %1700 = vmatpush.msrb.mxu0 %v1463_v60 }
  0xc0   :  { %305 = vst [vmem:[#allocation2 + $0x4] sm:$0xf] %v301_v1  ;;  %1740 = vmatpush.msra.mxu2 %v1464_v62  ;;  %1760 = vmatpush.msra.mxu3 %v1496_v63  ;;  %v1789_v62 = vld [vmem:[#allocation8 + $0x4b0] sm:$0xff] }
  0xc1   :  { %v502_v5 = vpop.f32.mrf.mxu0  ;;  %v1821_v63 = vld [vmem:[#allocation8 + $0x5b0] sm:$0xff] }
  0xc3   :  { %v429_v7 = vpop.f32.mrf.mxu2 }
  0xc4   :  { %v449_v6 = vpop.f32.mrf.mxu3  ;;  %v452_v9 = vadd.f32 %v429_v7, %v381_v4  ;;  %v5632_v16 = vpop.f32.mrf.mxu1  ;;  %v1822_v4 = vld [vmem:[#allocation8 + $0x5b8] sm:$0xff]  ;;  %v1787_v7 = vld [vmem:[#allocation8 + $0x4a0] sm:$0xff] }
  0xc5   :  { %v453_v8 = vadd.f32 %v449_v6, %v401_v3  ;;  %v1790_v3 = vld [vmem:[#allocation8 + $0x4b8] sm:$0xff] }
  0xc6   :  { %v454_v13 = vadd.f32 %v452_v9, %v5622_v37  ;;  %v1788_v9 = vld [vmem:[#allocation8 + $0x4a8] sm:$0xff] }
  0xc7   :  { %v1527_v10 = vld [vmem:[#allocation2 + $0x4] sm:$0xf]  ;;  %v455_v11 = vadd.f32 %v453_v8, %v5620_v28  ;;  %v1819_v8 = vld [vmem:[#allocation8 + $0x5a0] sm:$0xff] }
  0xc8   :  { %1594 = vst [vmem:[#allocation1] ss:$4 sm:$0xff] %v1527_v10  ;;  %vm456_vm5 = vcmp.ge.f32.partialorder %v454_v13, 0.0  ;;  %v458_v15 = vmul.f32 0.1, %v454_v13  ;;  %v1820_v10 = vld [vmem:[#allocation8 + $0x5a8] sm:$0xff] }
  0xc9   :  { %vm457_vm4 = vcmp.ge.f32.partialorder %v455_v11, 0.0  ;;  %v459_v14 = vmul.f32 0.1, %v455_v11  ;;  %v594_v17 = vpop.f32.mrf.mxu0 }
  0xca   :  { %v460_v19 = vsel %vm456_vm5, %v454_v13, %v458_v15  ;;  %v1817_v15 = vld [vmem:[#allocation8 + $0x590] sm:$0xff] }
  0xcb   :  { %v461_v12 = vsel %vm457_vm4, %v455_v11, %v459_v14  ;;  %v545_v21 = vpop.f32.mrf.mxu2  ;;  %v1785_v14 = vld [vmem:[#allocation8 + $0x490] sm:$0xff] }
  0xcc   :  { %v464_v18 = vrot.slane %v461_v12, 6  ;;  %v565_v20 = vpop.f32.mrf.mxu3  ;;  %v546_v24 = vadd.f32 %v545_v21, %v502_v5  ;;  %v5638_v47 = vpop.f32.mrf.mxu1  ;;  %v1815_v21 = vld [vmem:[#allocation8 + $0x580] sm:$0xff] }
  0xcd   :  { %v566_v23 = vadd.f32 %v565_v20, %v5624_v38  ;;  %v1795_v38 = vld [vmem:[#allocation8 + $0x4e0] sm:$0xff] }
  0xce   :  { %v465_v30 = vsel %vm300_vm3, %v460_v19, %v464_v18  ;;  %v617_v32 = vadd.f32 %v594_v17, %v546_v24  ;;  %v1818_v19 = vld [vmem:[#allocation8 + $0x598] sm:$0xff]  ;;  %v1783_v20 = vld [vmem:[#allocation8 + $0x480] sm:$0xff]  ;;  %v1816_v24 = vld [vmem:[#allocation8 + $0x588] sm:$0xff] }
  0xcf   :  { %v1595_v27 = vld.sshfl [vmem:[#allocation1] sm:$0xff pattern:$0x73625140]  ;;  %v1596_v29 = vld.sshfl [vmem:[#allocation1 + $0x8] sm:$0xff pattern:$0x73625140]  ;;  %v618_v31 = vadd.f32 %v614_v2, %v566_v23 }
  0xd0   :  { %1680 = vst [vmem:[#allocation1] ss:$4 sm:$0xff] %v1462_v22  ;;  %1615 = vmatmul.f32.vlgmr.msra.gmra.mxu0 %v1595_v27  ;;  %1635 = vmatmul.f32.vlgmr.msra.gmra.mxu1 %v1596_v29  ;;  %v619_v36 = vadd.f32 %v617_v32, %v5622_v37  ;;  %v1784_v23 = vld [vmem:[#allocation8 + $0x488] sm:$0xff] }
  0xd1   :  { %468 = vst [vmem:[#allocation13 + $0x4] sm:$0xf] %v465_v30  ;;  %v620_v35 = vadd.f32 %v618_v31, %v5620_v28  ;;  %1655 = vmatmul.f32.vlgmr.msrb.gmra.mxu2 %v1595_v27  ;;  %1675 = vmatmul.f32.vlgmr.msrb.gmra.mxu3 %v1596_v29  ;;  %v710_v44 = vpop.f32.mrf.mxu0  ;;  %v1813_v27 = vld [vmem:[#allocation8 + $0x570] sm:$0xff]  ;;  %v1782_v29 = vld [vmem:[#allocation8 + $0x478] sm:$0xff] }
  0xd2   :  { %470 = vst [vmem:[#allocation2 + $0x8] sm:$0xf] %v465_v30  ;;  %1837 = vmatpush.msra.mxu0 %v1797_v25  ;;  %1857 = vmatpush.msra.mxu1 %v1829_v26  ;;  %vm621_vm7 = vcmp.ge.f32.partialorder %v619_v36, 0.0  ;;  %v623_v46 = vmul.f32 0.1, %v619_v36  ;;  %v1781_v26 = vld [vmem:[#allocation8 + $0x470] sm:$0xff] }
  0xd3   :  { %vm622_vm6 = vcmp.ge.f32.partialorder %v620_v35, 0.0  ;;  %v624_v45 = vmul.f32 0.1, %v620_v35  ;;  %1877 = vmatpush.msrb.mxu2 %v1798_v33  ;;  %1897 = vmatpush.msrb.mxu3 %v1830_v34  ;;  %v667_v51 = vpop.f32.mrf.mxu2  ;;  %v1814_v30 = vld [vmem:[#allocation8 + $0x578] sm:$0xff] }
  0xd4   :  { %1838 = vmatpush.msra.mxu0 %v1795_v38  ;;  %1858 = vmatpush.msra.mxu1 %v1827_v39  ;;  %v687_v50 = vpop.f32.mrf.mxu3  ;;  %v625_v53 = vsel %vm621_vm7, %v619_v36, %v623_v46  ;;  %v711_v5 = vadd.f32 %v710_v44, %v667_v51  ;;  %v944_v18 = vpop.f32.mrf.mxu1  ;;  %v1779_v38 = vld [vmem:[#allocation8 + $0x460] sm:$0xff] }
  0xd5   :  { %v626_v52 = vsel %vm622_vm6, %v620_v35, %v624_v45  ;;  %1878 = vmatpush.msrb.mxu2 %v1796_v40  ;;  %1898 = vmatpush.msrb.mxu3 %v1828_v41  ;;  %v731_v2 = vadd.f32 %v5632_v16, %v687_v50  ;;  %v1786_v16 = vld [vmem:[#allocation8 + $0x498] sm:$0xff]  ;;  %v1811_v39 = vld [vmem:[#allocation8 + $0x560] sm:$0xff]  ;;  %v5650_v41 = vld [vmem:[#allocation8 + $0x468] sm:$0xff] }
  0xd6   :  { %v629_v56 = vrot.slane %v626_v52, 6  ;;  %1839 = vmatpush.msra.mxu0 %v1793_v42  ;;  %1859 = vmatpush.msra.mxu1 %v1825_v43  ;;  %v5652_v42 = vld [vmem:[#allocation8 + $0x568] sm:$0xff]  ;;  %v5661_v52 = vld [vmem:[#allocation8 + $0x458] sm:$0xff] }
  0xd7   :  { %v1681_v59 = vld.sshfl [vmem:[#allocation1] sm:$0xff pattern:$0x73625140]  ;;  %v1682_v60 = vld.sshfl [vmem:[#allocation1 + $0x8] sm:$0xff pattern:$0x73625140]  ;;  %1879 = vmatpush.msrb.mxu2 %v1794_v48  ;;  %1899 = vmatpush.msrb.mxu3 %v1826_v49 }
  0xd8   :  { %v630_v61 = vsel %vm300_vm3, %v625_v53, %v629_v56  ;;  %1840 = vmatpush.msra.mxu0 %v1791_v54  ;;  %1860 = vmatpush.msra.mxu1 %v1823_v55  ;;  %v5655_v48 = vld [vmem:[#allocation8 + $0x450] sm:$0xff]  ;;  %v5663_v53 = vld [vmem:[#allocation8 + $0x558] sm:$0xff]  ;;  %v5668_v55 = vld [vmem:[#allocation8 + $0x440] sm:$0xff] }
  0xd9   :  { %v1765_v1 = vld [vmem:[#allocation2 + $0x8] sm:$0xf]  ;;  %633 = vst [vmem:[#allocation13 + $0x8] sm:$0xf] %v630_v61  ;;  %1880 = vmatpush.msrb.mxu2 %v1792_v57  ;;  %1900 = vmatpush.msrb.mxu3 %v1824_v58  ;;  %v5642_v6 = vpop.f32.mrf.mxu0  ;;  %v5670_v56 = vld [vmem:[#allocation8 + $0x540] sm:$0xff] }
  0xda   :  { %1832 = vst [vmem:[#allocation1] ss:$4 sm:$0xff] %v1765_v1  ;;  %1701 = vmatmul.f32.vlgmr.msrb.gmra.mxu0 %v1681_v59  ;;  %1741 = vmatmul.f32.vlgmr.msra.gmra.mxu2 %v1681_v59  ;;  %v5657_v49 = vld [vmem:[#allocation8 + $0x550] sm:$0xff]  ;;  %v5674_v59 = vld [vmem:[#allocation8 + $0x448] sm:$0xff]  ;;  %v5685_v1 = vld [vmem:[#allocation8 + $0x438] sm:$0xff] }
  0xdb   :  { %635 = vst [vmem:[#allocation2 + $0xc] sm:$0xf] %v630_v61  ;;  %1841 = vmatpush.msra.mxu0 %v1789_v62  ;;  %1861 = vmatpush.msra.mxu1 %v1821_v63  ;;  %v759_v13 = vpop.f32.mrf.mxu2  ;;  %v5681_v62 = vld [vmem:[#allocation8 + $0x430] sm:$0xff] }
  0xdc   :  { %1881 = vmatpush.msrb.mxu2 %v1790_v3  ;;  %1901 = vmatpush.msrb.mxu3 %v1822_v4  ;;  %v779_v11 = vpop.f32.mrf.mxu3  ;;  %v782_v12 = vadd.f32 %v759_v13, %v711_v5  ;;  %v1060_v58 = vpop.f32.mrf.mxu1  ;;  %v5683_v63 = vld [vmem:[#allocation8 + $0x530] sm:$0xff]  ;;  %v5690_v3 = vld [vmem:[#allocation8 + $0x538] sm:$0xff]  ;;  %v5692_v4 = vld [vmem:[#allocation8 + $0x420] sm:$0xff] }
  0xdd   :  { %1721 = vmatmul.f32.vlgmr.msrb.gmra.mxu1 %v1682_v60  ;;  %1761 = vmatmul.f32.vlgmr.msra.gmra.mxu3 %v1682_v60  ;;  %v783_v17 = vadd.f32 %v779_v11, %v731_v2  ;;  %v5676_v60 = vld [vmem:[#allocation8 + $0x548] sm:$0xff]  ;;  %v5694_v5 = vld [vmem:[#allocation8 + $0x520] sm:$0xff] }
  0xde   :  { %1842 = vmatpush.msra.mxu0 %v1787_v7  ;;  %1862 = vmatpush.msra.mxu1 %v1819_v8  ;;  %v784_v25 = vadd.f32 %v782_v12, %v5622_v37 }
  0xdf   :  { %1882 = vmatpush.msrb.mxu2 %v1788_v9  ;;  %1902 = vmatpush.msrb.mxu3 %v1820_v10  ;;  %v785_v22 = vadd.f32 %v783_v17, %v5620_v28  ;;  %v5700_v9 = vld [vmem:[#allocation8 + $0x428] sm:$0xff]  ;;  %v5708_v17 = vld [vmem:[#allocation8 + $0x510] sm:$0xff] }
  0xe0   :  { %1843 = vmatpush.msra.mxu0 %v1785_v14  ;;  %1863 = vmatpush.msra.mxu1 %v1817_v15  ;;  %vm786_vm9 = vcmp.ge.f32.partialorder %v784_v25, 0.0  ;;  %v788_v36 = vmul.f32 0.1, %v784_v25  ;;  %v5702_v10 = vld [vmem:[#allocation8 + $0x528] sm:$0xff] }
  0xe1   :  { %v5646_v31 = vld.sshfl [vmem:[#allocation1] sm:$0xff pattern:$0x73625140]  ;;  %v5648_v32 = vld.sshfl [vmem:[#allocation1 + $0x8] sm:$0xff pattern:$0x73625140]  ;;  %1883 = vmatpush.msrb.mxu2 %v1786_v16  ;;  %1903 = vmatpush.msrb.mxu3 %v1818_v19  ;;  %v924_v35 = vpop.f32.mrf.mxu0 }
  0xe2   :  { %v2005_v33 = vld [vmem:[#allocation2 + $0xc] sm:$0xf]  ;;  %vm787_vm8 = vcmp.ge.f32.partialorder %v785_v22, 0.0  ;;  %v789_v34 = vmul.f32 0.1, %v785_v22  ;;  %1844 = vmatpush.msra.mxu0 %v1783_v20  ;;  %1864 = vmatpush.msra.mxu1 %v1815_v21  ;;  %v790_v46 = vsel %vm786_vm9, %v784_v25, %v788_v36  ;;  %v5714_v19 = vld [vmem:[#allocation8 + $0x518] sm:$0xff] }
  0xe3   :  { %2071 = vst [vmem:[#allocation1] ss:$4 sm:$0xff] %v2005_v33  ;;  %1884 = vmatpush.msrb.mxu2 %v1784_v23  ;;  %1904 = vmatpush.msrb.mxu3 %v1816_v24  ;;  %v875_v44 = vpop.f32.mrf.mxu2  ;;  %v5706_v16 = vld [vmem:[#allocation8 + $0x410] sm:$0xff]  ;;  %v5716_v20 = vld [vmem:[#allocation8 + $0x400] sm:$0xff]  ;;  %v5724_v23 = vld [vmem:[#allocation8 + $0x508] sm:$0xff] }
  0xe4   :  { %v791_v40 = vsel %vm787_vm8, %v785_v22, %v789_v34  ;;  %1845 = vmatpush.msra.mxu0 %v1781_v26  ;;  %1865 = vmatpush.msra.mxu1 %v1813_v27  ;;  %v895_v43 = vpop.f32.mrf.mxu3  ;;  %v876_v51 = vadd.f32 %v875_v44, %v5642_v6  ;;  %v5720_v21 = vld [vmem:[#allocation8 + $0x500] sm:$0xff]  ;;  %v5722_v22 = vld [vmem:[#allocation8 + $0x408] sm:$0xff]  ;;  %v5745_v36 = vld [vmem:[#allocation8 + $0x3f0] sm:$0xff] }
  0xe5   :  { %v794_v45 = vrot.slane %v791_v40, 6  ;;  %1885 = vmatpush.msrb.mxu2 %v1782_v29  ;;  %1905 = vmatpush.msrb.mxu3 %v1814_v30  ;;  %v896_v50 = vadd.f32 %v895_v43, %v5638_v47  ;;  %v5735_v30 = vpop.f32.mrf.mxu1  ;;  %v1940_v33 = vld [vmem:[#allocation2 + $0x8] sm:$0xf]  ;;  %v5755_v44 = vld [vmem:[#allocation8 + $0x2e0] sm:$0xff] }
  0xe6   :  { %1846 = vmatpush.msra.mxu0 %v1779_v38  ;;  %1866 = vmatpush.msra.mxu1 %v1811_v39  ;;  %v947_v47 = vadd.f32 %v924_v35, %v876_v51  ;;  %v5743_v35 = vld [vmem:[#allocation8 + $0x2f0] sm:$0xff]  ;;  %v5749_v38 = vld [vmem:[#allocation8 + $0x2f8] sm:$0xff]  ;;  %v5761_v51 = vld [vmem:[#allocation8 + $0x2e8] sm:$0xff] }
  0xe7   :  { %v795_v54 = vsel %vm300_vm3, %v790_v46, %v794_v45  ;;  %1886 = vmatpush.msrb.mxu2 %v5650_v41  ;;  %1906 = vmatpush.msrb.mxu3 %v5652_v42  ;;  %v948_v57 = vadd.f32 %v944_v18, %v896_v50  ;;  %v5712_v18 = vld [vmem:[#allocation8 + $0x418] sm:$0xff]  ;;  %v5757_v45 = vld [vmem:[#allocation8 + $0x3e0] sm:$0xff] }
  0xe8   :  { %798 = vst [vmem:[#allocation13 + $0xc] sm:$0xf] %v795_v54  ;;  %1847 = vmatpush.msra.mxu0 %v5655_v48  ;;  %1867 = vmatpush.msra.mxu1 %v5657_v49  ;;  %v949_v2 = vadd.f32 %v947_v47, %v5622_v37  ;;  %v5751_v39 = vld [vmem:[#allocation8 + $0x3f8] sm:$0xff] }
  0xe9   :  { %800 = vst [vmem:[#allocation2 + $0x10] sm:$0xf] %v795_v54  ;;  %1887 = vmatpush.msrb.mxu2 %v5661_v52  ;;  %1907 = vmatpush.msrb.mxu3 %v5663_v53  ;;  %v950_v61 = vadd.f32 %v948_v57, %v5620_v28  ;;  %v1040_v6 = vpop.f32.mrf.mxu0  ;;  %v5763_v54 = vld [vmem:[#allocation8 + $0x3e8] sm:$0xff] }
  0xea   :  { %1848 = vmatpush.msra.mxu0 %v5668_v55  ;;  %1868 = vmatpush.msra.mxu1 %v5670_v56  ;;  %vm951_vm11 = vcmp.ge.f32.partialorder %v949_v2, 0.0  ;;  %v953_v8 = vmul.f32 0.1, %v949_v2  ;;  %v5729_v25 = vld.sshfl [vmem:[#allocation1] sm:$0xff pattern:$0x73625140] }
  0xeb   :  { %1888 = vmatpush.msrb.mxu2 %v5674_v59  ;;  %1908 = vmatpush.msrb.mxu3 %v5676_v60  ;;  %vm952_vm10 = vcmp.ge.f32.partialorder %v950_v61, 0.0  ;;  %v954_v7 = vmul.f32 0.1, %v950_v61  ;;  %v997_v13 = vpop.f32.mrf.mxu2  ;;  %v5731_v26 = vld.sshfl [vmem:[#allocation1 + $0x8] sm:$0xff pattern:$0x73625140] }
  0xec   :  { %1849 = vmatpush.msra.mxu0 %v5681_v62  ;;  %1869 = vmatpush.msra.mxu1 %v5683_v63  ;;  %v1017_v11 = vpop.f32.mrf.mxu3  ;;  %v955_v15 = vsel %vm951_vm11, %v949_v2, %v953_v8  ;;  %v1041_v29 = vadd.f32 %v1040_v6, %v997_v13  ;;  %2157 = vst [vmem:[#allocation1] ss:$4 sm:$0xff] %v1940_v33  ;;  %v5781_v6 = vld [vmem:[#allocation8 + $0x2c0] sm:$0xff]  ;;  %v5787_v8 = vld [vmem:[#allocation8 + $0x2c8] sm:$0xff] }
  0xed   :  { %v956_v14 = vsel %vm952_vm10, %v950_v61, %v954_v7  ;;  %1889 = vmatpush.msrb.mxu2 %v5685_v1  ;;  %1909 = vmatpush.msrb.mxu3 %v5690_v3  ;;  %v1061_v27 = vadd.f32 %v1060_v58, %v1017_v11  ;;  %v5775_v58 = vld [vmem:[#allocation8 + $0x2d8] sm:$0xff]  ;;  %7946 = vst [vmem:[#allocation34_spill] sm:$0xff] %v5781_v6  ;;  %v5783_v7 = vld [vmem:[#allocation8 + $0x3c0] sm:$0xff]  ;;  %v5789_v11 = vld [vmem:[#allocation8 + $0x3c8] sm:$0xff] }
  0xee   :  { %v959_v12 = vrot.slane %v956_v14, 6  ;;  %1850 = vmatpush.msra.mxu0 %v5692_v4  ;;  %1870 = vmatpush.msra.mxu1 %v5694_v5  ;;  %7944 = vst [vmem:[#allocation32_spill] sm:$0xff] %v5775_v58  ;;  %v5777_v61 = vld [vmem:[#allocation8 + $0x3d8] sm:$0xff]  ;;  %v5791_v14 = vld [vmem:[#allocation8 + $0x2b0] sm:$0xff] }
  0xef   :  { %1890 = vmatpush.msrb.mxu2 %v5700_v9  ;;  %1910 = vmatpush.msrb.mxu3 %v5702_v10  ;;  %7945 = vst [vmem:[#allocation33_spill] sm:$0xff] %v5777_v61 }
  0xf0   :  { %v960_v24 = vsel %vm300_vm3, %v955_v15, %v959_v12  ;;  %1851 = vmatpush.msra.mxu0 %v5706_v16  ;;  %1871 = vmatpush.msra.mxu1 %v5708_v17  ;;  %7947 = vst [vmem:[#allocation35_spill] sm:$0xff] %v5783_v7  ;;  %v2242_v15 = vld [vmem:[#allocation2 + $0x10] sm:$0xf] }
  0xf1   :  { %963 = vst [vmem:[#allocation13 + $0x10] sm:$0xf] %v960_v24  ;;  %1891 = vmatpush.msrb.mxu2 %v5712_v18  ;;  %1911 = vmatpush.msrb.mxu3 %v5714_v19  ;;  %v5739_v34 = vpop.f32.mrf.mxu0 }
  0xf2   :  { %965 = vst [vmem:[#allocation2 + $0x14] sm:$0xf] %v960_v24  ;;  %1852 = vmatpush.msra.mxu0 %v5716_v20  ;;  %1872 = vmatpush.msra.mxu1 %v5720_v21  ;;  %v5795_v24 = vld [vmem:[#allocation8 + $0x3b0] sm:$0xff] }
  0xf3   :  { %1892 = vmatpush.msrb.mxu2 %v5722_v22  ;;  %1912 = vmatpush.msrb.mxu3 %v5724_v23  ;;  %v1089_v43 = vpop.f32.mrf.mxu2  ;;  %7948 = vst [vmem:[#allocation36_spill] sm:$0xff] %v5787_v8  ;;  %v5797_v33 = vld.sshfl [vmem:[#allocation1] sm:$0xff pattern:$0x73625140] }
  0xf4   :  { %1853 = vmatmul.f32.vlgmr.msra.gmra.mxu0 %v5646_v31  ;;  %1873 = vmatmul.f32.vlgmr.msra.gmra.mxu1 %v5648_v32  ;;  %v1109_v40 = vpop.f32.mrf.mxu3  ;;  %v1112_v50 = vadd.f32 %v1089_v43, %v1041_v29  ;;  %7949 = vst [vmem:[#allocation37_spill] sm:$0xff] %v5789_v11 }
  0xf5   :  { %1893 = vmatmul.f32.vlgmr.msrb.gmra.mxu2 %v5646_v31  ;;  %1913 = vmatmul.f32.vlgmr.msrb.gmra.mxu3 %v5648_v32  ;;  %v1113_v46 = vadd.f32 %v1109_v40, %v1061_v27  ;;  %v5767_v31 = vld [vmem:[#allocation8 + $0x2d0] sm:$0xff]  ;;  %7950 = vst [vmem:[#allocation38_spill] sm:$0xff] %v5791_v14  ;;  %v1274_v27 = vpop.f32.mrf.mxu1 }
  0xf6   :  { %2076 = vmatpush.msrb.mxu0 %v5743_v35  ;;  %2096 = vmatpush.msrb.mxu1 %v5745_v36  ;;  %v5769_v32 = vld [vmem:[#allocation8 + $0x3d0] sm:$0xff]  ;;  %v1114_v47 = vadd.f32 %v1112_v50, %v5622_v37  ;;  %7951 = vst [vmem:[#allocation39_spill] sm:$0xff] %v5795_v24  ;;  %v5804_v50 = vld [vmem:[#allocation8 + $0x3b8] sm:$0xff] }
  0xf7   :  { %2116 = vmatpush.msra.mxu2 %v5749_v38  ;;  %2136 = vmatpush.msra.mxu3 %v5751_v39  ;;  %v1115_v57 = vadd.f32 %v1113_v46, %v5620_v28  ;;  %v5802_v46 = vld [vmem:[#allocation8 + $0x2b8] sm:$0xff]  ;;  %7953 = vst [vmem:[#allocation41_spill] sm:$0xff] %v5804_v50 }
  0xf8   :  { %2077 = vmatpush.msrb.mxu0 %v5755_v44  ;;  %2097 = vmatpush.msrb.mxu1 %v5757_v45  ;;  %vm1116_vm13 = vcmp.ge.f32.partialorder %v1114_v47, 0.0  ;;  %v1118_v13 = vmul.f32 0.1, %v1114_v47  ;;  %7952 = vst [vmem:[#allocation40_spill] sm:$0xff] %v5802_v46 }
  0xf9   :  { %2117 = vmatpush.msra.mxu2 %v5761_v51  ;;  %2137 = vmatpush.msra.mxu3 %v5763_v54  ;;  %vm1117_vm12 = vcmp.ge.f32.partialorder %v1115_v57, 0.0  ;;  %v1119_v2 = vmul.f32 0.1, %v1115_v57  ;;  %v1254_v29 = vpop.f32.mrf.mxu0 }
  0xfa   :  { %2078 = vmatpush.msrb.mxu0 %v5767_v31  ;;  %2098 = vmatpush.msrb.mxu1 %v5769_v32  ;;  %v1120_v43 = vsel %vm1116_vm13, %v1114_v47, %v1118_v13  ;;  %v5819_v13 = vld [vmem:[#allocation8 + $0x2a8] sm:$0xff]  ;;  %vm4160_vm13 = vcmask 523264  }
  0xfb   :  { %2118 = vmatpush.msra.mxu2 %v5775_v58  ;;  %2138 = vmatpush.msra.mxu3 %v5777_v61  ;;  %v1121_v12 = vsel %vm1117_vm12, %v1115_v57, %v1119_v2  ;;  %v1205_v61 = vpop.f32.mrf.mxu2  ;;  %v5808_v57 = vld [vmem:[#allocation8 + $0x2a0] sm:$0xff]  ;;  %7956 = vst [vmem:[#allocation44_spill] sm:$0xff] %v5819_v13  ;;  %vm121_vm12 = vcmask 517120  }
  0xfc   :  { %v1124_v40 = vrot.slane %v1121_v12, 6  ;;  %2079 = vmatpush.msrb.mxu0 %v5781_v6  ;;  %2099 = vmatpush.msrb.mxu1 %v5783_v7  ;;  %v1225_v0 = vpop.f32.mrf.mxu3  ;;  %7954 = vst [vmem:[#allocation42_spill] sm:$0xff] %v5808_v57  ;;  %v5810_v2 = vld [vmem:[#allocation8 + $0x3a0] sm:$0xff]  ;;  %v1206_v7 = vadd.f32 %v1205_v61, %v5739_v34 }
  0xfd   :  { %2119 = vmatpush.msra.mxu2 %v5787_v8  ;;  %2139 = vmatpush.msra.mxu3 %v5789_v11  ;;  %7955 = vst [vmem:[#allocation43_spill] sm:$0xff] %v5810_v2  ;;  %v1226_v12 = vadd.f32 %v1225_v0, %v5735_v30  ;;  %v5814_v6 = vld.sshfl [vmem:[#allocation1 + $0x8] sm:$0xff pattern:$0x73625140]  ;;  %v5825_v0 = vld [vmem:[#allocation8 + $0x290] sm:$0xff] }
  0xfe   :  { %v1125_v47 = vsel %vm300_vm3, %v1120_v43, %v1124_v40  ;;  %2080 = vmatpush.msrb.mxu0 %v5791_v14  ;;  %2100 = vmatpush.msrb.mxu1 %v5795_v24  ;;  %v5821_v8 = vld [vmem:[#allocation8 + $0x3a8] sm:$0xff]  ;;  %2308 = vst [vmem:[#allocation1] ss:$4 sm:$0xff] %v2242_v15  ;;  %v5827_v30 = vld [vmem:[#allocation8 + $0x390] sm:$0xff]  ;;  %v1277_v61 = vadd.f32 %v1254_v29, %v1206_v7  ;;  %v5831_v40 = vld [vmem:[#allocation8 + $0x298] sm:$0xff] }
  0xff   :  { %7957 = vst [vmem:[#allocation45_spill] sm:$0xff] %v5821_v8  ;;  %2120 = vmatpush.msra.mxu2 %v5802_v46  ;;  %2140 = vmatpush.msra.mxu3 %v5804_v50  ;;  %v1278_v34 = vadd.f32 %v1274_v27, %v1226_v12  ;;  %v5833_v43 = vld [vmem:[#allocation8 + $0x398] sm:$0xff]  ;;  %v5837_v15 = vld [vmem:[#allocation8 + $0x280] sm:$0xff]  ;;  %v5841_v46 = vld [vmem:[#allocation8 + $0x288] sm:$0xff] }
 0x100   :  { %1128 = vst [vmem:[#allocation13 + $0x14] sm:$0xf] %v1125_v47  ;;  %2081 = vmatpush.msrb.mxu0 %v5808_v57  ;;  %2101 = vmatpush.msrb.mxu1 %v5810_v2  ;;  %v5839_v50 = vld [vmem:[#allocation8 + $0x380] sm:$0xff]  ;;  %v1279_v27 = vadd.f32 %v1277_v61, %v5622_v37  ;;  %v5847_v29 = vld [vmem:[#allocation8 + $0x388] sm:$0xff]  ;;  %v5849_v12 = vld [vmem:[#allocation8 + $0x270] sm:$0xff] }
 0x101   :  { %7958 = vst [vmem:[#allocation46_spill] sm:$0xff] %v5825_v0  ;;  %2121 = vmatpush.msra.mxu2 %v5819_v13  ;;  %2141 = vmatpush.msra.mxu3 %v5821_v8  ;;  %v1280_v7 = vadd.f32 %v1278_v34, %v5620_v28  ;;  %v5857_v61 = vld [vmem:[#allocation8 + $0x278] sm:$0xff]  ;;  %v5863_v2 = vld [vmem:[#allocation8 + $0x260] sm:$0xff]  ;;  %v5873_v14 = vld [vmem:[#allocation8 + $0x250] sm:$0xff]  ;;  %v1370_v11 = vpop.f32.mrf.mxu0 }
 0x102   :  { %7959 = vst [vmem:[#allocation47_spill] sm:$0xff] %v5827_v30  ;;  %2082 = vmatpush.msrb.mxu0 %v5825_v0  ;;  %2102 = vmatpush.msrb.mxu1 %v5827_v30  ;;  %vm1281_vm15 = vcmp.ge.f32.partialorder %v1279_v27, 0.0  ;;  %v1283_v34 = vmul.f32 0.1, %v1279_v27  ;;  %v5859_v30 = vld [vmem:[#allocation8 + $0x378] sm:$0xff]  ;;  %v5865_v57 = vld [vmem:[#allocation8 + $0x360] sm:$0xff] }
 0x103   :  { %1130 = vst [vmem:[#allocation2 + $0x18] sm:$0xf] %v1125_v47  ;;  %v5851_v47 = vld [vmem:[#allocation8 + $0x370] sm:$0xff]  ;;  %2122 = vmatpush.msra.mxu2 %v5831_v40  ;;  %2142 = vmatpush.msra.mxu3 %v5833_v43  ;;  %vm1282_vm14 = vcmp.ge.f32.partialorder %v1280_v7, 0.0  ;;  %v1284_v8 = vmul.f32 0.1, %v1280_v7  ;;  %v1327_v13 = vpop.f32.mrf.mxu2 }
 0x104   :  { %7960 = vst [vmem:[#allocation48_spill] sm:$0xff] %v5831_v40  ;;  %2083 = vmatpush.msrb.mxu0 %v5837_v15  ;;  %2103 = vmatpush.msrb.mxu1 %v5839_v50  ;;  %v1347_v0 = vpop.f32.mrf.mxu3 }
 0x105   :  { %7961 = vst [vmem:[#allocation49_spill] sm:$0xff] %v5833_v43  ;;  %2123 = vmatpush.msra.mxu2 %v5841_v46  ;;  %2143 = vmatpush.msra.mxu3 %v5847_v29  ;;  %v1286_v40 = vsel %vm1282_vm14, %v1280_v7, %v1284_v8  ;;  %v1285_v43 = vsel %vm1281_vm15, %v1279_v27, %v1283_v34  ;;  %v5877_v8 = vld [vmem:[#allocation8 + $0x350] sm:$0xff]  ;;  %v5879_v7 = vld [vmem:[#allocation8 + $0x258] sm:$0xff]  ;;  %v5894_v58 = vld.sshfl [vmem:[#allocation1 + $0x8] sm:$0xff pattern:$0x73625140] }
 0x106   :  { %7962 = vst [vmem:[#allocation50_spill] sm:$0xff] %v5837_v15  ;;  %v1289_v24 = vrot.slane %v1286_v40, 6  ;;  %2084 = vmatpush.msrb.mxu0 %v5849_v12  ;;  %2104 = vmatpush.msrb.mxu1 %v5851_v47  ;;  %v5871_v15 = vld [vmem:[#allocation8 + $0x368] sm:$0xff]  ;;  %v5881_v40 = vld [vmem:[#allocation8 + $0x358] sm:$0xff] }
 0x107   :  { %7963 = vst [vmem:[#allocation51_spill] sm:$0xff] %v5839_v50  ;;  %v5869_v50 = vld [vmem:[#allocation8 + $0x268] sm:$0xff]  ;;  %2124 = vmatpush.msra.mxu2 %v5857_v61  ;;  %2144 = vmatpush.msra.mxu3 %v5859_v30  ;;  %v2477_v27 = vld [vmem:[#allocation2 + $0x14] sm:$0xf] }
 0x108   :  { %7964 = vst [vmem:[#allocation52_spill] sm:$0xff] %v5841_v46  ;;  %v1390_v46 = vpop.f32.mrf.mxu1  ;;  %v1290_v34 = vsel %vm300_vm3, %v1285_v43, %v1289_v24  ;;  %2085 = vmatpush.msrb.mxu0 %v5863_v2  ;;  %2105 = vmatpush.msrb.mxu1 %v5865_v57  ;;  %v5898_v24 = vld [vmem:[#allocation8 + $0x248] sm:$0xff] }
 0x109   :  { %7965 = vst [vmem:[#allocation53_spill] sm:$0xff] %v5847_v29  ;;  %2125 = vmatpush.msra.mxu2 %v5869_v50  ;;  %2145 = vmatpush.msra.mxu3 %v5871_v15  ;;  %v1371_v29 = vadd.f32 %v1370_v11, %v1327_v13  ;;  %v5900_v43 = vld [vmem:[#allocation8 + $0x348] sm:$0xff]  ;;  %v5910_v11 = vld [vmem:[#allocation8 + $0x238] sm:$0xff] }
 0x10a   :  { %7966 = vst [vmem:[#allocation54_spill] sm:$0xff] %v5849_v12  ;;  %v5888_v12 = vld.sshfl [vmem:[#allocation1] sm:$0xff pattern:$0x73625140]  ;;  %2086 = vmatpush.msrb.mxu0 %v5873_v14  ;;  %2106 = vmatpush.msrb.mxu1 %v5877_v8 }
 0x10b   :  { %7967 = vst [vmem:[#allocation55_spill] sm:$0xff] %v5851_v47  ;;  %v5886_v47 = vld [vmem:[#allocation8 + $0x240] sm:$0xff]  ;;  %2126 = vmatpush.msra.mxu2 %v5879_v7  ;;  %2146 = vmatpush.msra.mxu3 %v5881_v40 }
 0x10c   :  { %7968 = vst [vmem:[#allocation56_spill] sm:$0xff] %v5857_v61  ;;  %v1391_v61 = vadd.f32 %v1390_v46, %v1347_v0  ;;  %2087 = vmatpush.msrb.mxu0 %v5886_v47  ;;  %v5912_v46 = vld [vmem:[#allocation8 + $0x338] sm:$0xff]  ;;  %v1439_v13 = vpop.f32.mrf.mxu3  ;;  %v1419_v0 = vpop.f32.mrf.mxu2 }
 0x10d   :  { %7969 = vst [vmem:[#allocation57_spill] sm:$0xff] %v5859_v30  ;;  %v5892_v30 = vld [vmem:[#allocation8 + $0x340] sm:$0xff]  ;;  %2127 = vmatpush.msra.mxu2 %v5898_v24  ;;  %2147 = vmatpush.msra.mxu3 %v5900_v43 }
 0x10e   :  { %7970 = vst [vmem:[#allocation58_spill] sm:$0xff] %v5869_v50  ;;  %v5906_v50 = vld [vmem:[#allocation8 + $0x330] sm:$0xff]  ;;  %2107 = vmatpush.msrb.mxu1 %v5892_v30 }
 0x10f   :  { %7971 = vst [vmem:[#allocation59_spill] sm:$0xff] %v5871_v15  ;;  %v5904_v15 = vld [vmem:[#allocation8 + $0x230] sm:$0xff]  ;;  %2128 = vmatpush.msra.mxu2 %v5910_v11  ;;  %2148 = vmatpush.msra.mxu3 %v5912_v46 }
 0x110   :  { %7972 = vst [vmem:[#allocation60_spill] sm:$0xff] %v5877_v8  ;;  %2088 = vmatpush.msrb.mxu0 %v5904_v15  ;;  %2108 = vmatpush.msrb.mxu1 %v5906_v50 }
 0x111   :  { %7973 = vst [vmem:[#allocation61_spill] sm:$0xff] %v5879_v7  ;;  %v1443_v7 = vadd.f32 %v1439_v13, %v1391_v61  ;;  %v5936_v61 = vld [vmem:[#allocation8 + $0x218] sm:$0xff] }
 0x112   :  { %7974 = vst [vmem:[#allocation62_spill] sm:$0xff] %v5881_v40  ;;  %v5918_v40 = vld [vmem:[#allocation8 + $0x320] sm:$0xff]  ;;  %v5938_v13 = vld [vmem:[#allocation8 + $0x318] sm:$0xff] }
 0x113   :  { %7975 = vst [vmem:[#allocation63_spill] sm:$0xff] %v5886_v47  ;;  %v5924_v47 = vld [vmem:[#allocation8 + $0x328] sm:$0xff]  ;;  %v1445_v8 = vadd.f32 %v1443_v7, %v5620_v28  ;;  %2109 = vmatpush.msrb.mxu1 %v5918_v40 }
 0x114   :  { %1293 = vst [vmem:[#allocation13 + $0x18] sm:$0xf] %v1290_v34  ;;  %2149 = vmatpush.msra.mxu3 %v5924_v47  ;;  %v5950_v7 = vld [vmem:[#allocation8 + $0x308] sm:$0xff] }
 0x115   :  { %7976 = vst [vmem:[#allocation64_spill] sm:$0xff] %v5892_v30  ;;  %v5922_v30 = vld [vmem:[#allocation8 + $0x228] sm:$0xff]  ;;  %vm1447_vm0 = vcmp.ge.f32.partialorder %v1445_v8, 0.0  ;;  %v1449_v28 = vmul.f32 0.1, %v1445_v8 }
 0x116   :  { %1295 = vst [vmem:[#allocation2 + $0x1c] sm:$0xf] %v1290_v34  ;;  %v5916_v34 = vld [vmem:[#allocation8 + $0x220] sm:$0xff]  ;;  %2129 = vmatpush.msra.mxu2 %v5922_v30  ;;  %2150 = vmatpush.msra.mxu3 %v5938_v13 }
 0x117   :  { %7977 = vst [vmem:[#allocation65_spill] sm:$0xff] %v5898_v24  ;;  %v5928_v24 = vld [vmem:[#allocation8 + $0x210] sm:$0xff]  ;;  %2089 = vmatpush.msrb.mxu0 %v5916_v34 }
 0x118   :  { %7978 = vst [vmem:[#allocation66_spill] sm:$0xff] %v5900_v43  ;;  %v5930_v43 = vld [vmem:[#allocation8 + $0x310] sm:$0xff]  ;;  %2130 = vmatpush.msra.mxu2 %v5936_v61  ;;  %2151 = vmatpush.msra.mxu3 %v5950_v7 }
 0x119   :  { %2543 = vst [vmem:[#allocation1] ss:$4 sm:$0xff] %v2477_v27  ;;  %v1442_v27 = vadd.f32 %v1419_v0, %v1371_v29  ;;  %v5942_v0 = vld [vmem:[#allocation8 + $0x200] sm:$0xff]  ;;  %2090 = vmatpush.msrb.mxu0 %v5928_v24  ;;  %2110 = vmatpush.msrb.mxu1 %v5930_v43 }
 0x11a   :  { %7979 = vst [vmem:[#allocation67_spill] sm:$0xff] %v5910_v11  ;;  %v5962_v11 = vld [vmem:[#allocation8 + $0x1f0] sm:$0xff]  ;;  %2152 = vmatmul.f32.vlgmr.msra.gmra.mxu3 %v5731_v26 }
 0x11b   :  { %7980 = vst [vmem:[#allocation68_spill] sm:$0xff] %v5912_v46  ;;  %v1444_v29 = vadd.f32 %v1442_v27, %v5622_v37  ;;  %v5944_v46 = vld [vmem:[#allocation8 + $0x300] sm:$0xff]  ;;  %v5948_v37 = vld [vmem:[#allocation8 + $0x208] sm:$0xff]  ;;  %2091 = vmatpush.msrb.mxu0 %v5942_v0 }
 0x11c   :  { %7981 = vst [vmem:[#allocation69_spill] sm:$0xff] %v5916_v34  ;;  %2111 = vmatpush.msrb.mxu1 %v5944_v46  ;;  %2131 = vmatpush.msra.mxu2 %v5948_v37 }
 0x11d   :  { %7982 = vst [vmem:[#allocation70_spill] sm:$0xff] %v5918_v40  ;;  %vm1446_vm1 = vcmp.ge.f32.partialorder %v1444_v29, 0.0  ;;  %v1448_v27 = vmul.f32 0.1, %v1444_v29  ;;  %v2412_v40 = vld [vmem:[#allocation2 + $0x10] sm:$0xf]  ;;  %2092 = vmatmul.f32.vlgmr.msrb.gmra.mxu0 %v5729_v25  ;;  %2112 = vmatmul.f32.vlgmr.msrb.gmra.mxu1 %v5731_v26 }
 0x11e   :  { %7983 = vst [vmem:[#allocation71_spill] sm:$0xff] %v5922_v30  ;;  %2132 = vmatmul.f32.vlgmr.msra.gmra.mxu2 %v5729_v25  ;;  %2182 = vmatpush.msra.mxu1 %v5962_v11  ;;  %v5987_v25 = vld [vmem:[#allocation8 + $0xd0] sm:$0xff] }
 0x11f   :  { %7984 = vst [vmem:[#allocation72_spill] sm:$0xff] %v5924_v47  ;;  %v1451_v47 = vsel %vm1447_vm0, %v1445_v8, %v1449_v28  ;;  %v1450_v34 = vsel %vm1446_vm1, %v1444_v29, %v1448_v27  ;;  %v5968_v8 = vld [vmem:[#allocation8 + $0xf8] sm:$0xff]  ;;  %v5975_v29 = vld [vmem:[#allocation8 + $0xe0] sm:$0xff]  ;;  %v5989_v26 = vld [vmem:[#allocation8 + $0x1d0] sm:$0xff]  ;;  %vm128_vm0 = vcmask 254976  }
 0x120   :  { %7985 = vst [vmem:[#allocation73_spill] sm:$0xff] %v5928_v24  ;;  %v5954_v30 = vld.sshfl [vmem:[#allocation1] sm:$0xff pattern:$0x73625140]  ;;  %v1454_v24 = vrot.slane %v1451_v47, 6  ;;  %2202 = vmatpush.msrb.mxu2 %v5968_v8 }
 0x121   :  { %7986 = vst [vmem:[#allocation74_spill] sm:$0xff] %v5930_v43  ;;  %v5960_v43 = vld [vmem:[#allocation8 + $0xf0] sm:$0xff]  ;;  %v5970_v28 = vld [vmem:[#allocation8 + $0x1f8] sm:$0xff]  ;;  %v5977_v27 = vld [vmem:[#allocation8 + $0x1e0] sm:$0xff] }
 0x122   :  { %7987 = vst [vmem:[#allocation75_spill] sm:$0xff] %v5936_v61  ;;  %v5964_v61 = vld.sshfl [vmem:[#allocation1 + $0x8] sm:$0xff pattern:$0x73625140]  ;;  %v1455_v47 = vsel %vm300_vm3, %v1450_v34, %v1454_v24  ;;  %2162 = vmatpush.msra.mxu0 %v5960_v43  ;;  %2222 = vmatpush.msrb.mxu3 %v5970_v28  ;;  %v5995_v24 = vld [vmem:[#allocation8 + $0x1d8] sm:$0xff] }
 0x123   :  { %7988 = vst [vmem:[#allocation76_spill] sm:$0xff] %v5954_v30  ;;  %v5983_v30 = vld [vmem:[#allocation8 + $0x1e8] sm:$0xff]  ;;  %2183 = vmatpush.msra.mxu1 %v5977_v27  ;;  %v5999_v34 = vld [vmem:[#allocation8 + $0xc0] sm:$0xff] }
 0x124   :  { %7989 = vst [vmem:[#allocation77_spill] sm:$0xff] %v5962_v11  ;;  %2163 = vmatpush.msra.mxu0 %v5975_v29  ;;  %2223 = vmatpush.msrb.mxu3 %v5983_v30  ;;  %v6025_v11 = vld [vmem:[#allocation8 + $0xa0] sm:$0xff] }
 0x125   :  { %7990 = vst [vmem:[#allocation78_spill] sm:$0xff] %v5964_v61  ;;  %v5981_v61 = vld [vmem:[#allocation8 + $0xe8] sm:$0xff]  ;;  %2184 = vmatpush.msra.mxu1 %v5989_v26 }
 0x126   :  { %7991 = vst [vmem:[#allocation79_spill] sm:$0xff] %v5968_v8  ;;  %2203 = vmatpush.msrb.mxu2 %v5981_v61  ;;  %2164 = vmatpush.msra.mxu0 %v5987_v25  ;;  %v2714_v8 = vld [vmem:[#allocation2 + $0x18] sm:$0xf] }
 0x127   :  { %7992 = vst [vmem:[#allocation80_spill] sm:$0xff] %v5970_v28  ;;  %v6005_v28 = vld [vmem:[#allocation8 + $0xc8] sm:$0xff]  ;;  %2224 = vmatpush.msrb.mxu3 %v5995_v24 }
 0x128   :  { %2629 = vst [vmem:[#allocation1] ss:$4 sm:$0xff] %v2412_v40  ;;  %v5993_v40 = vld [vmem:[#allocation8 + $0xd8] sm:$0xff]  ;;  %2165 = vmatpush.msra.mxu0 %v5999_v34 }
 0x129   :  { %7993 = vst [vmem:[#allocation81_spill] sm:$0xff] %v5975_v29  ;;  %v6007_v29 = vld [vmem:[#allocation8 + $0x1c8] sm:$0xff]  ;;  %2204 = vmatpush.msrb.mxu2 %v5993_v40 }
 0x12a   :  { %7994 = vst [vmem:[#allocation82_spill] sm:$0xff] %v5977_v27  ;;  %v6009_v27 = vld [vmem:[#allocation8 + $0xb0] sm:$0xff]  ;;  %2225 = vmatpush.msrb.mxu3 %v6007_v29 }
 0x12b   :  { %1458 = vst [vmem:[#allocation13 + $0x1c] sm:$0xf] %v1455_v47  ;;  %2205 = vmatpush.msrb.mxu2 %v6005_v28  ;;  %2166 = vmatpush.msra.mxu0 %v6009_v27 }
 0x12c   :  { %7995 = vst [vmem:[#allocation83_spill] sm:$0xff] %v5981_v61 }
 0x12d   :  { %7996 = vst [vmem:[#allocation84_spill] sm:$0xff] %v5983_v30  ;;  %v6013_v30 = vld [vmem:[#allocation8 + $0x1b0] sm:$0xff]  ;;  %2167 = vmatpush.msra.mxu0 %v6025_v11 }
 0x12e   :  { %1460 = vst [vmem:[#allocation2 + $0x20] sm:$0xf] %v1455_v47  ;;  %v6001_v47 = vld [vmem:[#allocation8 + $0x1c0] sm:$0xff] }
 0x12f   :  { %7997 = vst [vmem:[#allocation85_spill] sm:$0xff] %v5987_v25  ;;  %v6015_v61 = vld.sshfl [vmem:[#allocation1] sm:$0xff pattern:$0x73625140]  ;;  %2185 = vmatpush.msra.mxu1 %v6001_v47 }
 0x130   :  { %7998 = vst [vmem:[#allocation86_spill] sm:$0xff] %v5989_v26  ;;  %v6019_v26 = vld [vmem:[#allocation8 + $0xb8] sm:$0xff] }
 0x131   :  { %7999 = vst [vmem:[#allocation87_spill] sm:$0xff] %v5993_v40  ;;  %v6021_v25 = vld [vmem:[#allocation8 + $0x1b8] sm:$0xff]  ;;  %v6027_v40 = vld [vmem:[#allocation8 + $0x1a0] sm:$0xff]  ;;  %2186 = vmatpush.msra.mxu1 %v6013_v30  ;;  %2206 = vmatpush.msrb.mxu2 %v6019_v26 }
 0x132   :  { %8000 = vst [vmem:[#allocation88_spill] sm:$0xff] %v5995_v24  ;;  %v6029_v24 = vld.sshfl [vmem:[#allocation1 + $0x8] sm:$0xff pattern:$0x73625140]  ;;  %2226 = vmatpush.msrb.mxu3 %v6021_v25 }
 0x133   :  { %8001 = vst [vmem:[#allocation89_spill] sm:$0xff] %v5999_v34  ;;  %2187 = vmatpush.msra.mxu1 %v6027_v40  ;;  %v6075_v34 = vld [vmem:[#allocation8 + $0x160] sm:$0xff] }
 0x134   :  { %8002 = vst [vmem:[#allocation90_spill] sm:$0xff] %v6001_v47  ;;  %v6035_v47 = vld [vmem:[#allocation8 + $0x1a8] sm:$0xff] }
 0x135   :  { %8003 = vst [vmem:[#allocation91_spill] sm:$0xff] %v6005_v28  ;;  %v6041_v28 = vld [vmem:[#allocation8 + $0x190] sm:$0xff]  ;;  %2227 = vmatpush.msrb.mxu3 %v6035_v47 }
 0x136   :  { %8004 = vst [vmem:[#allocation92_spill] sm:$0xff] %v6007_v29  ;;  %v6039_v29 = vld [vmem:[#allocation8 + $0x90] sm:$0xff]  ;;  %2188 = vmatpush.msra.mxu1 %v6041_v28 }
 0x137   :  { %8005 = vst [vmem:[#allocation93_spill] sm:$0xff] %v6009_v27  ;;  %2168 = vmatpush.msra.mxu0 %v6039_v29  ;;  %v2949_v27 = vld [vmem:[#allocation2 + $0x1c] sm:$0xf] }
 0x138   :  { %8006 = vst [vmem:[#allocation94_spill] sm:$0xff] %v6013_v30  ;;  %v6047_v30 = vld [vmem:[#allocation8 + $0x198] sm:$0xff] }
 0x139   :  { %8007 = vst [vmem:[#allocation95_spill] sm:$0xff] %v6015_v61  ;;  %v6033_v61 = vld [vmem:[#allocation8 + $0xa8] sm:$0xff]  ;;  %2228 = vmatpush.msrb.mxu3 %v6047_v30 }
 0x13a   :  { %8008 = vst [vmem:[#allocation96_spill] sm:$0xff] %v6019_v26  ;;  %2207 = vmatpush.msrb.mxu2 %v6033_v61  ;;  %v6053_v26 = vld [vmem:[#allocation8 + $0x180] sm:$0xff] }
 0x13b   :  { %8009 = vst [vmem:[#allocation97_spill] sm:$0xff] %v6021_v25  ;;  %v6057_v25 = vld [vmem:[#allocation8 + $0x88] sm:$0xff]  ;;  %2189 = vmatpush.msra.mxu1 %v6053_v26 }
 0x13c   :  { %8010 = vst [vmem:[#allocation98_spill] sm:$0xff] %v6025_v11  ;;  %v6059_v11 = vld [vmem:[#allocation8 + $0x188] sm:$0xff] }
 0x13d   :  { %8011 = vst [vmem:[#allocation99_spill] sm:$0xff] %v6027_v40  ;;  %v6061_v40 = vld [vmem:[#allocation8 + $0x70] sm:$0xff]  ;;  %2229 = vmatpush.msrb.mxu3 %v6059_v11 }
 0x13e   :  { %8012 = vst [vmem:[#allocation100_spill] sm:$0xff] %v6029_v24  ;;  %v6045_v24 = vld [vmem:[#allocation8 + $0x98] sm:$0xff] }
 0x13f   :  { %8013 = vst [vmem:[#allocation101_spill] sm:$0xff] %v6033_v61  ;;  %2208 = vmatpush.msrb.mxu2 %v6045_v24  ;;  %v6067_v61 = vld [vmem:[#allocation8 + $0x78] sm:$0xff] }
 0x140   :  { %8014 = vst [vmem:[#allocation102_spill] sm:$0xff] %v6035_v47  ;;  %v6065_v47 = vld [vmem:[#allocation8 + $0x170] sm:$0xff] }
 0x141   :  { %2780 = vst [vmem:[#allocation1] ss:$4 sm:$0xff] %v2714_v8  ;;  %v6051_v8 = vld [vmem:[#allocation8 + $0x80] sm:$0xff]  ;;  %2209 = vmatpush.msrb.mxu2 %v6057_v25  ;;  %2190 = vmatpush.msra.mxu1 %v6065_v47 }
 0x142   :  { %8015 = vst [vmem:[#allocation103_spill] sm:$0xff] %v6039_v29  ;;  %2169 = vmatpush.msra.mxu0 %v6051_v8  ;;  %v6073_v29 = vld [vmem:[#allocation8 + $0x60] sm:$0xff] }
 0x143   :  { %8016 = vst [vmem:[#allocation104_spill] sm:$0xff] %v6041_v28  ;;  %v6071_v28 = vld [vmem:[#allocation8 + $0x178] sm:$0xff]  ;;  %2210 = vmatpush.msrb.mxu2 %v6067_v61  ;;  %2191 = vmatpush.msra.mxu1 %v6075_v34 }
 0x144   :  { %8017 = vst [vmem:[#allocation105_spill] sm:$0xff] %v6045_v24  ;;  %2170 = vmatpush.msra.mxu0 %v6061_v40  ;;  %2230 = vmatpush.msrb.mxu3 %v6071_v28 }
 0x145   :  { %8018 = vst [vmem:[#allocation106_spill] sm:$0xff] %v6047_v30 }
 0x146   :  { %8019 = vst [vmem:[#allocation107_spill] sm:$0xff] %v6051_v8  ;;  %v6085_v8 = vld [vmem:[#allocation8 + $0x68] sm:$0xff]  ;;  %2171 = vmatpush.msra.mxu0 %v6073_v29 }
 0x147   :  { %8020 = vst [vmem:[#allocation108_spill] sm:$0xff] %v6053_v26  ;;  %v6087_v26 = vld [vmem:[#allocation8 + $0x168] sm:$0xff]  ;;  %2211 = vmatpush.msrb.mxu2 %v6085_v8 }
 0x148   :  { %8021 = vst [vmem:[#allocation109_spill] sm:$0xff] %v6057_v25  ;;  %v6079_v24 = vld.sshfl [vmem:[#allocation1] sm:$0xff pattern:$0x73625140]  ;;  %v6091_v25 = vld [vmem:[#allocation8 + $0x50] sm:$0xff]  ;;  %2231 = vmatpush.msrb.mxu3 %v6087_v26 }
 0x149   :  { %8022 = vst [vmem:[#allocation110_spill] sm:$0xff] %v6059_v11  ;;  %v6081_v30 = vld.sshfl [vmem:[#allocation1 + $0x8] sm:$0xff pattern:$0x73625140]  ;;  %v6093_v11 = vld [vmem:[#allocation8 + $0x150] sm:$0xff]  ;;  %2172 = vmatpush.msra.mxu0 %v6091_v25 }
 0x14a   :  { %8023 = vst [vmem:[#allocation111_spill] sm:$0xff] %v6061_v40  ;;  %2192 = vmatpush.msra.mxu1 %v6093_v11  ;;  %v6127_v40 = vld [vmem:[#allocation8 + $0x120] sm:$0xff] }
 0x14b   :  { %8024 = vst [vmem:[#allocation112_spill] sm:$0xff] %v6065_v47  ;;  %v6119_v47 = vld [vmem:[#allocation8 + $0x38] sm:$0xff] }
 0x14c   :  { %8025 = vst [vmem:[#allocation113_spill] sm:$0xff] %v6067_v61  ;;  %v6105_v61 = vld [vmem:[#allocation8 + $0x140] sm:$0xff] }
 0x14d   :  { %8026 = vst [vmem:[#allocation114_spill] sm:$0xff] %v6071_v28  ;;  %v6109_v28 = vld [vmem:[#allocation8 + $0x48] sm:$0xff]  ;;  %2193 = vmatpush.msra.mxu1 %v6105_v61 }
 0x14e   :  { %8027 = vst [vmem:[#allocation115_spill] sm:$0xff] %v6073_v29  ;;  %v6111_v29 = vld [vmem:[#allocation8 + $0x148] sm:$0xff] }
 0x14f   :  { %8028 = vst [vmem:[#allocation116_spill] sm:$0xff] %v6075_v34  ;;  %v2884_v34 = vld [vmem:[#allocation2 + $0x18] sm:$0xf] }
 0x150   :  { %8029 = vst [vmem:[#allocation117_spill] sm:$0xff] %v6079_v24  ;;  %v6099_v24 = vld [vmem:[#allocation8 + $0x158] sm:$0xff] }
 0x151   :  { %8030 = vst [vmem:[#allocation118_spill] sm:$0xff] %v6081_v30  ;;  %v6097_v30 = vld [vmem:[#allocation8 + $0x58] sm:$0xff]  ;;  %2232 = vmatpush.msrb.mxu3 %v6099_v24 }
 0x152   :  { %8031 = vst [vmem:[#allocation119_spill] sm:$0xff] %v6085_v8  ;;  %2212 = vmatpush.msrb.mxu2 %v6097_v30  ;;  %v6115_v8 = vld [vmem:[#allocation8 + $0x30] sm:$0xff] }
 0x153   :  { %8032 = vst [vmem:[#allocation120_spill] sm:$0xff] %v6087_v26  ;;  %v6117_v26 = vld [vmem:[#allocation8 + $0x130] sm:$0xff]  ;;  %2233 = vmatpush.msrb.mxu3 %v6111_v29 }
 0x154   :  { %3015 = vst [vmem:[#allocation1] ss:$4 sm:$0xff] %v2949_v27  ;;  %v6103_v27 = vld [vmem:[#allocation8 + $0x40] sm:$0xff]  ;;  %2213 = vmatpush.msrb.mxu2 %v6109_v28  ;;  %2194 = vmatpush.msra.mxu1 %v6117_v26 }
 0x155   :  { %8033 = vst [vmem:[#allocation121_spill] sm:$0xff] %v6091_v25  ;;  %2173 = vmatpush.msra.mxu0 %v6103_v27  ;;  %v6125_v25 = vld [vmem:[#allocation8 + $0x20] sm:$0xff] }
 0x156   :  { %8034 = vst [vmem:[#allocation122_spill] sm:$0xff] %v6093_v11  ;;  %v6123_v11 = vld [vmem:[#allocation8 + $0x138] sm:$0xff]  ;;  %2214 = vmatpush.msrb.mxu2 %v6119_v47  ;;  %2195 = vmatpush.msra.mxu1 %v6127_v40 }
 0x157   :  { %8035 = vst [vmem:[#allocation123_spill] sm:$0xff] %v6097_v30  ;;  %2174 = vmatpush.msra.mxu0 %v6115_v8  ;;  %2234 = vmatpush.msrb.mxu3 %v6123_v11 }
 0x158   :  { %8036 = vst [vmem:[#allocation124_spill] sm:$0xff] %v6099_v24 }
 0x159   :  { %8037 = vst [vmem:[#allocation125_spill] sm:$0xff] %v6103_v27  ;;  %v6137_v27 = vld [vmem:[#allocation8 + $0x28] sm:$0xff]  ;;  %2175 = vmatpush.msra.mxu0 %v6125_v25 }
 0x15a   :  { %8038 = vst [vmem:[#allocation126_spill] sm:$0xff] %v6105_v61  ;;  %v6139_v61 = vld [vmem:[#allocation8 + $0x128] sm:$0xff]  ;;  %2215 = vmatpush.msrb.mxu2 %v6137_v27 }
 0x15b   :  { %8039 = vst [vmem:[#allocation127_spill] sm:$0xff] %v6109_v28  ;;  %v6131_v24 = vld.sshfl [vmem:[#allocation1] sm:$0xff pattern:$0x73625140]  ;;  %v6143_v28 = vld [vmem:[#allocation8 + $0x10] sm:$0xff]  ;;  %2235 = vmatpush.msrb.mxu3 %v6139_v61 }
 0x15c   :  { %8040 = vst [vmem:[#allocation128_spill] sm:$0xff] %v6111_v29  ;;  %v6133_v30 = vld.sshfl [vmem:[#allocation1 + $0x8] sm:$0xff pattern:$0x73625140]  ;;  %v6145_v29 = vld [vmem:[#allocation8 + $0x110] sm:$0xff]  ;;  %2176 = vmatpush.msra.mxu0 %v6143_v28 }
 0x15d   :  { %8041 = vst [vmem:[#allocation129_spill] sm:$0xff] %v6119_v47  ;;  %v6157_v47 = vld [vmem:[#allocation8 + $0x100] sm:$0xff]  ;;  %2196 = vmatpush.msra.mxu1 %v6145_v29 }
 0x15e   :  { %8042 = vst [vmem:[#allocation130_spill] sm:$0xff] %v6123_v11  ;;  %v6161_v11 = vld [vmem:[#allocation8 + $0x8] sm:$0xff] }
 0x15f   :  { %8043 = vst [vmem:[#allocation131_spill] sm:$0xff] %v6125_v25  ;;  %v6163_v25 = vld [vmem:[#allocation8 + $0x108] sm:$0xff]  ;;  %2197 = vmatpush.msra.mxu1 %v6157_v47 }
 0x160   :  { %8044 = vst [vmem:[#allocation132_spill] sm:$0xff] %v6127_v40  ;;  %v3186_v40 = vld [vmem:[#allocation2 + $0x20] sm:$0xf]  ;;  %2198 = vmatmul.f32.vlgmr.msra.gmra.mxu1 %v5814_v6 }
 0x161   :  { %8045 = vst [vmem:[#allocation133_spill] sm:$0xff] %v6131_v24  ;;  %v6151_v24 = vld [vmem:[#allocation8 + $0x118] sm:$0xff] }
 0x162   :  { %8046 = vst [vmem:[#allocation134_spill] sm:$0xff] %v6133_v30  ;;  %v6149_v30 = vld [vmem:[#allocation8 + $0x18] sm:$0xff]  ;;  %2236 = vmatpush.msrb.mxu3 %v6151_v24 }
 0x163   :  { %8047 = vst [vmem:[#allocation135_spill] sm:$0xff] %v6137_v27  ;;  %2216 = vmatpush.msrb.mxu2 %v6149_v30  ;;  %v6171_v27 = vld [vmem:[#allocation8 + $0x5f0] sm:$0xff] }
 0x164   :  { %8048 = vst [vmem:[#allocation136_spill] sm:$0xff] %v6139_v61  ;;  %v6169_v61 = vld [vmem:[#allocation8 + $0x4f0] sm:$0xff]  ;;  %2237 = vmatpush.msrb.mxu3 %v6163_v25  ;;  %2333 = vmatpush.msrb.mxu1 %v6171_v27 }
 0x165   :  { %3101 = vst [vmem:[#allocation1] ss:$4 sm:$0xff] %v2884_v34  ;;  %v6155_v34 = vld [vmem:[#allocation8] sm:$0xff]  ;;  %2217 = vmatpush.msrb.mxu2 %v6161_v11  ;;  %2238 = vmatmul.f32.vlgmr.msrb.gmra.mxu3 %v5814_v6  ;;  %v6205_v6 = vld [vmem:[#allocation8 + $0x4d8] sm:$0xff] }
 0x166   :  { %8049 = vst [vmem:[#allocation137_spill] sm:$0xff] %v6143_v28  ;;  %2177 = vmatpush.msra.mxu0 %v6155_v34  ;;  %2218 = vmatmul.f32.vlgmr.msrb.gmra.mxu2 %v5797_v33 }
 0x167   :  { %8050 = vst [vmem:[#allocation138_spill] sm:$0xff] %v6145_v29  ;;  %2178 = vmatmul.f32.vlgmr.msra.gmra.mxu0 %v5797_v33  ;;  %v6201_v33 = vld [vmem:[#allocation8 + $0x5d0] sm:$0xff] }
 0x168   :  { %8051 = vst [vmem:[#allocation139_spill] sm:$0xff] %v6151_v24  ;;  %v6181_v24 = vld [vmem:[#allocation8 + $0x4f8] sm:$0xff]  ;;  %2313 = vmatpush.msrb.mxu0 %v6169_v61 }
 0x169   :  { %8052 = vst [vmem:[#allocation140_spill] sm:$0xff] %v6155_v34  ;;  %v6183_v34 = vld [vmem:[#allocation8 + $0x5f8] sm:$0xff]  ;;  %2353 = vmatpush.msra.mxu2 %v6181_v24 }
 0x16a   :  { %8053 = vst [vmem:[#allocation141_spill] sm:$0xff] %v6161_v11  ;;  %v6187_v11 = vld [vmem:[#allocation8 + $0x4e0] sm:$0xff]  ;;  %2373 = vmatpush.msra.mxu3 %v6183_v34 }
 0x16b   :  { %8054 = vst [vmem:[#allocation142_spill] sm:$0xff] %v6163_v25  ;;  %v6189_v25 = vld [vmem:[#allocation8 + $0x5e0] sm:$0xff]  ;;  %2314 = vmatpush.msrb.mxu0 %v6187_v11 }
 0x16c   :  { %8055 = vst [vmem:[#allocation143_spill] sm:$0xff] %v6169_v61  ;;  %v6175_v29 = vld.sshfl [vmem:[#allocation1] sm:$0xff pattern:$0x73625140]  ;;  %2334 = vmatpush.msrb.mxu1 %v6189_v25 }
 0x16d   :  { %8056 = vst [vmem:[#allocation144_spill] sm:$0xff] %v6171_v27  ;;  %v6177_v28 = vld.sshfl [vmem:[#allocation1 + $0x8] sm:$0xff pattern:$0x73625140]  ;;  %v6207_v61 = vld [vmem:[#allocation8 + $0x5d8] sm:$0xff] }
 0x16e   :  { %8057 = vst [vmem:[#allocation145_spill] sm:$0xff] %v6175_v29  ;;  %v6195_v29 = vld [vmem:[#allocation8 + $0x5e8] sm:$0xff]  ;;  %v6211_v27 = vld [vmem:[#allocation8 + $0x4c0] sm:$0xff]  ;;  %2335 = vmatpush.msrb.mxu1 %v6201_v33 }
 0x16f   :  { %8058 = vst [vmem:[#allocation146_spill] sm:$0xff] %v6177_v28  ;;  %v6193_v28 = vld [vmem:[#allocation8 + $0x4e8] sm:$0xff]  ;;  %2374 = vmatpush.msra.mxu3 %v6195_v29 }
 0x170   :  { %8059 = vst [vmem:[#allocation147_spill] sm:$0xff] %v6181_v24  ;;  %2354 = vmatpush.msra.mxu2 %v6193_v28  ;;  %v6213_v24 = vld [vmem:[#allocation8 + $0x5c0] sm:$0xff] }
 0x171   :  { %8060 = vst [vmem:[#allocation148_spill] sm:$0xff] %v6183_v34  ;;  %v6217_v34 = vld [vmem:[#allocation8 + $0x4c8] sm:$0xff]  ;;  %2375 = vmatpush.msra.mxu3 %v6207_v61  ;;  %2336 = vmatpush.msrb.mxu1 %v6213_v24 }
 0x172   :  { %3252 = vst [vmem:[#allocation1] ss:$4 sm:$0xff] %v3186_v40  ;;  %v6199_v40 = vld [vmem:[#allocation8 + $0x4d0] sm:$0xff]  ;;  %2355 = vmatpush.msra.mxu2 %v6205_v6 }
 0x173   :  { %8061 = vst [vmem:[#allocation149_spill] sm:$0xff] %v6187_v11  ;;  %2315 = vmatpush.msrb.mxu0 %v6199_v40  ;;  %v6219_v11 = vld [vmem:[#allocation8 + $0x5c8] sm:$0xff] }
 0x174   :  { %8062 = vst [vmem:[#allocation150_spill] sm:$0xff] %v6189_v25  ;;  %v6223_v25 = vld [vmem:[#allocation8 + $0x4b0] sm:$0xff]  ;;  %2356 = vmatpush.msra.mxu2 %v6217_v34  ;;  %2376 = vmatpush.msra.mxu3 %v6219_v11 }
 0x175   :  { %8063 = vst [vmem:[#allocation151_spill] sm:$0xff] %v6193_v28  ;;  %v6225_v28 = vld [vmem:[#allocation8 + $0x5b0] sm:$0xff]  ;;  %2316 = vmatpush.msrb.mxu0 %v6211_v27 }
 0x176   :  { %8064 = vst [vmem:[#allocation152_spill] sm:$0xff] %v6195_v29  ;;  %v6229_v29 = vld [vmem:[#allocation8 + $0x4b8] sm:$0xff]  ;;  %2337 = vmatpush.msrb.mxu1 %v6225_v28 }
 0x177   :  { %8065 = vst [vmem:[#allocation153_spill] sm:$0xff] %v6199_v40  ;;  %v6231_v40 = vld [vmem:[#allocation8 + $0x5b8] sm:$0xff]  ;;  %2317 = vmatpush.msrb.mxu0 %v6223_v25  ;;  %2357 = vmatpush.msra.mxu2 %v6229_v29 }
 0x178   :  { %8066 = vst [vmem:[#allocation154_spill] sm:$0xff] %v6201_v33  ;;  %v6235_v33 = vld [vmem:[#allocation8 + $0x4a0] sm:$0xff]  ;;  %2377 = vmatpush.msra.mxu3 %v6231_v40 }
 0x179   :  { %8067 = vst [vmem:[#allocation155_spill] sm:$0xff] %v6205_v6  ;;  %v6237_v6 = vld [vmem:[#allocation8 + $0x5a0] sm:$0xff]  ;;  %2318 = vmatpush.msrb.mxu0 %v6235_v33 }
 0x17a   :  { %8068 = vst [vmem:[#allocation156_spill] sm:$0xff] %v6207_v61  ;;  %v6241_v61 = vld [vmem:[#allocation8 + $0x4a8] sm:$0xff]  ;;  %2338 = vmatpush.msrb.mxu1 %v6237_v6 }
 0x17b   :  { %8069 = vst [vmem:[#allocation157_spill] sm:$0xff] %v6211_v27  ;;  %v6243_v27 = vld [vmem:[#allocation8 + $0x5a8] sm:$0xff]  ;;  %2358 = vmatpush.msra.mxu2 %v6241_v61 }
 0x17c   :  { %8070 = vst [vmem:[#allocation158_spill] sm:$0xff] %v6213_v24  ;;  %v6247_v24 = vld [vmem:[#allocation8 + $0x490] sm:$0xff]  ;;  %2378 = vmatpush.msra.mxu3 %v6243_v27 }
 0x17d   :  { %8071 = vst [vmem:[#allocation159_spill] sm:$0xff] %v6217_v34  ;;  %v6249_v34 = vld [vmem:[#allocation8 + $0x590] sm:$0xff]  ;;  %2319 = vmatpush.msrb.mxu0 %v6247_v24 }
 0x17e   :  { %8072 = vst [vmem:[#allocation160_spill] sm:$0xff] %v6219_v11  ;;  %v6253_v11 = vld [vmem:[#allocation8 + $0x498] sm:$0xff]  ;;  %2339 = vmatpush.msrb.mxu1 %v6249_v34 }
 0x17f   :  { %8073 = vst [vmem:[#allocation161_spill] sm:$0xff] %v6223_v25  ;;  %v6255_v25 = vld [vmem:[#allocation8 + $0x598] sm:$0xff]  ;;  %2359 = vmatpush.msra.mxu2 %v6253_v11 }
 0x180   :  { %8074 = vst [vmem:[#allocation162_spill] sm:$0xff] %v6225_v28  ;;  %2379 = vmatpush.msra.mxu3 %v6255_v25  ;;  %v4908_v28 = vld [vmem:[#allocation8 + $0x470] sm:$0xff] }
 0x181   :  { %8075 = vst [vmem:[#allocation163_spill] sm:$0xff] %v6229_v29  ;;  %v4907_v29 = vld [vmem:[#allocation8 + $0x588] sm:$0xff] }
 0x182   :  { %8076 = vst [vmem:[#allocation164_spill] sm:$0xff] %v6231_v40  ;;  %v4904_v40 = vld [vmem:[#allocation8 + $0x480] sm:$0xff]  ;;  %2380 = vmatpush.msra.mxu3 %v4907_v29 }
 0x183   :  { %8077 = vst [vmem:[#allocation165_spill] sm:$0xff] %v6235_v33  ;;  %2320 = vmatpush.msrb.mxu0 %v4904_v40  ;;  %v4905_v33 = vld [vmem:[#allocation8 + $0x580] sm:$0xff]  ;;  %v8118_v40 = vld [vmem:[#allocation66_spill] sm:$0xff] }
 0x184   :  { %8078 = vst [vmem:[#allocation166_spill] sm:$0xff] %v6237_v6  ;;  %2340 = vmatpush.msrb.mxu1 %v4905_v33  ;;  %v4906_v6 = vld [vmem:[#allocation8 + $0x488] sm:$0xff] }
 0x185   :  { %8079 = vst [vmem:[#allocation167_spill] sm:$0xff] %v6241_v61  ;;  %2360 = vmatpush.msra.mxu2 %v4906_v6  ;;  %2321 = vmatpush.msrb.mxu0 %v4908_v28  ;;  %v4909_v61 = vld [vmem:[#allocation8 + $0x570] sm:$0xff] }
 0x186   :  { %8080 = vst [vmem:[#allocation168_spill] sm:$0xff] %v6243_v27  ;;  %2341 = vmatpush.msrb.mxu1 %v4909_v61  ;;  %v4910_v27 = vld [vmem:[#allocation8 + $0x478] sm:$0xff]  ;;  %v8113_v61 = vld [vmem:[#allocation61_spill] sm:$0xff]  ;;  %v8114_v28 = vld [vmem:[#allocation62_spill] sm:$0xff] }
 0x187   :  { %8081 = vst [vmem:[#allocation169_spill] sm:$0xff] %v6247_v24  ;;  %2361 = vmatpush.msra.mxu2 %v4910_v27  ;;  %v4911_v24 = vld [vmem:[#allocation8 + $0x578] sm:$0xff] }
 0x188   :  { %8082 = vst [vmem:[#allocation170_spill] sm:$0xff] %v6249_v34  ;;  %2381 = vmatpush.msra.mxu3 %v4911_v24  ;;  %v4912_v34 = vld [vmem:[#allocation8 + $0x460] sm:$0xff]  ;;  %v8115_v24 = vld [vmem:[#allocation63_spill] sm:$0xff] }
 0x189   :  { %8083 = vst [vmem:[#allocation171_spill] sm:$0xff] %v6253_v11  ;;  %2322 = vmatpush.msrb.mxu0 %v4912_v34  ;;  %v4913_v11 = vld [vmem:[#allocation8 + $0x560] sm:$0xff]  ;;  %2362 = vmatpush.msra.mxu2 %v5650_v41  ;;  %v1616_v41 = vpop.f32.mrf.mxu0 }
 0x18a   :  { %2342 = vmatpush.msrb.mxu1 %v4913_v11  ;;  %2382 = vmatpush.msra.mxu3 %v5652_v42  ;;  %v1636_v42 = vpop.f32.mrf.mxu1  ;;  %v8117_v34 = vld [vmem:[#allocation65_spill] sm:$0xff] }
 0x18b   :  { %2323 = vmatpush.msrb.mxu0 %v5655_v48  ;;  %2363 = vmatpush.msra.mxu2 %v5661_v52  ;;  %v8084_v48 = vld [vmem:[#allocation32_spill] sm:$0xff]  ;;  %v8086_v52 = vld [vmem:[#allocation34_spill] sm:$0xff] }
 0x18c   :  { %2343 = vmatpush.msrb.mxu1 %v5657_v49  ;;  %2383 = vmatpush.msra.mxu3 %v5663_v53  ;;  %v8085_v49 = vld [vmem:[#allocation33_spill] sm:$0xff]  ;;  %v8087_v53 = vld [vmem:[#allocation35_spill] sm:$0xff] }
 0x18d   :  { %2324 = vmatpush.msrb.mxu0 %v5668_v55  ;;  %2364 = vmatpush.msra.mxu2 %v5674_v59  ;;  %v8088_v55 = vld [vmem:[#allocation36_spill] sm:$0xff]  ;;  %v8090_v59 = vld [vmem:[#allocation38_spill] sm:$0xff] }
 0x18e   :  { %2344 = vmatpush.msrb.mxu1 %v5670_v56  ;;  %2384 = vmatpush.msra.mxu3 %v5676_v60  ;;  %v8089_v56 = vld [vmem:[#allocation37_spill] sm:$0xff]  ;;  %v8091_v60 = vld [vmem:[#allocation39_spill] sm:$0xff] }
 0x18f   :  { %2325 = vmatpush.msrb.mxu0 %v5681_v62  ;;  %2365 = vmatpush.msra.mxu2 %v5685_v1  ;;  %v8092_v62 = vld [vmem:[#allocation40_spill] sm:$0xff]  ;;  %v1656_v1 = vpop.f32.mrf.mxu2 }
 0x190   :  { %2345 = vmatpush.msrb.mxu1 %v5683_v63  ;;  %2385 = vmatpush.msra.mxu3 %v5690_v3  ;;  %v8093_v63 = vld [vmem:[#allocation41_spill] sm:$0xff]  ;;  %v8094_v3 = vld [vmem:[#allocation42_spill] sm:$0xff] }
 0x191   :  { %2326 = vmatpush.msrb.mxu0 %v5692_v4  ;;  %2366 = vmatpush.msra.mxu2 %v5700_v9  ;;  %v8095_v4 = vld [vmem:[#allocation43_spill] sm:$0xff]  ;;  %v8097_v9 = vld [vmem:[#allocation45_spill] sm:$0xff] }
 0x192   :  { %2346 = vmatpush.msrb.mxu1 %v5694_v5  ;;  %2386 = vmatpush.msra.mxu3 %v5702_v10  ;;  %v8096_v5 = vld [vmem:[#allocation44_spill] sm:$0xff]  ;;  %v1676_v10 = vpop.f32.mrf.mxu3 }
 0x193   :  { %2327 = vmatpush.msrb.mxu0 %v5706_v16  ;;  %2367 = vmatpush.msra.mxu2 %v5712_v18  ;;  %v8098_v16 = vld [vmem:[#allocation46_spill] sm:$0xff]  ;;  %v1702_v18 = vpop.f32.mrf.mxu0  ;;  %v1677_v27 = vadd.f32 %v1676_v10, %v1656_v1  ;;  %v8128_v1 = vld [vmem:[#allocation75_spill] sm:$0xff]  ;;  %v8130_v10 = vld [vmem:[#allocation76_spill] sm:$0xff] }
 0x194   :  { %2347 = vmatpush.msrb.mxu1 %v5708_v17  ;;  %2387 = vmatpush.msra.mxu3 %v5714_v19  ;;  %v8099_v17 = vld [vmem:[#allocation47_spill] sm:$0xff]  ;;  %v1722_v19 = vpop.f32.mrf.mxu1 }
 0x195   :  { %2328 = vmatpush.msrb.mxu0 %v5716_v20  ;;  %2368 = vmatpush.msra.mxu2 %v5722_v22  ;;  %v8100_v20 = vld [vmem:[#allocation48_spill] sm:$0xff]  ;;  %v8102_v22 = vld [vmem:[#allocation50_spill] sm:$0xff] }
 0x196   :  { %2348 = vmatpush.msrb.mxu1 %v5720_v21  ;;  %2388 = vmatpush.msra.mxu3 %v5724_v23  ;;  %v8101_v21 = vld [vmem:[#allocation49_spill] sm:$0xff]  ;;  %v8103_v23 = vld [vmem:[#allocation51_spill] sm:$0xff] }
 0x197   :  { %2329 = vmatmul.f32.vlgmr.msrb.gmra.mxu0 %v5888_v12  ;;  %2349 = vmatmul.f32.vlgmr.msrb.gmra.mxu1 %v5894_v58 }
 0x198   :  { %2369 = vmatmul.f32.vlgmr.msra.gmra.mxu2 %v5888_v12  ;;  %2389 = vmatmul.f32.vlgmr.msra.gmra.mxu3 %v5894_v58  ;;  %v8112_v12 = vld [vmem:[#allocation60_spill] sm:$0xff] }
 0x199   :  { %2548 = vmatpush.msra.mxu0 %v5743_v35  ;;  %2568 = vmatpush.msra.mxu1 %v5745_v36  ;;  %v8104_v35 = vld [vmem:[#allocation52_spill] sm:$0xff]  ;;  %v8105_v36 = vld [vmem:[#allocation53_spill] sm:$0xff] }
 0x19a   :  { %2588 = vmatpush.msrb.mxu2 %v5749_v38  ;;  %2608 = vmatpush.msrb.mxu3 %v5751_v39  ;;  %v8106_v38 = vld [vmem:[#allocation54_spill] sm:$0xff]  ;;  %v8107_v39 = vld [vmem:[#allocation55_spill] sm:$0xff]  ;;  %v1762_v58 = vpop.f32.mrf.mxu3 }
 0x19b   :  { %2549 = vmatpush.msra.mxu0 %v5755_v44  ;;  %2569 = vmatpush.msra.mxu1 %v5757_v45  ;;  %v8108_v44 = vld [vmem:[#allocation56_spill] sm:$0xff]  ;;  %v8109_v45 = vld [vmem:[#allocation57_spill] sm:$0xff]  ;;  %v1854_v29 = vpop.f32.mrf.mxu0 }
 0x19c   :  { %2589 = vmatpush.msrb.mxu2 %v5761_v51  ;;  %2609 = vmatpush.msrb.mxu3 %v5763_v54  ;;  %v1637_v51 = vadd.f32 %v1636_v42, %v1616_v41  ;;  %v8110_v54 = vld [vmem:[#allocation58_spill] sm:$0xff]  ;;  %v8119_v42 = vld [vmem:[#allocation67_spill] sm:$0xff] }
 0x19d   :  { %2550 = vmatpush.msra.mxu0 %v5767_v31  ;;  %2570 = vmatpush.msra.mxu1 %v5769_v32  ;;  %v8111_v31 = vld [vmem:[#allocation59_spill] sm:$0xff]  ;;  %v1742_v32 = vpop.f32.mrf.mxu2 }
 0x19e   :  { %2590 = vmatpush.msrb.mxu2 %v8084_v48  ;;  %2610 = vmatpush.msrb.mxu3 %v8085_v49  ;;  %v1703_v11 = vadd.f32 %v1702_v18, %v1637_v51  ;;  %v1743_v41 = vadd.f32 %v1742_v32, %v1677_v27  ;;  %v8120_v48 = vld [vmem:[#allocation68_spill] sm:$0xff]  ;;  %v8121_v49 = vld [vmem:[#allocation69_spill] sm:$0xff] }
 0x19f   :  { %2551 = vmatpush.msra.mxu0 %v8086_v52  ;;  %2571 = vmatpush.msra.mxu1 %v8087_v53  ;;  %v8122_v52 = vld [vmem:[#allocation70_spill] sm:$0xff]  ;;  %v8123_v53 = vld [vmem:[#allocation71_spill] sm:$0xff]  ;;  %v8135_v18 = vld [vmem:[#allocation81_spill] sm:$0xff] }
 0x1a0   :  { %2591 = vmatpush.msrb.mxu2 %v8088_v55  ;;  %2611 = vmatpush.msrb.mxu3 %v8089_v56  ;;  %v1723_v6 = vadd.f32 %v1722_v19, %v1703_v11  ;;  %v8124_v55 = vld [vmem:[#allocation72_spill] sm:$0xff]  ;;  %v8126_v56 = vld [vmem:[#allocation73_spill] sm:$0xff]  ;;  %v8136_v19 = vld [vmem:[#allocation82_spill] sm:$0xff] }
 0x1a1   :  { %2552 = vmatpush.msra.mxu0 %v8090_v59  ;;  %2572 = vmatpush.msra.mxu1 %v8091_v60  ;;  %v8127_v59 = vld [vmem:[#allocation74_spill] sm:$0xff]  ;;  %v8147_v32 = vld [vmem:[#allocation93_spill] sm:$0xff] }
 0x1a2   :  { %2592 = vmatpush.msrb.mxu2 %v8092_v62  ;;  %2612 = vmatpush.msrb.mxu3 %v8093_v63  ;;  %v1914_v62 = vpop.f32.mrf.mxu3  ;;  %v1763_v63 = vadd.f32 %v1762_v58, %v1743_v41  ;;  %v8148_v58 = vld [vmem:[#allocation94_spill] sm:$0xff]  ;;  %v8150_v11 = vld [vmem:[#allocation97_spill] sm:$0xff] }
 0x1a3   :  { %2553 = vmatpush.msra.mxu0 %v8094_v3  ;;  %2573 = vmatpush.msra.mxu1 %v8095_v4  ;;  %v8157_v27 = vld [vmem:[#allocation105_spill] sm:$0xff] }
 0x1a4   :  { %2593 = vmatpush.msrb.mxu2 %v8096_v5  ;;  %2613 = vmatpush.msrb.mxu3 %v8097_v9  ;;  %v8162_v41 = vld [vmem:[#allocation109_spill] sm:$0xff] }
 0x1a5   :  { %2554 = vmatpush.msra.mxu0 %v8098_v16  ;;  %2574 = vmatpush.msra.mxu1 %v8099_v17  ;;  %v1894_v60 = vpop.f32.mrf.mxu2  ;;  %v8131_v16 = vld [vmem:[#allocation78_spill] sm:$0xff] }
 0x1a6   :  { %2594 = vmatpush.msrb.mxu2 %v8100_v20  ;;  %2614 = vmatpush.msrb.mxu3 %v8101_v21  ;;  %v1915_v3 = vadd.f32 %v1914_v62, %v1894_v60  ;;  %v8137_v20 = vld [vmem:[#allocation83_spill] sm:$0xff]  ;;  %v8138_v21 = vld [vmem:[#allocation84_spill] sm:$0xff]  ;;  %v8173_v62 = vld [vmem:[#allocation121_spill] sm:$0xff] }
 0x1a7   :  { %2555 = vmatpush.msra.mxu0 %v8102_v22  ;;  %2575 = vmatpush.msra.mxu1 %v8103_v23  ;;  %v8140_v23 = vld [vmem:[#allocation86_spill] sm:$0xff]  ;;  %v8172_v60 = vld [vmem:[#allocation120_spill] sm:$0xff] }
 0x1a8   :  { %2595 = vmatpush.msrb.mxu2 %v8104_v35  ;;  %2615 = vmatpush.msrb.mxu3 %v8105_v36  ;;  %v1918_v9 = vadd.f32 %v1915_v3, %v1763_v63  ;;  %v8174_v63 = vld [vmem:[#allocation122_spill] sm:$0xff]  ;;  %v8176_v3 = vld [vmem:[#allocation124_spill] sm:$0xff] }
 0x1a9   :  { %2556 = vmatpush.msra.mxu0 %v8106_v38  ;;  %2576 = vmatpush.msra.mxu1 %v8107_v39  ;;  %v8141_v38 = vld [vmem:[#allocation87_spill] sm:$0xff]  ;;  %v8142_v39 = vld [vmem:[#allocation88_spill] sm:$0xff] }
 0x1aa   :  { %2596 = vmatpush.msrb.mxu2 %v8108_v44  ;;  %2616 = vmatpush.msrb.mxu3 %v8109_v45  ;;  %v8143_v44 = vld [vmem:[#allocation89_spill] sm:$0xff]  ;;  %v8144_v45 = vld [vmem:[#allocation90_spill] sm:$0xff] }
 0x1ab   :  { %2557 = vmatpush.msra.mxu0 %v5863_v2  ;;  %2577 = vmatpush.msra.mxu1 %v5865_v57  ;;  %v1874_v2 = vpop.f32.mrf.mxu1  ;;  %v8116_v57 = vld [vmem:[#allocation64_spill] sm:$0xff] }
 0x1ac   :  { %2597 = vmatpush.msrb.mxu2 %v8110_v54  ;;  %2617 = vmatpush.msrb.mxu3 %v8111_v31  ;;  %v1875_v33 = vadd.f32 %v1874_v2, %v1854_v29  ;;  %v8145_v54 = vld [vmem:[#allocation91_spill] sm:$0xff]  ;;  %v8146_v31 = vld [vmem:[#allocation92_spill] sm:$0xff]  ;;  %v8153_v29 = vld [vmem:[#allocation101_spill] sm:$0xff] }
 0x1ad   :  { %2558 = vmatpush.msra.mxu0 %v5873_v14  ;;  %2578 = vmatpush.msra.mxu1 %v8112_v12  ;;  %v1461_v14 = vld [vmem:[%s7690_s9] sm:$0x3]  ;;  %v8154_v2 = vld [vmem:[#allocation102_spill] sm:$0xff]  ;;  %s5180_s9 = smov [#allocation13]  }
 0x1ae   :  { %2598 = vmatpush.msrb.mxu2 %v8113_v61  ;;  %2618 = vmatpush.msrb.mxu3 %v8114_v28  ;;  %v6358_v4 = vperm.slane %v1461_v14, 1  ;;  %v8149_v12 = vld [vmem:[#allocation96_spill] sm:$0xff]  ;;  %v8151_v61 = vld [vmem:[#allocation98_spill] sm:$0xff]  ;;  %v8152_v28 = vld [vmem:[#allocation99_spill] sm:$0xff]  ;;  %s4521_s6 = sshll.u32 %s5180_s9, 4  ;;  %s4522_s6 = int_to_ptr.vmem [resolvable:$true] %s4521_s6 }
 0x1af   :  { %2559 = vmatpush.msra.mxu0 %v8115_v24  ;;  %2579 = vmatpush.msra.mxu1 %v8116_v57  ;;  %v8155_v24 = vld [vmem:[#allocation103_spill] sm:$0xff]  ;;  %v8156_v57 = vld [vmem:[#allocation104_spill] sm:$0xff]  ;;  %4529 = dma.vmem_to_hbm [thread:$0]  %s4522_s6, 512, %s4524_s0, [#allocation10], %s5176_s4, %s5176_s4, %s5177_s3  }
 0x1b0   :  { %2599 = vmatpush.msrb.mxu2 %v8117_v34  ;;  %2619 = vmatpush.msrb.mxu3 %v8118_v40  ;;  %8129 = vst [vmem:[#allocation33_spill] sm:$0xff] %v6358_v4  ;;  %v8158_v34 = vld [vmem:[#allocation106_spill] sm:$0xff]  ;;  %v8159_v40 = vld [vmem:[#allocation107_spill] sm:$0xff] }
 0x1b1   :  { %2560 = vmatpush.msra.mxu0 %v5904_v15  ;;  %2580 = vmatpush.msra.mxu1 %v5906_v50  ;;  %v1917_v15 = vadd.f32 %v1875_v33, %v1723_v6  ;;  %v6352_v50 = vperm.slane %v1461_v14, 0  ;;  %v8160_v33 = vld [vmem:[#allocation108_spill] sm:$0xff] }
 0x1b2   :  { %2600 = vmatpush.msrb.mxu2 %v8119_v42  ;;  %2620 = vmatpush.msrb.mxu3 %v8120_v48  ;;  %v6401_v14 = vld.sshfl [vmem:[#allocation1] sm:$0xff pattern:$0x73625140]  ;;  %v8163_v42 = vld [vmem:[#allocation110_spill] sm:$0xff] }
 0x1b3   :  { %2561 = vmatpush.msra.mxu0 %v8121_v49  ;;  %2581 = vmatpush.msra.mxu1 %v8122_v52  ;;  %8125 = vst [vmem:[#allocation32_spill] sm:$0xff] %v6352_v50  ;;  %v1924_v5 = vadd.f32 %v6352_v50, %v1917_v15  ;;  %v6405_v48 = vld.sshfl [vmem:[#allocation1 + $0x8] sm:$0xff pattern:$0x73625140]  ;;  %v8165_v49 = vld [vmem:[#allocation111_spill] sm:$0xff]  ;;  %v8166_v52 = vld [vmem:[#allocation112_spill] sm:$0xff] }
 0x1b4   :  { %2601 = vmatpush.msrb.mxu2 %v8123_v53  ;;  %2621 = vmatpush.msrb.mxu3 %v8124_v55  ;;  %8161 = vst [vmem:[#allocation34_spill] sm:$0xff] %v6401_v14  ;;  %v8167_v53 = vld [vmem:[#allocation113_spill] sm:$0xff]  ;;  %v8168_v55 = vld [vmem:[#allocation114_spill] sm:$0xff]  ;;  %v8169_v15 = vld [vmem:[#allocation115_spill] sm:$0xff] }
 0x1b5   :  { %2562 = vmatpush.msra.mxu0 %v8126_v56  ;;  %2582 = vmatpush.msra.mxu1 %v8127_v59  ;;  %vm1926_vm4 = vcmp.ge.f32.partialorder %v1924_v5, 0.0  ;;  %8164 = vst [vmem:[#allocation35_spill] sm:$0xff] %v6405_v48  ;;  %v8170_v56 = vld [vmem:[#allocation116_spill] sm:$0xff]  ;;  %v8171_v59 = vld [vmem:[#allocation119_spill] sm:$0xff] }
 0x1b6   :  { %2602 = vmatpush.msrb.mxu2 %v8128_v1  ;;  %2622 = vmatpush.msrb.mxu3 %v5938_v13  ;;  %v1925_v13 = vadd.f32 %v6358_v4, %v1918_v9  ;;  %v8175_v1 = vld [vmem:[#allocation123_spill] sm:$0xff]  ;;  %v8178_v9 = vld [vmem:[#allocation126_spill] sm:$0xff]  ;;  %v2986_v48 = vld [vmem:[#allocation8 + $0x320] sm:$0xff] }
 0x1b7   :  { %2563 = vmatpush.msra.mxu0 %v5942_v0  ;;  %2583 = vmatpush.msra.mxu1 %v5944_v46  ;;  %v8132_v46 = vld [vmem:[#allocation77_spill] sm:$0xff]  ;;  %v8133_v0 = vld [vmem:[#allocation79_spill] sm:$0xff] }
 0x1b8   :  { %2603 = vmatpush.msrb.mxu2 %v5948_v37  ;;  %2623 = vmatpush.msrb.mxu3 %v5950_v7  ;;  %v8134_v37 = vld [vmem:[#allocation80_spill] sm:$0xff]  ;;  %v1928_v7 = vmul.f32 0.1, %v1924_v5  ;;  %vm1927_vm2 = vcmp.ge.f32.partialorder %v1925_v13, 0.0  ;;  %v1929_v17 = vmul.f32 0.1, %v1925_v13 }
 0x1b9   :  { %2564 = vmatmul.f32.vlgmr.msra.gmra.mxu0 %v8130_v10  ;;  %2584 = vmatmul.f32.vlgmr.msra.gmra.mxu1 %v8131_v16  ;;  %v2984_v14 = vld [vmem:[#allocation8 + $0x310] sm:$0xff] }
 0x1ba   :  { %2604 = vmatmul.f32.vlgmr.msrb.gmra.mxu2 %v8130_v10  ;;  %2624 = vmatmul.f32.vlgmr.msrb.gmra.mxu3 %v8131_v16  ;;  %v1931_v22 = vsel %vm1927_vm2, %v1925_v13, %v1929_v17  ;;  %v1930_v36 = vsel %vm1926_vm4, %v1924_v5, %v1928_v7  ;;  %v8177_v5 = vld [vmem:[#allocation125_spill] sm:$0xff]  ;;  %v8179_v10 = vld [vmem:[#allocation127_spill] sm:$0xff]  ;;  %v8180_v16 = vld [vmem:[#allocation128_spill] sm:$0xff]  ;;  %vm4390_vm2 = vcmask 261120  }
 0x1bb   :  { %2634 = vmatpush.msrb.mxu0 %v5960_v43  ;;  %2654 = vmatpush.msrb.mxu1 %v8132_v46  ;;  %v8139_v43 = vld [vmem:[#allocation85_spill] sm:$0xff]  ;;  %v1934_v35 = vrot.slane %v1931_v22, 6  ;;  %v8182_v46 = vld [vmem:[#allocation130_spill] sm:$0xff]  ;;  %v8185_v7 = vld [vmem:[#allocation135_spill] sm:$0xff] }
 0x1bc   :  { %2674 = vmatpush.msra.mxu2 %v8133_v0  ;;  %2694 = vmatpush.msra.mxu3 %v8134_v37  ;;  %v8181_v13 = vld [vmem:[#allocation129_spill] sm:$0xff]  ;;  %v8183_v0 = vld [vmem:[#allocation131_spill] sm:$0xff]  ;;  %v8184_v37 = vld [vmem:[#allocation132_spill] sm:$0xff] }
 0x1bd   :  { %2635 = vmatpush.msrb.mxu0 %v8135_v18  ;;  %2655 = vmatpush.msrb.mxu1 %v8136_v19  ;;  %v1935_v51 = vsel %vm300_vm3, %v1930_v36, %v1934_v35  ;;  %v8186_v17 = vld [vmem:[#allocation136_spill] sm:$0xff]  ;;  %v8187_v18 = vld [vmem:[#allocation137_spill] sm:$0xff]  ;;  %v8188_v19 = vld [vmem:[#allocation138_spill] sm:$0xff] }
 0x1be   :  { %2675 = vmatpush.msra.mxu2 %v8137_v20  ;;  %2695 = vmatpush.msra.mxu3 %v8138_v21  ;;  %1937 = vst [vmem:[#allocation14] sm:$0xf] %v1935_v51  ;;  %v8191_v20 = vld [vmem:[#allocation141_spill] sm:$0xff]  ;;  %v8192_v21 = vld [vmem:[#allocation142_spill] sm:$0xff]  ;;  %v8193_v22 = vld [vmem:[#allocation95_spill] sm:$0xff] }
 0x1bf   :  { %2636 = vmatpush.msrb.mxu0 %v8139_v43  ;;  %2656 = vmatpush.msrb.mxu1 %v8140_v23  ;;  %1939 = vst [vmem:[#allocation3 + $0x4] sm:$0xf] %v1935_v51  ;;  %v8194_v43 = vld [vmem:[#allocation100_spill] sm:$0xff]  ;;  %v8195_v23 = vld [vmem:[#allocation143_spill] sm:$0xff]  ;;  %v8204_v51 = vld [vmem:[#allocation154_spill] sm:$0xff] }
 0x1c0   :  { %2676 = vmatpush.msra.mxu2 %v8141_v38  ;;  %2696 = vmatpush.msra.mxu3 %v8142_v39  ;;  %v8197_v35 = vld [vmem:[#allocation147_spill] sm:$0xff]  ;;  %v8198_v36 = vld [vmem:[#allocation148_spill] sm:$0xff]  ;;  %v8200_v38 = vld [vmem:[#allocation150_spill] sm:$0xff] }
 0x1c1   :  { %2637 = vmatpush.msrb.mxu0 %v8143_v44  ;;  %2657 = vmatpush.msrb.mxu1 %v8144_v45  ;;  %v8201_v39 = vld [vmem:[#allocation151_spill] sm:$0xff]  ;;  %v8202_v44 = vld [vmem:[#allocation152_spill] sm:$0xff]  ;;  %v8203_v45 = vld [vmem:[#allocation153_spill] sm:$0xff] }
 0x1c2   :  { %2677 = vmatpush.msra.mxu2 %v8145_v54  ;;  %2697 = vmatpush.msra.mxu3 %v8146_v31  ;;  %v8205_v54 = vld [vmem:[#allocation155_spill] sm:$0xff]  ;;  %v8206_v31 = vld [vmem:[#allocation156_spill] sm:$0xff] }
 0x1c3   :  { %2638 = vmatpush.msrb.mxu0 %v8147_v32  ;;  %2658 = vmatpush.msrb.mxu1 %v8148_v58  ;;  %v8207_v32 = vld [vmem:[#allocation157_spill] sm:$0xff]  ;;  %v8208_v58 = vld [vmem:[#allocation158_spill] sm:$0xff] }
 0x1c4   :  { %2678 = vmatpush.msra.mxu2 %v8149_v12  ;;  %2698 = vmatpush.msra.mxu3 %v8150_v11  ;;  %v8209_v12 = vld [vmem:[#allocation159_spill] sm:$0xff]  ;;  %v8210_v11 = vld [vmem:[#allocation160_spill] sm:$0xff] }
 0x1c5   :  { %2639 = vmatpush.msrb.mxu0 %v8151_v61  ;;  %2659 = vmatpush.msrb.mxu1 %v8152_v28  ;;  %v8211_v61 = vld [vmem:[#allocation161_spill] sm:$0xff]  ;;  %v8212_v28 = vld [vmem:[#allocation162_spill] sm:$0xff] }
 0x1c6   :  { %2679 = vmatpush.msra.mxu2 %v8153_v29  ;;  %2699 = vmatpush.msra.mxu3 %v8154_v2  ;;  %v3390_v6 = vld [vmem:[#allocation3 + $0x4] sm:$0xf]  ;;  %v8213_v29 = vld [vmem:[#allocation163_spill] sm:$0xff]  ;;  %v8214_v2 = vld [vmem:[#allocation164_spill] sm:$0xff] }
 0x1c7   :  { %2640 = vmatpush.msrb.mxu0 %v8155_v24  ;;  %2660 = vmatpush.msrb.mxu1 %v8156_v57  ;;  %3425 = vst [vmem:[#allocation1] ss:$4 sm:$0xff] %v3390_v6  ;;  %v8215_v24 = vld [vmem:[#allocation165_spill] sm:$0xff]  ;;  %v8216_v57 = vld [vmem:[#allocation166_spill] sm:$0xff] }
 0x1c8   :  { %2680 = vmatpush.msra.mxu2 %v8157_v27  ;;  %2700 = vmatpush.msra.mxu3 %v8158_v34  ;;  %v8217_v27 = vld [vmem:[#allocation167_spill] sm:$0xff]  ;;  %v8218_v34 = vld [vmem:[#allocation168_spill] sm:$0xff]  ;;  %v8219_v6 = vld [vmem:[#allocation169_spill] sm:$0xff] }
 0x1c9   :  { %2641 = vmatpush.msrb.mxu0 %v8159_v40  ;;  %2661 = vmatpush.msrb.mxu1 %v8160_v33  ;;  %v6467_v40 = vld [vmem:[#allocation8 + $0x480] sm:$0xff] }
 0x1ca   :  { %2681 = vmatpush.msra.mxu2 %v8162_v41  ;;  %2701 = vmatpush.msra.mxu3 %v8163_v42  ;;  %v6469_v33 = vld [vmem:[#allocation8 + $0x580] sm:$0xff]  ;;  %v8220_v41 = vld [vmem:[#allocation170_spill] sm:$0xff] }
 0x1cb   :  { %2642 = vmatpush.msrb.mxu0 %v8165_v49  ;;  %2662 = vmatpush.msrb.mxu1 %v8166_v52  ;;  %v6473_v42 = vld [vmem:[#allocation8 + $0x488] sm:$0xff]  ;;  %v8221_v52 = vld [vmem:[#allocation171_spill] sm:$0xff] }
 0x1cc   :  { %2682 = vmatpush.msra.mxu2 %v8167_v53  ;;  %2702 = vmatpush.msra.mxu3 %v8168_v55  ;;  %v6475_v49 = vld [vmem:[#allocation8 + $0x588] sm:$0xff]  ;;  %v6479_v53 = vld [vmem:[#allocation8 + $0x470] sm:$0xff] }
 0x1cd   :  { %2643 = vmatpush.msrb.mxu0 %v8169_v15  ;;  %2663 = vmatpush.msrb.mxu1 %v8170_v56  ;;  %v6481_v55 = vld [vmem:[#allocation8 + $0x570] sm:$0xff]  ;;  %v6485_v15 = vld [vmem:[#allocation8 + $0x478] sm:$0xff] }
 0x1ce   :  { %2683 = vmatpush.msra.mxu2 %v8171_v59  ;;  %2703 = vmatpush.msra.mxu3 %v8172_v60  ;;  %v6487_v56 = vld [vmem:[#allocation8 + $0x578] sm:$0xff]  ;;  %v6491_v59 = vld [vmem:[#allocation8 + $0x460] sm:$0xff] }
 0x1cf   :  { %2644 = vmatpush.msrb.mxu0 %v8173_v62  ;;  %2664 = vmatpush.msrb.mxu1 %v8174_v63  ;;  %v6493_v60 = vld [vmem:[#allocation8 + $0x560] sm:$0xff]  ;;  %v6499_v62 = vld [vmem:[#allocation8 + $0x568] sm:$0xff]  ;;  %v6503_v63 = vld [vmem:[#allocation8 + $0x450] sm:$0xff] }
 0x1d0   :  { %2684 = vmatpush.msra.mxu2 %v8175_v1  ;;  %2704 = vmatpush.msra.mxu3 %v8176_v3  ;;  %v6505_v1 = vld [vmem:[#allocation8 + $0x550] sm:$0xff]  ;;  %v6509_v3 = vld [vmem:[#allocation8 + $0x458] sm:$0xff] }
 0x1d1   :  { %2645 = vmatpush.msrb.mxu0 %v8177_v5  ;;  %2665 = vmatpush.msrb.mxu1 %v8178_v9  ;;  %v6511_v5 = vld [vmem:[#allocation8 + $0x558] sm:$0xff]  ;;  %v6515_v9 = vld [vmem:[#allocation8 + $0x440] sm:$0xff] }
 0x1d2   :  { %2685 = vmatpush.msra.mxu2 %v8179_v10  ;;  %2705 = vmatpush.msra.mxu3 %v8180_v16  ;;  %v6517_v10 = vld [vmem:[#allocation8 + $0x540] sm:$0xff]  ;;  %v6521_v16 = vld [vmem:[#allocation8 + $0x448] sm:$0xff] }
 0x1d3   :  { %2646 = vmatpush.msrb.mxu0 %v6115_v8  ;;  %2666 = vmatpush.msrb.mxu1 %v6117_v26  ;;  %v8189_v8 = vld [vmem:[#allocation139_spill] sm:$0xff]  ;;  %v8190_v26 = vld [vmem:[#allocation140_spill] sm:$0xff] }
 0x1d4   :  { %2686 = vmatpush.msra.mxu2 %v8181_v13  ;;  %2706 = vmatpush.msra.mxu3 %v8182_v46  ;;  %v6523_v13 = vld [vmem:[#allocation8 + $0x548] sm:$0xff]  ;;  %v6527_v46 = vld [vmem:[#allocation8 + $0x430] sm:$0xff] }
 0x1d5   :  { %2647 = vmatpush.msrb.mxu0 %v8183_v0  ;;  %2667 = vmatpush.msrb.mxu1 %v8184_v37  ;;  %v6529_v0 = vld [vmem:[#allocation8 + $0x530] sm:$0xff]  ;;  %v6533_v37 = vld [vmem:[#allocation8 + $0x438] sm:$0xff] }
 0x1d6   :  { %2687 = vmatpush.msra.mxu2 %v8185_v7  ;;  %2707 = vmatpush.msra.mxu3 %v8186_v17  ;;  %v6535_v7 = vld [vmem:[#allocation8 + $0x538] sm:$0xff]  ;;  %v6539_v17 = vld [vmem:[#allocation8 + $0x420] sm:$0xff] }
 0x1d7   :  { %2648 = vmatpush.msrb.mxu0 %v8187_v18  ;;  %2668 = vmatpush.msrb.mxu1 %v8188_v19  ;;  %v6541_v18 = vld [vmem:[#allocation8 + $0x520] sm:$0xff]  ;;  %v6545_v19 = vld [vmem:[#allocation8 + $0x428] sm:$0xff] }
 0x1d8   :  { %2688 = vmatpush.msra.mxu2 %v6149_v30  ;;  %2708 = vmatpush.msra.mxu3 %v8189_v8  ;;  %v8196_v30 = vld [vmem:[#allocation144_spill] sm:$0xff]  ;;  %v6547_v8 = vld [vmem:[#allocation8 + $0x528] sm:$0xff] }
 0x1d9   :  { %2649 = vmatpush.msrb.mxu0 %v8190_v26  ;;  %2669 = vmatpush.msrb.mxu1 %v6157_v47  ;;  %v8199_v47 = vld [vmem:[#allocation149_spill] sm:$0xff]  ;;  %v6551_v26 = vld [vmem:[#allocation8 + $0x410] sm:$0xff] }
 0x1da   :  { %2689 = vmatpush.msra.mxu2 %v8191_v20  ;;  %2709 = vmatpush.msra.mxu3 %v8192_v21  ;;  %v6553_v20 = vld [vmem:[#allocation8 + $0x510] sm:$0xff]  ;;  %v6557_v21 = vld [vmem:[#allocation8 + $0x418] sm:$0xff] }
 0x1db   :  { %2650 = vmatmul.f32.vlgmr.msrb.gmra.mxu0 %v8193_v22  ;;  %2670 = vmatmul.f32.vlgmr.msrb.gmra.mxu1 %v8194_v43 }
 0x1dc   :  { %2690 = vmatmul.f32.vlgmr.msra.gmra.mxu2 %v8193_v22  ;;  %2710 = vmatmul.f32.vlgmr.msra.gmra.mxu3 %v8194_v43  ;;  %v6559_v22 = vld [vmem:[#allocation8 + $0x518] sm:$0xff]  ;;  %v6563_v43 = vld [vmem:[#allocation8 + $0x400] sm:$0xff] }
 0x1dd   :  { %2785 = vmatpush.msra.mxu0 %v8195_v23  ;;  %2805 = vmatpush.msra.mxu1 %v8196_v30  ;;  %v6565_v23 = vld [vmem:[#allocation8 + $0x500] sm:$0xff]  ;;  %v6569_v30 = vld [vmem:[#allocation8 + $0x408] sm:$0xff] }
 0x1de   :  { %2825 = vmatpush.msrb.mxu2 %v8197_v35  ;;  %2845 = vmatpush.msrb.mxu3 %v8198_v36  ;;  %v6571_v35 = vld [vmem:[#allocation8 + $0x508] sm:$0xff]  ;;  %v2980_v36 = vld [vmem:[#allocation8 + $0x2f0] sm:$0xff] }
 0x1df   :  { %2786 = vmatpush.msra.mxu0 %v8199_v47  ;;  %2806 = vmatpush.msra.mxu1 %v8200_v38  ;;  %v3012_v47 = vld [vmem:[#allocation8 + $0x3f0] sm:$0xff]  ;;  %v8222_v38 = vld [vmem:[#allocation117_spill] sm:$0xff] }
 0x1e0   :  { %2826 = vmatpush.msrb.mxu2 %v8201_v39  ;;  %2846 = vmatpush.msrb.mxu3 %v8202_v44  ;;  %v8223_v39 = vld [vmem:[#allocation118_spill] sm:$0xff]  ;;  %v2981_v44 = vld [vmem:[#allocation8 + $0x2f8] sm:$0xff] }
 0x1e1   :  { %2787 = vmatpush.msra.mxu0 %v8203_v45  ;;  %2807 = vmatpush.msra.mxu1 %v8204_v51  ;;  %v3013_v45 = vld [vmem:[#allocation8 + $0x3f8] sm:$0xff]  ;;  %v2978_v51 = vld [vmem:[#allocation8 + $0x2e0] sm:$0xff] }
 0x1e2   :  { %2827 = vmatpush.msrb.mxu2 %v8205_v54  ;;  %2847 = vmatpush.msrb.mxu3 %v8206_v31  ;;  %v3010_v54 = vld [vmem:[#allocation8 + $0x3e0] sm:$0xff]  ;;  %v2979_v31 = vld [vmem:[#allocation8 + $0x2e8] sm:$0xff] }
 0x1e3   :  { %2788 = vmatpush.msra.mxu0 %v8207_v32  ;;  %2808 = vmatpush.msra.mxu1 %v8208_v58  ;;  %v3011_v32 = vld [vmem:[#allocation8 + $0x3e8] sm:$0xff]  ;;  %v2976_v58 = vld [vmem:[#allocation8 + $0x2d0] sm:$0xff] }
 0x1e4   :  { %2828 = vmatpush.msrb.mxu2 %v8209_v12  ;;  %2848 = vmatpush.msrb.mxu3 %v8210_v11  ;;  %v3008_v12 = vld [vmem:[#allocation8 + $0x3d0] sm:$0xff]  ;;  %v2977_v11 = vld [vmem:[#allocation8 + $0x2d8] sm:$0xff] }
 0x1e5   :  { %2789 = vmatpush.msra.mxu0 %v8211_v61  ;;  %2809 = vmatpush.msra.mxu1 %v8212_v28  ;;  %v3009_v61 = vld [vmem:[#allocation8 + $0x3d8] sm:$0xff]  ;;  %v2974_v28 = vld [vmem:[#allocation8 + $0x2c0] sm:$0xff] }
 0x1e6   :  { %2829 = vmatpush.msrb.mxu2 %v8213_v29  ;;  %2849 = vmatpush.msrb.mxu3 %v8214_v2  ;;  %v3006_v29 = vld [vmem:[#allocation8 + $0x3c0] sm:$0xff]  ;;  %v2975_v2 = vld [vmem:[#allocation8 + $0x2c8] sm:$0xff] }
 0x1e7   :  { %2790 = vmatpush.msra.mxu0 %v8215_v24  ;;  %2810 = vmatpush.msra.mxu1 %v8216_v57  ;;  %v3007_v24 = vld [vmem:[#allocation8 + $0x3c8] sm:$0xff]  ;;  %v2093_v57 = vpop.f32.mrf.mxu0 }
 0x1e8   :  { %2830 = vmatpush.msrb.mxu2 %v8217_v27  ;;  %2850 = vmatpush.msrb.mxu3 %v8218_v34  ;;  %v2113_v27 = vpop.f32.mrf.mxu1  ;;  %v2972_v34 = vld [vmem:[#allocation8 + $0x2b0] sm:$0xff] }
 0x1e9   :  { %2791 = vmatpush.msra.mxu0 %v8219_v6  ;;  %2811 = vmatpush.msra.mxu1 %v8220_v41  ;;  %v3004_v6 = vld [vmem:[#allocation8 + $0x3b0] sm:$0xff]  ;;  %v2973_v41 = vld [vmem:[#allocation8 + $0x2b8] sm:$0xff] }
 0x1ea   :  { %2831 = vmatpush.msrb.mxu2 %v8221_v52  ;;  %2851 = vmatpush.msrb.mxu3 %v6255_v25  ;;  %v6497_v25 = vld [vmem:[#allocation8 + $0x468] sm:$0xff]  ;;  %v3005_v52 = vld [vmem:[#allocation8 + $0x3b8] sm:$0xff] }
 0x1eb   :  { %2792 = vmatpush.msra.mxu0 %v6467_v40  ;;  %2812 = vmatpush.msra.mxu1 %v6469_v33 }
 0x1ec   :  { %2832 = vmatpush.msrb.mxu2 %v6473_v42  ;;  %2852 = vmatpush.msrb.mxu3 %v6475_v49 }
 0x1ed   :  { %2793 = vmatpush.msra.mxu0 %v6479_v53  ;;  %2813 = vmatpush.msra.mxu1 %v6481_v55 }
 0x1ee   :  { %2833 = vmatpush.msrb.mxu2 %v6485_v15  ;;  %2853 = vmatpush.msrb.mxu3 %v6487_v56 }
 0x1ef   :  { %2794 = vmatpush.msra.mxu0 %v6491_v59  ;;  %2814 = vmatpush.msra.mxu1 %v6493_v60 }
 0x1f0   :  { %2834 = vmatpush.msrb.mxu2 %v6497_v25  ;;  %2854 = vmatpush.msrb.mxu3 %v6499_v62 }
 0x1f1   :  { %2795 = vmatpush.msra.mxu0 %v6503_v63  ;;  %2815 = vmatpush.msra.mxu1 %v6505_v1 }
 0x1f2   :  { %2835 = vmatpush.msrb.mxu2 %v6509_v3  ;;  %2855 = vmatpush.msrb.mxu3 %v6511_v5 }
 0x1f3   :  { %2796 = vmatpush.msra.mxu0 %v6515_v9  ;;  %2816 = vmatpush.msra.mxu1 %v6517_v10 }
 0x1f4   :  { %2836 = vmatpush.msrb.mxu2 %v6521_v16  ;;  %2856 = vmatpush.msrb.mxu3 %v6523_v13 }
 0x1f5   :  { %2797 = vmatpush.msra.mxu0 %v6527_v46  ;;  %2817 = vmatpush.msra.mxu1 %v6529_v0 }
 0x1f6   :  { %2837 = vmatpush.msrb.mxu2 %v6533_v37  ;;  %2857 = vmatpush.msrb.mxu3 %v6535_v7 }
 0x1f7   :  { %2798 = vmatpush.msra.mxu0 %v6539_v17  ;;  %2818 = vmatpush.msra.mxu1 %v6541_v18 }
 0x1f8   :  { %2838 = vmatpush.msrb.mxu2 %v6545_v19  ;;  %2858 = vmatpush.msrb.mxu3 %v6547_v8 }
 0x1f9   :  { %2799 = vmatpush.msra.mxu0 %v6551_v26  ;;  %2819 = vmatpush.msra.mxu1 %v6553_v20 }
 0x1fa   :  { %2839 = vmatpush.msrb.mxu2 %v6557_v21  ;;  %2859 = vmatpush.msrb.mxu3 %v6559_v22 }
 0x1fb   :  { %2800 = vmatpush.msra.mxu0 %v6563_v43  ;;  %2820 = vmatpush.msra.mxu1 %v6565_v23 }
 0x1fc   :  { %2840 = vmatpush.msrb.mxu2 %v6569_v30  ;;  %2860 = vmatpush.msrb.mxu3 %v6571_v35 }
 0x1fd   :  { %2801 = vmatmul.f32.vlgmr.msra.gmra.mxu0 %v8222_v38  ;;  %2821 = vmatmul.f32.vlgmr.msra.gmra.mxu1 %v8223_v39 }
 0x1fe   :  { %2841 = vmatmul.f32.vlgmr.msrb.gmra.mxu2 %v8222_v38  ;;  %2861 = vmatmul.f32.vlgmr.msrb.gmra.mxu3 %v8223_v39  ;;  %v2971_v38 = vld [vmem:[#allocation8 + $0x2a8] sm:$0xff] }
 0x1ff   :  { %3020 = vmatpush.msrb.mxu0 %v2980_v36  ;;  %3040 = vmatpush.msrb.mxu1 %v3012_v47  ;;  %v2970_v36 = vld [vmem:[#allocation8 + $0x2a0] sm:$0xff]  ;;  %v3003_v39 = vld [vmem:[#allocation8 + $0x3a8] sm:$0xff] }
 0x200   :  { %3060 = vmatpush.msra.mxu2 %v2981_v44  ;;  %3080 = vmatpush.msra.mxu3 %v3013_v45  ;;  %v3002_v47 = vld [vmem:[#allocation8 + $0x3a0] sm:$0xff]  ;;  %v2968_v44 = vld [vmem:[#allocation8 + $0x290] sm:$0xff] }
 0x201   :  { %3021 = vmatpush.msrb.mxu0 %v2978_v51  ;;  %3041 = vmatpush.msrb.mxu1 %v3010_v54  ;;  %v3000_v45 = vld [vmem:[#allocation8 + $0x390] sm:$0xff]  ;;  %v2969_v51 = vld [vmem:[#allocation8 + $0x298] sm:$0xff] }
 0x202   :  { %3061 = vmatpush.msra.mxu2 %v2979_v31  ;;  %3081 = vmatpush.msra.mxu3 %v3011_v32  ;;  %v3001_v54 = vld [vmem:[#allocation8 + $0x398] sm:$0xff]  ;;  %v2966_v31 = vld [vmem:[#allocation8 + $0x280] sm:$0xff] }
 0x203   :  { %3022 = vmatpush.msrb.mxu0 %v2976_v58  ;;  %3042 = vmatpush.msrb.mxu1 %v3008_v12  ;;  %v2998_v32 = vld [vmem:[#allocation8 + $0x380] sm:$0xff]  ;;  %v2133_v58 = vpop.f32.mrf.mxu2  ;;  %v2153_v12 = vpop.f32.mrf.mxu3 }
 0x204   :  { %3062 = vmatpush.msra.mxu2 %v2977_v11  ;;  %3082 = vmatpush.msra.mxu3 %v3009_v61  ;;  %v2967_v11 = vld [vmem:[#allocation8 + $0x288] sm:$0xff] }
 0x205   :  { %3023 = vmatpush.msrb.mxu0 %v2974_v28  ;;  %3043 = vmatpush.msrb.mxu1 %v3006_v29  ;;  %v2999_v61 = vld [vmem:[#allocation8 + $0x388] sm:$0xff]  ;;  %v2179_v28 = vpop.f32.mrf.mxu0  ;;  %v2199_v29 = vpop.f32.mrf.mxu1 }
 0x206   :  { %3063 = vmatpush.msra.mxu2 %v2975_v2  ;;  %3083 = vmatpush.msra.mxu3 %v3007_v24  ;;  %v2964_v2 = vld [vmem:[#allocation8 + $0x270] sm:$0xff] }
 0x207   :  { %3024 = vmatpush.msrb.mxu0 %v2972_v34  ;;  %3044 = vmatpush.msrb.mxu1 %v3004_v6  ;;  %v2996_v24 = vld [vmem:[#allocation8 + $0x370] sm:$0xff]  ;;  %v2965_v34 = vld [vmem:[#allocation8 + $0x278] sm:$0xff] }
 0x208   :  { %3064 = vmatpush.msra.mxu2 %v2973_v41  ;;  %3084 = vmatpush.msra.mxu3 %v3005_v52  ;;  %v2997_v6 = vld [vmem:[#allocation8 + $0x378] sm:$0xff]  ;;  %v2962_v41 = vld [vmem:[#allocation8 + $0x260] sm:$0xff] }
 0x209   :  { %3025 = vmatpush.msrb.mxu0 %v2970_v36  ;;  %3045 = vmatpush.msrb.mxu1 %v3002_v47  ;;  %v2994_v52 = vld [vmem:[#allocation8 + $0x360] sm:$0xff]  ;;  %v2963_v36 = vld [vmem:[#allocation8 + $0x268] sm:$0xff] }
 0x20a   :  { %3065 = vmatpush.msra.mxu2 %v2971_v38  ;;  %3085 = vmatpush.msra.mxu3 %v3003_v39  ;;  %v2995_v47 = vld [vmem:[#allocation8 + $0x368] sm:$0xff]  ;;  %v2960_v38 = vld [vmem:[#allocation8 + $0x250] sm:$0xff] }
 0x20b   :  { %3026 = vmatpush.msrb.mxu0 %v2968_v44  ;;  %3046 = vmatpush.msrb.mxu1 %v3000_v45  ;;  %v2992_v39 = vld [vmem:[#allocation8 + $0x350] sm:$0xff]  ;;  %v2961_v44 = vld [vmem:[#allocation8 + $0x258] sm:$0xff] }
 0x20c   :  { %3066 = vmatpush.msra.mxu2 %v2969_v51  ;;  %3086 = vmatpush.msra.mxu3 %v3001_v54  ;;  %v2993_v45 = vld [vmem:[#allocation8 + $0x358] sm:$0xff]  ;;  %v2114_v51 = vadd.f32 %v2113_v27, %v2093_v57  ;;  %v2958_v54 = vld [vmem:[#allocation8 + $0x240] sm:$0xff] }
 0x20d   :  { %3027 = vmatpush.msrb.mxu0 %v2966_v31  ;;  %3047 = vmatpush.msrb.mxu1 %v2998_v32  ;;  %v2990_v31 = vld [vmem:[#allocation8 + $0x340] sm:$0xff]  ;;  %v2219_v32 = vpop.f32.mrf.mxu2  ;;  %v2957_v57 = vld [vmem:[#allocation8 + $0x238] sm:$0xff] }
 0x20e   :  { %3067 = vmatpush.msra.mxu2 %v2967_v11  ;;  %3087 = vmatpush.msra.mxu3 %v2999_v61  ;;  %v2239_v11 = vpop.f32.mrf.mxu3  ;;  %v2959_v61 = vld [vmem:[#allocation8 + $0x248] sm:$0xff]  ;;  %v2989_v27 = vld [vmem:[#allocation8 + $0x338] sm:$0xff] }
 0x20f   :  { %3028 = vmatpush.msrb.mxu0 %v2964_v2  ;;  %3048 = vmatpush.msrb.mxu1 %v2996_v24  ;;  %v2991_v2 = vld [vmem:[#allocation8 + $0x348] sm:$0xff]  ;;  %v2180_v24 = vadd.f32 %v2179_v28, %v2114_v51  ;;  %v2952_v51 = vld [vmem:[#allocation8 + $0x210] sm:$0xff] }
 0x210   :  { %3068 = vmatpush.msra.mxu2 %v2965_v34  ;;  %3088 = vmatpush.msra.mxu3 %v2997_v6  ;;  %v2956_v34 = vld [vmem:[#allocation8 + $0x230] sm:$0xff]  ;;  %v2987_v28 = vld [vmem:[#allocation8 + $0x328] sm:$0xff] }
 0x211   :  { %3029 = vmatpush.msrb.mxu0 %v2962_v41  ;;  %3049 = vmatpush.msrb.mxu1 %v2994_v52  ;;  %v2988_v6 = vld [vmem:[#allocation8 + $0x330] sm:$0xff] }
 0x212   :  { %3069 = vmatpush.msra.mxu2 %v2963_v36  ;;  %3089 = vmatpush.msra.mxu3 %v2995_v47  ;;  %v2154_v36 = vadd.f32 %v2153_v12, %v2133_v58  ;;  %v2954_v47 = vld [vmem:[#allocation8 + $0x220] sm:$0xff] }
 0x213   :  { %3030 = vmatpush.msrb.mxu0 %v2960_v38  ;;  %3050 = vmatpush.msrb.mxu1 %v2992_v39  ;;  %v2955_v39 = vld [vmem:[#allocation8 + $0x228] sm:$0xff]  ;;  %v2950_v58 = vld [vmem:[#allocation8 + $0x200] sm:$0xff] }
 0x214   :  { %3070 = vmatpush.msra.mxu2 %v2961_v44  ;;  %3090 = vmatpush.msra.mxu3 %v2993_v45  ;;  %v2330_v41 = vpop.f32.mrf.mxu0  ;;  %v2350_v52 = vpop.f32.mrf.mxu1  ;;  %v2200_v44 = vadd.f32 %v2199_v29, %v2180_v24  ;;  %v2220_v45 = vadd.f32 %v2219_v32, %v2154_v36  ;;  %v2982_v12 = vld [vmem:[#allocation8 + $0x300] sm:$0xff] }
 0x215   :  { %3031 = vmatpush.msrb.mxu0 %v2958_v54  ;;  %3051 = vmatpush.msrb.mxu1 %v2990_v31  ;;  %v2351_v38 = vadd.f32 %v2350_v52, %v2330_v41  ;;  %v2953_v54 = vld [vmem:[#allocation8 + $0x218] sm:$0xff]  ;;  %v3357_v52 = vld [vmem:[#allocation3] sm:$0xf] }
 0x216   :  { %3071 = vmatpush.msra.mxu2 %v2959_v61  ;;  %3091 = vmatpush.msra.mxu3 %v2991_v2  ;;  %v2985_v31 = vld [vmem:[#allocation8 + $0x318] sm:$0xff]  ;;  %v2951_v2 = vld [vmem:[#allocation8 + $0x208] sm:$0xff]  ;;  %v2240_v24 = vadd.f32 %v2239_v11, %v2220_v45 }
 0x217   :  { %3032 = vmatpush.msrb.mxu0 %v2956_v34  ;;  %3052 = vmatpush.msrb.mxu1 %v2988_v6  ;;  %v2393_v61 = vadd.f32 %v2351_v38, %v2200_v44  ;;  %v2983_v34 = vld [vmem:[#allocation8 + $0x308] sm:$0xff]  ;;  %v6583_v32 = vld.sshfl [vmem:[#allocation1] sm:$0xff pattern:$0x73625140] }
 0x218   :  { %3072 = vmatpush.msra.mxu2 %v2957_v57  ;;  %3092 = vmatpush.msra.mxu3 %v2989_v27  ;;  %v2915_v57 = vld [vmem:[#allocation8 + $0xf0] sm:$0xff]  ;;  %v2916_v11 = vld [vmem:[#allocation8 + $0xf8] sm:$0xff]  ;;  %v2945_v44 = vld [vmem:[#allocation8 + $0x1e0] sm:$0xff] }
 0x219   :  { %3033 = vmatpush.msrb.mxu0 %v2954_v47  ;;  %3053 = vmatpush.msrb.mxu1 %v2986_v48  ;;  %v6585_v48 = vld.sshfl [vmem:[#allocation1 + $0x8] sm:$0xff pattern:$0x73625140]  ;;  %v2395_v27 = vadd.f32 %v2393_v61, %v6352_v50  ;;  %v8225_v38 = vld [vmem:[#allocation134_spill] sm:$0xff] }
 0x21a   :  { %3073 = vmatpush.msra.mxu2 %v2955_v39  ;;  %3093 = vmatpush.msra.mxu3 %v2987_v28  ;;  %3471 = vst [vmem:[#allocation1] ss:$4 sm:$0xff] %v3357_v52  ;;  %v8224_v47 = vld [vmem:[#allocation133_spill] sm:$0xff]  ;;  %v2948_v39 = vld [vmem:[#allocation8 + $0x1f8] sm:$0xff] }
 0x21b   :  { %3034 = vmatpush.msrb.mxu0 %v2952_v51  ;;  %3054 = vmatpush.msrb.mxu1 %v2984_v14  ;;  %v2370_v6 = vpop.f32.mrf.mxu2  ;;  %v2390_v29 = vpop.f32.mrf.mxu3  ;;  %v2947_v14 = vld [vmem:[#allocation8 + $0x1f0] sm:$0xff]  ;;  %v2913_v28 = vld [vmem:[#allocation8 + $0xe0] sm:$0xff]  ;;  %v2914_v51 = vld [vmem:[#allocation8 + $0xe8] sm:$0xff]  ;;  %vm2397_vm6 = vcmp.ge.f32.partialorder %v2395_v27, 0.0 }
 0x21c   :  { %3074 = vmatpush.msra.mxu2 %v2953_v54  ;;  %3094 = vmatpush.msra.mxu3 %v2985_v31  ;;  %v2391_v41 = vadd.f32 %v2390_v29, %v2370_v6  ;;  %v2946_v54 = vld [vmem:[#allocation8 + $0x1e8] sm:$0xff]  ;;  %v2911_v31 = vld [vmem:[#allocation8 + $0xd0] sm:$0xff]  ;;  %v2909_v6 = vld [vmem:[#allocation8 + $0xc0] sm:$0xff] }
 0x21d   :  { %3035 = vmatpush.msrb.mxu0 %v2950_v58  ;;  %3055 = vmatpush.msrb.mxu1 %v2982_v12  ;;  %v2399_v58 = vmul.f32 0.1, %v2395_v27  ;;  %v2943_v12 = vld [vmem:[#allocation8 + $0x1d0] sm:$0xff]  ;;  %v2941_v29 = vld [vmem:[#allocation8 + $0x1c0] sm:$0xff]  ;;  %v2942_v52 = vld [vmem:[#allocation8 + $0x1c8] sm:$0xff] }
 0x21e   :  { %3075 = vmatpush.msra.mxu2 %v2951_v2  ;;  %3095 = vmatpush.msra.mxu3 %v2983_v34  ;;  %v2394_v36 = vadd.f32 %v2391_v41, %v2240_v24  ;;  %v2912_v2 = vld [vmem:[#allocation8 + $0xd8] sm:$0xff]  ;;  %v2910_v41 = vld [vmem:[#allocation8 + $0xc8] sm:$0xff] }
 0x21f   :  { %3036 = vmatmul.f32.vlgmr.msrb.gmra.mxu0 %v8224_v47  ;;  %3056 = vmatmul.f32.vlgmr.msrb.gmra.mxu1 %v8225_v38  ;;  %v2944_v34 = vld [vmem:[#allocation8 + $0x1d8] sm:$0xff] }
 0x220   :  { %3076 = vmatmul.f32.vlgmr.msra.gmra.mxu2 %v8224_v47  ;;  %3096 = vmatmul.f32.vlgmr.msra.gmra.mxu3 %v8225_v38  ;;  %v2396_v45 = vadd.f32 %v2394_v36, %v6358_v4  ;;  %v2907_v36 = vld [vmem:[#allocation8 + $0xb0] sm:$0xff] }
 0x221   :  { %3106 = vmatpush.msra.mxu0 %v2915_v57  ;;  %3126 = vmatpush.msra.mxu1 %v2947_v14  ;;  %v2401_v14 = vsel %vm2397_vm6, %v2395_v27, %v2399_v58  ;;  %v2939_v47 = vld [vmem:[#allocation8 + $0x1b0] sm:$0xff]  ;;  %v2938_v27 = vld [vmem:[#allocation8 + $0x1a8] sm:$0xff]  ;;  %v2936_v58 = vld [vmem:[#allocation8 + $0x198] sm:$0xff] }
 0x222   :  { %3146 = vmatpush.msrb.mxu2 %v2916_v11  ;;  %3166 = vmatpush.msrb.mxu3 %v2948_v39  ;;  %vm2398_vm5 = vcmp.ge.f32.partialorder %v2396_v45, 0.0  ;;  %v2400_v61 = vmul.f32 0.1, %v2396_v45  ;;  %v2908_v11 = vld [vmem:[#allocation8 + $0xb8] sm:$0xff] }
 0x223   :  { %3107 = vmatpush.msra.mxu0 %v2913_v28  ;;  %3127 = vmatpush.msra.mxu1 %v2945_v44  ;;  %v2940_v39 = vld [vmem:[#allocation8 + $0x1b8] sm:$0xff]  ;;  %v2905_v28 = vld [vmem:[#allocation8 + $0xa0] sm:$0xff] }
 0x224   :  { %3147 = vmatpush.msrb.mxu2 %v2914_v51  ;;  %3167 = vmatpush.msrb.mxu3 %v2946_v54  ;;  %v2402_v24 = vsel %vm2398_vm5, %v2396_v45, %v2400_v61  ;;  %v2937_v44 = vld [vmem:[#allocation8 + $0x1a0] sm:$0xff]  ;;  %v2906_v45 = vld [vmem:[#allocation8 + $0xa8] sm:$0xff]  ;;  %v2903_v51 = vld [vmem:[#allocation8 + $0x90] sm:$0xff] }
 0x225   :  { %3108 = vmatpush.msra.mxu0 %v2911_v31  ;;  %3128 = vmatpush.msra.mxu1 %v2943_v12  ;;  %v2405_v57 = vrot.slane %v2402_v24, 6  ;;  %v2935_v54 = vld [vmem:[#allocation8 + $0x190] sm:$0xff]  ;;  %v2904_v31 = vld [vmem:[#allocation8 + $0x98] sm:$0xff]  ;;  %v2901_v12 = vld [vmem:[#allocation8 + $0x80] sm:$0xff] }
 0x226   :  { %3148 = vmatpush.msrb.mxu2 %v2912_v2  ;;  %3168 = vmatpush.msrb.mxu3 %v2944_v34  ;;  %v2933_v61 = vld [vmem:[#allocation8 + $0x180] sm:$0xff]  ;;  %v2902_v2 = vld [vmem:[#allocation8 + $0x88] sm:$0xff] }
 0x227   :  { %3109 = vmatpush.msra.mxu0 %v2909_v6  ;;  %3129 = vmatpush.msra.mxu1 %v2941_v29  ;;  %v2406_v38 = vsel %vm300_vm3, %v2401_v14, %v2405_v57  ;;  %v2934_v34 = vld [vmem:[#allocation8 + $0x188] sm:$0xff]  ;;  %v2899_v6 = vld [vmem:[#allocation8 + $0x70] sm:$0xff]  ;;  %v6594_v24 = vld.sshfl [vmem:[#allocation1] sm:$0xff pattern:$0x73625140] }
 0x228   :  { %3149 = vmatpush.msrb.mxu2 %v2910_v41  ;;  %3169 = vmatpush.msrb.mxu3 %v2942_v52  ;;  %2409 = vst [vmem:[#allocation14 + $0x4] sm:$0xf] %v2406_v38  ;;  %v2931_v29 = vld [vmem:[#allocation8 + $0x170] sm:$0xff]  ;;  %v6596_v41 = vld.sshfl [vmem:[#allocation1 + $0x8] sm:$0xff pattern:$0x73625140] }
 0x229   :  { %2411 = vst [vmem:[#allocation3 + $0x8] sm:$0xf] %v2406_v38  ;;  %3110 = vmatpush.msra.mxu0 %v2907_v36  ;;  %3130 = vmatpush.msra.mxu1 %v2939_v47  ;;  %v2900_v52 = vld [vmem:[#allocation8 + $0x78] sm:$0xff]  ;;  %v2897_v36 = vld [vmem:[#allocation8 + $0x60] sm:$0xff]  ;;  %v2898_v38 = vld [vmem:[#allocation8 + $0x68] sm:$0xff] }
 0x22a   :  { %3150 = vmatpush.msrb.mxu2 %v2908_v11  ;;  %3170 = vmatpush.msrb.mxu3 %v2940_v39  ;;  %v2932_v57 = vld [vmem:[#allocation8 + $0x178] sm:$0xff]  ;;  %v2929_v47 = vld [vmem:[#allocation8 + $0x160] sm:$0xff]  ;;  %v2930_v11 = vld [vmem:[#allocation8 + $0x168] sm:$0xff] }
 0x22b   :  { %3111 = vmatpush.msra.mxu0 %v2905_v28  ;;  %3131 = vmatpush.msra.mxu1 %v2937_v44  ;;  %v2895_v39 = vld [vmem:[#allocation8 + $0x50] sm:$0xff]  ;;  %v2896_v44 = vld [vmem:[#allocation8 + $0x58] sm:$0xff] }
 0x22c   :  { %3151 = vmatpush.msrb.mxu2 %v2906_v45  ;;  %3171 = vmatpush.msrb.mxu3 %v2938_v27  ;;  %v2927_v28 = vld [vmem:[#allocation8 + $0x150] sm:$0xff]  ;;  %v2928_v45 = vld [vmem:[#allocation8 + $0x158] sm:$0xff]  ;;  %v2893_v27 = vld [vmem:[#allocation8 + $0x40] sm:$0xff] }
 0x22d   :  { %3112 = vmatpush.msra.mxu0 %v2903_v51  ;;  %3132 = vmatpush.msra.mxu1 %v2935_v54  ;;  %v2925_v51 = vld [vmem:[#allocation8 + $0x140] sm:$0xff]  ;;  %v2894_v54 = vld [vmem:[#allocation8 + $0x48] sm:$0xff] }
 0x22e   :  { %3152 = vmatpush.msrb.mxu2 %v2904_v31  ;;  %3172 = vmatpush.msrb.mxu3 %v2936_v58  ;;  %v2926_v31 = vld [vmem:[#allocation8 + $0x148] sm:$0xff]  ;;  %v2891_v58 = vld [vmem:[#allocation8 + $0x30] sm:$0xff] }
 0x22f   :  { %3113 = vmatpush.msra.mxu0 %v2901_v12  ;;  %3133 = vmatpush.msra.mxu1 %v2933_v61  ;;  %v2923_v12 = vld [vmem:[#allocation8 + $0x130] sm:$0xff]  ;;  %v2892_v61 = vld [vmem:[#allocation8 + $0x38] sm:$0xff] }
 0x230   :  { %v3516_v14 = vld [vmem:[#allocation3 + $0x8] sm:$0xf]  ;;  %3153 = vmatpush.msrb.mxu2 %v2902_v2  ;;  %3173 = vmatpush.msrb.mxu3 %v2934_v34  ;;  %v2889_v34 = vld [vmem:[#allocation8 + $0x20] sm:$0xff] }
 0x231   :  { %3114 = vmatpush.msra.mxu0 %v2899_v6  ;;  %3134 = vmatpush.msra.mxu1 %v2931_v29  ;;  %3551 = vst [vmem:[#allocation1] ss:$4 sm:$0xff] %v3516_v14  ;;  %v2924_v2 = vld [vmem:[#allocation8 + $0x138] sm:$0xff]  ;;  %v2921_v6 = vld [vmem:[#allocation8 + $0x120] sm:$0xff]  ;;  %v2890_v29 = vld [vmem:[#allocation8 + $0x28] sm:$0xff] }
 0x232   :  { %3154 = vmatpush.msrb.mxu2 %v2900_v52  ;;  %3174 = vmatpush.msrb.mxu3 %v2932_v57  ;;  %v2922_v52 = vld [vmem:[#allocation8 + $0x128] sm:$0xff]  ;;  %v2887_v57 = vld [vmem:[#allocation8 + $0x10] sm:$0xff] }
 0x233   :  { %3115 = vmatpush.msra.mxu0 %v2897_v36  ;;  %3135 = vmatpush.msra.mxu1 %v2929_v47  ;;  %v2919_v14 = vld [vmem:[#allocation8 + $0x110] sm:$0xff]  ;;  %v2888_v36 = vld [vmem:[#allocation8 + $0x18] sm:$0xff] }
 0x234   :  { %3155 = vmatpush.msrb.mxu2 %v2898_v38  ;;  %3175 = vmatpush.msrb.mxu3 %v2930_v11  ;;  %v2920_v47 = vld [vmem:[#allocation8 + $0x118] sm:$0xff]  ;;  %v2885_v38 = vld [vmem:[#allocation8] sm:$0xff] }
 0x235   :  { %3116 = vmatpush.msra.mxu0 %v2895_v39  ;;  %3136 = vmatpush.msra.mxu1 %v2927_v28  ;;  %v2917_v11 = vld [vmem:[#allocation8 + $0x100] sm:$0xff]  ;;  %v2886_v39 = vld [vmem:[#allocation8 + $0x8] sm:$0xff] }
 0x236   :  { %3156 = vmatpush.msrb.mxu2 %v2896_v44  ;;  %3176 = vmatpush.msrb.mxu3 %v2928_v45  ;;  %v2918_v28 = vld [vmem:[#allocation8 + $0x108] sm:$0xff]  ;;  %v3217_v44 = vld [vmem:[#allocation8 + $0x4f0] sm:$0xff] }
 0x237   :  { %3117 = vmatpush.msra.mxu0 %v2893_v27  ;;  %3137 = vmatpush.msra.mxu1 %v2925_v51  ;;  %v3249_v45 = vld [vmem:[#allocation8 + $0x5f0] sm:$0xff]  ;;  %v8226_v27 = vld [vmem:[#allocation145_spill] sm:$0xff] }
 0x238   :  { %3157 = vmatpush.msrb.mxu2 %v2894_v54  ;;  %3177 = vmatpush.msrb.mxu3 %v2926_v31  ;;  %v8227_v51 = vld [vmem:[#allocation146_spill] sm:$0xff]  ;;  %v3218_v54 = vld [vmem:[#allocation8 + $0x4f8] sm:$0xff] }
 0x239   :  { %3118 = vmatpush.msra.mxu0 %v2891_v58  ;;  %3138 = vmatpush.msra.mxu1 %v2923_v12  ;;  %v3250_v31 = vld [vmem:[#allocation8 + $0x5f8] sm:$0xff]  ;;  %v3215_v58 = vld [vmem:[#allocation8 + $0x4e0] sm:$0xff] }
 0x23a   :  { %3158 = vmatpush.msrb.mxu2 %v2892_v61  ;;  %3178 = vmatpush.msrb.mxu3 %v2924_v2  ;;  %v3247_v12 = vld [vmem:[#allocation8 + $0x5e0] sm:$0xff]  ;;  %v3216_v61 = vld [vmem:[#allocation8 + $0x4e8] sm:$0xff] }
 0x23b   :  { %3119 = vmatpush.msra.mxu0 %v2889_v34  ;;  %3139 = vmatpush.msra.mxu1 %v2921_v6  ;;  %v3248_v2 = vld [vmem:[#allocation8 + $0x5e8] sm:$0xff]  ;;  %v3213_v34 = vld [vmem:[#allocation8 + $0x4d0] sm:$0xff] }
 0x23c   :  { %3159 = vmatpush.msrb.mxu2 %v2890_v29  ;;  %3179 = vmatpush.msrb.mxu3 %v2922_v52  ;;  %v3245_v6 = vld [vmem:[#allocation8 + $0x5d0] sm:$0xff]  ;;  %v3214_v29 = vld [vmem:[#allocation8 + $0x4d8] sm:$0xff] }
 0x23d   :  { %3120 = vmatpush.msra.mxu0 %v2887_v57  ;;  %3140 = vmatpush.msra.mxu1 %v2919_v14  ;;  %v3246_v52 = vld [vmem:[#allocation8 + $0x5d8] sm:$0xff]  ;;  %v3211_v57 = vld [vmem:[#allocation8 + $0x4c0] sm:$0xff] }
 0x23e   :  { %3160 = vmatpush.msrb.mxu2 %v2888_v36  ;;  %3180 = vmatpush.msrb.mxu3 %v2920_v47  ;;  %v3243_v14 = vld [vmem:[#allocation8 + $0x5c0] sm:$0xff]  ;;  %v3212_v36 = vld [vmem:[#allocation8 + $0x4c8] sm:$0xff] }
 0x23f   :  { %3121 = vmatpush.msra.mxu0 %v2885_v38  ;;  %3141 = vmatpush.msra.mxu1 %v2917_v11  ;;  %v3244_v47 = vld [vmem:[#allocation8 + $0x5c8] sm:$0xff]  ;;  %v3209_v38 = vld [vmem:[#allocation8 + $0x4b0] sm:$0xff] }
 0x240   :  { %3161 = vmatpush.msrb.mxu2 %v2886_v39  ;;  %3181 = vmatpush.msrb.mxu3 %v2918_v28  ;;  %v3241_v11 = vld [vmem:[#allocation8 + $0x5b0] sm:$0xff]  ;;  %v3210_v39 = vld [vmem:[#allocation8 + $0x4b8] sm:$0xff] }
 0x241   :  { %3122 = vmatmul.f32.vlgmr.msra.gmra.mxu0 %v8226_v27  ;;  %3142 = vmatmul.f32.vlgmr.msra.gmra.mxu1 %v8227_v51  ;;  %v3242_v28 = vld [vmem:[#allocation8 + $0x5b8] sm:$0xff] }
 0x242   :  { %3162 = vmatmul.f32.vlgmr.msrb.gmra.mxu2 %v8226_v27  ;;  %3182 = vmatmul.f32.vlgmr.msrb.gmra.mxu3 %v8227_v51  ;;  %v3208_v27 = vld [vmem:[#allocation8 + $0x4a8] sm:$0xff] }
 0x243   :  { %3257 = vmatpush.msrb.mxu0 %v3217_v44  ;;  %3277 = vmatpush.msrb.mxu1 %v3249_v45  ;;  %v3207_v44 = vld [vmem:[#allocation8 + $0x4a0] sm:$0xff]  ;;  %v3240_v51 = vld [vmem:[#allocation8 + $0x5a8] sm:$0xff] }
 0x244   :  { %3297 = vmatpush.msra.mxu2 %v3218_v54  ;;  %3317 = vmatpush.msra.mxu3 %v3250_v31  ;;  %v3239_v45 = vld [vmem:[#allocation8 + $0x5a0] sm:$0xff]  ;;  %v3205_v54 = vld [vmem:[#allocation8 + $0x490] sm:$0xff] }
 0x245   :  { %3258 = vmatpush.msrb.mxu0 %v3215_v58  ;;  %3278 = vmatpush.msrb.mxu1 %v3247_v12  ;;  %v3237_v31 = vld [vmem:[#allocation8 + $0x590] sm:$0xff]  ;;  %v3206_v58 = vld [vmem:[#allocation8 + $0x498] sm:$0xff] }
 0x246   :  { %3298 = vmatpush.msra.mxu2 %v3216_v61  ;;  %3318 = vmatpush.msra.mxu3 %v3248_v2  ;;  %v3238_v12 = vld [vmem:[#allocation8 + $0x598] sm:$0xff]  ;;  %v6728_v61 = vld [vmem:[#allocation11 + $0x40] sm:$0xff] }
 0x247   :  { %3259 = vmatpush.msrb.mxu0 %v3213_v34  ;;  %3279 = vmatpush.msrb.mxu1 %v3245_v6  ;;  %v6730_v2 = vld [vmem:[#allocation11 + $0xc0] sm:$0xff] }
 0x248   :  { %3299 = vmatpush.msra.mxu2 %v3214_v29  ;;  %3319 = vmatpush.msra.mxu3 %v3246_v52  ;;  %v6734_v29 = vld [vmem:[#allocation11 + $0x138] sm:$0xff] }
 0x249   :  { %3260 = vmatpush.msrb.mxu0 %v3211_v57  ;;  %3280 = vmatpush.msrb.mxu1 %v3243_v14  ;;  %v6736_v52 = vld [vmem:[#allocation11 + $0x1b8] sm:$0xff] }
 0x24a   :  { %3300 = vmatpush.msra.mxu2 %v3212_v36  ;;  %3320 = vmatpush.msra.mxu3 %v3244_v47  ;;  %v6740_v57 = vld [vmem:[#allocation11 + $0x38] sm:$0xff]  ;;  %v6746_v36 = vld [vmem:[#allocation11 + $0x130] sm:$0xff] }
 0x24b   :  { %3261 = vmatpush.msrb.mxu0 %v3209_v38  ;;  %3281 = vmatpush.msrb.mxu1 %v3241_v11  ;;  %v6742_v14 = vld [vmem:[#allocation11 + $0xb8] sm:$0xff]  ;;  %8230 = vst [vmem:[#allocation36_spill] sm:$0xff] %v6746_v36  ;;  %v6748_v47 = vld [vmem:[#allocation11 + $0x1b0] sm:$0xff] }
 0x24c   :  { %3301 = vmatpush.msra.mxu2 %v3210_v39  ;;  %3321 = vmatpush.msra.mxu3 %v3242_v28  ;;  %8231 = vst [vmem:[#allocation37_spill] sm:$0xff] %v6748_v47  ;;  %v6752_v38 = vld [vmem:[#allocation11 + $0x30] sm:$0xff]  ;;  %v6758_v39 = vld [vmem:[#allocation11 + $0x128] sm:$0xff] }
 0x24d   :  { %3262 = vmatpush.msrb.mxu0 %v3207_v44  ;;  %3282 = vmatpush.msrb.mxu1 %v3239_v45  ;;  %8232 = vst [vmem:[#allocation38_spill] sm:$0xff] %v6752_v38  ;;  %v6754_v11 = vld [vmem:[#allocation11 + $0xb0] sm:$0xff]  ;;  %v6760_v28 = vld [vmem:[#allocation11 + $0x1a8] sm:$0xff] }
 0x24e   :  { %3302 = vmatpush.msra.mxu2 %v3208_v27  ;;  %3322 = vmatpush.msra.mxu3 %v3240_v51  ;;  %8233 = vst [vmem:[#allocation39_spill] sm:$0xff] %v6754_v11  ;;  %v6764_v44 = vld [vmem:[#allocation11 + $0x28] sm:$0xff]  ;;  %v6770_v51 = vld [vmem:[#allocation11 + $0x120] sm:$0xff] }
 0x24f   :  { %3263 = vmatpush.msrb.mxu0 %v3205_v54  ;;  %3283 = vmatpush.msrb.mxu1 %v3237_v31  ;;  %8234 = vst [vmem:[#allocation40_spill] sm:$0xff] %v6758_v39  ;;  %v6766_v45 = vld [vmem:[#allocation11 + $0xa8] sm:$0xff]  ;;  %v6772_v54 = vld [vmem:[#allocation11 + $0x1a0] sm:$0xff] }
 0x250   :  { %3303 = vmatpush.msra.mxu2 %v3206_v58  ;;  %3323 = vmatpush.msra.mxu3 %v3238_v12  ;;  %8235 = vst [vmem:[#allocation41_spill] sm:$0xff] %v6760_v28  ;;  %v6776_v12 = vld [vmem:[#allocation11 + $0x20] sm:$0xff] }
 0x251   :  { %3264 = vmatpush.msrb.mxu0 %v6467_v40  ;;  %3284 = vmatpush.msrb.mxu1 %v6469_v33  ;;  %v6638_v40 = vld [vmem:[#allocation11 + $0x178] sm:$0xff]  ;;  %8236 = vst [vmem:[#allocation42_spill] sm:$0xff] %v6764_v44 }
 0x252   :  { %3304 = vmatpush.msra.mxu2 %v6473_v42  ;;  %3324 = vmatpush.msra.mxu3 %v6475_v49  ;;  %v6640_v33 = vld [vmem:[#allocation11 + $0x1f8] sm:$0xff]  ;;  %v8228_v42 = vld [vmem:[#allocation34_spill] sm:$0xff]  ;;  %8237 = vst [vmem:[#allocation43_spill] sm:$0xff] %v6766_v45 }
 0x253   :  { %3265 = vmatpush.msrb.mxu0 %v6479_v53  ;;  %3285 = vmatpush.msrb.mxu1 %v6481_v55  ;;  %v8229_v49 = vld [vmem:[#allocation35_spill] sm:$0xff]  ;;  %8238 = vst [vmem:[#allocation44_spill] sm:$0xff] %v6770_v51 }
 0x254   :  { %3305 = vmatpush.msra.mxu2 %v6485_v15  ;;  %3325 = vmatpush.msra.mxu3 %v6487_v56  ;;  %v6644_v53 = vld [vmem:[#allocation11 + $0x78] sm:$0xff]  ;;  %v6650_v15 = vld [vmem:[#allocation11 + $0x170] sm:$0xff]  ;;  %8239 = vst [vmem:[#allocation45_spill] sm:$0xff] %v6772_v54 }
 0x255   :  { %3266 = vmatpush.msrb.mxu0 %v6491_v59  ;;  %3286 = vmatpush.msrb.mxu1 %v6493_v60  ;;  %v6646_v55 = vld [vmem:[#allocation11 + $0xf8] sm:$0xff]  ;;  %v6652_v56 = vld [vmem:[#allocation11 + $0x1f0] sm:$0xff] }
 0x256   :  { %3306 = vmatpush.msra.mxu2 %v6497_v25  ;;  %3326 = vmatpush.msra.mxu3 %v6499_v62  ;;  %v6656_v59 = vld [vmem:[#allocation11 + $0x70] sm:$0xff]  ;;  %v6662_v25 = vld [vmem:[#allocation11 + $0x168] sm:$0xff] }
 0x257   :  { %3267 = vmatpush.msrb.mxu0 %v6503_v63  ;;  %3287 = vmatpush.msrb.mxu1 %v6505_v1  ;;  %v6658_v60 = vld [vmem:[#allocation11 + $0xf0] sm:$0xff]  ;;  %v6664_v62 = vld [vmem:[#allocation11 + $0x1e8] sm:$0xff] }
 0x258   :  { %3307 = vmatpush.msra.mxu2 %v6509_v3  ;;  %3327 = vmatpush.msra.mxu3 %v6511_v5  ;;  %v6668_v63 = vld [vmem:[#allocation11 + $0x68] sm:$0xff]  ;;  %v6674_v3 = vld [vmem:[#allocation11 + $0x160] sm:$0xff] }
 0x259   :  { %3268 = vmatpush.msrb.mxu0 %v6515_v9  ;;  %3288 = vmatpush.msrb.mxu1 %v6517_v10  ;;  %v6670_v1 = vld [vmem:[#allocation11 + $0xe8] sm:$0xff]  ;;  %v6676_v5 = vld [vmem:[#allocation11 + $0x1e0] sm:$0xff] }
 0x25a   :  { %3308 = vmatpush.msra.mxu2 %v6521_v16  ;;  %3328 = vmatpush.msra.mxu3 %v6523_v13  ;;  %v6680_v9 = vld [vmem:[#allocation11 + $0x60] sm:$0xff]  ;;  %v2565_v16 = vpop.f32.mrf.mxu0  ;;  %v2585_v13 = vpop.f32.mrf.mxu1 }
 0x25b   :  { %3269 = vmatpush.msrb.mxu0 %v6527_v46  ;;  %3289 = vmatpush.msrb.mxu1 %v6529_v0  ;;  %v6682_v10 = vld [vmem:[#allocation11 + $0xe0] sm:$0xff]  ;;  %v6686_v46 = vld [vmem:[#allocation11 + $0x158] sm:$0xff]  ;;  %v2586_v27 = vadd.f32 %v2585_v13, %v2565_v16 }
 0x25c   :  { %3309 = vmatpush.msra.mxu2 %v6533_v37  ;;  %3329 = vmatpush.msra.mxu3 %v6535_v7  ;;  %v6688_v0 = vld [vmem:[#allocation11 + $0x1d8] sm:$0xff] }
 0x25d   :  { %3270 = vmatpush.msrb.mxu0 %v6539_v17  ;;  %3290 = vmatpush.msrb.mxu1 %v6541_v18  ;;  %v6692_v37 = vld [vmem:[#allocation11 + $0x58] sm:$0xff]  ;;  %v6698_v17 = vld [vmem:[#allocation11 + $0x150] sm:$0xff] }
 0x25e   :  { %3310 = vmatpush.msra.mxu2 %v6545_v19  ;;  %3330 = vmatpush.msra.mxu3 %v6547_v8  ;;  %v6694_v7 = vld [vmem:[#allocation11 + $0xd8] sm:$0xff]  ;;  %v6700_v18 = vld [vmem:[#allocation11 + $0x1d0] sm:$0xff] }
 0x25f   :  { %3271 = vmatpush.msrb.mxu0 %v6551_v26  ;;  %3291 = vmatpush.msrb.mxu1 %v6553_v20  ;;  %v6704_v19 = vld [vmem:[#allocation11 + $0x50] sm:$0xff]  ;;  %v6710_v26 = vld [vmem:[#allocation11 + $0x148] sm:$0xff]  ;;  %v6782_v16 = vld [vmem:[#allocation11 + $0x118] sm:$0xff] }
 0x260   :  { %3311 = vmatpush.msra.mxu2 %v6557_v21  ;;  %3331 = vmatpush.msra.mxu3 %v6559_v22  ;;  %v6706_v8 = vld [vmem:[#allocation11 + $0xd0] sm:$0xff]  ;;  %v6712_v20 = vld [vmem:[#allocation11 + $0x1c8] sm:$0xff]  ;;  %v6784_v13 = vld [vmem:[#allocation11 + $0x198] sm:$0xff] }
 0x261   :  { %3272 = vmatpush.msrb.mxu0 %v6563_v43  ;;  %3292 = vmatpush.msrb.mxu1 %v6565_v23  ;;  %v6716_v21 = vld [vmem:[#allocation11 + $0x48] sm:$0xff]  ;;  %v6722_v43 = vld [vmem:[#allocation11 + $0x140] sm:$0xff] }
 0x262   :  { %3312 = vmatpush.msra.mxu2 %v6569_v30  ;;  %3332 = vmatpush.msra.mxu3 %v6571_v35  ;;  %v6718_v22 = vld [vmem:[#allocation11 + $0xc8] sm:$0xff]  ;;  %v6724_v23 = vld [vmem:[#allocation11 + $0x1c0] sm:$0xff]  ;;  %v2605_v30 = vpop.f32.mrf.mxu2  ;;  %v2625_v35 = vpop.f32.mrf.mxu3 }
 0x263   :  { %3273 = vmatmul.f32.vlgmr.msrb.gmra.mxu0 %v8228_v42  ;;  %3293 = vmatmul.f32.vlgmr.msrb.gmra.mxu1 %v8229_v49  ;;  %v2651_v34 = vpop.f32.mrf.mxu0  ;;  %v2671_v6 = vpop.f32.mrf.mxu1 }
 0x264   :  { %3313 = vmatmul.f32.vlgmr.msra.gmra.mxu2 %v8228_v42  ;;  %3333 = vmatmul.f32.vlgmr.msra.gmra.mxu3 %v8229_v49  ;;  %v6778_v42 = vld [vmem:[#allocation11 + $0xa0] sm:$0xff]  ;;  %v2652_v49 = vadd.f32 %v2651_v34, %v2586_v27  ;;  %v6794_v34 = vld [vmem:[#allocation11 + $0x110] sm:$0xff] }
 0x265   :  { %3430 = vmatpush.msra.mxu0 %v6638_v40  ;;  %3450 = vmatpush.msra.mxu1 %v6640_v33  ;;  %8242 = vst [vmem:[#allocation48_spill] sm:$0xff] %v6794_v34  ;;  %v6796_v27 = vld [vmem:[#allocation11 + $0x190] sm:$0xff] }
 0x266   :  { %3476 = vmatpush.msrb.mxu2 %v6644_v53  ;;  %3496 = vmatpush.msrb.mxu3 %v6646_v55  ;;  %8243 = vst [vmem:[#allocation49_spill] sm:$0xff] %v6796_v27 }
 0x267   :  { %3431 = vmatpush.msra.mxu0 %v6650_v15  ;;  %3451 = vmatpush.msra.mxu1 %v6652_v56 }
 0x268   :  { %3477 = vmatpush.msrb.mxu2 %v6656_v59  ;;  %3497 = vmatpush.msrb.mxu3 %v6658_v60 }
 0x269   :  { %3432 = vmatpush.msra.mxu0 %v6662_v25  ;;  %3452 = vmatpush.msra.mxu1 %v6664_v62 }
 0x26a   :  { %3478 = vmatpush.msrb.mxu2 %v6668_v63  ;;  %3498 = vmatpush.msrb.mxu3 %v6670_v1  ;;  %v2691_v31 = vpop.f32.mrf.mxu2  ;;  %v2711_v58 = vpop.f32.mrf.mxu3 }
 0x26b   :  { %3433 = vmatpush.msra.mxu0 %v6674_v3  ;;  %3453 = vmatpush.msra.mxu1 %v6676_v5 }
 0x26c   :  { %3479 = vmatpush.msrb.mxu2 %v6680_v9  ;;  %3499 = vmatpush.msrb.mxu3 %v6682_v10 }
 0x26d   :  { %3434 = vmatpush.msra.mxu0 %v6686_v46  ;;  %3454 = vmatpush.msra.mxu1 %v6688_v0 }
 0x26e   :  { %3480 = vmatpush.msrb.mxu2 %v6692_v37  ;;  %3500 = vmatpush.msrb.mxu3 %v6694_v7 }
 0x26f   :  { %3435 = vmatpush.msra.mxu0 %v6698_v17  ;;  %3455 = vmatpush.msra.mxu1 %v6700_v18 }
 0x270   :  { %3481 = vmatpush.msrb.mxu2 %v6704_v19  ;;  %3501 = vmatpush.msrb.mxu3 %v6706_v8 }
 0x271   :  { %3436 = vmatpush.msra.mxu0 %v6710_v26  ;;  %3456 = vmatpush.msra.mxu1 %v6712_v20 }
 0x272   :  { %3482 = vmatpush.msrb.mxu2 %v6716_v21  ;;  %3502 = vmatpush.msrb.mxu3 %v6718_v22 }
 0x273   :  { %3437 = vmatpush.msra.mxu0 %v6722_v43  ;;  %3457 = vmatpush.msra.mxu1 %v6724_v23 }
 0x274   :  { %3483 = vmatpush.msrb.mxu2 %v6728_v61  ;;  %3503 = vmatpush.msrb.mxu3 %v6730_v2 }
 0x275   :  { %3438 = vmatpush.msra.mxu0 %v6734_v29  ;;  %3458 = vmatpush.msra.mxu1 %v6736_v52 }
 0x276   :  { %3484 = vmatpush.msrb.mxu2 %v6740_v57  ;;  %3504 = vmatpush.msrb.mxu3 %v6742_v14 }
 0x277   :  { %3439 = vmatpush.msra.mxu0 %v6746_v36  ;;  %3459 = vmatpush.msra.mxu1 %v6748_v47  ;;  %v2626_v47 = vadd.f32 %v2625_v35, %v2605_v30  ;;  %v6806_v30 = vld [vmem:[#allocation11 + $0x108] sm:$0xff] }
 0x278   :  { %3485 = vmatpush.msrb.mxu2 %v6752_v38  ;;  %3505 = vmatpush.msrb.mxu3 %v6754_v11  ;;  %v6808_v35 = vld [vmem:[#allocation11 + $0x188] sm:$0xff] }
 0x279   :  { %3440 = vmatpush.msra.mxu0 %v6758_v39  ;;  %3460 = vmatpush.msra.mxu1 %v6760_v28  ;;  %v6788_v28 = vld [vmem:[#allocation11 + $0x18] sm:$0xff]  ;;  %v2692_v36 = vadd.f32 %v2691_v31, %v2626_v47  ;;  %8245 = vst [vmem:[#allocation51_spill] sm:$0xff] %v6808_v35  ;;  %v6820_v47 = vld [vmem:[#allocation11 + $0x180] sm:$0xff] }
 0x27a   :  { %3486 = vmatpush.msrb.mxu2 %v6764_v44  ;;  %3506 = vmatpush.msrb.mxu3 %v6766_v45  ;;  %v2802_v11 = vpop.f32.mrf.mxu0  ;;  %v2822_v38 = vpop.f32.mrf.mxu1  ;;  %8240 = vst [vmem:[#allocation46_spill] sm:$0xff] %v6788_v28  ;;  %v6790_v39 = vld [vmem:[#allocation11 + $0x98] sm:$0xff]  ;;  %v2672_v44 = vadd.f32 %v2671_v6, %v2652_v49  ;;  %v6818_v6 = vld [vmem:[#allocation11 + $0x100] sm:$0xff] }
 0x27b   :  { %3441 = vmatpush.msra.mxu0 %v6770_v51  ;;  %3461 = vmatpush.msra.mxu1 %v6772_v54  ;;  %8241 = vst [vmem:[#allocation47_spill] sm:$0xff] %v6790_v39  ;;  %v2823_v45 = vadd.f32 %v2822_v38, %v2802_v11  ;;  %v6800_v51 = vld [vmem:[#allocation11 + $0x10] sm:$0xff]  ;;  %v6812_v38 = vld [vmem:[#allocation11 + $0x8] sm:$0xff]  ;;  %v6824_v49 = vld [vmem:[#allocation11] sm:$0xff] }
 0x27c   :  { %3487 = vmatpush.msrb.mxu2 %v6776_v12  ;;  %3507 = vmatpush.msrb.mxu3 %v6778_v42  ;;  %v6802_v54 = vld [vmem:[#allocation11 + $0x90] sm:$0xff]  ;;  %v6814_v11 = vld [vmem:[#allocation11 + $0x88] sm:$0xff]  ;;  %8246 = vst [vmem:[#allocation52_spill] sm:$0xff] %v6824_v49 }
 0x27d   :  { %3442 = vmatpush.msra.mxu0 %v6782_v16  ;;  %3462 = vmatpush.msra.mxu1 %v6784_v13  ;;  %8244 = vst [vmem:[#allocation50_spill] sm:$0xff] %v6802_v54  ;;  %v2865_v31 = vadd.f32 %v2823_v45, %v2672_v44  ;;  %v6832_v44 = vld [vmem:[#allocation11 + $0x278] sm:$0xff] }
 0x27e   :  { %3488 = vmatpush.msrb.mxu2 %v6788_v28  ;;  %3508 = vmatpush.msrb.mxu3 %v6790_v39  ;;  %v2712_v28 = vadd.f32 %v2711_v58, %v2692_v36  ;;  %v6836_v45 = vld [vmem:[#allocation11 + $0x2f8] sm:$0xff] }
 0x27f   :  { %3443 = vmatpush.msra.mxu0 %v6794_v34  ;;  %3463 = vmatpush.msra.mxu1 %v6796_v27  ;;  %v6826_v27 = vld [vmem:[#allocation11 + $0x80] sm:$0xff]  ;;  %8248 = vst [vmem:[#allocation54_spill] sm:$0xff] %v6836_v45  ;;  %v2867_v36 = vadd.f32 %v2865_v31, %v6352_v50 }
 0x280   :  { %3489 = vmatpush.msrb.mxu2 %v6800_v51  ;;  %3509 = vmatpush.msrb.mxu3 %v6802_v54  ;;  %8247 = vst [vmem:[#allocation53_spill] sm:$0xff] %v6826_v27  ;;  %v6872_v50 = vld [vmem:[#allocation11 + $0x260] sm:$0xff] }
 0x281   :  { %3444 = vmatpush.msra.mxu0 %v6806_v30  ;;  %3464 = vmatpush.msra.mxu1 %v6808_v35  ;;  %v2842_v34 = vpop.f32.mrf.mxu2  ;;  %v2862_v39 = vpop.f32.mrf.mxu3  ;;  %v6838_v35 = vld [vmem:[#allocation11 + $0x378] sm:$0xff]  ;;  %vm2869_vm8 = vcmp.ge.f32.partialorder %v2867_v36, 0.0  ;;  %8259 = vst [vmem:[#allocation65_spill] sm:$0xff] %v6872_v50 }
 0x282   :  { %3490 = vmatpush.msrb.mxu2 %v6812_v38  ;;  %3510 = vmatpush.msrb.mxu3 %v6814_v11  ;;  %v2863_v54 = vadd.f32 %v2862_v39, %v2842_v34  ;;  %8249 = vst [vmem:[#allocation55_spill] sm:$0xff] %v6838_v35  ;;  %v6843_v39 = vld [vmem:[#allocation11 + $0x3f8] sm:$0xff]  ;;  %v6845_v34 = vld [vmem:[#allocation11 + $0x270] sm:$0xff] }
 0x283   :  { %3445 = vmatpush.msra.mxu0 %v6818_v6  ;;  %3465 = vmatpush.msra.mxu1 %v6820_v47  ;;  %8250 = vst [vmem:[#allocation56_spill] sm:$0xff] %v6843_v39 }
 0x284   :  { %3491 = vmatpush.msrb.mxu2 %v6824_v49  ;;  %3511 = vmatpush.msrb.mxu3 %v6826_v27  ;;  %v2866_v58 = vadd.f32 %v2863_v54, %v2712_v28  ;;  %8251 = vst [vmem:[#allocation57_spill] sm:$0xff] %v6845_v34  ;;  %v6849_v27 = vld [vmem:[#allocation11 + $0x2f0] sm:$0xff]  ;;  %v2871_v54 = vmul.f32 0.1, %v2867_v36 }
 0x285   :  { %3446 = vmatmul.f32.vlgmr.msra.gmra.mxu0 %v6583_v32  ;;  %3466 = vmatmul.f32.vlgmr.msra.gmra.mxu1 %v6585_v48  ;;  %8252 = vst [vmem:[#allocation58_spill] sm:$0xff] %v6849_v27  ;;  %v6854_v28 = vld [vmem:[#allocation11 + $0x370] sm:$0xff]  ;;  %v6858_v48 = vld [vmem:[#allocation11 + $0x268] sm:$0xff] }
 0x286   :  { %3492 = vmatmul.f32.vlgmr.msrb.gmra.mxu2 %v6594_v24  ;;  %3556 = vmatpush.msrb.mxu0 %v6832_v44  ;;  %v2868_v49 = vadd.f32 %v2866_v58, %v6358_v4  ;;  %8253 = vst [vmem:[#allocation59_spill] sm:$0xff] %v6854_v28  ;;  %v6856_v32 = vld [vmem:[#allocation11 + $0x3f0] sm:$0xff]  ;;  %v6862_v24 = vld [vmem:[#allocation11 + $0x2e8] sm:$0xff] }
 0x287   :  { %3576 = vmatpush.msrb.mxu1 %v6836_v45  ;;  %3637 = vmatpush.msra.mxu2 %v6838_v35  ;;  %8254 = vst [vmem:[#allocation60_spill] sm:$0xff] %v6856_v32  ;;  %v6866_v58 = vld [vmem:[#allocation11 + $0x368] sm:$0xff]  ;;  %v2873_v45 = vsel %vm2869_vm8, %v2867_v36, %v2871_v54  ;;  %v6897_v36 = vld [vmem:[#allocation11 + $0x250] sm:$0xff] }
 0x288   :  { %8255 = vst [vmem:[#allocation61_spill] sm:$0xff] %v6858_v48  ;;  %3657 = vmatpush.msra.mxu3 %v6843_v39  ;;  %3557 = vmatpush.msrb.mxu0 %v6845_v34  ;;  %vm2870_vm7 = vcmp.ge.f32.partialorder %v2868_v49, 0.0  ;;  %v2872_v31 = vmul.f32 0.1, %v2868_v49  ;;  %v6868_v4 = vld [vmem:[#allocation11 + $0x3e8] sm:$0xff]  ;;  %v6874_v34 = vld [vmem:[#allocation11 + $0x2e0] sm:$0xff] }
 0x289   :  { %8256 = vst [vmem:[#allocation62_spill] sm:$0xff] %v6862_v24  ;;  %3512 = vmatmul.f32.vlgmr.msrb.gmra.mxu3 %v6596_v41  ;;  %3577 = vmatpush.msrb.mxu1 %v6849_v27  ;;  %v6878_v41 = vld [vmem:[#allocation11 + $0x360] sm:$0xff]  ;;  %v6903_v54 = vld [vmem:[#allocation11 + $0x350] sm:$0xff] }
 0x28a   :  { %8257 = vst [vmem:[#allocation63_spill] sm:$0xff] %v6866_v58  ;;  %3638 = vmatpush.msra.mxu2 %v6854_v28  ;;  %3658 = vmatpush.msra.mxu3 %v6856_v32  ;;  %v2874_v39 = vsel %vm2870_vm7, %v2868_v49, %v2872_v31  ;;  %v6880_v27 = vld [vmem:[#allocation11 + $0x3e0] sm:$0xff]  ;;  %v6884_v32 = vld [vmem:[#allocation11 + $0x258] sm:$0xff] }
 0x28b   :  { %8258 = vst [vmem:[#allocation64_spill] sm:$0xff] %v6868_v4  ;;  %3558 = vmatpush.msrb.mxu0 %v6858_v48  ;;  %3578 = vmatpush.msrb.mxu1 %v6862_v24  ;;  %v2877_v35 = vrot.slane %v2874_v39, 6  ;;  %v6886_v28 = vld [vmem:[#allocation11 + $0x2d8] sm:$0xff]  ;;  %v6899_v39 = vld [vmem:[#allocation11 + $0x2d0] sm:$0xff] }
 0x28c   :  { %8260 = vst [vmem:[#allocation66_spill] sm:$0xff] %v6874_v34  ;;  %3639 = vmatpush.msra.mxu2 %v6866_v58  ;;  %3659 = vmatpush.msra.mxu3 %v6868_v4  ;;  %v6891_v31 = vld [vmem:[#allocation11 + $0x358] sm:$0xff]  ;;  %v7003_v58 = vld [vmem:[#allocation11 + $0x310] sm:$0xff] }
 0x28d   :  { %8261 = vst [vmem:[#allocation67_spill] sm:$0xff] %v6878_v41  ;;  %3559 = vmatpush.msrb.mxu0 %v6872_v50  ;;  %3579 = vmatpush.msrb.mxu1 %v6874_v34  ;;  %v2878_v49 = vsel %vm300_vm3, %v2873_v45, %v2877_v35  ;;  %v6893_v24 = vld [vmem:[#allocation11 + $0x3d8] sm:$0xff]  ;;  %v6905_v35 = vld [vmem:[#allocation11 + $0x3d0] sm:$0xff]  ;;  %v6909_v45 = vld [vmem:[#allocation11 + $0x248] sm:$0xff] }
 0x28e   :  { %8262 = vst [vmem:[#allocation68_spill] sm:$0xff] %v6880_v27  ;;  %3640 = vmatpush.msra.mxu2 %v6878_v41  ;;  %3660 = vmatpush.msra.mxu3 %v6880_v27  ;;  %v6911_v27 = vld [vmem:[#allocation11 + $0x2c8] sm:$0xff]  ;;  %v6991_v50 = vld [vmem:[#allocation11 + $0x398] sm:$0xff]  ;;  %v7005_v48 = vld [vmem:[#allocation11 + $0x390] sm:$0xff] }
 0x28f   :  { %8263 = vst [vmem:[#allocation69_spill] sm:$0xff] %v6884_v32  ;;  %3560 = vmatpush.msrb.mxu0 %v6884_v32  ;;  %3580 = vmatpush.msrb.mxu1 %v6886_v28  ;;  %v6917_v32 = vld [vmem:[#allocation11 + $0x3c8] sm:$0xff] }
 0x290   :  { %8264 = vst [vmem:[#allocation70_spill] sm:$0xff] %v6886_v28  ;;  %3641 = vmatpush.msra.mxu2 %v6891_v31  ;;  %3661 = vmatpush.msra.mxu3 %v6893_v24  ;;  %v6921_v28 = vld [vmem:[#allocation11 + $0x240] sm:$0xff] }
 0x291   :  { %8265 = vst [vmem:[#allocation71_spill] sm:$0xff] %v6891_v31  ;;  %3561 = vmatpush.msrb.mxu0 %v6897_v36  ;;  %3581 = vmatpush.msrb.mxu1 %v6899_v39  ;;  %v6923_v31 = vld [vmem:[#allocation11 + $0x2c0] sm:$0xff] }
 0x292   :  { %8266 = vst [vmem:[#allocation72_spill] sm:$0xff] %v6893_v24  ;;  %3642 = vmatpush.msra.mxu2 %v6903_v54  ;;  %3662 = vmatpush.msra.mxu3 %v6905_v35  ;;  %v6927_v24 = vld [vmem:[#allocation11 + $0x340] sm:$0xff] }
 0x293   :  { %2881 = vst [vmem:[#allocation14 + $0x8] sm:$0xf] %v2878_v49  ;;  %3562 = vmatpush.msrb.mxu0 %v6909_v45  ;;  %3582 = vmatpush.msrb.mxu1 %v6911_v27  ;;  %v6945_v41 = vld.sshfl [vmem:[#allocation1 + $0x8] sm:$0xff pattern:$0x73625140] }
 0x294   :  { %8267 = vst [vmem:[#allocation73_spill] sm:$0xff] %v6897_v36  ;;  %v6929_v36 = vld [vmem:[#allocation11 + $0x3c0] sm:$0xff]  ;;  %3663 = vmatpush.msra.mxu3 %v6917_v32 }
 0x295   :  { %8268 = vst [vmem:[#allocation74_spill] sm:$0xff] %v6899_v39  ;;  %v6933_v39 = vld [vmem:[#allocation11 + $0x238] sm:$0xff]  ;;  %3563 = vmatpush.msrb.mxu0 %v6921_v28  ;;  %3583 = vmatpush.msrb.mxu1 %v6923_v31 }
 0x296   :  { %2883 = vst [vmem:[#allocation3 + $0xc] sm:$0xf] %v2878_v49  ;;  %v6915_v49 = vld [vmem:[#allocation11 + $0x348] sm:$0xff]  ;;  %3664 = vmatpush.msra.mxu3 %v6929_v36 }
 0x297   :  { %8269 = vst [vmem:[#allocation75_spill] sm:$0xff] %v6903_v54  ;;  %3643 = vmatpush.msra.mxu2 %v6915_v49  ;;  %v6935_v54 = vld [vmem:[#allocation11 + $0x2b8] sm:$0xff]  ;;  %3564 = vmatpush.msrb.mxu0 %v6933_v39 }
 0x298   :  { %8270 = vst [vmem:[#allocation76_spill] sm:$0xff] %v6905_v35  ;;  %v6937_v35 = vld.sshfl [vmem:[#allocation1] sm:$0xff pattern:$0x73625140]  ;;  %3584 = vmatpush.msrb.mxu1 %v6935_v54 }
 0x299   :  { %8271 = vst [vmem:[#allocation78_spill] sm:$0xff] %v6909_v45  ;;  %v6941_v45 = vld [vmem:[#allocation11 + $0x338] sm:$0xff]  ;;  %3644 = vmatpush.msra.mxu2 %v6927_v24 }
 0x29a   :  { %8272 = vst [vmem:[#allocation77_spill] sm:$0xff] %v6911_v27  ;;  %v6943_v27 = vld [vmem:[#allocation11 + $0x3b8] sm:$0xff] }
 0x29b   :  { %8273 = vst [vmem:[#allocation79_spill] sm:$0xff] %v6915_v49  ;;  %v6951_v49 = vld [vmem:[#allocation11 + $0x2b0] sm:$0xff]  ;;  %3645 = vmatpush.msra.mxu2 %v6941_v45  ;;  %3665 = vmatpush.msra.mxu3 %v6943_v27 }
 0x29c   :  { %8274 = vst [vmem:[#allocation80_spill] sm:$0xff] %v6917_v32  ;;  %v6949_v32 = vld [vmem:[#allocation11 + $0x230] sm:$0xff]  ;;  %3585 = vmatpush.msrb.mxu1 %v6951_v49 }
 0x29d   :  { %8275 = vst [vmem:[#allocation81_spill] sm:$0xff] %v6921_v28  ;;  %v3597_v34 = vld [vmem:[#allocation3 + $0xc] sm:$0xf]  ;;  %v6957_v28 = vld [vmem:[#allocation11 + $0x3b0] sm:$0xff]  ;;  %3565 = vmatpush.msrb.mxu0 %v6949_v32 }
 0x29e   :  { %8276 = vst [vmem:[#allocation82_spill] sm:$0xff] %v6923_v31  ;;  %v6955_v31 = vld [vmem:[#allocation11 + $0x330] sm:$0xff]  ;;  %3666 = vmatpush.msra.mxu3 %v6957_v28  ;;  %v3721_v4 = vld [vmem:[#allocation3 + $0xc] sm:$0xf] }
 0x29f   :  { %8277 = vst [vmem:[#allocation83_spill] sm:$0xff] %v6927_v24  ;;  %v6961_v24 = vld [vmem:[#allocation11 + $0x228] sm:$0xff]  ;;  %3646 = vmatpush.msra.mxu2 %v6955_v31 }
 0x2a0   :  { %8278 = vst [vmem:[#allocation84_spill] sm:$0xff] %v6929_v36  ;;  %v6963_v36 = vld [vmem:[#allocation11 + $0x2a8] sm:$0xff]  ;;  %3566 = vmatpush.msrb.mxu0 %v6961_v24 }
 0x2a1   :  { %8279 = vst [vmem:[#allocation85_spill] sm:$0xff] %v6933_v39  ;;  %v6967_v39 = vld [vmem:[#allocation11 + $0x328] sm:$0xff]  ;;  %3586 = vmatpush.msrb.mxu1 %v6963_v36 }
 0x2a2   :  { %8280 = vst [vmem:[#allocation86_spill] sm:$0xff] %v6935_v54  ;;  %v6969_v54 = vld [vmem:[#allocation11 + $0x3a8] sm:$0xff]  ;;  %3647 = vmatpush.msra.mxu2 %v6967_v39 }
 0x2a3   :  { %8281 = vst [vmem:[#allocation87_spill] sm:$0xff] %v6941_v45  ;;  %v6975_v45 = vld [vmem:[#allocation11 + $0x2a0] sm:$0xff]  ;;  %3667 = vmatpush.msra.mxu3 %v6969_v54 }
 0x2a4   :  { %8282 = vst [vmem:[#allocation88_spill] sm:$0xff] %v6943_v27  ;;  %v6979_v27 = vld [vmem:[#allocation11 + $0x320] sm:$0xff]  ;;  %3587 = vmatpush.msrb.mxu1 %v6975_v45 }
 0x2a5   :  { %8283 = vst [vmem:[#allocation89_spill] sm:$0xff] %v6949_v32  ;;  %v6981_v32 = vld [vmem:[#allocation11 + $0x3a0] sm:$0xff]  ;;  %3648 = vmatpush.msra.mxu2 %v6979_v27 }
 0x2a6   :  { %8284 = vst [vmem:[#allocation90_spill] sm:$0xff] %v6951_v49  ;;  %v6983_v49 = vld [vmem:[#allocation11 + $0x218] sm:$0xff]  ;;  %3668 = vmatpush.msra.mxu3 %v6981_v32 }
 0x2a7   :  { %8285 = vst [vmem:[#allocation91_spill] sm:$0xff] %v6955_v31  ;;  %v6987_v31 = vld [vmem:[#allocation11 + $0x298] sm:$0xff] }
 0x2a8   :  { %8286 = vst [vmem:[#allocation92_spill] sm:$0xff] %v6957_v28  ;;  %v6989_v28 = vld [vmem:[#allocation11 + $0x318] sm:$0xff]  ;;  %3588 = vmatpush.msrb.mxu1 %v6987_v31  ;;  %3669 = vmatpush.msra.mxu3 %v6991_v50 }
 0x2a9   :  { %3632 = vst [vmem:[#allocation1] ss:$4 sm:$0xff] %v3597_v34  ;;  %v6973_v34 = vld [vmem:[#allocation11 + $0x220] sm:$0xff]  ;;  %3649 = vmatpush.msra.mxu2 %v6989_v28 }
 0x2aa   :  { %8287 = vst [vmem:[#allocation93_spill] sm:$0xff] %v6961_v24  ;;  %3567 = vmatpush.msrb.mxu0 %v6973_v34  ;;  %v6997_v24 = vld [vmem:[#allocation11 + $0x290] sm:$0xff]  ;;  %3670 = vmatpush.msra.mxu3 %v7005_v48 }
 0x2ab   :  { %8288 = vst [vmem:[#allocation94_spill] sm:$0xff] %v6963_v36  ;;  %v6995_v36 = vld [vmem:[#allocation11 + $0x210] sm:$0xff]  ;;  %3589 = vmatpush.msrb.mxu1 %v6997_v24  ;;  %3650 = vmatpush.msra.mxu2 %v7003_v58 }
 0x2ac   :  { %8289 = vst [vmem:[#allocation96_spill] sm:$0xff] %v6967_v39  ;;  %3568 = vmatpush.msrb.mxu0 %v6983_v49 }
 0x2ad   :  { %8290 = vst [vmem:[#allocation97_spill] sm:$0xff] %v6969_v54 }
 0x2ae   :  { %8291 = vst [vmem:[#allocation98_spill] sm:$0xff] %v6975_v45  ;;  %v7009_v45 = vld [vmem:[#allocation11 + $0x208] sm:$0xff]  ;;  %3569 = vmatpush.msrb.mxu0 %v6995_v36 }
 0x2af   :  { %8292 = vst [vmem:[#allocation99_spill] sm:$0xff] %v6979_v27  ;;  %v7011_v27 = vld [vmem:[#allocation11 + $0x288] sm:$0xff] }
 0x2b0   :  { %8293 = vst [vmem:[#allocation101_spill] sm:$0xff] %v6983_v49  ;;  %v3633_v54 = vld.sshfl [vmem:[#allocation1] sm:$0xff pattern:$0x73625140]  ;;  %v7015_v49 = vld [vmem:[#allocation11 + $0x308] sm:$0xff]  ;;  %3570 = vmatpush.msrb.mxu0 %v7009_v45  ;;  %3590 = vmatpush.msrb.mxu1 %v7011_v27 }
 0x2b1   :  { %8294 = vst [vmem:[#allocation102_spill] sm:$0xff] %v6987_v31  ;;  %v3634_v39 = vld.sshfl [vmem:[#allocation1 + $0x8] sm:$0xff pattern:$0x73625140]  ;;  %3651 = vmatpush.msra.mxu2 %v7015_v49 }
 0x2b2   :  { %8295 = vst [vmem:[#allocation103_spill] sm:$0xff] %v6989_v28  ;;  %v7017_v31 = vld [vmem:[#allocation11 + $0x388] sm:$0xff]  ;;  %v7023_v28 = vld [vmem:[#allocation11 + $0x280] sm:$0xff] }
 0x2b3   :  { %8296 = vst [vmem:[#allocation104_spill] sm:$0xff] %v6991_v50  ;;  %v7027_v50 = vld [vmem:[#allocation11 + $0x300] sm:$0xff]  ;;  %3671 = vmatpush.msra.mxu3 %v7017_v31  ;;  %3591 = vmatpush.msrb.mxu1 %v7023_v28 }
 0x2b4   :  { %8297 = vst [vmem:[#allocation105_spill] sm:$0xff] %v6995_v36  ;;  %v7029_v36 = vld [vmem:[#allocation11 + $0x380] sm:$0xff]  ;;  %3652 = vmatpush.msra.mxu2 %v7027_v50  ;;  %3592 = vmatmul.f32.vlgmr.msrb.gmra.mxu1 %v6945_v41 }
 0x2b5   :  { %8298 = vst [vmem:[#allocation106_spill] sm:$0xff] %v6997_v24  ;;  %v3688_v24 = vld [vmem:[#allocation3 + $0x8] sm:$0xf]  ;;  %3672 = vmatpush.msra.mxu3 %v7029_v36  ;;  %3780 = vmatpush.msra.mxu1 %v6640_v33  ;;  %v8302_v33 = vld [vmem:[#allocation37_spill] sm:$0xff] }
 0x2b6   :  { %3755 = vst [vmem:[#allocation1] ss:$4 sm:$0xff] %v3721_v4  ;;  %v7021_v4 = vld [vmem:[#allocation11 + $0x200] sm:$0xff]  ;;  %3806 = vmatpush.msrb.mxu2 %v6644_v53  ;;  %3673 = vmatmul.f32.vlgmr.msra.gmra.mxu3 %v3634_v39  ;;  %v8303_v53 = vld [vmem:[#allocation38_spill] sm:$0xff] }
 0x2b7   :  { %8299 = vst [vmem:[#allocation107_spill] sm:$0xff] %v7009_v45  ;;  %3571 = vmatpush.msrb.mxu0 %v7021_v4  ;;  %3826 = vmatpush.msrb.mxu3 %v6646_v55  ;;  %v8304_v55 = vld [vmem:[#allocation39_spill] sm:$0xff] }
 0x2b8   :  { %8300 = vst [vmem:[#allocation108_spill] sm:$0xff] %v7011_v27  ;;  %3572 = vmatmul.f32.vlgmr.msrb.gmra.mxu0 %v6937_v35  ;;  %3781 = vmatpush.msra.mxu1 %v6652_v56  ;;  %v8306_v56 = vld [vmem:[#allocation41_spill] sm:$0xff]  ;;  %v8345_v35 = vld [vmem:[#allocation80_spill] sm:$0xff] }
 0x2b9   :  { %3760 = vmatpush.msra.mxu0 %v6638_v40  ;;  %3807 = vmatpush.msrb.mxu2 %v6656_v59  ;;  %v8301_v40 = vld [vmem:[#allocation36_spill] sm:$0xff]  ;;  %v8307_v59 = vld [vmem:[#allocation42_spill] sm:$0xff] }
 0x2ba   :  { %3827 = vmatpush.msrb.mxu3 %v6658_v60  ;;  %3782 = vmatpush.msra.mxu1 %v6664_v62  ;;  %v8308_v60 = vld [vmem:[#allocation43_spill] sm:$0xff]  ;;  %v8310_v62 = vld [vmem:[#allocation45_spill] sm:$0xff] }
 0x2bb   :  { %3761 = vmatpush.msra.mxu0 %v6650_v15  ;;  %3808 = vmatpush.msrb.mxu2 %v6668_v63  ;;  %v8305_v15 = vld [vmem:[#allocation40_spill] sm:$0xff]  ;;  %v8311_v63 = vld [vmem:[#allocation46_spill] sm:$0xff] }
 0x2bc   :  { %3828 = vmatpush.msrb.mxu3 %v6670_v1  ;;  %3653 = vmatmul.f32.vlgmr.msra.gmra.mxu2 %v3633_v54  ;;  %v8312_v1 = vld [vmem:[#allocation47_spill] sm:$0xff] }
 0x2bd   :  { %v7037_v45 = vld.sshfl [vmem:[#allocation1] sm:$0xff pattern:$0x73625140]  ;;  %v7039_v27 = vld.sshfl [vmem:[#allocation1 + $0x8] sm:$0xff pattern:$0x73625140]  ;;  %3762 = vmatpush.msra.mxu0 %v6662_v25  ;;  %3783 = vmatpush.msra.mxu1 %v6676_v5 }
 0x2be   :  { %3801 = vst [vmem:[#allocation1] ss:$4 sm:$0xff] %v3688_v24  ;;  %3809 = vmatpush.msrb.mxu2 %v6680_v9  ;;  %3829 = vmatpush.msrb.mxu3 %v6682_v10  ;;  %v8309_v25 = vld [vmem:[#allocation44_spill] sm:$0xff]  ;;  %v8314_v5 = vld [vmem:[#allocation49_spill] sm:$0xff]  ;;  %v8315_v9 = vld [vmem:[#allocation50_spill] sm:$0xff] }
 0x2bf   :  { %3763 = vmatpush.msra.mxu0 %v6674_v3  ;;  %3784 = vmatpush.msra.mxu1 %v6688_v0  ;;  %v8313_v3 = vld [vmem:[#allocation48_spill] sm:$0xff]  ;;  %v8316_v10 = vld [vmem:[#allocation51_spill] sm:$0xff]  ;;  %v8318_v0 = vld [vmem:[#allocation53_spill] sm:$0xff] }
 0x2c0   :  { %3810 = vmatpush.msrb.mxu2 %v6692_v37  ;;  %3830 = vmatpush.msrb.mxu3 %v6694_v7  ;;  %v8343_v24 = vld [vmem:[#allocation77_spill] sm:$0xff]  ;;  %v8344_v54 = vld [vmem:[#allocation79_spill] sm:$0xff] }
 0x2c1   :  { %3764 = vmatpush.msra.mxu0 %v6686_v46  ;;  %3785 = vmatpush.msra.mxu1 %v6700_v18  ;;  %v8317_v46 = vld [vmem:[#allocation52_spill] sm:$0xff]  ;;  %v8320_v18 = vld [vmem:[#allocation55_spill] sm:$0xff] }
 0x2c2   :  { %3811 = vmatpush.msrb.mxu2 %v6704_v19  ;;  %3831 = vmatpush.msrb.mxu3 %v6706_v8  ;;  %v8321_v19 = vld [vmem:[#allocation56_spill] sm:$0xff]  ;;  %v8322_v8 = vld [vmem:[#allocation57_spill] sm:$0xff] }
 0x2c3   :  { %3765 = vmatpush.msra.mxu0 %v6698_v17  ;;  %3786 = vmatpush.msra.mxu1 %v6712_v20  ;;  %v8319_v17 = vld [vmem:[#allocation54_spill] sm:$0xff]  ;;  %v8324_v20 = vld [vmem:[#allocation59_spill] sm:$0xff] }
 0x2c4   :  { %3812 = vmatpush.msrb.mxu2 %v6716_v21  ;;  %3832 = vmatpush.msrb.mxu3 %v6718_v22  ;;  %v8325_v21 = vld [vmem:[#allocation60_spill] sm:$0xff]  ;;  %v8326_v22 = vld [vmem:[#allocation61_spill] sm:$0xff] }
 0x2c5   :  { %3766 = vmatpush.msra.mxu0 %v6710_v26  ;;  %3787 = vmatpush.msra.mxu1 %v6724_v23  ;;  %v3802_v37 = vld.sshfl [vmem:[#allocation1] sm:$0xff pattern:$0x73625140]  ;;  %v3803_v7 = vld.sshfl [vmem:[#allocation1 + $0x8] sm:$0xff pattern:$0x73625140]  ;;  %v3037_v23 = vpop.f32.mrf.mxu0 }
 0x2c6   :  { %3813 = vmatpush.msrb.mxu2 %v6728_v61  ;;  %3833 = vmatpush.msrb.mxu3 %v6730_v2  ;;  %v8323_v26 = vld [vmem:[#allocation58_spill] sm:$0xff]  ;;  %v3057_v61 = vpop.f32.mrf.mxu1  ;;  %v8328_v2 = vld [vmem:[#allocation63_spill] sm:$0xff] }
 0x2c7   :  { %3767 = vmatpush.msra.mxu0 %v6722_v43  ;;  %3788 = vmatpush.msra.mxu1 %v6736_v52  ;;  %v8327_v43 = vld [vmem:[#allocation62_spill] sm:$0xff]  ;;  %v8330_v52 = vld [vmem:[#allocation65_spill] sm:$0xff] }
 0x2c8   :  { %3814 = vmatpush.msrb.mxu2 %v6740_v57  ;;  %3834 = vmatpush.msrb.mxu3 %v6742_v14  ;;  %v8331_v57 = vld [vmem:[#allocation66_spill] sm:$0xff]  ;;  %v8332_v14 = vld [vmem:[#allocation67_spill] sm:$0xff] }
 0x2c9   :  { %3768 = vmatpush.msra.mxu0 %v6734_v29  ;;  %3789 = vmatpush.msra.mxu1 %v8302_v33  ;;  %v8329_v29 = vld [vmem:[#allocation64_spill] sm:$0xff]  ;;  %v8348_v33 = vld [vmem:[#allocation83_spill] sm:$0xff] }
 0x2ca   :  { %3815 = vmatpush.msrb.mxu2 %v8303_v53  ;;  %3835 = vmatpush.msrb.mxu3 %v8304_v55  ;;  %v8349_v53 = vld [vmem:[#allocation84_spill] sm:$0xff]  ;;  %v8350_v55 = vld [vmem:[#allocation85_spill] sm:$0xff] }
 0x2cb   :  { %3769 = vmatpush.msra.mxu0 %v8301_v40  ;;  %3790 = vmatpush.msra.mxu1 %v8306_v56  ;;  %v8347_v40 = vld [vmem:[#allocation82_spill] sm:$0xff]  ;;  %v8352_v56 = vld [vmem:[#allocation87_spill] sm:$0xff] }
 0x2cc   :  { %3816 = vmatpush.msrb.mxu2 %v8307_v59  ;;  %3836 = vmatpush.msrb.mxu3 %v8308_v60  ;;  %v8353_v59 = vld [vmem:[#allocation88_spill] sm:$0xff]  ;;  %v8354_v60 = vld [vmem:[#allocation89_spill] sm:$0xff] }
 0x2cd   :  { %3770 = vmatpush.msra.mxu0 %v8305_v15  ;;  %3791 = vmatpush.msra.mxu1 %v8310_v62  ;;  %v3123_v41 = vpop.f32.mrf.mxu0  ;;  %v8351_v15 = vld [vmem:[#allocation86_spill] sm:$0xff]  ;;  %v3058_v62 = vadd.f32 %v3057_v61, %v3037_v23  ;;  %v8366_v23 = vld [vmem:[#allocation103_spill] sm:$0xff]  ;;  %v8367_v61 = vld [vmem:[#allocation104_spill] sm:$0xff] }
 0x2ce   :  { %3817 = vmatpush.msrb.mxu2 %v6776_v12  ;;  %3837 = vmatpush.msrb.mxu3 %v6778_v42  ;;  %v8334_v12 = vld [vmem:[#allocation69_spill] sm:$0xff]  ;;  %v8335_v42 = vld [vmem:[#allocation70_spill] sm:$0xff]  ;;  %v3143_v39 = vpop.f32.mrf.mxu1 }
 0x2cf   :  { %3771 = vmatpush.msra.mxu0 %v8309_v25  ;;  %3792 = vmatpush.msra.mxu1 %v6784_v13  ;;  %v8337_v13 = vld [vmem:[#allocation72_spill] sm:$0xff]  ;;  %v8355_v25 = vld [vmem:[#allocation90_spill] sm:$0xff] }
 0x2d0   :  { %3818 = vmatpush.msrb.mxu2 %v8311_v63  ;;  %3838 = vmatpush.msrb.mxu3 %v8312_v1  ;;  %v8356_v63 = vld [vmem:[#allocation91_spill] sm:$0xff]  ;;  %v8357_v1 = vld [vmem:[#allocation92_spill] sm:$0xff] }
 0x2d1   :  { %3772 = vmatpush.msra.mxu0 %v6782_v16  ;;  %3793 = vmatpush.msra.mxu1 %v8314_v5  ;;  %v8336_v16 = vld [vmem:[#allocation71_spill] sm:$0xff] }
 0x2d2   :  { %3819 = vmatpush.msrb.mxu2 %v6800_v51  ;;  %3839 = vmatpush.msrb.mxu3 %v8315_v9  ;;  %v8333_v51 = vld [vmem:[#allocation68_spill] sm:$0xff]  ;;  %v8358_v9 = vld [vmem:[#allocation93_spill] sm:$0xff] }
 0x2d3   :  { %3773 = vmatpush.msra.mxu0 %v8313_v3  ;;  %3794 = vmatpush.msra.mxu1 %v8316_v10  ;;  %v8359_v10 = vld [vmem:[#allocation94_spill] sm:$0xff] }
 0x2d4   :  { %3820 = vmatpush.msrb.mxu2 %v6812_v38  ;;  %3840 = vmatpush.msrb.mxu3 %v6814_v11  ;;  %v8340_v38 = vld [vmem:[#allocation75_spill] sm:$0xff]  ;;  %v8341_v11 = vld [vmem:[#allocation76_spill] sm:$0xff] }
 0x2d5   :  { %3774 = vmatpush.msra.mxu0 %v6806_v30  ;;  %3795 = vmatpush.msra.mxu1 %v6820_v47  ;;  %v8339_v30 = vld [vmem:[#allocation74_spill] sm:$0xff]  ;;  %v3097_v47 = vpop.f32.mrf.mxu3 }
 0x2d6   :  { %3821 = vmatpush.msrb.mxu2 %v8317_v46  ;;  %3841 = vmatpush.msrb.mxu3 %v8318_v0  ;;  %v3124_v46 = vadd.f32 %v3123_v41, %v3058_v62  ;;  %v4798_v41 = vld [vmem:[%s8374_s27 + $0xe8] sm:$0xff]  ;;  %v4792_v62 = vld [vmem:[%s8374_s27 + $0xb8] sm:$0xff] }
 0x2d7   :  { %3775 = vmatpush.msra.mxu0 %v6818_v6  ;;  %3796 = vmatmul.f32.vlgmr.msra.gmra.mxu1 %v7039_v27  ;;  %v8338_v27 = vld [vmem:[#allocation73_spill] sm:$0xff]  ;;  %v3077_v6 = vpop.f32.mrf.mxu2 }
 0x2d8   :  { %3776 = vmatmul.f32.vlgmr.msra.gmra.mxu0 %v7037_v45  ;;  %3822 = vmatmul.f32.vlgmr.msrb.gmra.mxu2 %v3802_v37  ;;  %v8346_v45 = vld [vmem:[#allocation81_spill] sm:$0xff] }
 0x2d9   :  { %3842 = vmatmul.f32.vlgmr.msrb.gmra.mxu3 %v3803_v7  ;;  %3885 = vmatpush.msrb.mxu0 %v6832_v44  ;;  %v8342_v44 = vld [vmem:[#allocation78_spill] sm:$0xff]  ;;  %v8360_v7 = vld [vmem:[#allocation96_spill] sm:$0xff] }
 0x2da   :  { %3905 = vmatpush.msrb.mxu1 %v8319_v17  ;;  %3966 = vmatpush.msra.mxu2 %v8320_v18  ;;  %v8361_v17 = vld [vmem:[#allocation97_spill] sm:$0xff]  ;;  %v8362_v18 = vld [vmem:[#allocation98_spill] sm:$0xff] }
 0x2db   :  { %3986 = vmatpush.msra.mxu3 %v8321_v19  ;;  %3886 = vmatpush.msrb.mxu0 %v8322_v8  ;;  %v3098_v19 = vadd.f32 %v3097_v47, %v3077_v6 }
 0x2dc   :  { %3906 = vmatpush.msrb.mxu1 %v8323_v26  ;;  %3967 = vmatpush.msra.mxu2 %v8324_v20  ;;  %v8363_v26 = vld [vmem:[#allocation99_spill] sm:$0xff]  ;;  %v8364_v20 = vld [vmem:[#allocation101_spill] sm:$0xff] }
 0x2dd   :  { %3987 = vmatpush.msra.mxu3 %v8325_v21  ;;  %3887 = vmatpush.msrb.mxu0 %v8326_v22  ;;  %v3183_v5 = vpop.f32.mrf.mxu3  ;;  %v8365_v21 = vld [vmem:[#allocation102_spill] sm:$0xff]  ;;  %v3144_v22 = vadd.f32 %v3143_v39, %v3124_v46  ;;  %v4030_v39 = vld [vmem:[%s8374_s27 + $0x68] sm:$0xff]  ;;  %v4021_v46 = vld [vmem:[%s8374_s27 + $0x20] sm:$0xff] }
 0x2de   :  { %3907 = vmatpush.msrb.mxu1 %v8327_v43  ;;  %3968 = vmatpush.msra.mxu2 %v8328_v2  ;;  %v8368_v2 = vld [vmem:[#allocation105_spill] sm:$0xff] }
 0x2df   :  { %3988 = vmatpush.msra.mxu3 %v8329_v29  ;;  %3888 = vmatpush.msrb.mxu0 %v8330_v52  ;;  %v3163_v3 = vpop.f32.mrf.mxu2 }
 0x2e0   :  { %3908 = vmatpush.msrb.mxu1 %v8331_v57  ;;  %3969 = vmatpush.msra.mxu2 %v8332_v14  ;;  %v3274_v0 = vpop.f32.mrf.mxu0  ;;  %v3294_v37 = vpop.f32.mrf.mxu1  ;;  %v3164_v43 = vadd.f32 %v3163_v3, %v3098_v19  ;;  %v8370_v57 = vld [vmem:[#allocation107_spill] sm:$0xff]  ;;  %v8371_v14 = vld [vmem:[#allocation108_spill] sm:$0xff]  ;;  %v4023_v3 = vld [vmem:[%s8374_s27 + $0x30] sm:$0xff] }
 0x2e1   :  { %3989 = vmatpush.msra.mxu3 %v8333_v51  ;;  %3889 = vmatpush.msrb.mxu0 %v8334_v12  ;;  %v3295_v8 = vadd.f32 %v3294_v37, %v3274_v0  ;;  %v4788_v0 = vld [vmem:[%s8374_s27 + $0x98] sm:$0xff]  ;;  %v4018_v19 = vld [vmem:[%s8374_s27 + $0x8] sm:$0xff] }
 0x2e2   :  { %3909 = vmatpush.msrb.mxu1 %v8335_v42  ;;  %3970 = vmatpush.msra.mxu2 %v8336_v16  ;;  %v3184_v51 = vadd.f32 %v3183_v5, %v3164_v43  ;;  %v8372_v42 = vld [vmem:[#allocation32_spill] sm:$0xff]  ;;  %v4790_v5 = vld [vmem:[%s8374_s27 + $0xa8] sm:$0xff]  ;;  %v4020_v37 = vld [vmem:[%s8374_s27 + $0x18] sm:$0xff] }
 0x2e3   :  { %3990 = vmatpush.msra.mxu3 %v8337_v13  ;;  %3890 = vmatpush.msrb.mxu0 %v8338_v27  ;;  %v3337_v29 = vadd.f32 %v3295_v8, %v3144_v22  ;;  %v4800_v27 = vld [vmem:[%s8374_s27 + $0xf8] sm:$0xff]  ;;  %v4785_v8 = vld [vmem:[%s8374_s27 + $0x80] sm:$0xff]  ;;  %v4016_v22 = vld [vmem:[#allocation4] sm:$0x3] }
 0x2e4   :  { %3910 = vmatpush.msrb.mxu1 %v8339_v30  ;;  %3971 = vmatpush.msra.mxu2 %v8340_v38 }
 0x2e5   :  { %3991 = vmatpush.msra.mxu3 %v8341_v11  ;;  %3891 = vmatpush.msrb.mxu0 %v8342_v44  ;;  %v3927_v11 = vld [vmem:[#allocation3 + $0x14] sm:$0xf]  ;;  %v4799_v44 = vld [vmem:[%s8374_s27 + $0xf0] sm:$0xff] }
 0x2e6   :  { %3911 = vmatpush.msrb.mxu1 %v8343_v24  ;;  %3972 = vmatpush.msra.mxu2 %v8344_v54  ;;  %v4031_v24 = vld [vmem:[%s8374_s27 + $0x70] sm:$0xff]  ;;  %v4797_v54 = vld [vmem:[%s8374_s27 + $0xe0] sm:$0xff] }
 0x2e7   :  { %3992 = vmatpush.msra.mxu3 %v8345_v35  ;;  %3892 = vmatpush.msrb.mxu0 %v8346_v45  ;;  %v3334_v52 = vpop.f32.mrf.mxu3  ;;  %v4029_v35 = vld [vmem:[%s8374_s27 + $0x60] sm:$0xff]  ;;  %v4796_v45 = vld [vmem:[%s8374_s27 + $0xd8] sm:$0xff] }
 0x2e8   :  { %3912 = vmatpush.msrb.mxu1 %v8347_v40  ;;  %3973 = vmatpush.msra.mxu2 %v8348_v33  ;;  %v4028_v40 = vld [vmem:[%s8374_s27 + $0x58] sm:$0xff] }
 0x2e9   :  { %3993 = vmatpush.msra.mxu3 %v8349_v53  ;;  %3893 = vmatpush.msrb.mxu0 %v8350_v55  ;;  %v4795_v55 = vld [vmem:[%s8374_s27 + $0xd0] sm:$0xff] }
 0x2ea   :  { %3913 = vmatpush.msrb.mxu1 %v8351_v15  ;;  %3974 = vmatpush.msra.mxu2 %v8352_v56  ;;  %v4027_v15 = vld [vmem:[%s8374_s27 + $0x50] sm:$0xff]  ;;  %v4794_v56 = vld [vmem:[%s8374_s27 + $0xc8] sm:$0xff] }
 0x2eb   :  { %3994 = vmatpush.msra.mxu3 %v8353_v59  ;;  %3894 = vmatpush.msrb.mxu0 %v8354_v60  ;;  %v4026_v59 = vld [vmem:[%s8374_s27 + $0x48] sm:$0xff]  ;;  %v4793_v60 = vld [vmem:[%s8374_s27 + $0xc0] sm:$0xff] }
 0x2ec   :  { %3914 = vmatpush.msrb.mxu1 %v8355_v25  ;;  %3975 = vmatpush.msra.mxu2 %v8356_v63  ;;  %v4025_v25 = vld [vmem:[%s8374_s27 + $0x40] sm:$0xff]  ;;  %v4024_v63 = vld [vmem:[%s8374_s27 + $0x38] sm:$0xff] }
 0x2ed   :  { %3995 = vmatpush.msra.mxu3 %v8357_v1  ;;  %3895 = vmatpush.msrb.mxu0 %v8358_v9  ;;  %v4791_v1 = vld [vmem:[%s8374_s27 + $0xb0] sm:$0xff]  ;;  %v4022_v9 = vld [vmem:[%s8374_s27 + $0x28] sm:$0xff] }
 0x2ee   :  { %3915 = vmatpush.msrb.mxu1 %v8359_v10  ;;  %3976 = vmatpush.msra.mxu2 %v8360_v7  ;;  %v4789_v10 = vld [vmem:[%s8374_s27 + $0xa0] sm:$0xff]  ;;  %v4787_v7 = vld [vmem:[%s8374_s27 + $0x90] sm:$0xff] }
 0x2ef   :  { %3996 = vmatpush.msra.mxu3 %v8361_v17  ;;  %3896 = vmatpush.msrb.mxu0 %v6973_v34  ;;  %v8369_v34 = vld [vmem:[#allocation106_spill] sm:$0xff] }
 0x2f0   :  { %3916 = vmatpush.msrb.mxu1 %v8362_v18  ;;  %3977 = vmatpush.msra.mxu2 %v8363_v26  ;;  %v4019_v17 = vld [vmem:[%s8374_s27 + $0x10] sm:$0xff]  ;;  %v4786_v18 = vld [vmem:[%s8374_s27 + $0x88] sm:$0xff]  ;;  %v4017_v26 = vld [vmem:[%s8374_s27] sm:$0xff] }
 0x2f1   :  { %3997 = vmatpush.msra.mxu3 %v6981_v32  ;;  %3897 = vmatpush.msrb.mxu0 %v8364_v20  ;;  %v3314_v32 = vpop.f32.mrf.mxu2 }
 0x2f2   :  { %3917 = vmatpush.msrb.mxu1 %v8365_v21  ;;  %3978 = vmatpush.msra.mxu2 %v8366_v23  ;;  %v3335_v12 = vadd.f32 %v3334_v52, %v3314_v32 }
 0x2f3   :  { %3998 = vmatpush.msra.mxu3 %v8367_v61  ;;  %3898 = vmatpush.msrb.mxu0 %v8368_v2 }
 0x2f4   :  { %3918 = vmatpush.msrb.mxu1 %v8369_v34  ;;  %3979 = vmatpush.msra.mxu2 %v7003_v58  ;;  %v3339_v58 = vadd.f32 %v3337_v29, %v8372_v42  ;;  %v3338_v16 = vadd.f32 %v3335_v12, %v3184_v51  ;;  %v4898_v42 = vld [vmem:[%s7691_s10] ss:$0 sm:$0xff]  ;;  %s4549_s10 = sshll.u32 %s7700_s19, 4  ;;  %s4596_s19 = sshll.u32 %s7704_s23, 4  ;;  %s4550_s10 = int_to_ptr.hbm [resolvable:$true] %s4549_s10  ;;  %s4597_s19 = int_to_ptr.hbm [resolvable:$true] %s4596_s19 }
 0x2f5   :  { %3999 = vmatpush.msra.mxu3 %v7005_v48  ;;  %3899 = vmatpush.msrb.mxu0 %v8370_v57  ;;  %v8373_v48 = vld [vmem:[#allocation33_spill] sm:$0xff] }
 0x2f6   :  { %3919 = vmatpush.msrb.mxu1 %v8371_v14  ;;  %3980 = vmatpush.msra.mxu2 %v7015_v49  ;;  %v3340_v13 = vadd.f32 %v3338_v16, %v8373_v48  ;;  %v3343_v49 = vmul.f32 0.1, %v3339_v58  ;;  %vm3341_vm10 = vcmp.ge.f32.partialorder %v3339_v58, 0.0 }
 0x2f7   :  { %4000 = vmatpush.msra.mxu3 %v7017_v31  ;;  %3900 = vmatpush.msrb.mxu0 %v7021_v4  ;;  %v4032_v31 = vld [vmem:[%s8374_s27 + $0x78] sm:$0xff] }
 0x2f8   :  { %3920 = vmatpush.msrb.mxu1 %v7023_v28  ;;  %3981 = vmatpush.msra.mxu2 %v7027_v50  ;;  %vm3342_vm9 = vcmp.ge.f32.partialorder %v3340_v13, 0.0  ;;  %v3344_v28 = vmul.f32 0.1, %v3340_v13  ;;  %v3345_v30 = vsel %vm3341_vm10, %v3339_v58, %v3343_v49  ;;  %v4815_v49 = vld [vmem:[%s8374_s27 + $0x170] sm:$0xff] }
 0x2f9   :  { %4001 = vmatpush.msra.mxu3 %v7029_v36  ;;  %4051 = vmatpush.msra.mxu0 %v4800_v27 }
 0x2fa   :  { %4071 = vmatpush.msra.mxu1 %v4032_v31  ;;  %v3346_v4 = vsel %vm3342_vm9, %v3340_v13, %v3344_v28  ;;  %v4816_v31 = vld [vmem:[%s8374_s27 + $0x178] sm:$0xff]  ;;  %v4814_v28 = vld [vmem:[%s8374_s27 + $0x168] sm:$0xff] }
 0x2fb   :  { %v3349_v50 = vrot.slane %v3346_v4, 6  ;;  %4052 = vmatpush.msra.mxu0 %v4799_v44  ;;  %4109 = vmatpush.msrb.mxu2 %v4816_v31  ;;  %v4813_v4 = vld [vmem:[%s8374_s27 + $0x160] sm:$0xff] }
 0x2fc   :  { %4072 = vmatpush.msra.mxu1 %v4031_v24  ;;  %v4805_v44 = vld [vmem:[%s8374_s27 + $0x120] sm:$0xff]  ;;  %v4804_v24 = vld [vmem:[%s8374_s27 + $0x118] sm:$0xff] }
 0x2fd   :  { %v3350_v36 = vsel %vm300_vm3, %v3345_v30, %v3349_v50  ;;  %4053 = vmatpush.msra.mxu0 %v4798_v41  ;;  %4110 = vmatpush.msrb.mxu2 %v4815_v49  ;;  %v4812_v50 = vld [vmem:[%s8374_s27 + $0x158] sm:$0xff]  ;;  %v4811_v30 = vld [vmem:[%s8374_s27 + $0x150] sm:$0xff]  ;;  %v4827_v49 = vld [vmem:[%s8375_s28 + $0x80] sm:$0xff] }
 0x2fe   :  { %3353 = vst [vmem:[#allocation14 + $0xc] sm:$0xf] %v3350_v36  ;;  %4073 = vmatpush.msra.mxu1 %v4030_v39 }
 0x2ff   :  { %3355 = vst [vmem:[#allocation3 + $0x10] sm:$0xf] %v3350_v36  ;;  %4054 = vmatpush.msra.mxu0 %v4797_v54  ;;  %4111 = vmatpush.msrb.mxu2 %v4814_v28  ;;  %v4810_v36 = vld [vmem:[%s8374_s27 + $0x148] sm:$0xff]  ;;  %v4803_v54 = vld [vmem:[%s8374_s27 + $0x110] sm:$0xff] }
 0x300   :  { %4074 = vmatpush.msra.mxu1 %v4029_v35  ;;  %v4802_v35 = vld [vmem:[%s8374_s27 + $0x108] sm:$0xff]  ;;  %v4850_v28 = vld [vmem:[%s8377_s8 + $0xf0] sm:$0xff] }
 0x301   :  { %4055 = vmatpush.msra.mxu0 %v4796_v45  ;;  %4112 = vmatpush.msrb.mxu2 %v4813_v4  ;;  %v4801_v45 = vld [vmem:[%s8374_s27 + $0x100] sm:$0xff] }
 0x302   :  { %4075 = vmatpush.msra.mxu1 %v4028_v40  ;;  %v3447_v20 = vpop.f32.mrf.mxu0  ;;  %v3467_v21 = vpop.f32.mrf.mxu1 }
 0x303   :  { %4056 = vmatpush.msra.mxu0 %v4795_v55  ;;  %v3468_v61 = vadd.f32 %v3467_v21, %v3447_v20  ;;  %4113 = vmatpush.msrb.mxu2 %v4812_v50  ;;  %v4817_v20 = vld [vmem:[%s8375_s28 + $0x40] sm:$0xff]  ;;  %v4149_v21 = vld [vmem:[%s8375_s28 + $0x38] sm:$0xff] }
 0x304   :  { %4076 = vmatpush.msra.mxu1 %v4027_v15  ;;  %v4266_v50 = vld [vmem:[%s8377_s8 + $0x60] sm:$0xff] }
 0x305   :  { %4057 = vmatpush.msra.mxu0 %v4794_v56  ;;  %4114 = vmatpush.msrb.mxu2 %v4811_v30  ;;  %v4849_v30 = vld [vmem:[%s8377_s8 + $0xe8] sm:$0xff] }
 0x306   :  { %v3846_v38 = vld [vmem:[#allocation3 + $0x10] sm:$0xf]  ;;  %4077 = vmatpush.msra.mxu1 %v4026_v59 }
 0x307   :  { %3880 = vst [vmem:[#allocation1] ss:$4 sm:$0xff] %v3846_v38  ;;  %4058 = vmatpush.msra.mxu0 %v4793_v60  ;;  %4115 = vmatpush.msrb.mxu2 %v4810_v36  ;;  %v4809_v38 = vld [vmem:[%s8374_s27 + $0x140] sm:$0xff] }
 0x308   :  { %4078 = vmatpush.msra.mxu1 %v4025_v25 }
 0x309   :  { %4059 = vmatpush.msra.mxu0 %v4792_v62  ;;  %v3493_v43 = vpop.f32.mrf.mxu2  ;;  %4116 = vmatpush.msrb.mxu2 %v4809_v38  ;;  %v4899_v38 = vld [vmem:[%s7692_s11] ss:$0 sm:$0xff] }
 0x30a   :  { %4079 = vmatpush.msra.mxu1 %v4024_v63  ;;  %v3494_v29 = vadd.f32 %v3493_v43, %v3468_v61  ;;  %v4834_v43 = vld [vmem:[%s8375_s28 + $0xb8] sm:$0xff]  ;;  %v4833_v61 = vld [vmem:[%s8375_s28 + $0xb0] sm:$0xff] }
 0x30b   :  { %4060 = vmatpush.msra.mxu0 %v4791_v1 }
 0x30c   :  { %4080 = vmatpush.msra.mxu1 %v4023_v3  ;;  %v3513_v23 = vpop.f32.mrf.mxu3 }
 0x30d   :  { %4061 = vmatpush.msra.mxu0 %v4790_v5  ;;  %v3514_v52 = vadd.f32 %v3513_v23, %v3494_v29  ;;  %v4147_v23 = vld [vmem:[%s8375_s28 + $0x28] sm:$0xff]  ;;  %v4831_v29 = vld [vmem:[%s8375_s28 + $0xa0] sm:$0xff] }
 0x30e   :  { %v3881_v6 = vld.sshfl [vmem:[#allocation1] sm:$0xff pattern:$0x73625140]  ;;  %v3882_v47 = vld.sshfl [vmem:[#allocation1 + $0x8] sm:$0xff pattern:$0x73625140]  ;;  %4081 = vmatpush.msra.mxu1 %v4022_v9 }
 0x30f   :  { %3901 = vmatmul.f32.vlgmr.msrb.gmra.mxu0 %v3881_v6  ;;  %3921 = vmatmul.f32.vlgmr.msrb.gmra.mxu1 %v3882_v47  ;;  %3961 = vst [vmem:[#allocation1] ss:$4 sm:$0xff] %v3927_v11  ;;  %v4808_v11 = vld [vmem:[%s8374_s27 + $0x138] sm:$0xff]  ;;  %v4807_v6 = vld [vmem:[%s8374_s27 + $0x130] sm:$0xff]  ;;  %v4806_v47 = vld [vmem:[%s8374_s27 + $0x128] sm:$0xff]  ;;  %s5179_s27 = smov [#allocation20]  }
 0x310   :  { %4062 = vmatpush.msra.mxu0 %v4789_v10  ;;  %4082 = vmatpush.msra.mxu1 %v4021_v46  ;;  %s4583_s11 = sshll.u32 %s5179_s27, 4  ;;  %s4584_s11 = int_to_ptr.vmem [resolvable:$true] %s4583_s11 }
 0x311   :  { %4117 = vmatpush.msrb.mxu2 %v4808_v11  ;;  %v4265_v11 = vld [vmem:[%s8377_s8 + $0x58] sm:$0xff] }
 0x312   :  { %4063 = vmatpush.msra.mxu0 %v4788_v0  ;;  %4083 = vmatpush.msra.mxu1 %v4020_v37  ;;  %v4824_v0 = vld [vmem:[%s8375_s28 + $0x78] sm:$0xff]  ;;  %v4823_v37 = vld [vmem:[%s8375_s28 + $0x70] sm:$0xff] }
 0x313   :  { %4118 = vmatpush.msrb.mxu2 %v4807_v6  ;;  %4172 = vmatpush.msrb.mxu3 %v4824_v0  ;;  %v4259_v0 = vld [vmem:[%s8377_s8 + $0x28] sm:$0xff] }
 0x314   :  { %4064 = vmatpush.msra.mxu0 %v4787_v7  ;;  %4084 = vmatpush.msra.mxu1 %v4019_v17  ;;  %v8376_v7 = vmov 0.0   ;;  %v4822_v17 = vld [vmem:[%s8375_s28 + $0x68] sm:$0xff] }
 0x315   :  { %4119 = vmatpush.msrb.mxu2 %v4806_v47  ;;  %122 = vst.msk [vmem:[#allocation5] sm:$0x3] %vm121_vm12, %v8376_v7  ;;  %4173 = vmatpush.msrb.mxu3 %v4823_v37  ;;  %v4858_v37 = vld [vmem:[%s8377_s8 + $0x130] sm:$0xff] }
 0x316   :  { %v3962_v33 = vld.sshfl [vmem:[#allocation1] sm:$0xff pattern:$0x73625140]  ;;  %v3963_v53 = vld.sshfl [vmem:[#allocation1 + $0x8] sm:$0xff pattern:$0x73625140]  ;;  %4065 = vmatpush.msra.mxu0 %v4786_v18  ;;  %4085 = vmatpush.msra.mxu1 %v4018_v19 }
 0x317   :  { %3982 = vmatmul.f32.vlgmr.msra.gmra.mxu2 %v3962_v33  ;;  %4002 = vmatmul.f32.vlgmr.msra.gmra.mxu3 %v3963_v53  ;;  %123 = vst.msk [vmem:[#allocation5 + $0x2] sm:$0x3] %vm121_vm12, %v8376_v7  ;;  %v4821_v18 = vld [vmem:[%s8375_s28 + $0x60] sm:$0xff]  ;;  %v4820_v19 = vld [vmem:[%s8375_s28 + $0x58] sm:$0xff] }
 0x318   :  { %4066 = vmatpush.msra.mxu0 %v4785_v8  ;;  %4086 = vmatpush.msra.mxu1 %v4017_v26  ;;  %124 = vst.msk [vmem:[#allocation5 + $0x4] sm:$0x3] %vm121_vm12, %v8376_v7  ;;  %v4819_v8 = vld [vmem:[%s8375_s28 + $0x50] sm:$0xff]  ;;  %v4818_v26 = vld [vmem:[%s8375_s28 + $0x48] sm:$0xff] }
 0x319   :  { %4087 = vmatmul.f32.vlgmr.msra.gmra.mxu1 %v4016_v22  ;;  %4120 = vmatpush.msrb.mxu2 %v4805_v44  ;;  %v4148_v22 = vld [vmem:[%s8375_s28 + $0x30] sm:$0xff]  ;;  %129 = vst.msk [vmem:[#allocation7] sm:$0x3] %vm128_vm0, %v8376_v7 }
 0x31a   :  { %4174 = vmatpush.msrb.mxu3 %v4822_v17  ;;  %4229 = vmatpush.msrb.mxu0 %v4834_v43  ;;  %v4264_v44 = vld [vmem:[%s8377_s8 + $0x50] sm:$0xff]  ;;  %v4843_v17 = vld [vmem:[%s8377_s8 + $0xb8] sm:$0xff]  ;;  %130 = vst.msk [vmem:[#allocation7 + $0x2] sm:$0x3] %vm128_vm0, %v8376_v7 }
 0x31b   :  { %4121 = vmatpush.msrb.mxu2 %v4804_v24  ;;  %v4855_v43 = vld [vmem:[%s8377_s8 + $0x118] sm:$0xff]  ;;  %131 = vst.msk [vmem:[#allocation7 + $0x4] sm:$0x3] %vm128_vm0, %v8376_v7 }
 0x31c   :  { %4175 = vmatpush.msrb.mxu3 %v4821_v18  ;;  %4230 = vmatpush.msrb.mxu0 %v4833_v61  ;;  %v4258_v18 = vld [vmem:[%s8377_s8 + $0x20] sm:$0xff]  ;;  %v4255_v61 = vld [vmem:[%s8377_s8 + $0x8] sm:$0xff]  ;;  %v4383_v7 = vld [vmem:[%s8378_s30 + $0x18] sm:$0xff] }
 0x31d   :  { %4122 = vmatpush.msrb.mxu2 %v4803_v54  ;;  %v4867_v54 = vld [vmem:[%s8377_s8 + $0x178] sm:$0xff] }
 0x31e   :  { %4176 = vmatpush.msrb.mxu3 %v4820_v19  ;;  %v4857_v19 = vld [vmem:[%s8377_s8 + $0x128] sm:$0xff] }
 0x31f   :  { %4123 = vmatpush.msrb.mxu2 %v4802_v35  ;;  %v4208_v4 = vld [vmem:[#allocation5 + $0x4] sm:$0x3] }
 0x320   :  { %4177 = vmatpush.msrb.mxu3 %v4819_v8  ;;  %v4842_v8 = vld [vmem:[%s8377_s8 + $0xb0] sm:$0xff] }
 0x321   :  { %4124 = vmatpush.msrb.mxu2 %v4801_v45  ;;  %v4866_v45 = vld [vmem:[%s8377_s8 + $0x170] sm:$0xff] }
 0x322   :  { %4178 = vmatpush.msrb.mxu3 %v4818_v26  ;;  %v4257_v26 = vld [vmem:[%s8377_s8 + $0x18] sm:$0xff] }
 0x324   :  { %4179 = vmatpush.msrb.mxu3 %v4817_v20  ;;  %v4856_v20 = vld [vmem:[%s8377_s8 + $0x120] sm:$0xff] }
 0x326   :  { %4195 = vmatpush.msra.mxu3 %v4149_v21  ;;  %v4841_v21 = vld [vmem:[%s8377_s8 + $0xa8] sm:$0xff] }
 0x328   :  { %4196 = vmatpush.msra.mxu3 %v4148_v22  ;;  %v4256_v22 = vld [vmem:[%s8377_s8 + $0x10] sm:$0xff] }
 0x32a   :  { %4197 = vmatpush.msra.mxu3 %v4147_v23  ;;  %v4840_v23 = vld [vmem:[%s8377_s8 + $0xa0] sm:$0xff] }
 0x331   :  { %v3593_v34 = vpop.f32.mrf.mxu1 }
 0x335   :  { %v3573_v2 = vpop.f32.mrf.mxu0 }
 0x336   :  { %v3594_v32 = vadd.f32 %v3593_v34, %v3573_v2  ;;  %v4832_v2 = vld [vmem:[%s8375_s28 + $0xa8] sm:$0xff]  ;;  %v4146_v34 = vld [vmem:[%s8375_s28 + $0x20] sm:$0xff] }
 0x337   :  { %4231 = vmatpush.msrb.mxu0 %v4832_v2  ;;  %4198 = vmatpush.msra.mxu3 %v4146_v34  ;;  %v4854_v2 = vld [vmem:[%s8377_s8 + $0x110] sm:$0xff]  ;;  %v4839_v34 = vld [vmem:[%s8377_s8 + $0x98] sm:$0xff] }
 0x338   :  { %v3596_v51 = vadd.f32 %v3594_v32, %v3514_v52  ;;  %v4145_v32 = vld [vmem:[%s8375_s28 + $0x18] sm:$0xff]  ;;  %v4144_v52 = vld [vmem:[%s8375_s28 + $0x10] sm:$0xff] }
 0x339   :  { %v3674_v14 = vpop.f32.mrf.mxu3  ;;  %4232 = vmatpush.msrb.mxu0 %v4831_v29  ;;  %4199 = vmatpush.msra.mxu3 %v4145_v32  ;;  %v4254_v29 = vld [vmem:[%s8377_s8] sm:$0xff]  ;;  %v4853_v32 = vld [vmem:[%s8377_s8 + $0x108] sm:$0xff] }
 0x33b   :  { %4200 = vmatpush.msra.mxu3 %v4144_v52  ;;  %v4253_v52 = vld [vmem:[#allocation6] sm:$0x3] }
 0x33f   :  { %v3654_v57 = vpop.f32.mrf.mxu2 }
 0x340   :  { %v3675_v12 = vadd.f32 %v3674_v14, %v3654_v57  ;;  %v4830_v57 = vld [vmem:[%s8375_s28 + $0x98] sm:$0xff]  ;;  %v4829_v14 = vld [vmem:[%s8375_s28 + $0x90] sm:$0xff] }
 0x341   :  { %4233 = vmatpush.msrb.mxu0 %v4830_v57  ;;  %v4838_v57 = vld [vmem:[%s8377_s8 + $0x90] sm:$0xff] }
 0x342   :  { %v3677_v58 = vadd.f32 %v3675_v12, %v3596_v51  ;;  %v4143_v51 = vld [vmem:[%s8375_s28 + $0x8] sm:$0xff]  ;;  %v4269_v12 = vld [vmem:[%s8377_s8 + $0x78] sm:$0xff] }
 0x343   :  { %4308 = vmatpush.msra.mxu2 %v4269_v12  ;;  %4234 = vmatpush.msrb.mxu0 %v4829_v14  ;;  %v4852_v14 = vld [vmem:[%s8377_s8 + $0x100] sm:$0xff]  ;;  %v4837_v12 = vld [vmem:[%s8377_s8 + $0x88] sm:$0xff] }
 0x344   :  { %v3681_v16 = vadd.f32 %v4898_v42, %v3677_v58  ;;  %v4268_v58 = vld [vmem:[%s8377_s8 + $0x70] sm:$0xff]  ;;  %4201 = vmatpush.msra.mxu3 %v4143_v51  ;;  %v4329_v51 = vld [vmem:[#allocation6 + $0x4] sm:$0x3] }
 0x345   :  { %4309 = vmatpush.msra.mxu2 %v4268_v58 }
 0x346   :  { %vm3682_vm3 = vcmp.ge.f32.partialorder %v3681_v16, 0.0  ;;  %v3683_v48 = vmul.f32 0.1, %v3681_v16 }
 0x348   :  { %v3684_v13 = vsel %vm3682_vm3, %v3681_v16, %v3683_v48  ;;  %v4142_v16 = vld [vmem:[%s8375_s28] sm:$0xff]  ;;  %v4267_v48 = vld [vmem:[%s8377_s8 + $0x68] sm:$0xff] }
 0x349   :  { %3685 = vst [vmem:[#allocation16] sm:$0x3] %v3684_v13  ;;  %4202 = vmatpush.msra.mxu3 %v4142_v16  ;;  %4310 = vmatpush.msra.mxu2 %v4267_v48 }
 0x34a   :  { %3687 = vst [vmem:[#allocation4 + $0x2] sm:$0x3] %v3684_v13  ;;  %v4851_v13 = vld [vmem:[%s8377_s8 + $0xf8] sm:$0xff] }
 0x34b   :  { %4288 = vmatpush.msrb.mxu1 %v4851_v13  ;;  %4311 = vmatpush.msra.mxu2 %v4266_v50 }
 0x34d   :  { %4289 = vmatpush.msrb.mxu1 %v4850_v28  ;;  %4312 = vmatpush.msra.mxu2 %v4265_v11  ;;  %v4868_v11 = vld [vmem:[%s8378_s30 + $0x20] sm:$0xff] }
 0x34f   :  { %4290 = vmatpush.msrb.mxu1 %v4849_v30  ;;  %4313 = vmatpush.msra.mxu2 %v4264_v44  ;;  %v4871_v30 = vld [vmem:[%s8378_s30 + $0x38] sm:$0xff]  ;;  %v4380_v44 = vld [vmem:[%s8378_s30] sm:$0xff] }
 0x351   :  { %v4033_v27 = vld [vmem:[#allocation4 + $0x2] sm:$0x3] }
 0x352   :  { %4067 = vmatmul.f32.vlgmr.msra.gmra.mxu0 %v4033_v27 }
 0x354   :  { %v3797_v39 = vpop.f32.mrf.mxu1 }
 0x355   :  { %v3777_v41 = vpop.f32.mrf.mxu0 }
 0x356   :  { %v3798_v53 = vadd.f32 %v3797_v39, %v3777_v41 }
 0x35b   :  { %v3823_v40 = vpop.f32.mrf.mxu2 }
 0x35c   :  { %v3843_v33 = vpop.f32.mrf.mxu3  ;;  %v3824_v56 = vadd.f32 %v3823_v40, %v3798_v53  ;;  %v4865_v40 = vld [vmem:[%s8377_s8 + $0x168] sm:$0xff]  ;;  %v4141_v53 = vld [vmem:[#allocation5] sm:$0x3] }
 0x35e   :  { %v3844_v60 = vadd.f32 %v3843_v33, %v3824_v56  ;;  %v4864_v33 = vld [vmem:[%s8377_s8 + $0x160] sm:$0xff]  ;;  %v4263_v56 = vld [vmem:[%s8377_s8 + $0x48] sm:$0xff] }
 0x35f   :  { %4314 = vmatpush.msra.mxu2 %v4263_v56 }
 0x38c   :  { %v3902_v55 = vpop.f32.mrf.mxu0  ;;  %v3922_v15 = vpop.f32.mrf.mxu1 }
 0x38d   :  { %v3923_v59 = vadd.f32 %v3922_v15, %v3902_v55  ;;  %v4863_v55 = vld [vmem:[%s8377_s8 + $0x158] sm:$0xff]  ;;  %v4848_v15 = vld [vmem:[%s8377_s8 + $0xe0] sm:$0xff] }
 0x38e   :  { %4291 = vmatpush.msrb.mxu1 %v4848_v15  ;;  %v4488_v15 = vld [vmem:[%s7696_s15 + $0x60] sm:$0xff] }
 0x38f   :  { %v3925_v63 = vadd.f32 %v3923_v59, %v3844_v60  ;;  %v4862_v59 = vld [vmem:[%s8377_s8 + $0x150] sm:$0xff]  ;;  %v4847_v60 = vld [vmem:[%s8377_s8 + $0xd8] sm:$0xff] }
 0x390   :  { %4292 = vmatpush.msrb.mxu1 %v4847_v60  ;;  %v4877_v60 = vld [vmem:[%s8378_s30 + $0x58] sm:$0xff] }
 0x396   :  { %v4088_v31 = vpop.f32.mrf.mxu1 }
 0x39a   :  { %v3983_v25 = vpop.f32.mrf.mxu2  ;;  %v4003_v62 = vpop.f32.mrf.mxu3 }
 0x39b   :  { %v4004_v1 = vadd.f32 %v4003_v62, %v3983_v25  ;;  %v4262_v25 = vld [vmem:[%s8377_s8 + $0x40] sm:$0xff]  ;;  %v4861_v62 = vld [vmem:[%s8377_s8 + $0x148] sm:$0xff] }
 0x39c   :  { %4315 = vmatpush.msra.mxu2 %v4262_v25 }
 0x39d   :  { %v4006_v3 = vadd.f32 %v4004_v1, %v3925_v63  ;;  %v4846_v63 = vld [vmem:[%s8377_s8 + $0xd0] sm:$0xff]  ;;  %v4261_v1 = vld [vmem:[%s8377_s8 + $0x38] sm:$0xff] }
 0x39e   :  { %4293 = vmatpush.msrb.mxu1 %v4846_v63  ;;  %4316 = vmatpush.msra.mxu2 %v4261_v1  ;;  %v4875_v63 = vld [vmem:[%s8378_s30 + $0x48] sm:$0xff]  ;;  %v4874_v1 = vld [vmem:[%s8378_s30 + $0x40] sm:$0xff] }
 0x39f   :  { %v4007_v5 = vadd.f32 %v4898_v42, %v4006_v3  ;;  %v4828_v42 = vld [vmem:[%s8375_s28 + $0x88] sm:$0xff]  ;;  %v4860_v3 = vld [vmem:[%s8377_s8 + $0x140] sm:$0xff] }
 0x3a0   :  { %4235 = vmatpush.msrb.mxu0 %v4828_v42  ;;  %v4836_v42 = vld [vmem:[%s8377_s8 + $0x80] sm:$0xff] }
 0x3a1   :  { %vm4008_vm11 = vcmp.ge.f32.partialorder %v4007_v5, 0.0  ;;  %v4009_v9 = vmul.f32 0.1, %v4007_v5 }
 0x3a2   :  { %4236 = vmatpush.msrb.mxu0 %v4827_v49 }
 0x3a3   :  { %v4010_v10 = vsel %vm4008_vm11, %v4007_v5, %v4009_v9  ;;  %4835 = vmatmul.msk.f32.vlgmr.msrb.gmra.mxu0 %vm4160_vm13, %v4208_v4  ;;  %v4845_v5 = vld [vmem:[%s8377_s8 + $0xc8] sm:$0xff]  ;;  %v4260_v9 = vld [vmem:[%s8377_s8 + $0x30] sm:$0xff] }
 0x3a4   :  { %4012 = vst [vmem:[#allocation16 + $0x2] sm:$0x3] %v4010_v10  ;;  %4294 = vmatpush.msrb.mxu1 %v4845_v5  ;;  %4317 = vmatpush.msra.mxu2 %v4260_v9  ;;  %v4438_v5 = vld [vmem:[#allocation7 + $0x4] sm:$0x3]  ;;  %v4487_v9 = vld [vmem:[%s7696_s15 + $0x58] sm:$0xff] }
 0x3a5   :  { %4014 = vst [vmem:[#allocation4 + $0x4] sm:$0x3] %v4010_v10  ;;  %v4859_v10 = vld [vmem:[%s8377_s8 + $0x138] sm:$0xff]  ;;  %4406 = vmatpush.msra.mxu0 %v4871_v30 }
 0x3a6   :  { %4318 = vmatpush.msra.mxu2 %v4259_v0  ;;  %v4484_v0 = vld [vmem:[%s7696_s15 + $0x40] sm:$0xff] }
 0x3a8   :  { %4319 = vmatpush.msra.mxu2 %v4258_v18  ;;  %v4481_v18 = vld [vmem:[%s7696_s15 + $0x28] sm:$0xff] }
 0x3aa   :  { %4320 = vmatpush.msra.mxu2 %v4257_v26  ;;  %v4478_v26 = vld [vmem:[%s7696_s15 + $0x10] sm:$0xff] }
 0x3ac   :  { %v4091_v46 = vld [vmem:[#allocation4 + $0x4] sm:$0x3]  ;;  %4321 = vmatpush.msra.mxu2 %v4256_v22 }
 0x3ad   :  { %4125 = vmatmul.f32.vlgmr.msrb.gmra.mxu2 %v4091_v46  ;;  %v4844_v46 = vld [vmem:[%s8377_s8 + $0xc0] sm:$0xff]  ;;  %s5175_s8 = smov [#allocation14]  }
 0x3ae   :  { %4295 = vmatpush.msrb.mxu1 %v4844_v46  ;;  %4322 = vmatpush.msra.mxu2 %v4255_v61  ;;  %v4485_v46 = vld [vmem:[%s7696_s15 + $0x48] sm:$0xff]  ;;  %v4902_v61 = vld [vmem:[%s7695_s14] ss:$0 sm:$0xff]  ;;  %s4534_s25 = sshll.u32 %s5175_s8, 4  ;;  %s5178_s14 = smov [#allocation17]   ;;  %s4535_s25 = int_to_ptr.vmem [resolvable:$true] %s4534_s25 }
 0x3af   :  { %s4561_s28 = sshll.u32 %s5178_s14, 4  ;;  %s5184_s8 = smov [#allocation19]   ;;  %s4562_s28 = int_to_ptr.vmem [resolvable:$true] %s4561_s28 }
 0x3b0   :  { %4296 = vmatpush.msrb.mxu1 %v4843_v17  ;;  %4323 = vmatpush.msra.mxu2 %v4254_v29  ;;  %v4482_v17 = vld [vmem:[%s7696_s15 + $0x30] sm:$0xff] }
 0x3b2   :  { %4297 = vmatpush.msrb.mxu1 %v4842_v8  ;;  %v4479_v8 = vld [vmem:[%s7696_s15 + $0x18] sm:$0xff] }
 0x3b4   :  { %4298 = vmatpush.msrb.mxu1 %v4841_v21  ;;  %v4476_v21 = vld [vmem:[%s7696_s15] sm:$0xff] }
 0x3b5   :  { %4324 = vmatmul.f32.vlgmr.msra.gmra.mxu2 %v4253_v52 }
 0x3b6   :  { %4299 = vmatpush.msrb.mxu1 %v4840_v23 }
 0x3b8   :  { %4300 = vmatpush.msrb.mxu1 %v4839_v34 }
 0x3ba   :  { %4301 = vmatpush.msrb.mxu1 %v4838_v57  ;;  %v4903_v57 = vld [vmem:[%s7697_s16] ss:$0 sm:$0xff] }
 0x3bc   :  { %4302 = vmatpush.msrb.mxu1 %v4837_v12 }
 0x3be   :  { %4303 = vmatpush.msrb.mxu1 %v4836_v42 }
 0x3cf   :  { %v4068_v27 = vpop.f32.mrf.mxu0 }
 0x3d0   :  { %v4089_v36 = vadd.f32 %v4088_v31, %v4068_v27  ;;  %v4900_v27 = vld [vmem:[%s7693_s12] ss:$0 sm:$0xff]  ;;  %s5181_s12 = smov [#allocation16]  }
 0x420   :  { %v4238_v48 = vpop.f32.mrf.mxu0 }
 0x430   :  { %v4126_v6 = vpop.f32.mrf.mxu2 }
 0x431   :  { %v4129_v47 = vadd.f32 %v4126_v6, %v4089_v36  ;;  %v4870_v36 = vld [vmem:[%s8378_s30 + $0x30] sm:$0xff] }
 0x432   :  { %4407 = vmatpush.msra.mxu0 %v4870_v36  ;;  %v4382_v6 = vld [vmem:[%s8378_s30 + $0x10] sm:$0xff] }
 0x433   :  { %v4133_v24 = vadd.f32 %v4899_v38, %v4129_v47  ;;  %v4869_v38 = vld [vmem:[%s8378_s30 + $0x28] sm:$0xff] }
 0x434   :  { %4408 = vmatpush.msra.mxu0 %v4869_v38  ;;  %v4381_v47 = vld [vmem:[%s8378_s30 + $0x8] sm:$0xff] }
 0x435   :  { %vm4134_vm14 = vcmp.ge.f32.partialorder %v4133_v24, 0.0  ;;  %v4135_v41 = vmul.f32 0.1, %v4133_v24 }
 0x436   :  { %4409 = vmatpush.msra.mxu0 %v4868_v11 }
 0x437   :  { %v4136_v39 = vsel %vm4134_vm14, %v4133_v24, %v4135_v41 }
 0x438   :  { %4139 = vst.msk [vmem:[#allocation5 + $0x2] sm:$0x3] %vm121_vm12, %v4136_v39  ;;  %4429 = vmatpush.msrb.mxu0 %v4383_v7  ;;  %v4325_v24 = vpop.f32.mrf.mxu2 }
 0x439   :  { %4137 = vst.msk [vmem:[#allocation17] sm:$0x3] %vm121_vm12, %v4136_v39 }
 0x43a   :  { %4430 = vmatpush.msrb.mxu0 %v4382_v6  ;;  %4566 = dma.vmem_to_hbm [thread:$0]  %s4562_s28, 32, %s4564_s5, [#allocation18]  }
 0x43c   :  { %4431 = vmatpush.msrb.mxu0 %v4381_v47 }
 0x43e   :  { %4432 = vmatpush.msrb.mxu0 %v4380_v44 }
 0x43f   :  { %v4150_v35 = vld [vmem:[#allocation5 + $0x2] sm:$0x3] }
 0x440   :  { %4825 = vmatmul.msk.f32.vlgmr.msrb.gmra.mxu3 %vm4160_vm13, %v4150_v35  ;;  %v4901_v35 = vld [vmem:[%s7694_s13] ss:$0 sm:$0xff]  ;;  %s4594_s13 = sshll.u32 %s5185_s1, 4  ;;  %s4595_s13 = int_to_ptr.vmem [resolvable:$true] %s4594_s13 }
 0x441   :  { %4347 = vmatpush.msrb.mxu3 %v4867_v54 }
 0x443   :  { %4348 = vmatpush.msrb.mxu3 %v4866_v45  ;;  %v4491_v45 = vld [vmem:[%s7696_s15 + $0x78] sm:$0xff] }
 0x444   :  { %4496 = vmatpush.msra.mxu1 %v4491_v45 }
 0x445   :  { %4349 = vmatpush.msrb.mxu3 %v4865_v40  ;;  %v4490_v40 = vld [vmem:[%s7696_s15 + $0x70] sm:$0xff] }
 0x446   :  { %4497 = vmatpush.msra.mxu1 %v4490_v40 }
 0x447   :  { %4350 = vmatpush.msrb.mxu3 %v4864_v33 }
 0x448   :  { %4826 = vmatmul.msk.f32.vlgmr.msra.gmra.mxu3 %vm4160_vm13, %v4141_v53  ;;  %v4489_v53 = vld [vmem:[%s7696_s15 + $0x68] sm:$0xff] }
 0x449   :  { %4351 = vmatpush.msrb.mxu3 %v4863_v55  ;;  %4498 = vmatpush.msra.mxu1 %v4489_v53 }
 0x44b   :  { %4352 = vmatpush.msrb.mxu3 %v4862_v59  ;;  %4499 = vmatpush.msra.mxu1 %v4488_v15 }
 0x44d   :  { %4353 = vmatpush.msrb.mxu3 %v4861_v62  ;;  %v4876_v62 = vld [vmem:[%s8378_s30 + $0x50] sm:$0xff]  ;;  %4500 = vmatpush.msra.mxu1 %v4487_v9  ;;  %s5182_s30 = smov 32  }
 0x44f   :  { %4354 = vmatpush.msrb.mxu3 %v4860_v3  ;;  %v4379_v3 = vld [vmem:[#allocation7] sm:$0x3] }
 0x451   :  { %4355 = vmatpush.msrb.mxu3 %v4859_v10  ;;  %v4486_v10 = vld [vmem:[%s7696_s15 + $0x50] sm:$0xff] }
 0x452   :  { %4501 = vmatpush.msra.mxu1 %v4486_v10 }
 0x453   :  { %4356 = vmatpush.msrb.mxu3 %v4858_v37  ;;  %v4483_v37 = vld [vmem:[%s7696_s15 + $0x38] sm:$0xff] }
 0x454   :  { %4502 = vmatpush.msra.mxu1 %v4485_v46 }
 0x455   :  { %4357 = vmatpush.msrb.mxu3 %v4857_v19  ;;  %v4480_v19 = vld [vmem:[%s7696_s15 + $0x20] sm:$0xff] }
 0x456   :  { %4503 = vmatpush.msra.mxu1 %v4484_v0 }
 0x457   :  { %4358 = vmatpush.msrb.mxu3 %v4856_v20  ;;  %v4477_v20 = vld [vmem:[%s7696_s15 + $0x8] sm:$0xff]  ;;  %s4536_s15 = sshll.u32 %s7699_s18, 4  ;;  %s4585_s18 = sshll.u32 %s7703_s22, 4  ;;  %s4537_s15 = int_to_ptr.hbm [resolvable:$true] %s4536_s15  ;;  %s4586_s18 = int_to_ptr.hbm [resolvable:$true] %s4585_s18 }
 0x458   :  { %4504 = vmatpush.msra.mxu1 %v4483_v37  ;;  %4542 = dma.vmem_to_hbm [thread:$0]  %s4535_s25, 256, %s4537_s15, [#allocation15], %s5176_s4, %s5176_s4, %s5177_s3  }
 0x459   :  { %4359 = vmatpush.msrb.mxu3 %v4855_v43  ;;  %s4547_s22 = sshll.u32 %s5181_s12, 4  ;;  %s5183_s15 = smov 2   ;;  %s4548_s22 = int_to_ptr.vmem [resolvable:$true] %s4547_s22 }
 0x45a   :  { %4505 = vmatpush.msra.mxu1 %v4482_v17  ;;  %4555 = dma.vmem_to_hbm [thread:$0]  %s4548_s22, 64, %s4550_s10, [#allocation15], %s5182_s30, %s5182_s30, %s5183_s15  }
 0x45b   :  { %4360 = vmatpush.msrb.mxu3 %v4854_v2  ;;  %s4572_s25 = sshll.u32 %s5184_s8, 4  ;;  %s4573_s25 = int_to_ptr.vmem [resolvable:$true] %s4572_s25 }
 0x45c   :  { %4506 = vmatpush.msra.mxu1 %v4481_v18 }
 0x45d   :  { %4361 = vmatpush.msrb.mxu3 %v4853_v32 }
 0x45e   :  { %4507 = vmatpush.msra.mxu1 %v4480_v19 }
 0x45f   :  { %4362 = vmatpush.msrb.mxu3 %v4852_v14 }
 0x460   :  { %4363 = vmatmul.f32.vlgmr.msrb.gmra.mxu3 %v4329_v51  ;;  %4508 = vmatpush.msra.mxu1 %v4479_v8 }
 0x462   :  { %4509 = vmatpush.msra.mxu1 %v4478_v26 }
 0x464   :  { %4510 = vmatpush.msra.mxu1 %v4477_v20 }
 0x466   :  { %4511 = vmatpush.msra.mxu1 %v4476_v21 }
 0x4c3   :  { %v4181_v58 = vpop.f32.mrf.mxu3 }
 0x4cb   :  { %v4204_v16 = vpop.f32.mrf.mxu3 }
 0x4cc   :  { %v4205_v13 = vadd.f32 %v4204_v16, %v4181_v58 }
 0x4ce   :  { %v4241_v31 = vadd.f32 %v4238_v48, %v4205_v13 }
 0x4d0   :  { %v4245_v49 = vadd.f32 %v4900_v27, %v4241_v31 }
 0x4d2   :  { %vm4246_vm15 = vcmp.ge.f32.partialorder %v4245_v49, 0.0  ;;  %v4247_v28 = vmul.f32 0.1, %v4245_v49 }
 0x4d4   :  { %v4248_v4 = vsel %vm4246_vm15, %v4245_v49, %v4247_v28 }
 0x4d5   :  { %4251 = vst [vmem:[#allocation6 + $0x2] sm:$0x3] %v4248_v4 }
 0x4d6   :  { %4249 = vst [vmem:[#allocation19] sm:$0x3] %v4248_v4 }
 0x4d7   :  { %4577 = dma.vmem_to_hbm [thread:$0]  %s4573_s25, 32, %s4575_s17, [#allocation18]  }
 0x4dc   :  { %v4270_v50 = vld [vmem:[#allocation6 + $0x2] sm:$0x3] }
 0x4dd   :  { %4304 = vmatmul.f32.vlgmr.msrb.gmra.mxu1 %v4270_v50 }
 0x4e3   :  { %v4364_v39 = vpop.f32.mrf.mxu3 }
 0x55a   :  { %v4305_v41 = vpop.f32.mrf.mxu1 }
 0x55b   :  { %v4326_v54 = vadd.f32 %v4325_v24, %v4305_v41 }
 0x55d   :  { %v4367_v33 = vadd.f32 %v4364_v39, %v4326_v54 }
 0x55f   :  { %v4371_v55 = vadd.f32 %v4901_v35, %v4367_v33 }
 0x561   :  { %vm4372_vm1 = vcmp.ge.f32.partialorder %v4371_v55, 0.0  ;;  %v4373_v56 = vmul.f32 0.1, %v4371_v55 }
 0x563   :  { %v4374_v59 = vsel %vm4372_vm1, %v4371_v55, %v4373_v56 }
 0x564   :  { %4377 = vst.msk [vmem:[#allocation7 + $0x2] sm:$0x3] %vm128_vm0, %v4374_v59 }
 0x565   :  { %4375 = vst.msk [vmem:[#allocation20] sm:$0x3] %vm128_vm0, %v4374_v59 }
 0x566   :  { %4588 = dma.vmem_to_hbm [thread:$0]  %s4584_s11, 32, %s4586_s18, [#allocation21]  }
 0x567   :  { %s4605_s18 = sshll.u32 %s5186_s24, 4  ;;  %s8379_s11 = sld [smem:[#allocation181_spill]]  ;;  %s4606_s18 = int_to_ptr.vmem [resolvable:$true] %s4605_s18 }
 0x56b   :  { %v4384_v25 = vld [vmem:[#allocation7 + $0x2] sm:$0x3] }
 0x56c   :  { %4872 = vmatmul.msk.f32.vlgmr.msra.gmra.mxu0 %vm4390_vm2, %v4384_v25 }
 0x56d   :  { %4459 = vmatpush.msra.mxu0 %v4877_v60  ;;  %s4607_s9 = sshll.u32 %s8379_s11, 4  ;;  %s4608_s9 = int_to_ptr.hbm [resolvable:$true] %s4607_s9 }
 0x56f   :  { %4460 = vmatpush.msra.mxu0 %v4876_v62 }
 0x571   :  { %4461 = vmatpush.msra.mxu0 %v4875_v63 }
 0x573   :  { %4462 = vmatpush.msra.mxu0 %v4874_v1 }
 0x574   :  { %4873 = vmatmul.msk.f32.vlgmr.msrb.gmra.mxu0 %vm4390_vm2, %v4379_v3 }
 0x57c   :  { %4878 = vmatmul.msk.f32.vlgmr.msra.gmra.mxu0 %vm4390_vm2, %v4438_v5 }
 0x5e9   :  { %v4411_v22 = vpop.f32.mrf.mxu0 }
 0x5f1   :  { %v4434_v43 = vpop.f32.mrf.mxu0 }
 0x5f2   :  { %v4435_v23 = vadd.f32 %v4434_v43, %v4411_v22 }
 0x5f9   :  { %v4464_v2 = vpop.f32.mrf.mxu0 }
 0x5fa   :  { %v4467_v34 = vadd.f32 %v4464_v2, %v4435_v23 }
 0x5fc   :  { %v4471_v29 = vadd.f32 %v4902_v61, %v4467_v34 }
 0x5fe   :  { %vm4472_vm4 = vcmp.ge.f32.partialorder %v4471_v29, 0.0  ;;  %v4473_v32 = vmul.f32 0.1, %v4471_v29 }
 0x600   :  { %v4474_v52 = vsel %vm4472_vm4, %v4471_v29, %v4473_v32 }
 0x601   :  { %4512 = vmatmul.f32.vlgmr.msra.gmra.mxu1 %v4474_v52  ;;  %4475 = vst [vmem:[#allocation22] sm:$0x3] %v4474_v52 }
 0x602   :  { %4599 = dma.vmem_to_hbm [thread:$0]  %s4595_s13, 32, %s4597_s19, [#allocation21]  }
 0x67e   :  { %v4513_v14 = vpop.f32.mrf.mxu1 }
 0x67f   :  { %v4514_v51 = vadd.f32 %v4903_v57, %v4513_v14 }
 0x681   :  { %4516 = vst [vmem:[#allocation23] sm:$0x3] %v4514_v51 }
 0x682   :  { %4610 = dma.vmem_to_hbm [thread:$0]  %s4606_s18, 32, %s4608_s9, [#allocation24]  }
 0x683   :  { %5158 = dma.done.wait [#allocation10], 512  }
 0x684   :  { %5159 = vsyncadd [#allocation10], 4294966784 }
 0x685   :  { %5160 = dma.done.wait [#allocation15], 320  }
 0x686   :  { %5161 = vsyncadd [#allocation15], 4294966976 }
 0x687   :  { %5162 = dma.done.wait [#allocation18], 64  }
 0x688   :  { %5163 = vsyncadd [#allocation18], 4294967232 }
 0x689   :  { %5164 = dma.done.wait [#allocation21], 64  }
 0x68a   :  { %5165 = vsyncadd [#allocation21], 4294967232 }
 0x68b   :  { %5166 = dma.done.wait [#allocation24], 32  }
 0x68c   :  { %5167 = vsyncadd [#allocation24], 4294967264 }
 0x68d   :  { %4643 = vsyncpa [#allocation9], 1 }
 0x68e   :  { %4644 = vsyncpa [#allocation12], 1 }
 0x68f   :  { %4645 = vsyncpa [#allocation10], 1 }
 0x690   :  { %4646 = vsyncpa [#allocation15], 1 }
 0x691   :  { %4647 = vsyncpa [#allocation18], 1 }
 0x692   :  { %4648 = vsyncpa [#allocation21], 1 }
 0x693   :  { %4649 = vsyncpa [#allocation24], 1 }

</bundles_post_ra>
